<compile_context>
chip_gen: v5e
topology: v5e:2x2
jax: 0.10.0
libtpu: 0.0.40
codegen_flags: <defaults>
</compile_context>

<pallas_src>
import jax
import jax.numpy as jnp
from jax import lax
from jax.experimental import pallas as pl
from jax.experimental.pallas import tpu as pltpu

_LANE = 128
_ALIGN_W = 8  # sublane alignment for the halo buffer's W pitch


def _round_up(x, m):
    return ((x + m - 1) // m) * m


def _make_chain_kernel(H, W, Cp, Wp, num_blocks, eps=1e-5):
    """One grid step = one sample; runs the full ResBlocks chain in VMEM."""
    HW = H * W

    def kernel(x_ref, w_ref, o_ref, xp_ref, cur_ref, res_ref):
        # ---- zero only the 1-pixel halo border (sublane-aligned strips). ---
        # Columns 1..W are overwritten by the interior write each stage, so
        # over-zeroing them here is harmless; columns > W+1 are never read.
        zrow = jnp.zeros((1, Wp, Cp), jnp.bfloat16)
        xp_ref[0:1, :, :] = zrow
        xp_ref[H + 1:H + 2, :, :] = zrow
        w_lo = ((W + 1) // _ALIGN_W) * _ALIGN_W
        xp_ref[:, 0:_ALIGN_W, :] = jnp.zeros((H + 2, _ALIGN_W, Cp), jnp.bfloat16)
        xp_ref[:, w_lo:Wp, :] = jnp.zeros((H + 2, Wp - w_lo, Cp), jnp.bfloat16)

        cur_ref[...] = x_ref[0].reshape(HW, Cp)

        def conv_in_stage(stage, relu):
            # Current feature map -> interior of the bf16 zero-padded buffer
            # (single f32->bf16 cast per stage).
            xp_ref[1:H + 1, 1:W + 1, :] = (
                cur_ref[...].reshape(H, W, Cp).astype(jnp.bfloat16))

            # 3x3 conv = 9 accumulated per-tap MXU matmuls (no im2col slab).
            acc = jnp.zeros((HW, Cp), jnp.float32)
            for t in range(9):
                ki, kj = t // 3, t % 3
                patch = xp_ref[ki:ki + H, kj:kj + W, :].reshape(HW, Cp)
                acc = acc + jnp.dot(patch, w_ref[stage * 9 + t],
                                    preferred_element_type=jnp.float32)

            # InstanceNorm2d(affine=False) fused with ReLU. Per-channel stats
            # over H*W, biased variance, eps inside rsqrt (PyTorch default).
            # Conv bias is omitted — exactly cancelled by the mean subtract.
            # Two-pass (centered) variance kept for numerical safety.
            mean = jnp.mean(acc, axis=0, keepdims=True)
            centered = acc - mean
            var = jnp.mean(centered * centered, axis=0, keepdims=True)
            y = centered * lax.rsqrt(var + eps)
            if relu:
                y = jnp.maximum(y, 0.0)
            cur_ref[...] = y

        def blk_body(blk, carry):
            res_ref[...] = cur_ref[...]                     # residual copy
            conv_in_stage(2 * blk, True)                    # conv -> IN -> ReLU
            conv_in_stage(2 * blk + 1, False)               # conv -> IN
            cur_ref[...] = cur_ref[...] + res_ref[...]      # skip connection
            return carry

        lax.fori_loop(0, num_blocks, blk_body, 0)

        o_ref[0] = cur_ref[...].reshape(H, W, Cp).astype(o_ref.dtype)

    return kernel


def _vmem_budget(H, W, Cp, Wp, num_blocks):
    """Compute vmem_limit_bytes from the actual footprint, capped by HW VMEM."""
    f32, bf16 = 4, 2
    hw = H * W
    need = 0
    need += 2 * 2 * hw * Cp * f32                 # (1,H,W,Cp) in + out, 2-deep each
    need += 2 * num_blocks * 9 * Cp * Cp * bf16   # weight slab, single-buffered
    need += (H + 2) * Wp * Cp * bf16              # bf16 zero-halo scratch
    need += 2 * hw * Cp * f32                     # cur + res scratch
    need += 2 * hw * Cp * f32                     # live f32 temporaries (acc etc.)
    budget = int(need * 1.5) + (4 << 20)
    try:
        phys = pltpu.get_tpu_info().vmem_capacity_bytes
    except Exception:
        phys = 64 << 20                           # conservative (v7x per-TC)
    return max(32 << 20, min(budget, int(phys * 0.9)))


def _resblocks_pallas(x, w_all, num_blocks, eps=1e-5):
    """x: (N, H, W, Cp) f32, Cp lane-padded; w_all: (2*nb*9, Cp, Cp) bf16."""
    N, H, W, Cp = x.shape
    Wp = _round_up(W + 2, _ALIGN_W)
    kernel = _make_chain_kernel(H, W, Cp, Wp, num_blocks, eps)
    # TODO(synk): for configs that exceed ~0.9x VMEM (e.g. 64x64x256 on v7x's
    # 64 MiB per TC) add an H-stripe grid axis with per-channel sum /
    # sum-of-squares IN accumulators finalized via pl.when; that also adds a
    # second "parallel" axis so both v7x TensorCores stay busy when N is small.
    return pl.pallas_call(
        kernel,
        out_shape=jax.ShapeDtypeStruct((N, H, W, Cp), x.dtype),
        grid_spec=pltpu.PrefetchScalarGridSpec(
            num_scalar_prefetch=0,
            grid=(N,),
            in_specs=[
                pl.BlockSpec((1, H, W, Cp), lambda n: (n, 0, 0, 0)),
                # Whole weight slab, constant index map, single-buffered: it
                # never changes across the grid, so no double-buffer copy.
                pl.BlockSpec((2 * num_blocks * 9, Cp, Cp),
                             lambda n: (0, 0, 0),
                             pipeline_mode=pl.Buffered(1)),
            ],
            out_specs=pl.BlockSpec((1, H, W, Cp), lambda n: (n, 0, 0, 0)),
            scratch_shapes=[
                pltpu.VMEM((H + 2, Wp, Cp), jnp.bfloat16),   # bf16 zero-halo
                pltpu.VMEM((H * W, Cp), jnp.float32),        # current map
                pltpu.VMEM((H * W, Cp), jnp.float32),        # residual
            ],
        ),
        compiler_params=pltpu.CompilerParams(
            dimension_semantics=("parallel",),
            vmem_limit_bytes=_vmem_budget(H, W, Cp, Wp, num_blocks),
        ),
    )(x, w_all)


def init_resblocks_params(key, num_blocks, dim):
    """Synthetic init. Conv weights stored as (3, 3, Cin, Cout). Biases are
    kept for interface fidelity but are mathematically cancelled by
    InstanceNorm(affine=False), so the kernel never consumes them."""
    params = []
    for i in range(num_blocks):
        k = jax.random.fold_in(key, i)
        k1, k2, k3, k4 = jax.random.split(k, 4)
        fan_in = dim * 3 * 3
        scale = 1.0 / jnp.sqrt(fan_in)
        w1 = jax.random.uniform(k1, (3, 3, dim, dim), jnp.float32, -scale, scale)
        b1 = jax.random.uniform(k2, (dim,), jnp.float32, -scale, scale)
        w2 = jax.random.uniform(k3, (3, 3, dim, dim), jnp.float32, -scale, scale)
        b2 = jax.random.uniform(k4, (dim,), jnp.float32, -scale, scale)
        params.append((w1, b1, w2, b2))
    return params


def res_blocks_forward(x_nchw, params):
    """ResBlocks.forward. NCHW in/out to match PyTorch semantics."""
    N, C, H, W = x_nchw.shape
    num_blocks = len(params)
    # Lane-pad channels to exactly one 128-lane multiple (do NOT over-pad:
    # Cp=128 already fills v5e's 128-wide MXU output dimension).
    Cp = max(_LANE, _round_up(C, _LANE))
    # TODO(synk): for real C << 128 the MXU mostly multiplies zero channels
    # (and underfills v6e/v7x's 256-wide MXU); a VPU direct-conv / lane-packed
    # spatial path would avoid that dead work.

    # NCHW -> NHWC; pad channels once. Padded channels stay exactly zero
    # through conv (zero weights) / IN / ReLU / residual.
    x = jnp.transpose(x_nchw, (0, 2, 3, 1))
    x = jnp.pad(x, ((0, 0), (0, 0), (0, 0), (0, Cp - C)))

    # All conv weights as one (2*num_blocks*9, Cp, Cp) bf16 slab; tap index
    # ki*3 + kj matches the kernel's per-tap loop order. Conv biases are
    # dropped (cancelled by IN with affine=False).
    ws = []
    for (w1, _b1, w2, _b2) in params:
        for w in (w1, w2):
            wp = jnp.zeros((3, 3, Cp, Cp), jnp.float32).at[:, :, :C, :C].set(w)
            ws.append(wp.reshape(9, Cp, Cp))
    w_all = jnp.concatenate(ws, axis=0).astype(jnp.bfloat16)

    out = _resblocks_pallas(x, w_all, num_blocks)        # (N, H, W, Cp)
    return jnp.transpose(out[..., :C], (0, 3, 1, 2))     # back to NCHW


if __name__ == "__main__":
    key = jax.random.PRNGKey(0)
    k_x, k_p = jax.random.split(key)

    N, C, Hs, Ws = 2, 4, 16, 16
    num_blocks = 2

    x = jax.random.normal(k_x, (N, C, Hs, Ws), jnp.float32)
    params = init_resblocks_params(k_p, num_blocks, C)

    out = jax.jit(res_blocks_forward)(x, params)
    jax.block_until_ready(out)

    assert out.shape == (N, C, Hs, Ws), out.shape
    print("KERNEL_OK")
</pallas_src>

<mosaic_0001>
module attributes {stable_mosaic.version = 11 : i64} {
  func.func @kernel(%arg0: i32, %arg1: memref<1x16x16x128xf32, #tpu.memory_space<vmem>>, %arg2: memref<36x128x128xbf16, #tpu.memory_space<vmem>>, %arg3: memref<1x16x16x128xf32, #tpu.memory_space<vmem>>, %arg4: memref<18x24x128xbf16, #tpu.memory_space<vmem>>, %arg5: memref<256x128xf32, #tpu.memory_space<vmem>>, %arg6: memref<256x128xf32, #tpu.memory_space<vmem>>) attributes {dimension_semantics = [#tpu.dimension_semantics<parallel>], iteration_bounds = array<i64: 2>, scalar_prefetch = 0 : i64, scratch_operands = 3 : i64, tpu.core_type = #tpu.core_type<tc>, window_params = [{transform_indices = @transform_0, window_bounds = array<i64: 1, 16, 16, 128>}, {pipeline_mode = #tpu.pipeline_mode<synchronous>, transform_indices = @transform_1, window_bounds = array<i64: 36, 128, 128>}, {transform_indices = @transform_2, window_bounds = array<i64: 1, 16, 16, 128>}]} {
    %cst = arith.constant 0.000000e+00 : bf16
    %0 = vector.broadcast %cst : bf16 to vector<1x24x128xbf16>
    %c0 = arith.constant 0 : index
    %c0_0 = arith.constant 0 : index
    %c0_1 = arith.constant 0 : index
    %1 = vector.load %arg4[%c0, %c0_0, %c0_1] : memref<18x24x128xbf16, #tpu.memory_space<vmem>>, vector<1x24x128xbf16>
    tpu.vector_store %arg4[%c0, %c0_0, %c0_1], %0 {strides = array<i32>} : memref<18x24x128xbf16, #tpu.memory_space<vmem>>, vector<1x24x128xbf16>,
    %c17 = arith.constant 17 : index
    %c0_2 = arith.constant 0 : index
    %c0_3 = arith.constant 0 : index
    %2 = vector.load %arg4[%c17, %c0_2, %c0_3] : memref<18x24x128xbf16, #tpu.memory_space<vmem>>, vector<1x24x128xbf16>
    tpu.vector_store %arg4[%c17, %c0_2, %c0_3], %0 {strides = array<i32>} : memref<18x24x128xbf16, #tpu.memory_space<vmem>>, vector<1x24x128xbf16>,
    %cst_4 = arith.constant 0.000000e+00 : bf16
    %3 = vector.broadcast %cst_4 : bf16 to vector<18x8x128xbf16>
    %c0_5 = arith.constant 0 : index
    %c0_6 = arith.constant 0 : index
    %c0_7 = arith.constant 0 : index
    %4 = vector.load %arg4[%c0_5, %c0_6, %c0_7] : memref<18x24x128xbf16, #tpu.memory_space<vmem>>, vector<18x8x128xbf16>
    tpu.vector_store %arg4[%c0_5, %c0_6, %c0_7], %3 {strides = array<i32>} : memref<18x24x128xbf16, #tpu.memory_space<vmem>>, vector<18x8x128xbf16>,
    %cst_8 = arith.constant 0.000000e+00 : bf16
    %5 = vector.broadcast %cst_8 : bf16 to vector<18x8x128xbf16>
    %c0_9 = arith.constant 0 : index
    %c16 = arith.constant 16 : index
    %c0_10 = arith.constant 0 : index
    %6 = vector.load %arg4[%c0_9, %c16, %c0_10] : memref<18x24x128xbf16, #tpu.memory_space<vmem>>, vector<18x8x128xbf16>
    tpu.vector_store %arg4[%c0_9, %c16, %c0_10], %5 {strides = array<i32>} : memref<18x24x128xbf16, #tpu.memory_space<vmem>>, vector<18x8x128xbf16>,
    %c0_11 = arith.constant 0 : index
    %c0_12 = arith.constant 0 : index
    %c0_13 = arith.constant 0 : index
    %c0_14 = arith.constant 0 : index
    %7 = vector.load %arg1[%c0_11, %c0_12, %c0_13, %c0_14] : memref<1x16x16x128xf32, #tpu.memory_space<vmem>>, vector<1x16x16x128xf32>
    %8 = vector.shape_cast %7 : vector<1x16x16x128xf32> to vector<16x16x128xf32>
    %9 = vector.shape_cast %8 : vector<16x16x128xf32> to vector<256x128xf32>
    %c0_15 = arith.constant 0 : index
    %c0_16 = arith.constant 0 : index
    %10 = vector.load %arg5[%c0_15, %c0_16] : memref<256x128xf32, #tpu.memory_space<vmem>>, vector<256x128xf32>
    tpu.vector_store %arg5[%c0_15, %c0_16], %9 {strides = array<i32>} : memref<256x128xf32, #tpu.memory_space<vmem>>, vector<256x128xf32>,
    %c0_i32 = arith.constant 0 : i32
    %c2_i32 = arith.constant 2 : i32
    %11 = arith.addi %c0_i32, %c2_i32 : i32
    %c1_i32 = arith.constant 1 : i32
    scf.for %arg7 = %c0_i32 to %11 step %c1_i32  : i32 {
      %c0_24 = arith.constant 0 : index
      %c0_25 = arith.constant 0 : index
      %17 = vector.load %arg5[%c0_24, %c0_25] : memref<256x128xf32, #tpu.memory_space<vmem>>, vector<256x128xf32>
      %c0_26 = arith.constant 0 : index
      %c0_27 = arith.constant 0 : index
      %18 = vector.load %arg6[%c0_26, %c0_27] : memref<256x128xf32, #tpu.memory_space<vmem>>, vector<256x128xf32>
      tpu.vector_store %arg6[%c0_26, %c0_27], %17 {strides = array<i32>} : memref<256x128xf32, #tpu.memory_space<vmem>>, vector<256x128xf32>,
      %c2_i32_28 = arith.constant 2 : i32
      %19 = arith.muli %c2_i32_28, %arg7 : i32
      %c0_29 = arith.constant 0 : index
      %c0_30 = arith.constant 0 : index
      %20 = vector.load %arg5[%c0_29, %c0_30] : memref<256x128xf32, #tpu.memory_space<vmem>>, vector<256x128xf32>
      %21 = vector.shape_cast %20 : vector<256x128xf32> to vector<16x16x128xf32>
      %22 = arith.truncf %21 : vector<16x16x128xf32> to vector<16x16x128xbf16>
      %c1 = arith.constant 1 : index
      %c1_31 = arith.constant 1 : index
      %c0_32 = arith.constant 0 : index
      %23 = vector.load %arg4[%c1, %c1_31, %c0_32] : memref<18x24x128xbf16, #tpu.memory_space<vmem>>, vector<16x16x128xbf16>
      tpu.vector_store %arg4[%c1, %c1_31, %c0_32], %22 {strides = array<i32>} : memref<18x24x128xbf16, #tpu.memory_space<vmem>>, vector<16x16x128xbf16>,
      %cst_33 = arith.constant 0.000000e+00 : f32
      %24 = vector.broadcast %cst_33 : f32 to vector<256x128xf32>
      %c0_34 = arith.constant 0 : index
      %c0_35 = arith.constant 0 : index
      %c0_36 = arith.constant 0 : index
      %25 = vector.load %arg4[%c0_34, %c0_35, %c0_36] : memref<18x24x128xbf16, #tpu.memory_space<vmem>>, vector<16x16x128xbf16>
      %26 = vector.shape_cast %25 : vector<16x16x128xbf16> to vector<256x128xbf16>
      %c9_i32 = arith.constant 9 : i32
      %27 = arith.muli %19, %c9_i32 : i32
      %c0_i32_37 = arith.constant 0 : i32
      %28 = arith.addi %27, %c0_i32_37 : i32
      %29 = arith.index_cast %28 : i32 to index
      %c0_38 = arith.constant 0 : index
      %c0_39 = arith.constant 0 : index
      %30 = vector.load %arg2[%29, %c0_38, %c0_39] : memref<36x128x128xbf16, #tpu.memory_space<vmem>>, vector<1x128x128xbf16>
      %31 = vector.shape_cast %30 : vector<1x128x128xbf16> to vector<128x128xbf16>
      %cst_40 = arith.constant dense<0.000000e+00> : vector<256x128xf32>
      %32 = tpu.matmul %26, %31, %cst_40 {dimension_numbers = #tpu.dot_dimension_numbers<[1], [0], [0], [1], [0, 0, 1, 1], [], []>} : vector<256x128xbf16>, vector<128x128xbf16>, vector<256x128xf32> -> vector<256x128xf32>
      %33 = arith.addf %24, %32 : vector<256x128xf32>
      %c0_41 = arith.constant 0 : index
      %c1_42 = arith.constant 1 : index
      %c0_43 = arith.constant 0 : index
      %34 = vector.load %arg4[%c0_41, %c1_42, %c0_43] : memref<18x24x128xbf16, #tpu.memory_space<vmem>>, vector<16x16x128xbf16>
      %35 = vector.shape_cast %34 : vector<16x16x128xbf16> to vector<256x128xbf16>
      %c9_i32_44 = arith.constant 9 : i32
      %36 = arith.muli %19, %c9_i32_44 : i32
      %c1_i32_45 = arith.constant 1 : i32
      %37 = arith.addi %36, %c1_i32_45 : i32
      %38 = arith.index_cast %37 : i32 to index
      %c0_46 = arith.constant 0 : index
      %c0_47 = arith.constant 0 : index
      %39 = vector.load %arg2[%38, %c0_46, %c0_47] : memref<36x128x128xbf16, #tpu.memory_space<vmem>>, vector<1x128x128xbf16>
      %40 = vector.shape_cast %39 : vector<1x128x128xbf16> to vector<128x128xbf16>
      %cst_48 = arith.constant dense<0.000000e+00> : vector<256x128xf32>
      %41 = tpu.matmul %35, %40, %cst_48 {dimension_numbers = #tpu.dot_dimension_numbers<[1], [0], [0], [1], [0, 0, 1, 1], [], []>} : vector<256x128xbf16>, vector<128x128xbf16>, vector<256x128xf32> -> vector<256x128xf32>
      %42 = arith.addf %33, %41 : vector<256x128xf32>
      %c0_49 = arith.constant 0 : index
      %c2 = arith.constant 2 : index
      %c0_50 = arith.constant 0 : index
      %43 = vector.load %arg4[%c0_49, %c2, %c0_50] : memref<18x24x128xbf16, #tpu.memory_space<vmem>>, vector<16x16x128xbf16>
      %44 = vector.shape_cast %43 : vector<16x16x128xbf16> to vector<256x128xbf16>
      %c9_i32_51 = arith.constant 9 : i32
      %45 = arith.muli %19, %c9_i32_51 : i32
      %c2_i32_52 = arith.constant 2 : i32
      %46 = arith.addi %45, %c2_i32_52 : i32
      %47 = arith.index_cast %46 : i32 to index
      %c0_53 = arith.constant 0 : index
      %c0_54 = arith.constant 0 : index
      %48 = vector.load %arg2[%47, %c0_53, %c0_54] : memref<36x128x128xbf16, #tpu.memory_space<vmem>>, vector<1x128x128xbf16>
      %49 = vector.shape_cast %48 : vector<1x128x128xbf16> to vector<128x128xbf16>
      %cst_55 = arith.constant dense<0.000000e+00> : vector<256x128xf32>
      %50 = tpu.matmul %44, %49, %cst_55 {dimension_numbers = #tpu.dot_dimension_numbers<[1], [0], [0], [1], [0, 0, 1, 1], [], []>} : vector<256x128xbf16>, vector<128x128xbf16>, vector<256x128xf32> -> vector<256x128xf32>
      %51 = arith.addf %42, %50 : vector<256x128xf32>
      %c1_56 = arith.constant 1 : index
      %c0_57 = arith.constant 0 : index
      %c0_58 = arith.constant 0 : index
      %52 = vector.load %arg4[%c1_56, %c0_57, %c0_58] : memref<18x24x128xbf16, #tpu.memory_space<vmem>>, vector<16x16x128xbf16>
      %53 = vector.shape_cast %52 : vector<16x16x128xbf16> to vector<256x128xbf16>
      %c9_i32_59 = arith.constant 9 : i32
      %54 = arith.muli %19, %c9_i32_59 : i32
      %c3_i32 = arith.constant 3 : i32
      %55 = arith.addi %54, %c3_i32 : i32
      %56 = arith.index_cast %55 : i32 to index
      %c0_60 = arith.constant 0 : index
      %c0_61 = arith.constant 0 : index
      %57 = vector.load %arg2[%56, %c0_60, %c0_61] : memref<36x128x128xbf16, #tpu.memory_space<vmem>>, vector<1x128x128xbf16>
      %58 = vector.shape_cast %57 : vector<1x128x128xbf16> to vector<128x128xbf16>
      %cst_62 = arith.constant dense<0.000000e+00> : vector<256x128xf32>
      %59 = tpu.matmul %53, %58, %cst_62 {dimension_numbers = #tpu.dot_dimension_numbers<[1], [0], [0], [1], [0, 0, 1, 1], [], []>} : vector<256x128xbf16>, vector<128x128xbf16>, vector<256x128xf32> -> vector<256x128xf32>
      %60 = arith.addf %51, %59 : vector<256x128xf32>
      %c1_63 = arith.constant 1 : index
      %c1_64 = arith.constant 1 : index
      %c0_65 = arith.constant 0 : index
      %61 = vector.load %arg4[%c1_63, %c1_64, %c0_65] : memref<18x24x128xbf16, #tpu.memory_space<vmem>>, vector<16x16x128xbf16>
      %62 = vector.shape_cast %61 : vector<16x16x128xbf16> to vector<256x128xbf16>
      %c9_i32_66 = arith.constant 9 : i32
      %63 = arith.muli %19, %c9_i32_66 : i32
      %c4_i32 = arith.constant 4 : i32
      %64 = arith.addi %63, %c4_i32 : i32
      %65 = arith.index_cast %64 : i32 to index
      %c0_67 = arith.constant 0 : index
      %c0_68 = arith.constant 0 : index
      %66 = vector.load %arg2[%65, %c0_67, %c0_68] : memref<36x128x128xbf16, #tpu.memory_space<vmem>>, vector<1x128x128xbf16>
      %67 = vector.shape_cast %66 : vector<1x128x128xbf16> to vector<128x128xbf16>
      %cst_69 = arith.constant dense<0.000000e+00> : vector<256x128xf32>
      %68 = tpu.matmul %62, %67, %cst_69 {dimension_numbers = #tpu.dot_dimension_numbers<[1], [0], [0], [1], [0, 0, 1, 1], [], []>} : vector<256x128xbf16>, vector<128x128xbf16>, vector<256x128xf32> -> vector<256x128xf32>
      %69 = arith.addf %60, %68 : vector<256x128xf32>
      %c1_70 = arith.constant 1 : index
      %c2_71 = arith.constant 2 : index
      %c0_72 = arith.constant 0 : index
      %70 = vector.load %arg4[%c1_70, %c2_71, %c0_72] : memref<18x24x128xbf16, #tpu.memory_space<vmem>>, vector<16x16x128xbf16>
      %71 = vector.shape_cast %70 : vector<16x16x128xbf16> to vector<256x128xbf16>
      %c9_i32_73 = arith.constant 9 : i32
      %72 = arith.muli %19, %c9_i32_73 : i32
      %c5_i32 = arith.constant 5 : i32
      %73 = arith.addi %72, %c5_i32 : i32
      %74 = arith.index_cast %73 : i32 to index
      %c0_74 = arith.constant 0 : index
      %c0_75 = arith.constant 0 : index
      %75 = vector.load %arg2[%74, %c0_74, %c0_75] : memref<36x128x128xbf16, #tpu.memory_space<vmem>>, vector<1x128x128xbf16>
      %76 = vector.shape_cast %75 : vector<1x128x128xbf16> to vector<128x128xbf16>
      %cst_76 = arith.constant dense<0.000000e+00> : vector<256x128xf32>
      %77 = tpu.matmul %71, %76, %cst_76 {dimension_numbers = #tpu.dot_dimension_numbers<[1], [0], [0], [1], [0, 0, 1, 1], [], []>} : vector<256x128xbf16>, vector<128x128xbf16>, vector<256x128xf32> -> vector<256x128xf32>
      %78 = arith.addf %69, %77 : vector<256x128xf32>
      %c2_77 = arith.constant 2 : index
      %c0_78 = arith.constant 0 : index
      %c0_79 = arith.constant 0 : index
      %79 = vector.load %arg4[%c2_77, %c0_78, %c0_79] : memref<18x24x128xbf16, #tpu.memory_space<vmem>>, vector<16x16x128xbf16>
      %80 = vector.shape_cast %79 : vector<16x16x128xbf16> to vector<256x128xbf16>
      %c9_i32_80 = arith.constant 9 : i32
      %81 = arith.muli %19, %c9_i32_80 : i32
      %c6_i32 = arith.constant 6 : i32
      %82 = arith.addi %81, %c6_i32 : i32
      %83 = arith.index_cast %82 : i32 to index
      %c0_81 = arith.constant 0 : index
      %c0_82 = arith.constant 0 : index
      %84 = vector.load %arg2[%83, %c0_81, %c0_82] : memref<36x128x128xbf16, #tpu.memory_space<vmem>>, vector<1x128x128xbf16>
      %85 = vector.shape_cast %84 : vector<1x128x128xbf16> to vector<128x128xbf16>
      %cst_83 = arith.constant dense<0.000000e+00> : vector<256x128xf32>
      %86 = tpu.matmul %80, %85, %cst_83 {dimension_numbers = #tpu.dot_dimension_numbers<[1], [0], [0], [1], [0, 0, 1, 1], [], []>} : vector<256x128xbf16>, vector<128x128xbf16>, vector<256x128xf32> -> vector<256x128xf32>
      %87 = arith.addf %78, %86 : vector<256x128xf32>
      %c2_84 = arith.constant 2 : index
      %c1_85 = arith.constant 1 : index
      %c0_86 = arith.constant 0 : index
      %88 = vector.load %arg4[%c2_84, %c1_85, %c0_86] : memref<18x24x128xbf16, #tpu.memory_space<vmem>>, vector<16x16x128xbf16>
      %89 = vector.shape_cast %88 : vector<16x16x128xbf16> to vector<256x128xbf16>
      %c9_i32_87 = arith.constant 9 : i32
      %90 = arith.muli %19, %c9_i32_87 : i32
      %c7_i32 = arith.constant 7 : i32
      %91 = arith.addi %90, %c7_i32 : i32
      %92 = arith.index_cast %91 : i32 to index
      %c0_88 = arith.constant 0 : index
      %c0_89 = arith.constant 0 : index
      %93 = vector.load %arg2[%92, %c0_88, %c0_89] : memref<36x128x128xbf16, #tpu.memory_space<vmem>>, vector<1x128x128xbf16>
      %94 = vector.shape_cast %93 : vector<1x128x128xbf16> to vector<128x128xbf16>
      %cst_90 = arith.constant dense<0.000000e+00> : vector<256x128xf32>
      %95 = tpu.matmul %89, %94, %cst_90 {dimension_numbers = #tpu.dot_dimension_numbers<[1], [0], [0], [1], [0, 0, 1, 1], [], []>} : vector<256x128xbf16>, vector<128x128xbf16>, vector<256x128xf32> -> vector<256x128xf32>
      %96 = arith.addf %87, %95 : vector<256x128xf32>
      %c2_91 = arith.constant 2 : index
      %c2_92 = arith.constant 2 : index
      %c0_93 = arith.constant 0 : index
      %97 = vector.load %arg4[%c2_91, %c2_92, %c0_93] : memref<18x24x128xbf16, #tpu.memory_space<vmem>>, vector<16x16x128xbf16>
      %98 = vector.shape_cast %97 : vector<16x16x128xbf16> to vector<256x128xbf16>
      %c9_i32_94 = arith.constant 9 : i32
      %99 = arith.muli %19, %c9_i32_94 : i32
      %c8_i32 = arith.constant 8 : i32
      %100 = arith.addi %99, %c8_i32 : i32
      %101 = arith.index_cast %100 : i32 to index
      %c0_95 = arith.constant 0 : index
      %c0_96 = arith.constant 0 : index
      %102 = vector.load %arg2[%101, %c0_95, %c0_96] : memref<36x128x128xbf16, #tpu.memory_space<vmem>>, vector<1x128x128xbf16>
      %103 = vector.shape_cast %102 : vector<1x128x128xbf16> to vector<128x128xbf16>
      %cst_97 = arith.constant dense<0.000000e+00> : vector<256x128xf32>
      %104 = tpu.matmul %98, %103, %cst_97 {dimension_numbers = #tpu.dot_dimension_numbers<[1], [0], [0], [1], [0, 0, 1, 1], [], []>} : vector<256x128xbf16>, vector<128x128xbf16>, vector<256x128xf32> -> vector<256x128xf32>
      %105 = arith.addf %96, %104 : vector<256x128xf32>
      %cst_98 = arith.constant dense<0.000000e+00> : vector<128xf32>
      %106 = vector.multi_reduction <add>, %105, %cst_98 [0] : vector<256x128xf32> to vector<128xf32>
      %107 = vector.shape_cast %106 : vector<128xf32> to vector<1x128xf32>
      %cst_99 = arith.constant 2.560000e+02 : f32
      %108 = vector.broadcast %cst_99 : f32 to vector<1x128xf32>
      %109 = arith.divf %107, %108 : vector<1x128xf32>
      %110 = vector.broadcast %109 : vector<1x128xf32> to vector<256x128xf32>
      %111 = arith.subf %105, %110 : vector<256x128xf32>
      %112 = arith.mulf %111, %111 : vector<256x128xf32>
      %cst_100 = arith.constant dense<0.000000e+00> : vector<128xf32>
      %113 = vector.multi_reduction <add>, %112, %cst_100 [0] : vector<256x128xf32> to vector<128xf32>
      %114 = vector.shape_cast %113 : vector<128xf32> to vector<1x128xf32>
      %cst_101 = arith.constant 2.560000e+02 : f32
      %115 = vector.broadcast %cst_101 : f32 to vector<1x128xf32>
      %116 = arith.divf %114, %115 : vector<1x128xf32>
      %cst_102 = arith.constant 9.99999974E-6 : f32
      %117 = vector.broadcast %cst_102 : f32 to vector<1x128xf32>
      %118 = arith.addf %116, %117 : vector<1x128xf32>
      %119 = math.rsqrt %118 : vector<1x128xf32>
      %120 = vector.broadcast %119 : vector<1x128xf32> to vector<256x128xf32>
      %121 = arith.mulf %111, %120 : vector<256x128xf32>
      %cst_103 = arith.constant 0.000000e+00 : f32
      %122 = vector.broadcast %cst_103 : f32 to vector<256x128xf32>
      %123 = arith.maximumf %121, %122 : vector<256x128xf32>
      %c0_104 = arith.constant 0 : index
      %c0_105 = arith.constant 0 : index
      %124 = vector.load %arg5[%c0_104, %c0_105] : memref<256x128xf32, #tpu.memory_space<vmem>>, vector<256x128xf32>
      tpu.vector_store %arg5[%c0_104, %c0_105], %123 {strides = array<i32>} : memref<256x128xf32, #tpu.memory_space<vmem>>, vector<256x128xf32>,
      %c2_i32_106 = arith.constant 2 : i32
      %125 = arith.muli %c2_i32_106, %arg7 : i32
      %c1_i32_107 = arith.constant 1 : i32
      %126 = arith.addi %125, %c1_i32_107 : i32
      %c0_108 = arith.constant 0 : index
      %c0_109 = arith.constant 0 : index
      %127 = vector.load %arg5[%c0_108, %c0_109] : memref<256x128xf32, #tpu.memory_space<vmem>>, vector<256x128xf32>
      %128 = vector.shape_cast %127 : vector<256x128xf32> to vector<16x16x128xf32>
      %129 = arith.truncf %128 : vector<16x16x128xf32> to vector<16x16x128xbf16>
      %c1_110 = arith.constant 1 : index
      %c1_111 = arith.constant 1 : index
      %c0_112 = arith.constant 0 : index
      %130 = vector.load %arg4[%c1_110, %c1_111, %c0_112] : memref<18x24x128xbf16, #tpu.memory_space<vmem>>, vector<16x16x128xbf16>
      tpu.vector_store %arg4[%c1_110, %c1_111, %c0_112], %129 {strides = array<i32>} : memref<18x24x128xbf16, #tpu.memory_space<vmem>>, vector<16x16x128xbf16>,
      %cst_113 = arith.constant 0.000000e+00 : f32
      %131 = vector.broadcast %cst_113 : f32 to vector<256x128xf32>
      %c0_114 = arith.constant 0 : index
      %c0_115 = arith.constant 0 : index
      %c0_116 = arith.constant 0 : index
      %132 = vector.load %arg4[%c0_114, %c0_115, %c0_116] : memref<18x24x128xbf16, #tpu.memory_space<vmem>>, vector<16x16x128xbf16>
      %133 = vector.shape_cast %132 : vector<16x16x128xbf16> to vector<256x128xbf16>
      %c9_i32_117 = arith.constant 9 : i32
      %134 = arith.muli %126, %c9_i32_117 : i32
      %c0_i32_118 = arith.constant 0 : i32
      %135 = arith.addi %134, %c0_i32_118 : i32
      %136 = arith.index_cast %135 : i32 to index
      %c0_119 = arith.constant 0 : index
      %c0_120 = arith.constant 0 : index
      %137 = vector.load %arg2[%136, %c0_119, %c0_120] : memref<36x128x128xbf16, #tpu.memory_space<vmem>>, vector<1x128x128xbf16>
      %138 = vector.shape_cast %137 : vector<1x128x128xbf16> to vector<128x128xbf16>
      %cst_121 = arith.constant dense<0.000000e+00> : vector<256x128xf32>
      %139 = tpu.matmul %133, %138, %cst_121 {dimension_numbers = #tpu.dot_dimension_numbers<[1], [0], [0], [1], [0, 0, 1, 1], [], []>} : vector<256x128xbf16>, vector<128x128xbf16>, vector<256x128xf32> -> vector<256x128xf32>
      %140 = arith.addf %131, %139 : vector<256x128xf32>
      %c0_122 = arith.constant 0 : index
      %c1_123 = arith.constant 1 : index
      %c0_124 = arith.constant 0 : index
      %141 = vector.load %arg4[%c0_122, %c1_123, %c0_124] : memref<18x24x128xbf16, #tpu.memory_space<vmem>>, vector<16x16x128xbf16>
      %142 = vector.shape_cast %141 : vector<16x16x128xbf16> to vector<256x128xbf16>
      %c9_i32_125 = arith.constant 9 : i32
      %143 = arith.muli %126, %c9_i32_125 : i32
      %c1_i32_126 = arith.constant 1 : i32
      %144 = arith.addi %143, %c1_i32_126 : i32
      %145 = arith.index_cast %144 : i32 to index
      %c0_127 = arith.constant 0 : index
      %c0_128 = arith.constant 0 : index
      %146 = vector.load %arg2[%145, %c0_127, %c0_128] : memref<36x128x128xbf16, #tpu.memory_space<vmem>>, vector<1x128x128xbf16>
      %147 = vector.shape_cast %146 : vector<1x128x128xbf16> to vector<128x128xbf16>
      %cst_129 = arith.constant dense<0.000000e+00> : vector<256x128xf32>
      %148 = tpu.matmul %142, %147, %cst_129 {dimension_numbers = #tpu.dot_dimension_numbers<[1], [0], [0], [1], [0, 0, 1, 1], [], []>} : vector<256x128xbf16>, vector<128x128xbf16>, vector<256x128xf32> -> vector<256x128xf32>
      %149 = arith.addf %140, %148 : vector<256x128xf32>
      %c0_130 = arith.constant 0 : index
      %c2_131 = arith.constant 2 : index
      %c0_132 = arith.constant 0 : index
      %150 = vector.load %arg4[%c0_130, %c2_131, %c0_132] : memref<18x24x128xbf16, #tpu.memory_space<vmem>>, vector<16x16x128xbf16>
      %151 = vector.shape_cast %150 : vector<16x16x128xbf16> to vector<256x128xbf16>
      %c9_i32_133 = arith.constant 9 : i32
      %152 = arith.muli %126, %c9_i32_133 : i32
      %c2_i32_134 = arith.constant 2 : i32
      %153 = arith.addi %152, %c2_i32_134 : i32
      %154 = arith.index_cast %153 : i32 to index
      %c0_135 = arith.constant 0 : index
      %c0_136 = arith.constant 0 : index
      %155 = vector.load %arg2[%154, %c0_135, %c0_136] : memref<36x128x128xbf16, #tpu.memory_space<vmem>>, vector<1x128x128xbf16>
      %156 = vector.shape_cast %155 : vector<1x128x128xbf16> to vector<128x128xbf16>
      %cst_137 = arith.constant dense<0.000000e+00> : vector<256x128xf32>
      %157 = tpu.matmul %151, %156, %cst_137 {dimension_numbers = #tpu.dot_dimension_numbers<[1], [0], [0], [1], [0, 0, 1, 1], [], []>} : vector<256x128xbf16>, vector<128x128xbf16>, vector<256x128xf32> -> vector<256x128xf32>
      %158 = arith.addf %149, %157 : vector<256x128xf32>
      %c1_138 = arith.constant 1 : index
      %c0_139 = arith.constant 0 : index
      %c0_140 = arith.constant 0 : index
      %159 = vector.load %arg4[%c1_138, %c0_139, %c0_140] : memref<18x24x128xbf16, #tpu.memory_space<vmem>>, vector<16x16x128xbf16>
      %160 = vector.shape_cast %159 : vector<16x16x128xbf16> to vector<256x128xbf16>
      %c9_i32_141 = arith.constant 9 : i32
      %161 = arith.muli %126, %c9_i32_141 : i32
      %c3_i32_142 = arith.constant 3 : i32
      %162 = arith.addi %161, %c3_i32_142 : i32
      %163 = arith.index_cast %162 : i32 to index
      %c0_143 = arith.constant 0 : index
      %c0_144 = arith.constant 0 : index
      %164 = vector.load %arg2[%163, %c0_143, %c0_144] : memref<36x128x128xbf16, #tpu.memory_space<vmem>>, vector<1x128x128xbf16>
      %165 = vector.shape_cast %164 : vector<1x128x128xbf16> to vector<128x128xbf16>
      %cst_145 = arith.constant dense<0.000000e+00> : vector<256x128xf32>
      %166 = tpu.matmul %160, %165, %cst_145 {dimension_numbers = #tpu.dot_dimension_numbers<[1], [0], [0], [1], [0, 0, 1, 1], [], []>} : vector<256x128xbf16>, vector<128x128xbf16>, vector<256x128xf32> -> vector<256x128xf32>
      %167 = arith.addf %158, %166 : vector<256x128xf32>
      %c1_146 = arith.constant 1 : index
      %c1_147 = arith.constant 1 : index
      %c0_148 = arith.constant 0 : index
      %168 = vector.load %arg4[%c1_146, %c1_147, %c0_148] : memref<18x24x128xbf16, #tpu.memory_space<vmem>>, vector<16x16x128xbf16>
      %169 = vector.shape_cast %168 : vector<16x16x128xbf16> to vector<256x128xbf16>
      %c9_i32_149 = arith.constant 9 : i32
      %170 = arith.muli %126, %c9_i32_149 : i32
      %c4_i32_150 = arith.constant 4 : i32
      %171 = arith.addi %170, %c4_i32_150 : i32
      %172 = arith.index_cast %171 : i32 to index
      %c0_151 = arith.constant 0 : index
      %c0_152 = arith.constant 0 : index
      %173 = vector.load %arg2[%172, %c0_151, %c0_152] : memref<36x128x128xbf16, #tpu.memory_space<vmem>>, vector<1x128x128xbf16>
      %174 = vector.shape_cast %173 : vector<1x128x128xbf16> to vector<128x128xbf16>
      %cst_153 = arith.constant dense<0.000000e+00> : vector<256x128xf32>
      %175 = tpu.matmul %169, %174, %cst_153 {dimension_numbers = #tpu.dot_dimension_numbers<[1], [0], [0], [1], [0, 0, 1, 1], [], []>} : vector<256x128xbf16>, vector<128x128xbf16>, vector<256x128xf32> -> vector<256x128xf32>
      %176 = arith.addf %167, %175 : vector<256x128xf32>
      %c1_154 = arith.constant 1 : index
      %c2_155 = arith.constant 2 : index
      %c0_156 = arith.constant 0 : index
      %177 = vector.load %arg4[%c1_154, %c2_155, %c0_156] : memref<18x24x128xbf16, #tpu.memory_space<vmem>>, vector<16x16x128xbf16>
      %178 = vector.shape_cast %177 : vector<16x16x128xbf16> to vector<256x128xbf16>
      %c9_i32_157 = arith.constant 9 : i32
      %179 = arith.muli %126, %c9_i32_157 : i32
      %c5_i32_158 = arith.constant 5 : i32
      %180 = arith.addi %179, %c5_i32_158 : i32
      %181 = arith.index_cast %180 : i32 to index
      %c0_159 = arith.constant 0 : index
      %c0_160 = arith.constant 0 : index
      %182 = vector.load %arg2[%181, %c0_159, %c0_160] : memref<36x128x128xbf16, #tpu.memory_space<vmem>>, vector<1x128x128xbf16>
      %183 = vector.shape_cast %182 : vector<1x128x128xbf16> to vector<128x128xbf16>
      %cst_161 = arith.constant dense<0.000000e+00> : vector<256x128xf32>
      %184 = tpu.matmul %178, %183, %cst_161 {dimension_numbers = #tpu.dot_dimension_numbers<[1], [0], [0], [1], [0, 0, 1, 1], [], []>} : vector<256x128xbf16>, vector<128x128xbf16>, vector<256x128xf32> -> vector<256x128xf32>
      %185 = arith.addf %176, %184 : vector<256x128xf32>
      %c2_162 = arith.constant 2 : index
      %c0_163 = arith.constant 0 : index
      %c0_164 = arith.constant 0 : index
      %186 = vector.load %arg4[%c2_162, %c0_163, %c0_164] : memref<18x24x128xbf16, #tpu.memory_space<vmem>>, vector<16x16x128xbf16>
      %187 = vector.shape_cast %186 : vector<16x16x128xbf16> to vector<256x128xbf16>
      %c9_i32_165 = arith.constant 9 : i32
      %188 = arith.muli %126, %c9_i32_165 : i32
      %c6_i32_166 = arith.constant 6 : i32
      %189 = arith.addi %188, %c6_i32_166 : i32
      %190 = arith.index_cast %189 : i32 to index
      %c0_167 = arith.constant 0 : index
      %c0_168 = arith.constant 0 : index
      %191 = vector.load %arg2[%190, %c0_167, %c0_168] : memref<36x128x128xbf16, #tpu.memory_space<vmem>>, vector<1x128x128xbf16>
      %192 = vector.shape_cast %191 : vector<1x128x128xbf16> to vector<128x128xbf16>
      %cst_169 = arith.constant dense<0.000000e+00> : vector<256x128xf32>
      %193 = tpu.matmul %187, %192, %cst_169 {dimension_numbers = #tpu.dot_dimension_numbers<[1], [0], [0], [1], [0, 0, 1, 1], [], []>} : vector<256x128xbf16>, vector<128x128xbf16>, vector<256x128xf32> -> vector<256x128xf32>
      %194 = arith.addf %185, %193 : vector<256x128xf32>
      %c2_170 = arith.constant 2 : index
      %c1_171 = arith.constant 1 : index
      %c0_172 = arith.constant 0 : index
      %195 = vector.load %arg4[%c2_170, %c1_171, %c0_172] : memref<18x24x128xbf16, #tpu.memory_space<vmem>>, vector<16x16x128xbf16>
      %196 = vector.shape_cast %195 : vector<16x16x128xbf16> to vector<256x128xbf16>
      %c9_i32_173 = arith.constant 9 : i32
      %197 = arith.muli %126, %c9_i32_173 : i32
      %c7_i32_174 = arith.constant 7 : i32
      %198 = arith.addi %197, %c7_i32_174 : i32
      %199 = arith.index_cast %198 : i32 to index
      %c0_175 = arith.constant 0 : index
      %c0_176 = arith.constant 0 : index
      %200 = vector.load %arg2[%199, %c0_175, %c0_176] : memref<36x128x128xbf16, #tpu.memory_space<vmem>>, vector<1x128x128xbf16>
      %201 = vector.shape_cast %200 : vector<1x128x128xbf16> to vector<128x128xbf16>
      %cst_177 = arith.constant dense<0.000000e+00> : vector<256x128xf32>
      %202 = tpu.matmul %196, %201, %cst_177 {dimension_numbers = #tpu.dot_dimension_numbers<[1], [0], [0], [1], [0, 0, 1, 1], [], []>} : vector<256x128xbf16>, vector<128x128xbf16>, vector<256x128xf32> -> vector<256x128xf32>
      %203 = arith.addf %194, %202 : vector<256x128xf32>
      %c2_178 = arith.constant 2 : index
      %c2_179 = arith.constant 2 : index
      %c0_180 = arith.constant 0 : index
      %204 = vector.load %arg4[%c2_178, %c2_179, %c0_180] : memref<18x24x128xbf16, #tpu.memory_space<vmem>>, vector<16x16x128xbf16>
      %205 = vector.shape_cast %204 : vector<16x16x128xbf16> to vector<256x128xbf16>
      %c9_i32_181 = arith.constant 9 : i32
      %206 = arith.muli %126, %c9_i32_181 : i32
      %c8_i32_182 = arith.constant 8 : i32
      %207 = arith.addi %206, %c8_i32_182 : i32
      %208 = arith.index_cast %207 : i32 to index
      %c0_183 = arith.constant 0 : index
      %c0_184 = arith.constant 0 : index
      %209 = vector.load %arg2[%208, %c0_183, %c0_184] : memref<36x128x128xbf16, #tpu.memory_space<vmem>>, vector<1x128x128xbf16>
      %210 = vector.shape_cast %209 : vector<1x128x128xbf16> to vector<128x128xbf16>
      %cst_185 = arith.constant dense<0.000000e+00> : vector<256x128xf32>
      %211 = tpu.matmul %205, %210, %cst_185 {dimension_numbers = #tpu.dot_dimension_numbers<[1], [0], [0], [1], [0, 0, 1, 1], [], []>} : vector<256x128xbf16>, vector<128x128xbf16>, vector<256x128xf32> -> vector<256x128xf32>
      %212 = arith.addf %203, %211 : vector<256x128xf32>
      %cst_186 = arith.constant dense<0.000000e+00> : vector<128xf32>
      %213 = vector.multi_reduction <add>, %212, %cst_186 [0] : vector<256x128xf32> to vector<128xf32>
      %214 = vector.shape_cast %213 : vector<128xf32> to vector<1x128xf32>
      %cst_187 = arith.constant 2.560000e+02 : f32
      %215 = vector.broadcast %cst_187 : f32 to vector<1x128xf32>
      %216 = arith.divf %214, %215 : vector<1x128xf32>
      %217 = vector.broadcast %216 : vector<1x128xf32> to vector<256x128xf32>
      %218 = arith.subf %212, %217 : vector<256x128xf32>
      %219 = arith.mulf %218, %218 : vector<256x128xf32>
      %cst_188 = arith.constant dense<0.000000e+00> : vector<128xf32>
      %220 = vector.multi_reduction <add>, %219, %cst_188 [0] : vector<256x128xf32> to vector<128xf32>
      %221 = vector.shape_cast %220 : vector<128xf32> to vector<1x128xf32>
      %cst_189 = arith.constant 2.560000e+02 : f32
      %222 = vector.broadcast %cst_189 : f32 to vector<1x128xf32>
      %223 = arith.divf %221, %222 : vector<1x128xf32>
      %cst_190 = arith.constant 9.99999974E-6 : f32
      %224 = vector.broadcast %cst_190 : f32 to vector<1x128xf32>
      %225 = arith.addf %223, %224 : vector<1x128xf32>
      %226 = math.rsqrt %225 : vector<1x128xf32>
      %227 = vector.broadcast %226 : vector<1x128xf32> to vector<256x128xf32>
      %228 = arith.mulf %218, %227 : vector<256x128xf32>
      %c0_191 = arith.constant 0 : index
      %c0_192 = arith.constant 0 : index
      %229 = vector.load %arg5[%c0_191, %c0_192] : memref<256x128xf32, #tpu.memory_space<vmem>>, vector<256x128xf32>
      tpu.vector_store %arg5[%c0_191, %c0_192], %228 {strides = array<i32>} : memref<256x128xf32, #tpu.memory_space<vmem>>, vector<256x128xf32>,
      %c0_193 = arith.constant 0 : index
      %c0_194 = arith.constant 0 : index
      %230 = vector.load %arg5[%c0_193, %c0_194] : memref<256x128xf32, #tpu.memory_space<vmem>>, vector<256x128xf32>
      %c0_195 = arith.constant 0 : index
      %c0_196 = arith.constant 0 : index
      %231 = vector.load %arg6[%c0_195, %c0_196] : memref<256x128xf32, #tpu.memory_space<vmem>>, vector<256x128xf32>
      %232 = arith.addf %230, %231 : vector<256x128xf32>
      %c0_197 = arith.constant 0 : index
      %c0_198 = arith.constant 0 : index
      %233 = vector.load %arg5[%c0_197, %c0_198] : memref<256x128xf32, #tpu.memory_space<vmem>>, vector<256x128xf32>
      tpu.vector_store %arg5[%c0_197, %c0_198], %232 {strides = array<i32>} : memref<256x128xf32, #tpu.memory_space<vmem>>, vector<256x128xf32>,
    }
    %c2_i32_17 = arith.constant 2 : i32
    %c0_18 = arith.constant 0 : index
    %c0_19 = arith.constant 0 : index
    %12 = vector.load %arg5[%c0_18, %c0_19] : memref<256x128xf32, #tpu.memory_space<vmem>>, vector<256x128xf32>
    %13 = vector.shape_cast %12 : vector<256x128xf32> to vector<16x16x128xf32>
    %c0_20 = arith.constant 0 : index
    %c0_21 = arith.constant 0 : index
    %c0_22 = arith.constant 0 : index
    %c0_23 = arith.constant 0 : index
    %14 = vector.load %arg3[%c0_20, %c0_21, %c0_22, %c0_23] : memref<1x16x16x128xf32, #tpu.memory_space<vmem>>, vector<1x16x16x128xf32>
    %15 = vector.shape_cast %14 : vector<1x16x16x128xf32> to vector<16x16x128xf32>
    %16 = vector.shape_cast %13 : vector<16x16x128xf32> to vector<1x16x16x128xf32>
    tpu.vector_store %arg3[%c0_20, %c0_21, %c0_22, %c0_23], %16 {strides = array<i32>} : memref<1x16x16x128xf32, #tpu.memory_space<vmem>>, vector<1x16x16x128xf32>,
    return
  }
  func.func @transform_0(%arg0: i32) -> (i32, i32, i32, i32) {
    %c0_i32 = arith.constant 0 : i32
    %c0_i32_0 = arith.constant 0 : i32
    %c0_i32_1 = arith.constant 0 : i32
    %c0_i32_2 = arith.constant 0 : i32
    return %arg0, %c0_i32, %c0_i32_0, %c0_i32_1 : i32, i32, i32, i32
  }
  func.func @transform_1(%arg0: i32) -> (i32, i32, i32) {
    %c0_i32 = arith.constant 0 : i32
    %c0_i32_0 = arith.constant 0 : i32
    %c0_i32_1 = arith.constant 0 : i32
    %c0_i32_2 = arith.constant 0 : i32
    return %c0_i32, %c0_i32_0, %c0_i32_1 : i32, i32, i32
  }
  func.func @transform_2(%arg0: i32) -> (i32, i32, i32, i32) {
    %c0_i32 = arith.constant 0 : i32
    %c0_i32_0 = arith.constant 0 : i32
    %c0_i32_1 = arith.constant 0 : i32
    %c0_i32_2 = arith.constant 0 : i32
    return %arg0, %c0_i32, %c0_i32_0, %c0_i32_1 : i32, i32, i32, i32
  }
}

</mosaic_0001>

<bundles_post_ra>
// kernel: res_blocks_forward.1
= control target key start
LH: loop header
LB: loop body
LE: loop exit
PB: predicated region body
PF: predicated region fallthrough
CT: control target
= control target key end

     0   :  { %s12242_s9 = smov 0   ;;  %s15672_s0 = inlined_call_operand.vmem [shape: f32[2,16,16,128], index: 0, kind: input, shape index: {}]   ;;  %s15673_s1 = inlined_call_operand.vmem [shape: bf16[36,128,128], index: 1, kind: input, shape index: {}]   ;;  %s15674_s2 = inlined_call_operand.vmem [shape: f32[2,16,16,128], index: 2, kind: output, shape index: {}]  }
   0x1 LB: > { %s10493_s10 = sadd.s32 4294967295, %s12219_s9   ;;  %p10497_p0 = scmp.ge.s32.totalorder %s12219_s9, 1  ;;  %s12219_s9 = sphi %s12242_s9, %s12_s9  }
   0x2   : > { %p112_p1 = scmp.lt.s32.totalorder %s12219_s9, 3 }
   0x4   : > { %p113_p2 = pnand %p10497_p0, %p112_p1 }
   0x5   : > { %p134_p3 = scmp.lt.s32.totalorder (!%p113_p2), %s10493_s10, 1  ;;  %s12299_s18 = smov (!%p113_p2), 0  }
   0x6   : > { %116 = sbr.rel (%p113_p2) target bundleno = 2168 (0x878), region = 28 }
   0xb   : > { %v12225_v0 = vmov 0   ;;  %s15852_s10 = smov (!%p134_p3, %s10493_s10), 1 }
   0xc   : > { %145 = vst [vmem:[#allocation2] sm:$0xf] %v12225_v0  ;;  %s11868_s11 = sshll.u32 %s15852_s10, 8 }
   0xd   : > { %146 = vst [vmem:[#allocation2 + $0x4] sm:$0xf] %v12225_v0  ;;  %s12258_s14 = scalar_lea.vmem %s15674_s2, %s11868_s11  ;;  %s12265_s17 = scalar_lea.vmem %s15672_s0, %s11868_s11 }
   0xe   : > { %147 = vst [vmem:[#allocation2 + $0x8] sm:$0xf] %v12225_v0  ;;  %v188_v1 = vld [vmem:[%s12265_s17] sm:$0xff]  ;;  %v189_v2 = vld [vmem:[%s12265_s17 + $0x8] sm:$0xff]  ;;  %v190_v3 = vld [vmem:[%s12265_s17 + $0x10] sm:$0xff] }
   0xf   : > { %149 = vst [vmem:[#allocation2 + $0xcc] sm:$0xf] %v12225_v0  ;;  %v191_v4 = vld [vmem:[%s12265_s17 + $0x18] sm:$0xff]  ;;  %v192_v5 = vld [vmem:[%s12265_s17 + $0x20] sm:$0xff]  ;;  %v193_v6 = vld [vmem:[%s12265_s17 + $0x28] sm:$0xff] }
  0x10   : > { %150 = vst [vmem:[#allocation2 + $0xd0] sm:$0xf] %v12225_v0  ;;  %v194_v7 = vld [vmem:[%s12265_s17 + $0x30] sm:$0xff]  ;;  %v195_v8 = vld [vmem:[%s12265_s17 + $0x38] sm:$0xff]  ;;  %v196_v9 = vld [vmem:[%s12265_s17 + $0x40] sm:$0xff] }
  0x11   : > { %151 = vst [vmem:[#allocation2 + $0xd4] sm:$0xf] %v12225_v0  ;;  %v197_v10 = vld [vmem:[%s12265_s17 + $0x48] sm:$0xff]  ;;  %v198_v11 = vld [vmem:[%s12265_s17 + $0x50] sm:$0xff]  ;;  %v199_v12 = vld [vmem:[%s12265_s17 + $0x58] sm:$0xff] }
  0x12   : > { %152 = vst [vmem:[#allocation2] sm:$0xf] %v12225_v0  ;;  %v200_v13 = vld [vmem:[%s12265_s17 + $0x60] sm:$0xff]  ;;  %v201_v14 = vld [vmem:[%s12265_s17 + $0x68] sm:$0xff]  ;;  %v202_v15 = vld [vmem:[%s12265_s17 + $0x70] sm:$0xff] }
  0x13   : > { %153 = vst [vmem:[#allocation2 + $0xc] sm:$0xf] %v12225_v0  ;;  %v203_v16 = vld [vmem:[%s12265_s17 + $0x78] sm:$0xff]  ;;  %v204_v17 = vld [vmem:[%s12265_s17 + $0x80] sm:$0xff]  ;;  %v205_v18 = vld [vmem:[%s12265_s17 + $0x88] sm:$0xff] }
  0x14   : > { %154 = vst [vmem:[#allocation2 + $0x18] sm:$0xf] %v12225_v0  ;;  %v206_v19 = vld [vmem:[%s12265_s17 + $0x90] sm:$0xff]  ;;  %v207_v20 = vld [vmem:[%s12265_s17 + $0x98] sm:$0xff]  ;;  %v208_v21 = vld [vmem:[%s12265_s17 + $0xa0] sm:$0xff] }
  0x15   : > { %155 = vst [vmem:[#allocation2 + $0x24] sm:$0xf] %v12225_v0  ;;  %v209_v22 = vld [vmem:[%s12265_s17 + $0xa8] sm:$0xff]  ;;  %v210_v23 = vld [vmem:[%s12265_s17 + $0xb0] sm:$0xff]  ;;  %v211_v24 = vld [vmem:[%s12265_s17 + $0xb8] sm:$0xff] }
  0x16   : > { %156 = vst [vmem:[#allocation2 + $0x30] sm:$0xf] %v12225_v0  ;;  %v212_v25 = vld [vmem:[%s12265_s17 + $0xc0] sm:$0xff]  ;;  %v213_v26 = vld [vmem:[%s12265_s17 + $0xc8] sm:$0xff]  ;;  %v214_v27 = vld [vmem:[%s12265_s17 + $0xd0] sm:$0xff] }
  0x17   : > { %157 = vst [vmem:[#allocation2 + $0x3c] sm:$0xf] %v12225_v0  ;;  %v215_v28 = vld [vmem:[%s12265_s17 + $0xd8] sm:$0xff]  ;;  %v216_v29 = vld [vmem:[%s12265_s17 + $0xe0] sm:$0xff]  ;;  %v217_v30 = vld [vmem:[%s12265_s17 + $0xe8] sm:$0xff] }
  0x18   : > { %158 = vst [vmem:[#allocation2 + $0x48] sm:$0xf] %v12225_v0  ;;  %v218_v31 = vld [vmem:[%s12265_s17 + $0xf0] sm:$0xff]  ;;  %v219_v32 = vld [vmem:[%s12265_s17 + $0xf8] sm:$0xff] }
  0x19   : > { %159 = vst [vmem:[#allocation2 + $0x54] sm:$0xf] %v12225_v0 }
  0x1a   : > { %160 = vst [vmem:[#allocation2 + $0x60] sm:$0xf] %v12225_v0 }
  0x1b   : > { %161 = vst [vmem:[#allocation2 + $0x6c] sm:$0xf] %v12225_v0 }
  0x1c   : > { %162 = vst [vmem:[#allocation2 + $0x78] sm:$0xf] %v12225_v0 }
  0x1d   : > { %163 = vst [vmem:[#allocation2 + $0x84] sm:$0xf] %v12225_v0 }
  0x1e   : > { %164 = vst [vmem:[#allocation2 + $0x90] sm:$0xf] %v12225_v0 }
  0x1f   : > { %165 = vst [vmem:[#allocation2 + $0x9c] sm:$0xf] %v12225_v0 }
  0x20   : > { %166 = vst [vmem:[#allocation2 + $0xa8] sm:$0xf] %v12225_v0 }
  0x21   : > { %167 = vst [vmem:[#allocation2 + $0xb4] sm:$0xf] %v12225_v0 }
  0x22   : > { %168 = vst [vmem:[#allocation2 + $0xc0] sm:$0xf] %v12225_v0 }
  0x23   : > { %171 = vst [vmem:[#allocation2 + $0x14] sm:$0xf] %v12225_v0 }
  0x24   : > { %172 = vst [vmem:[#allocation2 + $0x20] sm:$0xf] %v12225_v0 }
  0x25   : > { %173 = vst [vmem:[#allocation2 + $0x2c] sm:$0xf] %v12225_v0 }
  0x26   : > { %174 = vst [vmem:[#allocation2 + $0x38] sm:$0xf] %v12225_v0 }
  0x27   : > { %175 = vst [vmem:[#allocation2 + $0x44] sm:$0xf] %v12225_v0 }
  0x28   : > { %176 = vst [vmem:[#allocation2 + $0x50] sm:$0xf] %v12225_v0 }
  0x29   : > { %177 = vst [vmem:[#allocation2 + $0x5c] sm:$0xf] %v12225_v0 }
  0x2a   : > { %178 = vst [vmem:[#allocation2 + $0x68] sm:$0xf] %v12225_v0 }
  0x2b   : > { %179 = vst [vmem:[#allocation2 + $0x74] sm:$0xf] %v12225_v0 }
  0x2c   : > { %180 = vst [vmem:[#allocation2 + $0x80] sm:$0xf] %v12225_v0 }
  0x2d   : > { %181 = vst [vmem:[#allocation2 + $0x8c] sm:$0xf] %v12225_v0 }
  0x2e   : > { %182 = vst [vmem:[#allocation2 + $0x98] sm:$0xf] %v12225_v0 }
  0x2f   : > { %183 = vst [vmem:[#allocation2 + $0xa4] sm:$0xf] %v12225_v0 }
  0x30   : > { %184 = vst [vmem:[#allocation2 + $0xb0] sm:$0xf] %v12225_v0 }
  0x31   : > { %185 = vst [vmem:[#allocation2 + $0xbc] sm:$0xf] %v12225_v0 }
  0x32   : > { %186 = vst [vmem:[#allocation2 + $0xc8] sm:$0xf] %v12225_v0 }
  0x33   : > { %169 = vst [vmem:[#allocation2 + $0xcc] sm:$0xf] %v12225_v0 }
  0x34   : > { %170 = vst [vmem:[#allocation2 + $0x8] sm:$0xf] %v12225_v0 }
  0x35   : > { %187 = vst [vmem:[#allocation2 + $0xd4] sm:$0xf] %v12225_v0 }
  0x36   : > { %220 = vst [vmem:[#allocation3 + $0xb0] sm:$0xff] %v188_v1 }
  0x37   : > { %221 = vst [vmem:[#allocation3] sm:$0xff] %v189_v2 }
  0x38   : > { %222 = vst [vmem:[#allocation3 + $0xd8] sm:$0xff] %v190_v3 }
  0x39   : > { %223 = vst [vmem:[#allocation3 + $0x18] sm:$0xff] %v191_v4 }
  0x3a   : > { %224 = vst [vmem:[#allocation3 + $0x50] sm:$0xff] %v192_v5 }
  0x3b   : > { %225 = vst [vmem:[#allocation3 + $0x68] sm:$0xff] %v193_v6 }
  0x3c   : > { %226 = vst [vmem:[#allocation3 + $0x30] sm:$0xff] %v194_v7 }
  0x3d   : > { %227 = vst [vmem:[#allocation3 + $0x48] sm:$0xff] %v195_v8 }
  0x3e   : > { %228 = vst [vmem:[#allocation3 + $0x80] sm:$0xff] %v196_v9 }
  0x3f   : > { %229 = vst [vmem:[#allocation3 + $0x88] sm:$0xff] %v197_v10 }
  0x40   : > { %230 = vst [vmem:[#allocation3 + $0xe8] sm:$0xff] %v198_v11 }
  0x41   : > { %231 = vst [vmem:[#allocation3 + $0xb8] sm:$0xff] %v199_v12 }
  0x42   : > { %232 = vst [vmem:[#allocation3 + $0x60] sm:$0xff] %v200_v13 }
  0x43   : > { %233 = vst [vmem:[#allocation3 + $0xf0] sm:$0xff] %v201_v14 }
  0x44   : > { %234 = vst [vmem:[#allocation3 + $0x8] sm:$0xff] %v202_v15 }
  0x45   : > { %235 = vst [vmem:[#allocation3 + $0x78] sm:$0xff] %v203_v16 }
  0x46   : > { %236 = vst [vmem:[#allocation3 + $0x38] sm:$0xff] %v204_v17 }
  0x47   : > { %237 = vst [vmem:[#allocation3 + $0x58] sm:$0xff] %v205_v18 }
  0x48   : > { %238 = vst [vmem:[#allocation3 + $0x40] sm:$0xff] %v206_v19 }
  0x49   : > { %239 = vst [vmem:[#allocation3 + $0xc8] sm:$0xff] %v207_v20 }
  0x4a   : > { %240 = vst [vmem:[#allocation3 + $0xe0] sm:$0xff] %v208_v21 }
  0x4b   : > { %241 = vst [vmem:[#allocation3 + $0x90] sm:$0xff] %v209_v22 }
  0x4c   : > { %242 = vst [vmem:[#allocation3 + $0x70] sm:$0xff] %v210_v23 }
  0x4d   : > { %243 = vst [vmem:[#allocation3 + $0xc0] sm:$0xff] %v211_v24 }
  0x4e   : > { %244 = vst [vmem:[#allocation3 + $0xa8] sm:$0xff] %v212_v25 }
  0x4f   : > { %245 = vst [vmem:[#allocation3 + $0xd0] sm:$0xff] %v213_v26 }
  0x50   : > { %246 = vst [vmem:[#allocation3 + $0x10] sm:$0xff] %v214_v27 }
  0x51   : > { %247 = vst [vmem:[#allocation3 + $0x28] sm:$0xff] %v215_v28 }
  0x52   : > { %248 = vst [vmem:[#allocation3 + $0xa0] sm:$0xff] %v216_v29 }
  0x53   : > { %249 = vst [vmem:[#allocation3 + $0xf8] sm:$0xff] %v217_v30 }
  0x54   : > { %250 = vst [vmem:[#allocation3 + $0x20] sm:$0xff] %v218_v31 }
  0x55   : > { %251 = vst [vmem:[#allocation3 + $0x98] sm:$0xff] %v219_v32 }
  0x56 LB: >> { %v336_v33 = vld [vmem:[#allocation3 + $0x8] sm:$0xff]  ;;  %v337_v34 = vld [vmem:[#allocation3 + $0x78] sm:$0xff]  ;;  %vm386_vm0 = vsmask.f32 256  ;;  %vm387_vm1 = vsmask.f32 4368  ;;  %s12223_s18 = sphi %s12299_s18, %s257_s18  }
  0x57   : >> { %v368_v35 = vpack.c.bf16 %v336_v33, %v336_v33  ;;  %v369_v36 = vpack.c.bf16 %v337_v34, %v337_v34  ;;  %s11886_s19 = smul.u32 1152, %s12223_s18  ;;  %vm710_vm2 = vcmask 1043456   ;;  %vm711_vm3 = vsmask.f32 7938  ;;  %v338_v37 = vld [vmem:[#allocation3 + $0x38] sm:$0xff]  ;;  %vm12311_vm5 = vmor %vm386_vm0, %vm387_vm1  ;;  %v322_v23 = vld [vmem:[#allocation3 + $0xb0] sm:$0xff] }
  0x58   : >> { %vm717_vm4 = vcmask 1040384   ;;  %v827_v42 = vld [vmem:[#allocation2] sm:$0xf]  ;;  %v15709_v43 = vmov 0  ;;  %v828_v45 = vld [vmem:[#allocation2 + $0x4] sm:$0xf]  ;;  %vm12319_vm6 = vmand %vm710_vm2, %vm711_vm3  ;;  %v370_v57 = vpack.c.bf16 %v338_v37, %v338_v37  ;;  %v354_v29 = vpack.c.bf16 %v322_v23, %v322_v23 }
  0x59   : >> { %v509_v38 = vshrl.u32 %v368_v35, 16  ;;  %v512_v39 = vshll.u32 %v368_v35, 16  ;;  %v517_v40 = vshrl.u32 %v369_v36, 16  ;;  %v520_v41 = vshll.u32 %v369_v36, 16  ;;  %s12308_s22 = scalar_lea.vmem %s15673_s1, %s11886_s19  ;;  %v764_v44 = vld [vmem:[#allocation2 + $0x60] sm:$0xf]  ;;  %vm12325_vm7 = vmand %vm717_vm4, %vm386_vm0 }
  0x5a   : >> { %v15710_v43 = vsel %vm12311_vm5, 4294967295, %v15709_v43  ;;  %v11902_v46 = vld [vmem:[%s12308_s22 + $0x78] sm:$0xff]  ;;  %v15712_v50 = vmov 0  ;;  %v899_v51 = vshrl.u32 %v827_v42, 16  ;;  %v15715_v52 = vmov 0  ;;  %v11901_v58 = vld [vmem:[%s12308_s22 + $0x70] sm:$0xff] }
  0x5b   : >> { %15711 = vst [vmem:[#allocation5_spill] sm:$0xff] %v15710_v43  ;;  %v11894_v47 = vld [vmem:[%s12308_s22 + $0x38] sm:$0xff]  ;;  %v511_v48 = vrot.slane %v509_v38, 7  ;;  %v519_v49 = vrot.slane %v517_v40, 7  ;;  %v15713_v50 = vsel %vm12319_vm6, 4294967295, %v15712_v50  ;;  %v15716_v52 = vsel %vm12325_vm7, 4294967295, %v15715_v52  ;;  %12111 = vmatpush.bf16.msra.mxu2 %v11902_v46  ;;  %1414 = vmatpush.bf16.msra.mxu0 %v11902_v46 }
  0x5c   : >> { %15714 = vst [vmem:[#allocation6_spill] sm:$0xff] %v15713_v50  ;;  %v768_v53 = vld [vmem:[#allocation2 + $0x68] sm:$0x1]  ;;  %v902_v54 = vshll.u32 %v827_v42, 16  ;;  %v908_v55 = vshll.u32 %v828_v45, 16  ;;  %v912_v56 = vshrl.u32 %v828_v45, 16  ;;  %12119 = vmatpush.bf16.msra.mxu3 %v11894_v47  ;;  %1647 = vmatpush.bf16.msra.mxu1 %v11894_v47 }
  0x5d   : >> { %15717 = vst [vmem:[#allocation7_spill] sm:$0xff] %v15716_v52  ;;  %v11893_v59 = vld [vmem:[%s12308_s22 + $0x30] sm:$0xff]  ;;  %v514_v60 = vor.u32 %v512_v39, %v511_v48  ;;  %v515_v61 = vrot.slane %v511_v48, 4  ;;  %v522_v62 = vor.u32 %v520_v41, %v519_v49  ;;  %v524_v63 = vrot.slane %v519_v49, 4  ;;  %v879_v0 = vld [vmem:[#allocation2 + $0x8] sm:$0x1] }
  0x5e   : >> { %vm895_vm8 = vsmask.f32 3328  ;;  %v901_v1 = vrot.slane %v899_v51, 4  ;;  %v904_v2 = vrot.slane %v902_v54, 5  ;;  %v910_v3 = vrot.slane %v908_v55, 5  ;;  %v11900_v11 = vld [vmem:[%s12308_s22 + $0x68] sm:$0xff] }
  0x5f   : >> { %v523_v4 = vsel %vm12311_vm5, %v515_v61, %v522_v62  ;;  %v765_v5 = vsel %vm12319_vm6, %v514_v60, %v764_v44  ;;  %v769_v6 = vsel %vm12325_vm7, %v524_v63, %v768_v53  ;;  %v914_v7 = vrot.slane %v912_v56, 4  ;;  %12112 = vmatpush.bf16.msra.mxu2 %v11901_v58  ;;  %v11892_v12 = vld [vmem:[%s12308_s22 + $0x28] sm:$0xff]  ;;  %1415 = vmatpush.bf16.msra.mxu0 %v11901_v58  ;;  %v339_v17 = vld [vmem:[#allocation3 + $0x58] sm:$0xff]  ;;  %v11899_v24 = vld [vmem:[%s12308_s22 + $0x60] sm:$0xff]  ;;  %s257_s18 = sadd.s32 1, %s12223_s18  }
  0x60   : >> { %766 = vst [vmem:[#allocation2 + $0x60] sm:$0xf] %v765_v5  ;;  %vm896_vm9 = vsmask.f32 7440  ;;  %v905_v8 = vor.u32 %v904_v2, %v901_v1  ;;  %v918_v9 = vshll.u32 %v879_v0, 16  ;;  %v526_v10 = vshrl.u32 %v370_v57, 16  ;;  %12120 = vmatpush.bf16.msra.mxu3 %v11893_v59  ;;  %1648 = vmatpush.bf16.msra.mxu1 %v11893_v59 }
  0x61   : >> { %767 = vst [vmem:[#allocation2 + $0x64] sm:$0xf] %v523_v4  ;;  %v915_v13 = vor.u32 %v914_v7, %v910_v3  ;;  %v529_v14 = vshll.u32 %v370_v57, 16  ;;  %vm12341_vm10 = vmor %vm895_vm8, %vm896_vm9  ;;  %v15718_v19 = vmov 0  ;;  %v371_v21 = vpack.c.bf16 %v339_v17, %v339_v17  ;;  %v771_v22 = vld [vmem:[#allocation2 + $0x6c] sm:$0xf] }
  0x62   : >> { %770 = vst [vmem:[#allocation2 + $0x68] sm:$0x1] %v769_v6  ;;  %v906_v15 = vrot.slane %v905_v8, 4  ;;  %v920_v16 = vrot.slane %v918_v9, 5  ;;  %v528_v18 = vrot.slane %v526_v10, 7  ;;  %v15719_v19 = vsel %vm12341_vm10, 4294967295, %v15718_v19 }
  0x63   : >> { %15720 = vst [vmem:[#allocation8_spill] sm:$0xff] %v15719_v19  ;;  %v916_v20 = vrot.slane %v915_v13, 4  ;;  %v323_v28 = vld [vmem:[#allocation3] sm:$0xff]  ;;  %12113 = vmatpush.bf16.msra.mxu2 %v11900_v11  ;;  %v11891_v30 = vld [vmem:[%s12308_s22 + $0x20] sm:$0xff]  ;;  %v534_v33 = vshrl.u32 %v371_v21, 16  ;;  %v537_v34 = vshll.u32 %v371_v21, 16  ;;  %1416 = vmatpush.bf16.msra.mxu0 %v11900_v11 }
  0x64   : >> { %v911_v25 = vsel %vm12341_vm10, %v906_v15, %v910_v3  ;;  %v531_v26 = vor.u32 %v529_v14, %v528_v18  ;;  %v532_v27 = vrot.slane %v528_v18, 4  ;;  %12121 = vmatpush.bf16.msra.mxu3 %v11892_v12  ;;  %v340_v35 = vld [vmem:[#allocation3 + $0x40] sm:$0xff]  ;;  %v341_v36 = vld [vmem:[#allocation3 + $0xc8] sm:$0xff]  ;;  %1649 = vmatpush.bf16.msra.mxu1 %v11892_v12  ;;  %v775_v39 = vld [vmem:[#allocation2 + $0x74] sm:$0x1]  ;;  %v12357_v40 = vpack.c.bf16 %v323_v28, %v323_v28  ;;  %p254_p4 = scmp.ge.s32.totalorder %s257_s18, 2  }
  0x65   : >> { %v921_v31 = vsel %vm12341_vm10, %v916_v20, %v920_v16  ;;  %v12351_v32 = vunpack.c.l.b16 %v911_v25  ;;  %v390_v41 = vshrl.u32 %v354_v29, 16  ;;  %v536_v44 = vrot.slane %v534_v33, 7  ;;  %v11898_v48 = vld [vmem:[%s12308_s22 + $0x58] sm:$0xff]  ;;  %v713_v2 = vld [vmem:[#allocation2 + $0xc] sm:$0xf]  ;;  %v324_v7 = vld [vmem:[#allocation3 + $0xd8] sm:$0xff] }
  0x66   : >> { %v12353_v37 = vunpack.c.l.b16 %v921_v31  ;;  %v772_v38 = vsel %vm12319_vm6, %v531_v26, %v771_v22  ;;  %v393_v45 = vshll.u32 %v354_v29, 16  ;;  %v12359_v46 = vpack.c.bf16 %v340_v35, %v340_v35  ;;  %v11890_v56 = vld [vmem:[%s12308_s22 + $0x18] sm:$0xff]  ;;  %v325_v8 = vld [vmem:[#allocation3 + $0x18] sm:$0xff] }
  0x67   : >> { %v843_v42 = vld [vmem:[#allocation2 + $0x60] sm:$0xf]  ;;  %773 = vst [vmem:[#allocation2 + $0x6c] sm:$0xf] %v772_v38  ;;  %v12361_v47 = vpack.c.bf16 %v341_v36, %v341_v36  ;;  %v12366_v55 = vrot.slane %v390_v41, 7  ;;  %12114 = vmatpush.bf16.msra.mxu2 %v11899_v24  ;;  %v539_v60 = vor.u32 %v537_v34, %v536_v44  ;;  %v541_v61 = vrot.slane %v536_v44, 4  ;;  %1417 = vmatpush.bf16.msra.mxu0 %v11899_v24 }
  0x68   : >> { %v844_v49 = vld [vmem:[#allocation2 + $0x64] sm:$0xf]  ;;  %v1091_v51 = vshrl.u32 %v843_v42, 16  ;;  %v1094_v53 = vshll.u32 %v843_v42, 16  ;;  %v1334_v54 = vpack.c.b16 %v12353_v37, %v12351_v32  ;;  %12122 = vmatpush.bf16.msra.mxu3 %v11891_v30  ;;  %1650 = vmatpush.bf16.msra.mxu1 %v11891_v30  ;;  %v398_v12 = vshrl.u32 %v12357_v40, 16  ;;  %v11897_v13 = vld [vmem:[%s12308_s22 + $0x50] sm:$0xff] }
  0x69   : >> { %v887_v57 = vld [vmem:[#allocation2 + $0x68] sm:$0x1]  ;;  %v1100_v58 = vshll.u32 %v844_v49, 16  ;;  %v1104_v59 = vshrl.u32 %v844_v49, 16  ;;  %v395_v1 = vor.u32 %v393_v45, %v12366_v55  ;;  %v540_v5 = vsel %vm12311_vm5, %v532_v27, %v539_v60  ;;  %v11889_v14 = vld [vmem:[%s12308_s22 + $0x10] sm:$0xff]  ;;  %v342_v35 = vld [vmem:[#allocation3 + $0xe0] sm:$0xff] }
  0x6a   : >> { %v1093_v62 = vrot.slane %v1091_v51, 4  ;;  %v1096_v63 = vrot.slane %v1094_v53, 5  ;;  %v1110_v0 = vshll.u32 %v887_v57, 16  ;;  %v776_v6 = vsel %vm12325_vm7, %v541_v61, %v775_v39  ;;  %774 = vst [vmem:[#allocation2 + $0x70] sm:$0xf] %v540_v5  ;;  %v343_v36 = vld [vmem:[#allocation3 + $0x90] sm:$0xff] }
  0x6b   : >> { %v1102_v3 = vrot.slane %v1100_v58, 5  ;;  %v1106_v4 = vrot.slane %v1104_v59, 4  ;;  %v396_v11 = vrot.slane %v12366_v55, 4  ;;  %12115 = vmatpush.bf16.msra.mxu2 %v11898_v48  ;;  %777 = vst [vmem:[#allocation2 + $0x74] sm:$0x1] %v776_v6  ;;  %v401_v16 = vshll.u32 %v12357_v40, 16  ;;  %1418 = vmatpush.bf16.msra.mxu0 %v11898_v48 }
  0x6c   : >> { %v1097_v9 = vor.u32 %v1096_v63, %v1093_v62  ;;  %v1112_v10 = vrot.slane %v1110_v0, 5  ;;  %12123 = vmatpush.bf16.msra.mxu3 %v11890_v56  ;;  %v714_v17 = vsel %vm12319_vm6, %v395_v1, %v713_v2  ;;  %v543_v18 = vshrl.u32 %v12359_v46, 16  ;;  %1651 = vmatpush.bf16.msra.mxu1 %v11890_v56  ;;  %v719_v28 = vld [vmem:[#allocation2 + $0x14] sm:$0x1]  ;;  %v11896_v38 = vld [vmem:[%s12308_s22 + $0x48] sm:$0xff]  ;;  %v11895_v53 = vld [vmem:[%s12308_s22 + $0x40] sm:$0xff] }
  0x6d   : >> { %v1107_v15 = vor.u32 %v1106_v4, %v1102_v3  ;;  %v400_v22 = vrot.slane %v398_v12, 7  ;;  %715 = vst [vmem:[#allocation2 + $0xc] sm:$0xf] %v714_v17  ;;  %v12382_v23 = vpack.c.bf16 %v324_v7, %v324_v7  ;;  %v12384_v24 = vpack.c.bf16 %v325_v8, %v325_v8  ;;  %v11888_v39 = vld [vmem:[%s12308_s22 + $0x8] sm:$0xff]  ;;  %v778_v45 = vld [vmem:[#allocation2 + $0x78] sm:$0xf] }
  0x6e   : >> { %v1098_v20 = vrot.slane %v1097_v9, 4  ;;  %v845_v21 = vld [vmem:[#allocation2 + $0x6c] sm:$0xf]  ;;  %v12386_v29 = vrot.slane %v543_v18, 7  ;;  %v546_v34 = vshll.u32 %v12359_v46, 16  ;;  %v11887_v55 = vld [vmem:[%s12308_s22] sm:$0xff]  ;;  %v12407_v59 = vpack.c.bf16 %v342_v35, %v342_v35 }
  0x6f   : >> { %v1108_v25 = vrot.slane %v1107_v15, 4  ;;  %v1115_v26 = vshrl.u32 %v845_v21, 16  ;;  %v1118_v27 = vshll.u32 %v845_v21, 16  ;;  %v403_v31 = vor.u32 %v401_v16, %v400_v22  ;;  %12116 = vmatpush.bf16.msra.mxu2 %v11897_v13  ;;  %1419 = vmatpush.bf16.msra.mxu0 %v11897_v13  ;;  %v11934_v12 = vld [vmem:[%s12308_s22 + $0xf8] sm:$0xff]  ;;  %v11878_v17 = vld [vmem:[#allocation2 + $0x60] sm:$0xff] }
  0x70   : >> { %v1103_v30 = vsel %vm12341_vm10, %v1098_v20, %v1102_v3  ;;  %v405_v33 = vrot.slane %v400_v22, 4  ;;  %12124 = vmatpush.bf16.msra.mxu3 %v11889_v14  ;;  %1652 = vmatpush.bf16.msra.mxu1 %v11889_v14  ;;  %v548_v51 = vor.u32 %v546_v34, %v12386_v29  ;;  %v549_v58 = vrot.slane %v12386_v29, 4  ;;  %v782_v22 = vld [vmem:[#allocation2 + $0x80] sm:$0x1] }
  0x71   : >> { %v1113_v40 = vsel %vm12341_vm10, %v1108_v25, %v1112_v10  ;;  %v12395_v41 = vunpack.c.l.b16 %v1103_v30  ;;  %v1117_v42 = vrot.slane %v1115_v26, 4  ;;  %v1120_v44 = vrot.slane %v1118_v27, 5  ;;  %v846_v56 = vld [vmem:[#allocation2 + $0x70] sm:$0xf]  ;;  %v11870_v25 = vld [vmem:[#allocation2] sm:$0xff]  ;;  %v11942_v26 = vld [vmem:[%s12308_s22 + $0x138] sm:$0xff] }
  0x72   : >> { %v12397_v48 = vunpack.c.l.b16 %v1113_v40  ;;  %v404_v46 = vsel %vm12311_vm5, %v396_v11, %v403_v31  ;;  %v720_v49 = vsel %vm12325_vm7, %v405_v33, %v719_v28  ;;  %v12409_v60 = vpack.c.bf16 %v343_v36, %v343_v36  ;;  %v888_v62 = vld [vmem:[#allocation2 + $0x74] sm:$0x1]  ;;  %v11910_v11 = vld [vmem:[%s12308_s22 + $0xb8] sm:$0xff]  ;;  %v326_v36 = vld [vmem:[#allocation3 + $0x50] sm:$0xff] }
  0x73   : >> { %v1121_v57 = vor.u32 %v1120_v44, %v1117_v42  ;;  %716 = vst [vmem:[#allocation2 + $0x10] sm:$0xf] %v404_v46  ;;  %v1124_v63 = vshll.u32 %v846_v56, 16  ;;  %v1128_v0 = vshrl.u32 %v846_v56, 16  ;;  %v779_v1 = vsel %vm12319_vm6, %v548_v51, %v778_v45  ;;  %12117 = vmatpush.bf16.msra.mxu2 %v11896_v38  ;;  %1420 = vmatpush.bf16.msra.mxu0 %v11896_v38  ;;  %v11909_v38 = vld [vmem:[%s12308_s22 + $0xb0] sm:$0xff] }
  0x74   : >> { %v1342_v61 = vpack.c.b16 %v12397_v48, %v12395_v41  ;;  %721 = vst [vmem:[#allocation2 + $0x14] sm:$0x1] %v720_v49  ;;  %12125 = vmatpush.bf16.msra.mxu3 %v11888_v39  ;;  %v1134_v3 = vshll.u32 %v888_v62, 16  ;;  %v829_v4 = vld [vmem:[#allocation2 + $0xc] sm:$0xf]  ;;  %v551_v5 = vshrl.u32 %v12361_v47, 16  ;;  %1653 = vmatpush.bf16.msra.mxu1 %v11888_v39 }
  0x75   : >> { %v1122_v2 = vrot.slane %v1121_v57, 4  ;;  %v554_v6 = vshll.u32 %v12361_v47, 16  ;;  %v1126_v7 = vrot.slane %v1124_v63, 5  ;;  %v1130_v8 = vrot.slane %v1128_v0, 4  ;;  %780 = vst [vmem:[#allocation2 + $0x78] sm:$0xf] %v779_v1 }
  0x76   : >> { %v923_v9 = vshrl.u32 %v829_v4, 16  ;;  %v926_v10 = vshll.u32 %v829_v4, 16  ;;  %v1136_v13 = vrot.slane %v1134_v3, 5  ;;  %v553_v14 = vrot.slane %v551_v5, 7  ;;  %v11933_v42 = vld [vmem:[%s12308_s22 + $0xf0] sm:$0xff]  ;;  %v11932_v4 = vld [vmem:[%s12308_s22 + $0xe8] sm:$0xff] }
  0x77   : >> { %v407_v15 = vshrl.u32 %v12382_v23, 16  ;;  %v410_v16 = vshll.u32 %v12382_v23, 16  ;;  %v1127_v47 = vsel %vm12341_vm10, %v1122_v2, %v1126_v7  ;;  %v1131_v18 = vor.u32 %v1130_v8, %v1126_v7  ;;  %12118 = vmatpush.bf16.msra.mxu2 %v11895_v53  ;;  %1421 = vmatpush.bf16.msra.mxu0 %v11895_v53  ;;  %v722_v51 = vld [vmem:[#allocation2 + $0x18] sm:$0xf]  ;;  %v11941_v62 = vld [vmem:[%s12308_s22 + $0x130] sm:$0xff]  ;;  %v11908_v2 = vld [vmem:[%s12308_s22 + $0xa8] sm:$0xff] }
  0x78   : >> { %v925_v20 = vrot.slane %v923_v9, 4  ;;  %v928_v21 = vrot.slane %v926_v10, 5  ;;  %12126 = vmatpush.bf16.msra.mxu3 %v11887_v55  ;;  %v12424_v27 = vunpack.c.l.b16 %v1127_v47  ;;  %v556_v28 = vor.u32 %v554_v6, %v553_v14  ;;  %1654 = vmatpush.bf16.msra.mxu1 %v11887_v55  ;;  %v726_v9 = vld [vmem:[#allocation2 + $0x20] sm:$0x1] }
  0x79   : >> { %v558_v29 = vrot.slane %v553_v14, 4  ;;  %v12426_v30 = vrot.slane %v407_v15, 7  ;;  %v1132_v23 = vrot.slane %v1131_v18, 4  ;;  %v415_v34 = vshrl.u32 %v12384_v24, 16  ;;  %v11940_v15 = vld [vmem:[%s12308_s22 + $0x128] sm:$0xff] }
  0x7a   : >> { %v830_v31 = vld [vmem:[#allocation2 + $0x10] sm:$0xf]  ;;  %v929_v33 = vor.u32 %v928_v21, %v925_v20  ;;  %v418_v35 = vshll.u32 %v12384_v24, 16  ;;  %v557_v44 = vsel %vm12311_vm5, %v549_v58, %v556_v28  ;;  %1462 = vmatmul.bf16.vlgmr.msra.gmra.mxu2 %v1342_v61  ;;  %1422 = vmatmul.bf16.vlgmr.msra.gmra.mxu0 %v1334_v54  ;;  %v12444_v58 = vpack.c.bf16 %v326_v36, %v326_v36  ;;  %v327_v28 = vld [vmem:[#allocation3 + $0x68] sm:$0xff] }
  0x7b   : >> { %2031 = vmatpush.bf16.msrb.mxu2 %v11910_v11  ;;  %v880_v39 = vld [vmem:[#allocation2 + $0x14] sm:$0x1]  ;;  %v932_v40 = vshll.u32 %v830_v31, 16  ;;  %v936_v41 = vshrl.u32 %v830_v31, 16  ;;  %v783_v45 = vsel %vm12325_vm7, %v558_v29, %v782_v22  ;;  %1695 = vmatmul.bf16.vlgmr.msra.gmra.mxu3 %v11878_v17  ;;  %v1137_v48 = vsel %vm12341_vm10, %v1132_v23, %v1136_v13  ;;  %781 = vst [vmem:[#allocation2 + $0x7c] sm:$0xf] %v557_v44 }
  0x7c   : >> { %2348 = vmatpush.bf16.msrb.mxu3 %v11934_v12  ;;  %v930_v24 = vrot.slane %v929_v33, 4  ;;  %v942_v46 = vshll.u32 %v880_v39, 16  ;;  %v412_v49 = vor.u32 %v410_v16, %v12426_v30  ;;  %1655 = vmatmul.bf16.vlgmr.msra.gmra.mxu1 %v11870_v25  ;;  %v12442_v53 = vunpack.c.l.b16 %v1137_v48  ;;  %784 = vst [vmem:[#allocation2 + $0x80] sm:$0x1] %v783_v45  ;;  %v847_v57 = vld [vmem:[#allocation2 + $0x78] sm:$0xf] }
  0x7d   : >> { %v934_v55 = vrot.slane %v932_v40, 5  ;;  %v938_v56 = vrot.slane %v936_v41, 4  ;;  %3033 = vmatpush.bf16.msrb.mxu0 %v11942_v26  ;;  %v1139_v63 = vshrl.u32 %v847_v57, 16  ;;  %v1142_v0 = vshll.u32 %v847_v57, 16  ;;  %v785_v26 = vld [vmem:[#allocation2 + $0x84] sm:$0xf] }
  0x7e   : >> { %v944_v61 = vrot.slane %v942_v46, 5  ;;  %v413_v1 = vrot.slane %v12426_v30, 4  ;;  %v1343_v32 = vpack.c.b16 %v12442_v53, %v12424_v27  ;;  %v417_v3 = vrot.slane %v415_v34, 7  ;;  %v11879_v41 = vld [vmem:[#allocation2 + $0x6c] sm:$0xff]  ;;  %v11931_v53 = vld [vmem:[%s12308_s22 + $0xe0] sm:$0xff] }
  0x7f   : >> { %2032 = vmatpush.bf16.msrb.mxu2 %v11909_v38  ;;  %v935_v37 = vsel %vm12341_vm10, %v930_v24, %v934_v55  ;;  %v939_v54 = vor.u32 %v938_v56, %v934_v55  ;;  %v1141_v6 = vrot.slane %v1139_v63, 4  ;;  %v1144_v7 = vrot.slane %v1142_v0, 5  ;;  %v789_v24 = vld [vmem:[#allocation2 + $0x8c] sm:$0x1] }
  0x80   : >> { %2349 = vmatpush.bf16.msrb.mxu3 %v11933_v42  ;;  %v12454_v5 = vunpack.c.l.b16 %v935_v37  ;;  %v723_v8 = vsel %vm12319_vm6, %v412_v49, %v722_v51  ;;  %v420_v11 = vor.u32 %v418_v35, %v417_v3  ;;  %v422_v12 = vrot.slane %v417_v3, 4  ;;  %v344_v46 = vld [vmem:[#allocation3 + $0x70] sm:$0xff]  ;;  %v729_v37 = vld [vmem:[#allocation2 + $0x24] sm:$0xf] }
  0x81   : >> { %v940_v10 = vrot.slane %v939_v54, 4  ;;  %724 = vst [vmem:[#allocation2 + $0x18] sm:$0xf] %v723_v8  ;;  %v560_v13 = vshrl.u32 %v12407_v59, 16  ;;  %3034 = vmatpush.bf16.msrb.mxu0 %v11941_v62  ;;  %v1145_v14 = vor.u32 %v1144_v7, %v1141_v6  ;;  %v563_v16 = vshll.u32 %v12407_v59, 16 }
  0x82   : >> { %v568_v17 = vshrl.u32 %v12409_v60, 16  ;;  %v571_v47 = vshll.u32 %v12409_v60, 16  ;;  %v848_v20 = vld [vmem:[#allocation2 + $0x7c] sm:$0xf]  ;;  %v421_v21 = vsel %vm12311_vm5, %v413_v1, %v420_v11  ;;  %v727_v22 = vsel %vm12325_vm7, %v422_v12, %v726_v9 }
  0x83   : >> { %v945_v18 = vsel %vm12341_vm10, %v940_v10, %v944_v61  ;;  %2033 = vmatpush.bf16.msrb.mxu2 %v11908_v2  ;;  %v562_v25 = vrot.slane %v560_v13, 7  ;;  %v889_v29 = vld [vmem:[#allocation2 + $0x80] sm:$0x1]  ;;  %v1146_v30 = vrot.slane %v1145_v14, 4  ;;  %v1148_v23 = vshll.u32 %v848_v20, 16  ;;  %v11871_v61 = vld [vmem:[#allocation2 + $0xc] sm:$0xff] }
  0x84   : >> { %2350 = vmatpush.bf16.msrb.mxu3 %v11932_v4  ;;  %v1305_v59 = vunpack.c.l.b16 %v945_v18  ;;  %v1152_v60 = vshrl.u32 %v848_v20, 16  ;;  %v1158_v31 = vshll.u32 %v889_v29, 16  ;;  %725 = vst [vmem:[#allocation2 + $0x1c] sm:$0xf] %v421_v21  ;;  %v570_v35 = vrot.slane %v568_v17, 7  ;;  %v11907_v10 = vld [vmem:[%s12308_s22 + $0xa0] sm:$0xff] }
  0x85   : >> { %v565_v33 = vor.u32 %v563_v16, %v562_v25  ;;  %v566_v34 = vrot.slane %v562_v25, 4  ;;  %v1150_v38 = vrot.slane %v1148_v23, 5  ;;  %728 = vst [vmem:[#allocation2 + $0x20] sm:$0x1] %v727_v22  ;;  %3035 = vmatpush.bf16.msrb.mxu0 %v11940_v15  ;;  %v359_v40 = vpack.c.bf16 %v327_v28, %v327_v28  ;;  %v733_v22 = vld [vmem:[#allocation2 + $0x2c] sm:$0x1] }
  0x86   : >> { %v1335_v36 = vpack.c.b16 %v1305_v59, %v12454_v5  ;;  %v1154_v39 = vrot.slane %v1152_v60, 4  ;;  %v1160_v42 = vrot.slane %v1158_v31, 5  ;;  %v573_v44 = vor.u32 %v571_v47, %v570_v35  ;;  %v345_v25 = vld [vmem:[#allocation3 + $0xc0] sm:$0xff] }
  0x87   : >> { %v575_v45 = vrot.slane %v570_v35, 4  ;;  %v786_v48 = vsel %vm12319_vm6, %v565_v33, %v785_v26  ;;  %v1151_v49 = vsel %vm12341_vm10, %v1146_v30, %v1150_v38  ;;  %v424_v56 = vshrl.u32 %v12444_v58, 16  ;;  %2034 = vmatpush.bf16.msrb.mxu2 %v11907_v10 }
  0x88   : >> { %v1155_v51 = vor.u32 %v1154_v39, %v1150_v38  ;;  %v831_v55 = vld [vmem:[#allocation2 + $0x18] sm:$0xf]  ;;  %787 = vst [vmem:[#allocation2 + $0x84] sm:$0xf] %v786_v48  ;;  %v427_v57 = vshll.u32 %v12444_v58, 16  ;;  %v12476_v62 = vunpack.c.l.b16 %v1151_v49  ;;  %v574_v1 = vsel %vm12311_vm5, %v566_v34, %v573_v44  ;;  %2351 = vmatpush.bf16.msrb.mxu3 %v11931_v53 }
  0x89   : >> { %v947_v63 = vshrl.u32 %v831_v55, 16  ;;  %v950_v0 = vshll.u32 %v831_v55, 16  ;;  %788 = vst [vmem:[#allocation2 + $0x88] sm:$0xf] %v574_v1  ;;  %v790_v2 = vsel %vm12325_vm7, %v575_v45, %v789_v24  ;;  %v426_v3 = vrot.slane %v424_v56, 7 }
  0x8a   : >> { %v1156_v54 = vrot.slane %v1155_v51, 4  ;;  %v432_v4 = vshrl.u32 %v359_v40, 16  ;;  %791 = vst [vmem:[#allocation2 + $0x8c] sm:$0x1] %v790_v2  ;;  %v435_v58 = vshll.u32 %v359_v40, 16  ;;  %v12482_v7 = vpack.c.bf16 %v344_v46, %v344_v46  ;;  %1467 = vmatmul.bf16.gmra.mxu2 %v1343_v32  ;;  %1427 = vmatmul.bf16.gmra.mxu0 %v1335_v36  ;;  %v11939_v32 = vld [vmem:[%s12308_s22 + $0x120] sm:$0xff] }
  0x8b   : >> { %v949_v5 = vrot.slane %v947_v63, 4  ;;  %v952_v6 = vrot.slane %v950_v0, 5  ;;  %1700 = vmatmul.bf16.gmra.mxu3 %v11879_v41  ;;  %v832_v9 = vld [vmem:[#allocation2 + $0x1c] sm:$0xf]  ;;  %v429_v11 = vor.u32 %v427_v57, %v426_v3  ;;  %v430_v12 = vrot.slane %v426_v3, 4  ;;  %3036 = vmatpush.bf16.msrb.mxu0 %v11939_v32 }
  0x8c   : >> { %v1161_v8 = vsel %vm12341_vm10, %v1156_v54, %v1160_v42  ;;  %v434_v13 = vrot.slane %v432_v4, 7  ;;  %1660 = vmatmul.bf16.gmra.mxu1 %v11871_v61  ;;  %v881_v15 = vld [vmem:[#allocation2 + $0x20] sm:$0x1]  ;;  %v956_v17 = vshll.u32 %v832_v9, 16  ;;  %v960_v27 = vshrl.u32 %v832_v9, 16  ;;  %v328_v61 = vld [vmem:[#allocation3 + $0x30] sm:$0xff] }
  0x8d   : >> { %v12490_v14 = vunpack.c.l.b16 %v1161_v8  ;;  %v953_v16 = vor.u32 %v952_v6, %v949_v5  ;;  %v966_v47 = vshll.u32 %v881_v15, 16  ;;  %v730_v21 = vsel %vm12319_vm6, %v429_v11, %v729_v37  ;;  %v11880_v5 = vld [vmem:[#allocation2 + $0x78] sm:$0xff] }
  0x8e   : >> { %v437_v18 = vor.u32 %v435_v58, %v434_v13  ;;  %v439_v20 = vrot.slane %v434_v13, 4  ;;  %v958_v59 = vrot.slane %v956_v17, 5  ;;  %v962_v29 = vrot.slane %v960_v27, 4  ;;  %731 = vst [vmem:[#allocation2 + $0x24] sm:$0xf] %v730_v21  ;;  %v11872_v17 = vld [vmem:[#allocation2 + $0x18] sm:$0xff] }
  0x8f   : >> { %v1344_v26 = vpack.c.b16 %v12490_v14, %v12476_v62  ;;  %v954_v28 = vrot.slane %v953_v16, 4  ;;  %v849_v30 = vld [vmem:[#allocation2 + $0x84] sm:$0xf]  ;;  %v968_v23 = vrot.slane %v966_v47, 5  ;;  %v377_v39 = vpack.c.bf16 %v345_v25, %v345_v25  ;;  %v792_v16 = vld [vmem:[#allocation2 + $0x90] sm:$0xf] }
  0x90   : >> { %v1163_v60 = vshrl.u32 %v849_v30, 16  ;;  %v1166_v31 = vshll.u32 %v849_v30, 16  ;;  %v438_v33 = vsel %vm12311_vm5, %v430_v12, %v437_v18  ;;  %v963_v35 = vor.u32 %v962_v29, %v958_v59  ;;  %v850_v36 = vld [vmem:[#allocation2 + $0x88] sm:$0xf]  ;;  %v796_v18 = vld [vmem:[#allocation2 + $0x98] sm:$0x1] }
  0x91   : >> { %v959_v34 = vsel %vm12341_vm10, %v954_v28, %v958_v59  ;;  %732 = vst [vmem:[#allocation2 + $0x28] sm:$0xf] %v438_v33  ;;  %v734_v38 = vsel %vm12325_vm7, %v439_v20, %v733_v22  ;;  %v890_v41 = vld [vmem:[#allocation2 + $0x8c] sm:$0x1]  ;;  %v1172_v45 = vshll.u32 %v850_v36, 16  ;;  %v1176_v24 = vshrl.u32 %v850_v36, 16 }
  0x92   : >> { %v1306_v40 = vunpack.c.l.b16 %v959_v34  ;;  %v1165_v42 = vrot.slane %v1163_v60, 4  ;;  %v1168_v44 = vrot.slane %v1166_v31, 5  ;;  %v964_v48 = vrot.slane %v963_v35, 4  ;;  %735 = vst [vmem:[#allocation2 + $0x2c] sm:$0x1] %v734_v38  ;;  %v329_v60 = vld [vmem:[#allocation3 + $0x48] sm:$0xff] }
  0x93   : >> { %v1182_v46 = vshll.u32 %v890_v41, 16  ;;  %v577_v49 = vshrl.u32 %v12482_v7, 16  ;;  %v1174_v55 = vrot.slane %v1172_v45, 5  ;;  %v580_v56 = vshll.u32 %v12482_v7, 16  ;;  %v346_v31 = vld [vmem:[#allocation3 + $0xa8] sm:$0xff]  ;;  %v11906_v38 = vld [vmem:[%s12308_s22 + $0x98] sm:$0xff] }
  0x94   : >> { %v1169_v51 = vor.u32 %v1168_v44, %v1165_v42  ;;  %v585_v57 = vshrl.u32 %v377_v39, 16  ;;  %v969_v63 = vsel %vm12341_vm10, %v964_v48, %v968_v23  ;;  %v1178_v0 = vrot.slane %v1176_v24, 4  ;;  %v11930_v42 = vld [vmem:[%s12308_s22 + $0xd8] sm:$0xff]  ;;  %2035 = vmatpush.bf16.msrb.mxu2 %v11906_v38 }
  0x95   : >> { %v1184_v1 = vrot.slane %v1182_v46, 5  ;;  %v579_v37 = vrot.slane %v577_v49, 7  ;;  %v1307_v54 = vunpack.c.l.b16 %v969_v63  ;;  %v588_v4 = vshll.u32 %v377_v39, 16  ;;  %v833_v58 = vld [vmem:[#allocation2 + $0x24] sm:$0xf]  ;;  %v347_v39 = vld [vmem:[#allocation3 + $0xd0] sm:$0xff]  ;;  %2352 = vmatpush.bf16.msrb.mxu3 %v11930_v42 }
  0x96   : >> { %v1170_v2 = vrot.slane %v1169_v51, 4  ;;  %v587_v3 = vrot.slane %v585_v57, 7  ;;  %v1179_v6 = vor.u32 %v1178_v0, %v1174_v55  ;;  %v12508_v10 = vpack.c.bf16 %v328_v61, %v328_v61  ;;  %v11938_v44 = vld [vmem:[%s12308_s22 + $0x118] sm:$0xff]  ;;  %v736_v0 = vld [vmem:[#allocation2 + $0x30] sm:$0xf] }
  0x97   : >> { %v582_v8 = vor.u32 %v580_v56, %v579_v37  ;;  %v583_v9 = vrot.slane %v579_v37, 4  ;;  %v1336_v7 = vpack.c.b16 %v1307_v54, %v1306_v40  ;;  %v971_v13 = vshrl.u32 %v833_v58, 16  ;;  %v330_v40 = vld [vmem:[#allocation3 + $0x80] sm:$0xff]  ;;  %3037 = vmatpush.bf16.msrb.mxu0 %v11938_v44 }
  0x98   : >> { %v1175_v11 = vsel %vm12341_vm10, %v1170_v2, %v1174_v55  ;;  %v834_v12 = vld [vmem:[#allocation2 + $0x28] sm:$0xf]  ;;  %v974_v15 = vshll.u32 %v833_v58, 16  ;;  %v1180_v27 = vrot.slane %v1179_v6, 4  ;;  %v590_v25 = vor.u32 %v588_v4, %v587_v3 }
  0x99   : >> { %v12512_v53 = vunpack.c.l.b16 %v1175_v11  ;;  %v980_v32 = vshll.u32 %v834_v12, 16  ;;  %v984_v47 = vshrl.u32 %v834_v12, 16  ;;  %v882_v20 = vld [vmem:[#allocation2 + $0x2c] sm:$0x1]  ;;  %v973_v21 = vrot.slane %v971_v13, 4 }
  0x9a   : >> { %v976_v22 = vrot.slane %v974_v15, 5  ;;  %v592_v28 = vrot.slane %v587_v3, 4  ;;  %v1185_v59 = vsel %vm12341_vm10, %v1180_v27, %v1184_v1  ;;  %v990_v23 = vshll.u32 %v882_v20, 16  ;;  %1472 = vmatmul.bf16.gmra.mxu2 %v1344_v26  ;;  %1432 = vmatmul.bf16.gmra.mxu0 %v1336_v7  ;;  %v331_v1 = vld [vmem:[#allocation3 + $0x88] sm:$0xff]  ;;  %v740_v7 = vld [vmem:[#allocation2 + $0x38] sm:$0x1] }
  0x9b   : >> { %v982_v29 = vrot.slane %v980_v32, 5  ;;  %v986_v30 = vrot.slane %v984_v47, 4  ;;  %1705 = vmatmul.bf16.gmra.mxu3 %v11880_v5  ;;  %v12519_v33 = vunpack.c.l.b16 %v1185_v59  ;;  %v591_v35 = vsel %vm12311_vm5, %v583_v9, %v590_v25  ;;  %v348_v9 = vld [vmem:[#allocation3 + $0x10] sm:$0xff]  ;;  %v799_v47 = vld [vmem:[#allocation2 + $0x9c] sm:$0xf] }
  0x9c   : >> { %v977_v34 = vor.u32 %v976_v22, %v973_v21  ;;  %v793_v36 = vsel %vm12319_vm6, %v582_v8, %v792_v16  ;;  %1665 = vmatmul.bf16.gmra.mxu1 %v11872_v17  ;;  %v992_v62 = vrot.slane %v990_v23, 5  ;;  %v797_v14 = vsel %vm12325_vm7, %v592_v28, %v796_v18  ;;  %795 = vst [vmem:[#allocation2 + $0x94] sm:$0xf] %v591_v35 }
  0x9d   : >> { %v987_v41 = vor.u32 %v986_v30, %v982_v29  ;;  %794 = vst [vmem:[#allocation2 + $0x90] sm:$0xf] %v793_v36  ;;  %v441_v26 = vshrl.u32 %v12508_v10, 16  ;;  %v1345_v45 = vpack.c.b16 %v12519_v33, %v12512_v53  ;;  %v361_v24 = vpack.c.bf16 %v329_v60, %v329_v60  ;;  %v803_v60 = vld [vmem:[#allocation2 + $0xa4] sm:$0x1]  ;;  %v11929_v53 = vld [vmem:[%s12308_s22 + $0xd0] sm:$0xff] }
  0x9e   : >> { %v978_v48 = vrot.slane %v977_v34, 4  ;;  %v444_v46 = vshll.u32 %v12508_v10, 16  ;;  %798 = vst [vmem:[#allocation2 + $0x98] sm:$0x1] %v797_v14  ;;  %v378_v55 = vpack.c.bf16 %v346_v31, %v346_v31  ;;  %v379_v56 = vpack.c.bf16 %v347_v39, %v347_v39  ;;  %v11881_v31 = vld [vmem:[#allocation2 + $0x84] sm:$0xff]  ;;  %v11937_v33 = vld [vmem:[%s12308_s22 + $0x110] sm:$0xff]  ;;  %2353 = vmatpush.bf16.msrb.mxu3 %v11929_v53 }
  0x9f   : >> { %v988_v49 = vrot.slane %v987_v41, 4  ;;  %v443_v51 = vrot.slane %v441_v26, 7  ;;  %v449_v61 = vshrl.u32 %v361_v24, 16  ;;  %v452_v63 = vshll.u32 %v361_v24, 16  ;;  %v349_v14 = vld [vmem:[#allocation3 + $0x28] sm:$0xff]  ;;  %3038 = vmatpush.bf16.msrb.mxu0 %v11937_v33 }
  0xa0   : >> { %v983_v57 = vsel %vm12341_vm10, %v978_v48, %v982_v29  ;;  %v12536_v37 = vpack.c.bf16 %v330_v40, %v330_v40  ;;  %v594_v58 = vshrl.u32 %v378_v55, 16  ;;  %v597_v8 = vshll.u32 %v378_v55, 16  ;;  %v11873_v26 = vld [vmem:[#allocation2 + $0x24] sm:$0xff] }
  0xa1   : >> { %v993_v54 = vsel %vm12341_vm10, %v988_v49, %v992_v62  ;;  %v12540_v2 = vunpack.c.l.b16 %v983_v57  ;;  %v446_v3 = vor.u32 %v444_v46, %v443_v51  ;;  %v447_v4 = vrot.slane %v443_v51, 4  ;;  %v332_v46 = vld [vmem:[#allocation3 + $0xe8] sm:$0xff] }
  0xa2   : >> { %v12542_v5 = vunpack.c.l.b16 %v993_v54  ;;  %v451_v6 = vrot.slane %v449_v61, 7  ;;  %v602_v11 = vshrl.u32 %v379_v56, 16  ;;  %v605_v12 = vshll.u32 %v379_v56, 16 }
  0xa3   : >> { %v737_v10 = vsel %vm12319_vm6, %v446_v3, %v736_v0  ;;  %v12546_v13 = vpack.c.bf16 %v331_v1, %v331_v1  ;;  %v596_v32 = vrot.slane %v594_v58, 7  ;;  %v852_v18 = vld [vmem:[#allocation2 + $0x94] sm:$0xf]  ;;  %v12550_v25 = vpack.c.bf16 %v348_v9, %v348_v9 }
  0xa4   : >> { %v1337_v15 = vpack.c.b16 %v12542_v5, %v12540_v2  ;;  %v851_v16 = vld [vmem:[#allocation2 + $0x90] sm:$0xf]  ;;  %v454_v17 = vor.u32 %v452_v63, %v451_v6  ;;  %v456_v27 = vrot.slane %v451_v6, 4  ;;  %738 = vst [vmem:[#allocation2 + $0x30] sm:$0xf] %v737_v10  ;;  %v604_v22 = vrot.slane %v602_v11, 7 }
  0xa5   : >> { %v1187_v20 = vshrl.u32 %v851_v16, 16  ;;  %v1190_v21 = vshll.u32 %v851_v16, 16  ;;  %v891_v28 = vld [vmem:[#allocation2 + $0x98] sm:$0x1]  ;;  %v1196_v59 = vshll.u32 %v852_v18, 16  ;;  %v1200_v29 = vshrl.u32 %v852_v18, 16 }
  0xa6   : >> { %v455_v30 = vsel %vm12311_vm5, %v447_v4, %v454_v17  ;;  %v741_v23 = vsel %vm12325_vm7, %v456_v27, %v740_v7  ;;  %v1206_v36 = vshll.u32 %v891_v28, 16  ;;  %v599_v38 = vor.u32 %v597_v8, %v596_v32  ;;  %v11905_v3 = vld [vmem:[%s12308_s22 + $0x90] sm:$0xff] }
  0xa7   : >> { %v1189_v34 = vrot.slane %v1187_v20, 4  ;;  %v1192_v35 = vrot.slane %v1190_v21, 5  ;;  %739 = vst [vmem:[#allocation2 + $0x34] sm:$0xf] %v455_v30  ;;  %v1198_v39 = vrot.slane %v1196_v59, 5  ;;  %v1202_v40 = vrot.slane %v1200_v29, 4  ;;  %2036 = vmatpush.bf16.msrb.mxu2 %v11905_v3 }
  0xa8   : >> { %742 = vst [vmem:[#allocation2 + $0x38] sm:$0x1] %v741_v23  ;;  %v600_v41 = vrot.slane %v596_v32, 4  ;;  %v607_v62 = vor.u32 %v605_v12, %v604_v22  ;;  %v1208_v44 = vrot.slane %v1206_v36, 5  ;;  %v609_v48 = vrot.slane %v604_v22, 4 }
  0xa9   : >> { %v1193_v42 = vor.u32 %v1192_v35, %v1189_v34  ;;  %v800_v24 = vsel %vm12319_vm6, %v599_v38, %v799_v47  ;;  %v1203_v49 = vor.u32 %v1202_v40, %v1198_v39  ;;  %v458_v55 = vshrl.u32 %v12536_v37, 16  ;;  %v743_v29 = vld [vmem:[#allocation2 + $0x3c] sm:$0xf] }
  0xaa   : >> { %v608_v51 = vsel %vm12311_vm5, %v600_v41, %v607_v62  ;;  %801 = vst [vmem:[#allocation2 + $0x9c] sm:$0xf] %v800_v24  ;;  %v461_v56 = vshll.u32 %v12536_v37, 16  ;;  %v804_v63 = vsel %vm12325_vm7, %v609_v48, %v803_v60  ;;  %v466_v0 = vshrl.u32 %v12546_v13, 16  ;;  %1477 = vmatmul.bf16.gmra.mxu2 %v1345_v45  ;;  %1437 = vmatmul.bf16.gmra.mxu0 %v1337_v15  ;;  %v747_v41 = vld [vmem:[#allocation2 + $0x44] sm:$0x1] }
  0xab   : >> { %v1194_v57 = vrot.slane %v1193_v42, 4  ;;  %v835_v61 = vld [vmem:[#allocation2 + $0x30] sm:$0xf]  ;;  %802 = vst [vmem:[#allocation2 + $0xa0] sm:$0xf] %v608_v51  ;;  %v12565_v1 = vpack.c.bf16 %v349_v14, %v349_v14  ;;  %1710 = vmatmul.bf16.gmra.mxu3 %v11881_v31  ;;  %v1204_v54 = vrot.slane %v1203_v49, 4  ;;  %v12571_v4 = vpack.c.bf16 %v332_v46, %v332_v46 }
  0xac   : >> { %v995_v2 = vshrl.u32 %v835_v61, 16  ;;  %v998_v37 = vshll.u32 %v835_v61, 16  ;;  %805 = vst [vmem:[#allocation2 + $0xa4] sm:$0x1] %v804_v63  ;;  %1670 = vmatmul.bf16.gmra.mxu1 %v11873_v26  ;;  %v460_v6 = vrot.slane %v458_v55, 7  ;;  %v468_v58 = vrot.slane %v466_v0, 7 }
  0xad   : >> { %v1199_v5 = vsel %vm12341_vm10, %v1194_v57, %v1198_v39  ;;  %v469_v8 = vshll.u32 %v12546_v13, 16  ;;  %v1209_v45 = vsel %vm12341_vm10, %v1204_v54, %v1208_v44  ;;  %v333_v57 = vld [vmem:[#allocation3 + $0xb8] sm:$0xff]  ;;  %v611_v0 = vshrl.u32 %v12550_v25, 16 }
  0xae   : >> { %v12580_v9 = vunpack.c.l.b16 %v1199_v5  ;;  %v836_v10 = vld [vmem:[#allocation2 + $0x34] sm:$0xf]  ;;  %v997_v7 = vrot.slane %v995_v2, 4  ;;  %v1000_v11 = vrot.slane %v998_v37, 5  ;;  %v12582_v12 = vunpack.c.l.b16 %v1209_v45 }
  0xaf   : >> { %v883_v15 = vld [vmem:[#allocation2 + $0x38] sm:$0x1]  ;;  %v1004_v16 = vshll.u32 %v836_v10, 16  ;;  %v1008_v17 = vshrl.u32 %v836_v10, 16  ;;  %v463_v27 = vor.u32 %v461_v56, %v460_v6  ;;  %v464_v47 = vrot.slane %v460_v6, 4  ;;  %v11882_v2 = vld [vmem:[#allocation2 + $0x90] sm:$0xff] }
  0xb0   : >> { %v1001_v13 = vor.u32 %v1000_v11, %v997_v7  ;;  %v1014_v32 = vshll.u32 %v883_v15, 16  ;;  %v471_v18 = vor.u32 %v469_v8, %v468_v58  ;;  %v1346_v20 = vpack.c.b16 %v12582_v12, %v12580_v9  ;;  %v806_v7 = vld [vmem:[#allocation2 + $0xa8] sm:$0xf] }
  0xb1   : >> { %v1006_v21 = vrot.slane %v1004_v16, 5  ;;  %v1010_v22 = vrot.slane %v1008_v17, 4  ;;  %v853_v28 = vld [vmem:[#allocation2 + $0x9c] sm:$0xf]  ;;  %v473_v59 = vrot.slane %v468_v58, 4  ;;  %v744_v55 = vsel %vm12319_vm6, %v463_v27, %v743_v29  ;;  %v11874_v58 = vld [vmem:[#allocation2 + $0x30] sm:$0xff] }
  0xb2   : >> { %v1002_v30 = vrot.slane %v1001_v13, 4  ;;  %v1016_v23 = vrot.slane %v1014_v32, 5  ;;  %v854_v60 = vld [vmem:[#allocation2 + $0xa0] sm:$0xf]  ;;  %v1211_v31 = vshrl.u32 %v853_v28, 16  ;;  %v1214_v34 = vshll.u32 %v853_v28, 16 }
  0xb3   : >> { %v1011_v35 = vor.u32 %v1010_v22, %v1006_v21  ;;  %v892_v36 = vld [vmem:[#allocation2 + $0xa4] sm:$0x1]  ;;  %v1220_v38 = vshll.u32 %v854_v60, 16  ;;  %v1224_v39 = vshrl.u32 %v854_v60, 16  ;;  %v472_v40 = vsel %vm12311_vm5, %v464_v47, %v471_v18  ;;  %745 = vst [vmem:[#allocation2 + $0x3c] sm:$0xf] %v744_v55 }
  0xb4   : >> { %v1007_v62 = vsel %vm12341_vm10, %v1002_v30, %v1006_v21  ;;  %v1213_v14 = vrot.slane %v1211_v31, 4  ;;  %v1216_v26 = vrot.slane %v1214_v34, 5  ;;  %v1230_v42 = vshll.u32 %v892_v36, 16  ;;  %746 = vst [vmem:[#allocation2 + $0x40] sm:$0xf] %v472_v40  ;;  %v11904_v18 = vld [vmem:[%s12308_s22 + $0x88] sm:$0xff] }
  0xb5   : >> { %v1012_v44 = vrot.slane %v1011_v35, 4  ;;  %v1310_v48 = vunpack.c.l.b16 %v1007_v62  ;;  %v1222_v24 = vrot.slane %v1220_v38, 5  ;;  %v1226_v46 = vrot.slane %v1224_v39, 4  ;;  %v810_v16 = vld [vmem:[#allocation2 + $0xb0] sm:$0x1]  ;;  %v11928_v29 = vld [vmem:[%s12308_s22 + $0xc8] sm:$0xff]  ;;  %2037 = vmatpush.bf16.msrb.mxu2 %v11904_v18 }
  0xb6   : >> { %v1217_v49 = vor.u32 %v1216_v26, %v1213_v14  ;;  %v1232_v51 = vrot.slane %v1230_v42, 5  ;;  %v748_v56 = vsel %vm12325_vm7, %v473_v59, %v747_v41  ;;  %v614_v54 = vshll.u32 %v12550_v25, 16  ;;  %v750_v21 = vld [vmem:[#allocation2 + $0x48] sm:$0xf]  ;;  %v11950_v30 = vld [vmem:[%s12308_s22 + $0x178] sm:$0xff]  ;;  %2354 = vmatpush.bf16.msrb.mxu3 %v11928_v29 }
  0xb7   : >> { %v1017_v61 = vsel %vm12341_vm10, %v1012_v44, %v1016_v23  ;;  %v1227_v63 = vor.u32 %v1226_v46, %v1222_v24  ;;  %749 = vst [vmem:[#allocation2 + $0x44] sm:$0x1] %v748_v56  ;;  %v619_v5 = vshrl.u32 %v12565_v1, 16  ;;  %v622_v6 = vshll.u32 %v12565_v1, 16  ;;  %v350_v36 = vld [vmem:[#allocation3 + $0xa0] sm:$0xff]  ;;  %3462 = vmatpush.bf16.msrb.mxu1 %v11950_v30 }
  0xb8   : >> { %v1311_v37 = vunpack.c.l.b16 %v1017_v61  ;;  %v1218_v3 = vrot.slane %v1217_v49, 4  ;;  %v613_v53 = vrot.slane %v611_v0, 7  ;;  %v12600_v33 = vpack.c.bf16 %v333_v57, %v333_v57  ;;  %v754_v14 = vld [vmem:[#allocation2 + $0x50] sm:$0x1]  ;;  %v334_v0 = vld [vmem:[#allocation3 + $0x60] sm:$0xff] }
  0xb9   : >> { %v1228_v8 = vrot.slane %v1227_v63, 4  ;;  %v475_v45 = vshrl.u32 %v12571_v4, 16  ;;  %v621_v10 = vrot.slane %v619_v5, 7  ;;  %v478_v17 = vshll.u32 %v12571_v4, 16  ;;  %v335_v5 = vld [vmem:[#allocation3 + $0xf0] sm:$0xff] }
  0xba   : >> { %v1338_v9 = vpack.c.b16 %v1311_v37, %v1310_v48  ;;  %v1223_v25 = vsel %vm12341_vm10, %v1218_v3, %v1222_v24  ;;  %v616_v15 = vor.u32 %v614_v54, %v613_v53  ;;  %v617_v1 = vrot.slane %v613_v53, 4  ;;  %1482 = vmatmul.bf16.gmra.mxu2 %v1346_v20  ;;  %v11936_v20 = vld [vmem:[%s12308_s22 + $0x108] sm:$0xff]  ;;  %v837_v60 = vld [vmem:[#allocation2 + $0x3c] sm:$0xf]  ;;  %v351_v24 = vld [vmem:[#allocation3 + $0xf8] sm:$0xff] }
  0xbb   : >> { %v1233_v11 = vsel %vm12341_vm10, %v1228_v8, %v1232_v51  ;;  %v838_v12 = vld [vmem:[#allocation2 + $0x40] sm:$0xf]  ;;  %1715 = vmatmul.bf16.gmra.mxu3 %v11882_v2  ;;  %v12608_v27 = vunpack.c.l.b16 %v1223_v25  ;;  %v624_v47 = vor.u32 %v622_v6, %v621_v10  ;;  %v626_v22 = vrot.slane %v621_v10, 4  ;;  %3039 = vmatpush.bf16.msrb.mxu0 %v11936_v20 }
  0xbc   : >> { %v1028_v13 = vshll.u32 %v838_v12, 16  ;;  %v1032_v32 = vshrl.u32 %v838_v12, 16  ;;  %1442 = vmatmul.bf16.gmra.mxu0 %v1338_v9  ;;  %1675 = vmatmul.bf16.gmra.mxu1 %v11874_v58  ;;  %v807_v28 = vsel %vm12319_vm6, %v616_v15, %v806_v7  ;;  %v477_v59 = vrot.slane %v475_v45, 7 }
  0xbd   : >> { %v483_v4 = vshrl.u32 %v12600_v33, 16  ;;  %v12617_v23 = vunpack.c.l.b16 %v1233_v11  ;;  %v625_v35 = vsel %vm12311_vm5, %v617_v1, %v624_v47  ;;  %v1019_v39 = vshrl.u32 %v837_v60, 16  ;;  %808 = vst [vmem:[#allocation2 + $0xa8] sm:$0xf] %v807_v28  ;;  %v11883_v47 = vld [vmem:[#allocation2 + $0x9c] sm:$0xff] }
  0xbe   : >> { %v1030_v31 = vrot.slane %v1028_v13, 5  ;;  %v1034_v34 = vrot.slane %v1032_v32, 4  ;;  %v884_v38 = vld [vmem:[#allocation2 + $0x44] sm:$0x1]  ;;  %v1022_v40 = vshll.u32 %v837_v60, 16  ;;  %v811_v41 = vsel %vm12325_vm7, %v626_v22, %v810_v16 }
  0xbf   : >> { %v480_v62 = vor.u32 %v478_v17, %v477_v59  ;;  %v1038_v42 = vshll.u32 %v884_v38, 16  ;;  %809 = vst [vmem:[#allocation2 + $0xac] sm:$0xf] %v625_v35  ;;  %v481_v44 = vrot.slane %v477_v59, 4  ;;  %v485_v48 = vrot.slane %v483_v4, 7 }
  0xc0   : >> { %v1035_v26 = vor.u32 %v1034_v34, %v1030_v31  ;;  %v1021_v46 = vrot.slane %v1019_v39, 4  ;;  %v1024_v49 = vrot.slane %v1022_v40, 5  ;;  %812 = vst [vmem:[#allocation2 + $0xb0] sm:$0x1] %v811_v41  ;;  %v486_v51 = vshll.u32 %v12600_v33, 16 }
  0xc1   : >> { %v751_v55 = vsel %vm12319_vm6, %v480_v62, %v750_v21  ;;  %v1040_v57 = vrot.slane %v1038_v42, 5  ;;  %v490_v61 = vrot.slane %v485_v48, 4  ;;  %v382_v63 = vpack.c.bf16 %v350_v36, %v350_v36  ;;  %v813_v32 = vld [vmem:[#allocation2 + $0xb4] sm:$0xf]  ;;  %v11875_v21 = vld [vmem:[#allocation2 + $0x3c] sm:$0xff] }
  0xc2   : >> { %v1036_v56 = vrot.slane %v1035_v26, 4  ;;  %752 = vst [vmem:[#allocation2 + $0x48] sm:$0xf] %v751_v55  ;;  %v1347_v54 = vpack.c.b16 %v12617_v23, %v12608_v27  ;;  %v1025_v2 = vor.u32 %v1024_v49, %v1021_v46  ;;  %v488_v37 = vor.u32 %v486_v51, %v485_v48  ;;  %v817_v62 = vld [vmem:[#allocation2 + $0xbc] sm:$0x1]  ;;  %v11903_v46 = vld [vmem:[%s12308_s22 + $0x80] sm:$0xff] }
  0xc3   : >> { %v383_v3 = vpack.c.bf16 %v351_v24, %v351_v24  ;;  %v755_v58 = vsel %vm12325_vm7, %v490_v61, %v754_v14  ;;  %v628_v8 = vshrl.u32 %v382_v63, 16  ;;  %v631_v53 = vshll.u32 %v382_v63, 16  ;;  %v11949_v14 = vld [vmem:[%s12308_s22 + $0x170] sm:$0xff]  ;;  %2038 = vmatpush.bf16.msrb.mxu2 %v11903_v46 }
  0xc4   : >> { %v1041_v6 = vsel %vm12341_vm10, %v1036_v56, %v1040_v57  ;;  %v1026_v33 = vrot.slane %v1025_v2, 4  ;;  %v489_v45 = vsel %vm12311_vm5, %v481_v44, %v488_v37  ;;  %756 = vst [vmem:[#allocation2 + $0x50] sm:$0x1] %v755_v58  ;;  %v12634_v25 = vpack.c.bf16 %v334_v0, %v334_v0  ;;  %v855_v7 = vld [vmem:[#allocation2 + $0xa8] sm:$0xf]  ;;  %3463 = vmatpush.bf16.msrb.mxu1 %v11949_v14  ;;  %v11927_v2 = vld [vmem:[%s12308_s22 + $0xc0] sm:$0xff] }
  0xc5   : >> { %v636_v9 = vshrl.u32 %v383_v3, 16  ;;  %v1313_v10 = vunpack.c.l.b16 %v1041_v6  ;;  %753 = vst [vmem:[#allocation2 + $0x4c] sm:$0xf] %v489_v45  ;;  %v630_v11 = vrot.slane %v628_v8, 7  ;;  %v639_v12 = vshll.u32 %v383_v3, 16  ;;  %v11948_v6 = vld [vmem:[%s12308_s22 + $0x168] sm:$0xff]  ;;  %2355 = vmatpush.bf16.msrb.mxu3 %v11927_v2 }
  0xc6   : >> { %v12636_v15 = vpack.c.bf16 %v335_v5, %v335_v5  ;;  %v1031_v1 = vsel %vm12341_vm10, %v1026_v33, %v1030_v31  ;;  %v856_v16 = vld [vmem:[#allocation2 + $0xac] sm:$0xf]  ;;  %v1235_v17 = vshrl.u32 %v855_v7, 16  ;;  %v1238_v27 = vshll.u32 %v855_v7, 16  ;;  %v11935_v45 = vld [vmem:[%s12308_s22 + $0x100] sm:$0xff] }
  0xc7   : >> { %v638_v13 = vrot.slane %v636_v9, 7  ;;  %v1312_v18 = vunpack.c.l.b16 %v1031_v1  ;;  %v893_v22 = vld [vmem:[#allocation2 + $0xb0] sm:$0x1]  ;;  %v1244_v28 = vshll.u32 %v856_v16, 16  ;;  %v1248_v59 = vshrl.u32 %v856_v16, 16  ;;  %3040 = vmatpush.bf16.msrb.mxu0 %v11935_v45 }
  0xc8   : >> { %v633_v4 = vor.u32 %v631_v53, %v630_v11  ;;  %v1237_v29 = vrot.slane %v1235_v17, 4  ;;  %v1240_v20 = vrot.slane %v1238_v27, 5  ;;  %v1254_v30 = vshll.u32 %v893_v22, 16  ;;  %v757_v27 = vld [vmem:[#allocation2 + $0x54] sm:$0xf]  ;;  %3464 = vmatpush.bf16.msrb.mxu1 %v11948_v6  ;;  %v11944_v6 = vld [vmem:[%s12308_s22 + $0x148] sm:$0xff] }
  0xc9   : >> { %v839_v23 = vld [vmem:[#allocation2 + $0x48] sm:$0xf]  ;;  %v634_v60 = vrot.slane %v630_v11, 4  ;;  %v1339_v34 = vpack.c.b16 %v1313_v10, %v1312_v18  ;;  %v1246_v31 = vrot.slane %v1244_v28, 5  ;;  %v1250_v35 = vrot.slane %v1248_v59, 4 }
  0xca   : >> { %v1043_v36 = vshrl.u32 %v839_v23, 16  ;;  %v1241_v38 = vor.u32 %v1240_v20, %v1237_v29  ;;  %v1256_v39 = vrot.slane %v1254_v30, 5  ;;  %v1046_v40 = vshll.u32 %v839_v23, 16  ;;  %1487 = vmatmul.bf16.gmra.mxu2 %v1347_v54  ;;  %v761_v29 = vld [vmem:[#allocation2 + $0x5c] sm:$0x1] }
  0xcb   : >> { %v641_v41 = vor.u32 %v639_v12, %v638_v13  ;;  %1720 = vmatmul.bf16.gmra.mxu3 %v11883_v47  ;;  %v1251_v26 = vor.u32 %v1250_v35, %v1246_v31  ;;  %v885_v42 = vld [vmem:[#allocation2 + $0x50] sm:$0x1]  ;;  %v643_v48 = vrot.slane %v638_v13, 4  ;;  %v814_v24 = vsel %vm12319_vm6, %v633_v4, %v813_v32  ;;  %v11947_v13 = vld [vmem:[%s12308_s22 + $0x160] sm:$0xff] }
  0xcc   : >> { %v1045_v44 = vrot.slane %v1043_v36, 4  ;;  %1447 = vmatmul.bf16.gmra.mxu0 %v1339_v34  ;;  %1680 = vmatmul.bf16.gmra.mxu1 %v11875_v21  ;;  %v1242_v49 = vrot.slane %v1241_v38, 4  ;;  %v12644_v51 = vld [vmem:[#allocation2 + $0x4c] sm:$0xf]  ;;  %v1048_v55 = vrot.slane %v1046_v40, 5  ;;  %v1062_v56 = vshll.u32 %v885_v42, 16 }
  0xcd   : >> { %v642_v57 = vsel %vm12311_vm5, %v634_v60, %v641_v41  ;;  %v1252_v61 = vrot.slane %v1251_v26, 4  ;;  %v1052_v63 = vshll.u32 %v12644_v51, 16  ;;  %v1056_v0 = vshrl.u32 %v12644_v51, 16  ;;  %815 = vst [vmem:[#allocation2 + $0xb4] sm:$0xf] %v814_v24  ;;  %3465 = vmatpush.bf16.msrb.mxu1 %v11947_v13  ;;  %v11946_v34 = vld [vmem:[%s12308_s22 + $0x158] sm:$0xff] }
  0xce   : >> { %v818_v54 = vsel %vm12325_vm7, %v643_v48, %v817_v62  ;;  %v1247_v37 = vsel %vm12341_vm10, %v1242_v49, %v1246_v31  ;;  %v1049_v3 = vor.u32 %v1048_v55, %v1045_v44  ;;  %816 = vst [vmem:[#allocation2 + $0xb8] sm:$0xf] %v642_v57  ;;  %v492_v5 = vshrl.u32 %v12634_v25, 16  ;;  %v11884_v40 = vld [vmem:[#allocation2 + $0xa8] sm:$0xff]  ;;  %v11974_v57 = vld [vmem:[%s12308_s22 + $0x1b8] sm:$0xff] }
  0xcf   : >> { %v1257_v58 = vsel %vm12341_vm10, %v1252_v61, %v1256_v39  ;;  %v1330_v8 = vunpack.c.l.b16 %v1247_v37  ;;  %v1054_v53 = vrot.slane %v1052_v63, 5  ;;  %v1058_v33 = vrot.slane %v1056_v0, 4  ;;  %819 = vst [vmem:[#allocation2 + $0xbc] sm:$0x1] %v818_v54  ;;  %v11876_v44 = vld [vmem:[#allocation2 + $0x48] sm:$0xff]  ;;  %3780 = vmatpush.bf16.msra.mxu2 %v11974_v57  ;;  %v11982_v37 = vld [vmem:[%s12308_s22 + $0x1f8] sm:$0xff] }
  0xd0   : >> { %v1331_v9 = vunpack.c.l.b16 %v1257_v58  ;;  %v1050_v10 = vrot.slane %v1049_v3, 4  ;;  %v494_v7 = vrot.slane %v492_v5, 7  ;;  %v495_v11 = vshll.u32 %v12634_v25, 16  ;;  %v2469_v61 = vld [vmem:[#allocation2 + $0xc] sm:$0xf]  ;;  %4465 = vmatpush.bf16.msra.mxu3 %v11982_v37 }
  0xd1   : >> { %v1059_v12 = vor.u32 %v1058_v33, %v1054_v53  ;;  %v1064_v1 = vrot.slane %v1062_v56, 5  ;;  %v500_v16 = vshrl.u32 %v12636_v15, 16  ;;  %v503_v17 = vshll.u32 %v12636_v15, 16  ;;  %3466 = vmatpush.bf16.msrb.mxu1 %v11946_v34  ;;  %v11945_v56 = vld [vmem:[%s12308_s22 + $0x150] sm:$0xff] }
  0xd2   : >> { %v1055_v32 = vsel %vm12341_vm10, %v1050_v10, %v1054_v53  ;;  %v497_v47 = vor.u32 %v495_v11, %v494_v7  ;;  %v498_v21 = vrot.slane %v494_v7, 4  ;;  %v1348_v28 = vpack.c.b16 %v1331_v9, %v1330_v8  ;;  %v12677_v2 = vld [vmem:[#allocation2 + $0x10] sm:$0xf] }
  0xd3   : >> { %v1060_v18 = vrot.slane %v1059_v12, 4  ;;  %v502_v22 = vrot.slane %v500_v16, 7  ;;  %v1314_v25 = vunpack.c.l.b16 %v1055_v32  ;;  %v2518_v5 = vshrl.u32 %v2469_v61, 16 }
  0xd4   : >> { %v857_v59 = vld [vmem:[#allocation2 + $0xb4] sm:$0xf]  ;;  %v758_v4 = vsel %vm12319_vm6, %v497_v47, %v757_v27  ;;  %v2521_v33 = vshll.u32 %v2469_v61, 16  ;;  %v2527_v45 = vshll.u32 %v12677_v2, 16  ;;  %v2531_v27 = vshrl.u32 %v12677_v2, 16  ;;  %v11943_v47 = vld [vmem:[%s12308_s22 + $0x140] sm:$0xff] }
  0xd5   : >> { %v1065_v15 = vsel %vm12341_vm10, %v1060_v18, %v1064_v1  ;;  %v858_v20 = vld [vmem:[#allocation2 + $0xb8] sm:$0xf]  ;;  %v1259_v30 = vshrl.u32 %v857_v59, 16  ;;  %v1262_v23 = vshll.u32 %v857_v59, 16  ;;  %v505_v60 = vor.u32 %v503_v17, %v502_v22  ;;  %759 = vst [vmem:[#allocation2 + $0x54] sm:$0xf] %v758_v4  ;;  %3467 = vmatpush.bf16.msrb.mxu1 %v11945_v56 }
  0xd6   : >> { %v1315_v31 = vunpack.c.l.b16 %v1065_v15  ;;  %v894_v35 = vld [vmem:[#allocation2 + $0xbc] sm:$0x1]  ;;  %v1268_v36 = vshll.u32 %v858_v20, 16  ;;  %v1272_v38 = vshrl.u32 %v858_v20, 16  ;;  %v507_v39 = vrot.slane %v502_v22, 4 }
  0xd7   : >> { %v1261_v41 = vrot.slane %v1259_v30, 4  ;;  %v1264_v62 = vrot.slane %v1262_v23, 5  ;;  %v1278_v14 = vshll.u32 %v894_v35, 16  ;;  %v506_v26 = vsel %vm12311_vm5, %v498_v21, %v505_v60  ;;  %v11990_v18 = vld [vmem:[%s12308_s22 + $0x238] sm:$0xff]  ;;  %v2471_v20 = vld [vmem:[#allocation2 + $0x14] sm:$0x1] }
  0xd8   : >> { %v1340_v42 = vpack.c.b16 %v1315_v31, %v1314_v25  ;;  %v1270_v48 = vrot.slane %v1268_v36, 5  ;;  %v1274_v24 = vrot.slane %v1272_v38, 4  ;;  %760 = vst [vmem:[#allocation2 + $0x58] sm:$0xf] %v506_v26  ;;  %v762_v46 = vsel %vm12325_vm7, %v507_v39, %v761_v29  ;;  %4894 = vmatpush.bf16.msra.mxu0 %v11990_v18  ;;  %v11885_v31 = vld [vmem:[#allocation2 + $0xb4] sm:$0xff] }
  0xd9   : >> { %v1265_v49 = vor.u32 %v1264_v62, %v1261_v41  ;;  %763 = vst [vmem:[#allocation2 + $0x5c] sm:$0x1] %v762_v46  ;;  %v1280_v54 = vrot.slane %v1278_v14, 5  ;;  %3468 = vmatpush.bf16.msrb.mxu1 %v11944_v6  ;;  %v2520_v4 = vrot.slane %v2518_v5, 4  ;;  %v2523_v29 = vrot.slane %v2521_v33, 5 }
  0xda   : >> { %v1275_v55 = vor.u32 %v1274_v24, %v1270_v48  ;;  %1492 = vmatmul.bf16.gmra.mxu2 %v1348_v28  ;;  %v2529_v30 = vrot.slane %v2527_v45, 5  ;;  %v2533_v23 = vrot.slane %v2531_v27, 4  ;;  %v12151_v36 = vld [vmem:[#allocation2 + $0x4] sm:$0xf]  ;;  %v1736_v62 = vld [vmem:[#allocation2] sm:$0xe] }
  0xdb   : >> { %1725 = vmatmul.bf16.gmra.mxu3 %v11884_v40  ;;  %v1266_v63 = vrot.slane %v1265_v49, 4  ;;  %v1789_v38 = vrot.slane %v12151_v36, 5  ;;  %v2524_v14 = vor.u32 %v2523_v29, %v2520_v4  ;;  %v2537_v26 = vshll.u32 %v2471_v20, 16  ;;  %v3154_v24 = vld [vmem:[#allocation2 + $0xc] sm:$0xe] }
  0xdc   : >> { %1452 = vmatmul.bf16.gmra.mxu0 %v1340_v42  ;;  %1685 = vmatmul.bf16.gmra.mxu1 %v11876_v44  ;;  %v1276_v0 = vrot.slane %v1275_v55, 4  ;;  %v841_v3 = vld [vmem:[#allocation2 + $0x54] sm:$0xf]  ;;  %v2534_v44 = vor.u32 %v2533_v23, %v2529_v30  ;;  %vm1784_vm11 = vcmask 1042432   ;;  %vm1785_vm12 = vcmask 1046532   ;;  %v11911_v4 = vld [vmem:[#allocation2 + $0xc] sm:$0xff] }
  0xdd   : >> { %v1067_v8 = vshrl.u32 %v841_v3, 16  ;;  %v1070_v53 = vshll.u32 %v841_v3, 16  ;;  %v1271_v9 = vsel %vm12341_vm10, %v1266_v63, %v1270_v48  ;;  %3469 = vmatpush.bf16.msrb.mxu1 %v11943_v47  ;;  %v3220_v48 = vrot.slane %v12677_v2, 5  ;;  %v12152_v56 = vld [vmem:[#allocation2 + $0x8] sm:$0x1]  ;;  %vm12701_vm13 = vmor %vm1784_vm11, %vm1785_vm12 }
  0xde   : >> { %v1281_v10 = vsel %vm12341_vm10, %v1276_v0, %v1280_v54  ;;  %v1332_v21 = vunpack.c.l.b16 %v1271_v9  ;;  %v10649_v49 = vrot.slane %v1736_v62, 9  ;;  %v1791_v55 = vrot.slane %v1789_v38, 4  ;;  %v2472_v5 = vld [vmem:[#allocation2 + $0x18] sm:$0xf]  ;;  %v12705_v6 = vld [vmem:[#allocation2 + $0x1c] sm:$0xf] }
  0xdf   : >> { %v12681_v58 = vld [vmem:[#allocation2 + $0x58] sm:$0xf]  ;;  %v1069_v1 = vrot.slane %v1067_v8, 4  ;;  %v1072_v16 = vrot.slane %v1070_v53, 5  ;;  %v1333_v22 = vunpack.c.l.b16 %v1281_v10  ;;  %v1792_v57 = vrot.slane %v12152_v56, 5  ;;  %v11973_v62 = vld [vmem:[%s12308_s22 + $0x1b0] sm:$0xff] }
  0xe0   : >> { %v12688_v7 = vld [vmem:[#allocation2 + $0x5c] sm:$0x1]  ;;  %v1076_v11 = vshll.u32 %v12681_v58, 16  ;;  %v1080_v12 = vshrl.u32 %v12681_v58, 16  ;;  %v11877_v41 = vld [vmem:[#allocation2 + $0x54] sm:$0xff]  ;;  %v2525_v61 = vrot.slane %v2524_v14, 4  ;;  %v1790_v8 = vsel %vm12701_vm13, %v10649_v49, %v1789_v38  ;;  %3781 = vmatpush.bf16.msra.mxu2 %v11973_v62 }
  0xe1   : >> { %v1086_v17 = vshll.u32 %v12688_v7, 16  ;;  %v1073_v28 = vor.u32 %v1072_v16, %v1069_v1  ;;  %v1349_v34 = vpack.c.b16 %v1333_v22, %v1332_v21  ;;  %v2539_v63 = vrot.slane %v2537_v26, 5  ;;  %v2474_v29 = vld [vmem:[#allocation2 + $0x20] sm:$0x1]  ;;  %v2475_v49 = vld [vmem:[#allocation2 + $0x24] sm:$0xf] }
  0xe2   : >> { %v1078_v13 = vrot.slane %v1076_v11, 5  ;;  %v1082_v32 = vrot.slane %v1080_v12, 4  ;;  %v15721_v0 = vmov 0  ;;  %v2535_v54 = vrot.slane %v2534_v44, 4 }
  0xe3   : >> { %v1088_v59 = vrot.slane %v1086_v17, 5  ;;  %v1074_v15 = vrot.slane %v1073_v28, 4  ;;  %v15722_v0 = vsel %vm12701_vm13, 4294967295, %v15721_v0  ;;  %v10876_v2 = vrot.slane %v3154_v24, 9 }
  0xe4   : >> { %v1083_v25 = vor.u32 %v1082_v32, %v1078_v13  ;;  %15723 = vst [vmem:[#allocation9_spill] sm:$0xff] %v15722_v0  ;;  %v3222_v37 = vrot.slane %v3220_v48, 4  ;;  %v3223_v3 = vrot.slane %v2471_v20, 5  ;;  %v1793_v53 = vsel %vm12701_vm13, %v1791_v55, %v1792_v57  ;;  %v12153_v20 = vld [vmem:[#allocation2 + $0x10] sm:$0xf] }
  0xe5   : >> { %v1079_v35 = vsel %vm12341_vm10, %v1074_v15, %v1078_v13  ;;  %v2530_v33 = vsel %vm12341_vm10, %v2525_v61, %v2529_v30  ;;  %v2540_v45 = vsel %vm12341_vm10, %v2535_v54, %v2539_v63  ;;  %v3221_v9 = vsel %vm12701_vm13, %v10876_v2, %v3220_v48  ;;  %v11981_v55 = vld [vmem:[%s12308_s22 + $0x1f0] sm:$0xff]  ;;  %v12726_v2 = vld [vmem:[#allocation2 + $0x28] sm:$0xf] }
  0xe6   : >> { %v1084_v60 = vrot.slane %v1083_v25, 4  ;;  %v1316_v40 = vunpack.c.l.b16 %v1079_v35  ;;  %v3224_v10 = vsel %vm12701_vm13, %v3222_v37, %v3223_v3  ;;  %v2542_v11 = vshrl.u32 %v2472_v5, 16  ;;  %4466 = vmatpush.bf16.msra.mxu3 %v11981_v55 }
  0xe7   : >> { %v2545_v12 = vshll.u32 %v2472_v5, 16  ;;  %v2551_v1 = vshll.u32 %v12705_v6, 16  ;;  %v2555_v16 = vshrl.u32 %v12705_v6, 16  ;;  %v1919_v17 = vunpack.c.l.b16 %v1790_v8 }
  0xe8   : >> { %v1089_v39 = vsel %vm12341_vm10, %v1084_v60, %v1088_v59  ;;  %v1920_v27 = vunpack.c.l.b16 %v1793_v53  ;;  %v3350_v13 = vunpack.c.l.b16 %v3221_v9  ;;  %v3351_v32 = vunpack.c.l.b16 %v3224_v10 }
  0xe9   : >> { %v1317_v42 = vunpack.c.l.b16 %v1089_v39  ;;  %v2921_v47 = vunpack.c.l.b16 %v2530_v33  ;;  %v2922_v18 = vunpack.c.l.b16 %v2540_v45  ;;  %v2544_v21 = vrot.slane %v2542_v11, 4 }
  0xea   : >> { %1497 = vmatmul.bf16.gmra.mxu2 %v1349_v34  ;;  %v2547_v22 = vrot.slane %v2545_v12, 5  ;;  %v2553_v28 = vrot.slane %v2551_v1, 5  ;;  %v2557_v25 = vrot.slane %v2555_v16, 4  ;;  %v1951_v59 = vpack.c.b16 %v1920_v27, %v1919_v17  ;;  %v11989_v17 = vld [vmem:[%s12308_s22 + $0x230] sm:$0xff] }
  0xeb   : >> { %1730 = vmatmul.bf16.gmra.mxu3 %v11885_v31  ;;  %v1341_v46 = vpack.c.b16 %v1317_v42, %v1316_v40  ;;  %v3382_v15 = vpack.c.b16 %v3351_v32, %v3350_v13  ;;  %v1796_v30 = vrot.slane %v12153_v20, 5  ;;  %v2953_v34 = vpack.c.b16 %v2922_v18, %v2921_v47  ;;  %v1737_v31 = vld [vmem:[#allocation2 + $0xc] sm:$0xe]  ;;  %v12154_v42 = vld [vmem:[#allocation2 + $0x14] sm:$0x1]  ;;  %4895 = vmatpush.bf16.msra.mxu0 %v11989_v17 }
  0xec   : >> { %1690 = vmatmul.bf16.gmra.mxu1 %v11877_v41  ;;  %v3227_v35 = vrot.slane %v12705_v6, 5  ;;  %v2548_v38 = vor.u32 %v2547_v22, %v2544_v21  ;;  %v2558_v39 = vor.u32 %v2557_v25, %v2553_v28  ;;  %v2561_v40 = vshll.u32 %v2474_v29, 16  ;;  %v3155_v41 = vld [vmem:[#allocation2 + $0x18] sm:$0xe] }
  0xed   : >> { %1457 = vmatmul.bf16.gmra.mxu0 %v1341_v46  ;;  %v10650_v14 = vrot.slane %v1737_v31, 9  ;;  %v1798_v26 = vrot.slane %v1796_v30, 4  ;;  %v1799_v44 = vrot.slane %v12154_v42, 5  ;;  %v10877_v48 = vrot.slane %v3155_v41, 9  ;;  %v12155_v31 = vld [vmem:[#allocation2 + $0x1c] sm:$0xf] }
  0xee   : >> { %v3229_v24 = vrot.slane %v3227_v35, 4  ;;  %v3230_v46 = vrot.slane %v2474_v29, 5  ;;  %v2549_v61 = vrot.slane %v2548_v38, 4  ;;  %v2559_v63 = vrot.slane %v2558_v39, 4 }
  0xef   : >> { %v2563_v54 = vrot.slane %v2561_v40, 5  ;;  %v1797_v3 = vsel %vm12701_vm13, %v10650_v14, %v1796_v30  ;;  %v1800_v5 = vsel %vm12701_vm13, %v1798_v26, %v1799_v44  ;;  %v2566_v6 = vshrl.u32 %v2475_v49, 16  ;;  %v3156_v44 = vld [vmem:[#allocation2 + $0x24] sm:$0xe] }
  0xf0   : >> { %v2569_v8 = vshll.u32 %v2475_v49, 16  ;;  %v3228_v45 = vsel %vm12701_vm13, %v10877_v48, %v3227_v35  ;;  %v3231_v9 = vsel %vm12701_vm13, %v3229_v24, %v3230_v46  ;;  %v2575_v10 = vshll.u32 %v12726_v2, 16  ;;  %v12156_v46 = vld [vmem:[#allocation2 + $0x20] sm:$0x1] }
  0xf1   : >> { %v2579_v11 = vshrl.u32 %v12726_v2, 16  ;;  %v2554_v1 = vsel %vm12341_vm10, %v2549_v61, %v2553_v28  ;;  %v2564_v16 = vsel %vm12341_vm10, %v2559_v63, %v2563_v54  ;;  %v1921_v27 = vunpack.c.l.b16 %v1797_v3 }
  0xf2   : >> { %v1922_v13 = vunpack.c.l.b16 %v1800_v5  ;;  %v3352_v32 = vunpack.c.l.b16 %v3228_v45  ;;  %v3353_v47 = vunpack.c.l.b16 %v3231_v9  ;;  %v2568_v18 = vrot.slane %v2566_v6, 4 }
  0xf3   : >> { %v2571_v21 = vrot.slane %v2569_v8, 5  ;;  %v2923_v22 = vunpack.c.l.b16 %v2554_v1  ;;  %v2924_v25 = vunpack.c.l.b16 %v2564_v16  ;;  %v2581_v29 = vrot.slane %v2579_v11, 4  ;;  %v12754_v8 = vld [vmem:[#allocation2 + $0x34] sm:$0xf] }
  0xf4   : >> { %v1952_v28 = vpack.c.b16 %v1922_v13, %v1921_v27  ;;  %v1803_v35 = vrot.slane %v12155_v31, 5  ;;  %v3234_v26 = vrot.slane %v12726_v2, 5  ;;  %v1806_v49 = vrot.slane %v12156_v46, 5  ;;  %v2478_v2 = vld [vmem:[#allocation2 + $0x30] sm:$0xf] }
  0xf5   : >> { %v2572_v38 = vor.u32 %v2571_v21, %v2568_v18  ;;  %v2954_v62 = vpack.c.b16 %v2924_v25, %v2923_v22  ;;  %v10878_v61 = vrot.slane %v3156_v44, 9  ;;  %v2590_v17 = vshrl.u32 %v2478_v2, 16  ;;  %v1739_v44 = vld [vmem:[#allocation2 + $0x24] sm:$0xe] }
  0xf6   : >> { %v1805_v24 = vrot.slane %v1803_v35, 4  ;;  %v3236_v63 = vrot.slane %v3234_v26, 4  ;;  %v2593_v13 = vshll.u32 %v2478_v2, 16 }
  0xf7   : >> { %v1423_v23 = vpop.f32.mrf.mxu0  ;;  %v2573_v55 = vrot.slane %v2572_v38, 4  ;;  %v3235_v1 = vsel %vm12701_vm13, %v10878_v61, %v3234_v26  ;;  %v2480_v38 = vld [vmem:[#allocation2 + $0x38] sm:$0x1]  ;;  %v10652_v61 = vrot.slane %v1739_v44, 9 }
  0xf8   : >> { %v3354_v22 = vunpack.c.l.b16 %v3235_v1 }
  0xf9   : >> { %v1656_v60 = vpop.f32.mrf.mxu1 }
  0xfa   : >> { %v12722_v36 = vadd.f32 %v1656_v60, %v1423_v23  ;;  %2039 = vmatmul.bf16.vlgmr.msrb.gmra.mxu2 %v1951_v59  ;;  %v2477_v59 = vld [vmem:[#allocation2 + $0x2c] sm:$0x1]  ;;  %v11912_v23 = vld [vmem:[#allocation2 + $0x18] sm:$0xff]  ;;  %v3383_v60 = vpack.c.b16 %v3353_v47, %v3352_v32  ;;  %v2599_v32 = vshll.u32 %v12754_v8, 16  ;;  %v2603_v47 = vshrl.u32 %v12754_v8, 16 }
  0xfb   : >> { %2356 = vmatmul.bf16.vlgmr.msrb.gmra.mxu3 %v11911_v4  ;;  %v2577_v4 = vrot.slane %v2575_v10, 5  ;;  %v2585_v39 = vshll.u32 %v2477_v59, 16  ;;  %v3237_v54 = vrot.slane %v2477_v59, 5 }
  0xfc   : >> { %3470 = vmatmul.bf16.vlgmr.msrb.gmra.mxu1 %v3382_v15 }
  0xfd   : >> { %3041 = vmatmul.bf16.vlgmr.msrb.gmra.mxu0 %v2953_v34  ;;  %v1463_v56 = vpop.f32.mrf.mxu2  ;;  %v1738_v34 = vld [vmem:[#allocation2 + $0x18] sm:$0xe]  ;;  %v2582_v14 = vor.u32 %v2581_v29, %v2577_v4  ;;  %v2578_v45 = vsel %vm12341_vm10, %v2573_v55, %v2577_v4  ;;  %v3238_v16 = vsel %vm12701_vm13, %v3236_v63, %v3237_v54  ;;  %v2609_v55 = vshll.u32 %v2480_v38, 16  ;;  %v12158_v54 = vld [vmem:[#allocation2 + $0x2c] sm:$0x1] }
  0xfe   : >> { %v1696_v57 = vpop.f32.mrf.mxu3  ;;  %v10651_v48 = vrot.slane %v1738_v34, 9  ;;  %v3355_v25 = vunpack.c.l.b16 %v3238_v16  ;;  %v2925_v59 = vunpack.c.l.b16 %v2578_v45  ;;  %v12782_v16 = vld [vmem:[#allocation2 + $0x40] sm:$0xf] }
  0xff   : >> { %v12728_v37 = vadd.f32 %v1696_v57, %v1463_v56  ;;  %v1425_v53 = vpop.f32.mrf.mxu0  ;;  %v2587_v56 = vrot.slane %v2585_v39, 5  ;;  %v2583_v57 = vrot.slane %v2582_v14, 4  ;;  %v2611_v1 = vrot.slane %v2609_v55, 5 }
 0x100   : >> { %v3384_v39 = vpack.c.b16 %v3355_v25, %v3354_v22 }
 0x101   : >> { %v1658_v33 = vpop.f32.mrf.mxu1  ;;  %v2588_v11 = vsel %vm12341_vm10, %v2583_v57, %v2587_v56  ;;  %v3157_v56 = vld [vmem:[#allocation2 + $0x30] sm:$0xe]  ;;  %v11972_v57 = vld [vmem:[%s12308_s22 + $0x1a8] sm:$0xff] }
 0x102   : >> { %v12740_v12 = vadd.f32 %v1658_v33, %v1425_v53  ;;  %v1804_v53 = vsel %vm12701_vm13, %v10651_v48, %v1803_v35  ;;  %v1807_v33 = vsel %vm12701_vm13, %v1805_v24, %v1806_v49  ;;  %v2926_v4 = vunpack.c.l.b16 %v2588_v11  ;;  %v11913_v35 = vld [vmem:[#allocation2 + $0x24] sm:$0xff]  ;;  %3782 = vmatpush.bf16.msra.mxu2 %v11972_v57 }
 0x103   : >> { %v1923_v18 = vunpack.c.l.b16 %v1804_v53  ;;  %v1924_v21 = vunpack.c.l.b16 %v1807_v33  ;;  %v3241_v48 = vrot.slane %v12754_v8, 5  ;;  %v3244_v8 = vrot.slane %v2480_v38, 5  ;;  %v2481_v53 = vld [vmem:[#allocation2 + $0x3c] sm:$0xf]  ;;  %v11980_v33 = vld [vmem:[%s12308_s22 + $0x1e8] sm:$0xff] }
 0x104   : >> { %v2955_v26 = vpack.c.b16 %v2926_v4, %v2925_v59  ;;  %4467 = vmatpush.bf16.msra.mxu3 %v11980_v33  ;;  %v2623_v4 = vshll.u32 %v12782_v16, 16 }
 0x105   : >> { %v1465_v15 = vpop.f32.mrf.mxu2  ;;  %v1953_v31 = vpack.c.b16 %v1924_v21, %v1923_v18  ;;  %v3243_v2 = vrot.slane %v3241_v48, 4  ;;  %v2617_v18 = vshll.u32 %v2481_v53, 16 }
 0x106   : >> { %v1698_v20 = vpop.f32.mrf.mxu3  ;;  %v2625_v44 = vrot.slane %v2623_v4, 5 }
 0x107   : >> { %v12747_v30 = vadd.f32 %v1698_v20, %v1465_v15  ;;  %v1428_v40 = vpop.f32.mrf.mxu0  ;;  %v2592_v20 = vrot.slane %v2590_v17, 4  ;;  %v3245_v59 = vsel %vm12701_vm13, %v3243_v2, %v3244_v8 }
 0x109   : >> { %v1661_v41 = vpop.f32.mrf.mxu1 }
 0x10a   : >> { %v12750_v42 = vadd.f32 %v1661_v41, %v1428_v40  ;;  %2044 = vmatmul.bf16.gmra.mxu2 %v1952_v28  ;;  %v2595_v28 = vrot.slane %v2593_v13, 5  ;;  %v12157_v40 = vld [vmem:[#allocation2 + $0x28] sm:$0xf] }
 0x10b   : >> { %2361 = vmatmul.bf16.gmra.mxu3 %v11912_v23  ;;  %v12772_v23 = vrot.slane %v2599_v32, 5  ;;  %v1810_v41 = vrot.slane %v12157_v40, 5 }
 0x10c   : >> { %3475 = vmatmul.bf16.gmra.mxu1 %v3383_v60  ;;  %v2605_v60 = vrot.slane %v2603_v47, 4  ;;  %v2596_v46 = vor.u32 %v2595_v28, %v2592_v20  ;;  %v2614_v47 = vshrl.u32 %v2481_v53, 16 }
 0x10d   : >> { %3046 = vmatmul.bf16.gmra.mxu0 %v2954_v62  ;;  %v1468_v3 = vpop.f32.mrf.mxu2  ;;  %v1812_v63 = vrot.slane %v1810_v41, 4  ;;  %v1811_v13 = vsel %vm12701_vm13, %v10652_v61, %v1810_v41  ;;  %v2619_v41 = vrot.slane %v2617_v18, 5  ;;  %v1740_v61 = vld [vmem:[#allocation2 + $0x30] sm:$0xe] }
 0x10e   : >> { %v1701_v5 = vpop.f32.mrf.mxu3  ;;  %v2606_v49 = vor.u32 %v2605_v60, %v12772_v23  ;;  %v11988_v60 = vld [vmem:[%s12308_s22 + $0x228] sm:$0xff]  ;;  %v2616_v40 = vrot.slane %v2614_v47, 4 }
 0x10f   : >> { %v12752_v6 = vadd.f32 %v1701_v5, %v1468_v3  ;;  %v1430_v9 = vpop.f32.mrf.mxu0  ;;  %v1813_v3 = vrot.slane %v12158_v54, 5  ;;  %v10879_v5 = vrot.slane %v3157_v56, 9  ;;  %4896 = vmatpush.bf16.msra.mxu0 %v11988_v60  ;;  %v11914_v56 = vld [vmem:[#allocation2 + $0x30] sm:$0xff] }
 0x110   : >> { %v2607_v11 = vrot.slane %v2606_v49, 4 }
 0x111   : >> { %v1663_v10 = vpop.f32.mrf.mxu1  ;;  %v1814_v32 = vsel %vm12701_vm13, %v1812_v63, %v1813_v3  ;;  %v3242_v25 = vsel %vm12701_vm13, %v10879_v5, %v3241_v48  ;;  %v12159_v63 = vld [vmem:[#allocation2 + $0x34] sm:$0xf]  ;;  %v2620_v3 = vor.u32 %v2619_v41, %v2616_v40 }
 0x112   : >> { %v12768_v27 = vadd.f32 %v1663_v10, %v1430_v9  ;;  %v2597_v10 = vrot.slane %v2596_v46, 4  ;;  %v2612_v28 = vsel %vm12341_vm10, %v2607_v11, %v2611_v1  ;;  %v3356_v38 = vunpack.c.l.b16 %v3242_v25 }
 0x113   : >> { %v1817_v54 = vrot.slane %v12159_v63, 5  ;;  %v10653_v11 = vrot.slane %v1740_v61, 9  ;;  %v2621_v47 = vrot.slane %v2620_v3, 4 }
 0x114   : >> { %v2602_v20 = vsel %vm12341_vm10, %v2597_v10, %v12772_v23  ;;  %v3158_v10 = vld [vmem:[#allocation2 + $0x3c] sm:$0xe] }
 0x115   : >> { %v1470_v29 = vpop.f32.mrf.mxu2  ;;  %v1819_v1 = vrot.slane %v1817_v54, 4  ;;  %v1818_v60 = vsel %vm12701_vm13, %v10653_v11, %v1817_v54  ;;  %v2486_v11 = vld [vmem:[#allocation2 + $0x50] sm:$0x1] }
 0x116   : >> { %v1703_v15 = vpop.f32.mrf.mxu3 }
 0x117   : >> { %v12774_v34 = vadd.f32 %v1703_v15, %v1470_v29  ;;  %v1433_v62 = vpop.f32.mrf.mxu0  ;;  %v2627_v29 = vshrl.u32 %v12782_v16, 16 }
 0x119   : >> { %v1666_v14 = vpop.f32.mrf.mxu1  ;;  %v2629_v48 = vrot.slane %v2627_v29, 4 }
 0x11a   : >> { %v12777_v24 = vadd.f32 %v1666_v14, %v1433_v62  ;;  %2049 = vmatmul.bf16.gmra.mxu2 %v1953_v31  ;;  %v1925_v31 = vunpack.c.l.b16 %v1811_v13  ;;  %v2927_v62 = vunpack.c.l.b16 %v2602_v20  ;;  %v2928_v14 = vunpack.c.l.b16 %v2612_v28  ;;  %v12160_v13 = vld [vmem:[#allocation2 + $0x38] sm:$0x1]  ;;  %v12811_v28 = vld [vmem:[#allocation2 + $0x4c] sm:$0xf] }
 0x11b   : >> { %2366 = vmatmul.bf16.gmra.mxu3 %v11913_v35  ;;  %v1926_v35 = vunpack.c.l.b16 %v1814_v32  ;;  %v2630_v33 = vor.u32 %v2629_v48, %v2625_v44  ;;  %v1820_v32 = vrot.slane %v12160_v13, 5  ;;  %v12161_v13 = vld [vmem:[#allocation2 + $0x40] sm:$0xf] }
 0x11c   : >> { %3480 = vmatmul.bf16.gmra.mxu1 %v3384_v39  ;;  %v3357_v39 = vunpack.c.l.b16 %v3245_v59  ;;  %v2956_v53 = vpack.c.b16 %v2928_v14, %v2927_v62 }
 0x11d   : >> { %3051 = vmatmul.bf16.gmra.mxu0 %v2955_v26  ;;  %v1473_v45 = vpop.f32.mrf.mxu2  ;;  %v2483_v26 = vld [vmem:[#allocation2 + $0x44] sm:$0x1]  ;;  %v1954_v23 = vpack.c.b16 %v1926_v35, %v1925_v31  ;;  %v1821_v31 = vsel %vm12701_vm13, %v1819_v1, %v1820_v32  ;;  %v2626_v35 = vsel %vm12341_vm10, %v2621_v47, %v2625_v44  ;;  %v1927_v44 = vunpack.c.l.b16 %v1818_v60  ;;  %v3159_v60 = vld [vmem:[#allocation2 + $0x48] sm:$0xe] }
 0x11e   : >> { %v1706_v9 = vpop.f32.mrf.mxu3  ;;  %v3385_v57 = vpack.c.b16 %v3357_v39, %v3356_v38  ;;  %v2633_v5 = vshll.u32 %v2483_v26, 16  ;;  %v3251_v59 = vrot.slane %v2483_v26, 5  ;;  %v2929_v61 = vunpack.c.l.b16 %v2626_v35 }
 0x11f   : >> { %v12784_v17 = vadd.f32 %v1706_v9, %v1473_v45  ;;  %v1435_v21 = vpop.f32.mrf.mxu0  ;;  %v3248_v45 = vrot.slane %v12782_v16, 5  ;;  %v2484_v16 = vld [vmem:[#allocation2 + $0x48] sm:$0xf]  ;;  %v1824_v32 = vrot.slane %v12161_v13, 5 }
 0x120   : >> { %v2635_v18 = vrot.slane %v2633_v5, 5  ;;  %v2638_v14 = vshrl.u32 %v2484_v16, 16  ;;  %v2641_v48 = vshll.u32 %v2484_v16, 16  ;;  %v2657_v16 = vshll.u32 %v2486_v11, 16 }
 0x121   : >> { %v1668_v22 = vpop.f32.mrf.mxu1  ;;  %v3250_v25 = vrot.slane %v3248_v45, 4 }
 0x122   : >> { %v12796_v15 = vadd.f32 %v1668_v22, %v1435_v21  ;;  %v2631_v21 = vrot.slane %v2630_v33, 4  ;;  %v10880_v22 = vrot.slane %v3158_v10, 9  ;;  %v2640_v5 = vrot.slane %v2638_v14, 4  ;;  %v11915_v10 = vld [vmem:[#allocation2 + $0x3c] sm:$0xff]  ;;  %v2487_v14 = vld [vmem:[#allocation2 + $0x54] sm:$0xf] }
 0x123   : >> { %v3252_v62 = vsel %vm12701_vm13, %v3250_v25, %v3251_v59  ;;  %v3255_v25 = vrot.slane %v12811_v28, 5 }
 0x124   : >> { %v2636_v40 = vsel %vm12341_vm10, %v2631_v21, %v2635_v18  ;;  %v3249_v41 = vsel %vm12701_vm13, %v10880_v22, %v3248_v45  ;;  %v1741_v22 = vld [vmem:[#allocation2 + $0x3c] sm:$0xe] }
 0x125   : >> { %v1475_v46 = vpop.f32.mrf.mxu2  ;;  %v2930_v63 = vunpack.c.l.b16 %v2636_v40  ;;  %v10654_v35 = vrot.slane %v1741_v22, 9 }
 0x126   : >> { %v1708_v49 = vpop.f32.mrf.mxu3 }
 0x127   : >> { %v12804_v55 = vadd.f32 %v1708_v49, %v1475_v46  ;;  %v1438_v2 = vpop.f32.mrf.mxu0  ;;  %v2647_v46 = vshll.u32 %v12811_v28, 16  ;;  %v2651_v49 = vshrl.u32 %v12811_v28, 16  ;;  %v2957_v21 = vpack.c.b16 %v2930_v63, %v2929_v61 }
 0x128   : >> { %v3258_v28 = vrot.slane %v2486_v11, 5  ;;  %v1825_v63 = vsel %vm12701_vm13, %v10654_v35, %v1824_v32  ;;  %v2489_v35 = vld [vmem:[#allocation2 + $0x5c] sm:$0x1] }
 0x129   : >> { %v1671_v8 = vpop.f32.mrf.mxu1 }
 0x12a   : >> { %v12807_v9 = vadd.f32 %v1671_v8, %v1438_v2  ;;  %2054 = vmatmul.bf16.gmra.mxu2 %v1954_v23  ;;  %v1928_v23 = vunpack.c.l.b16 %v1821_v31  ;;  %v2643_v2 = vrot.slane %v2641_v48, 5  ;;  %v12829_v8 = vrot.slane %v2647_v46, 5  ;;  %v11971_v31 = vld [vmem:[%s12308_s22 + $0x1a0] sm:$0xff] }
 0x12b   : >> { %2371 = vmatmul.bf16.gmra.mxu3 %v11914_v56  ;;  %v3358_v56 = vunpack.c.l.b16 %v3249_v41  ;;  %v10881_v41 = vrot.slane %v3159_v60, 9  ;;  %3783 = vmatpush.bf16.msra.mxu2 %v11971_v31  ;;  %v11979_v48 = vld [vmem:[%s12308_s22 + $0x1e0] sm:$0xff] }
 0x12c   : >> { %3485 = vmatmul.bf16.gmra.mxu1 %v3385_v57  ;;  %v3359_v57 = vunpack.c.l.b16 %v3252_v62  ;;  %v1955_v45 = vpack.c.b16 %v1928_v23, %v1927_v44  ;;  %v3257_v62 = vrot.slane %v3255_v25, 4  ;;  %4468 = vmatpush.bf16.msra.mxu3 %v11979_v48  ;;  %v1742_v48 = vld [vmem:[#allocation2 + $0x48] sm:$0xe] }
 0x12d   : >> { %3056 = vmatmul.bf16.gmra.mxu0 %v2956_v53  ;;  %v1478_v4 = vpop.f32.mrf.mxu2  ;;  %v2653_v53 = vrot.slane %v2651_v49, 4 }
 0x12e   : >> { %v1711_v29 = vpop.f32.mrf.mxu3  ;;  %v3386_v1 = vpack.c.b16 %v3359_v57, %v3358_v56  ;;  %v2659_v56 = vrot.slane %v2657_v16, 5  ;;  %v12839_v57 = vld [vmem:[#allocation2 + $0x58] sm:$0xf] }
 0x12f   : >> { %v12809_v20 = vadd.f32 %v1711_v29, %v1478_v4  ;;  %v1440_v38 = vpop.f32.mrf.mxu0  ;;  %v2644_v4 = vor.u32 %v2643_v2, %v2640_v5  ;;  %v2654_v29 = vor.u32 %v2653_v53, %v12829_v8  ;;  %v2665_v5 = vshll.u32 %v2487_v14, 16 }
 0x130   : >> { %v2671_v11 = vshll.u32 %v12839_v57, 16 }
 0x131   : >> { %v1673_v39 = vpop.f32.mrf.mxu1  ;;  %v2645_v44 = vrot.slane %v2644_v4, 4  ;;  %v2655_v23 = vrot.slane %v2654_v29, 4  ;;  %v2667_v16 = vrot.slane %v2665_v5, 5 }
 0x132   : >> { %v12825_v26 = vadd.f32 %v1673_v39, %v1440_v38  ;;  %v1826_v38 = vrot.slane %v1824_v32, 4  ;;  %v12162_v39 = vld [vmem:[#allocation2 + $0x44] sm:$0x1] }
 0x133   : >> { %v1827_v40 = vrot.slane %v12162_v39, 5  ;;  %v2650_v32 = vsel %vm12341_vm10, %v2645_v44, %v12829_v8  ;;  %v2681_v44 = vshll.u32 %v2489_v35, 16 }
 0x134   : >> { %v2931_v60 = vunpack.c.l.b16 %v2650_v32 }
 0x135   : >> { %v1480_v54 = vpop.f32.mrf.mxu2 }
 0x136   : >> { %v1713_v3 = vpop.f32.mrf.mxu3 }
 0x137   : >> { %v12831_v33 = vadd.f32 %v1713_v3, %v1480_v54  ;;  %v1828_v54 = vsel %vm12701_vm13, %v1826_v38, %v1827_v40  ;;  %v2662_v3 = vshrl.u32 %v2487_v14, 16  ;;  %v2673_v38 = vrot.slane %v2671_v11, 5 }
 0x138   : >> { %v1930_v22 = vunpack.c.l.b16 %v1828_v54 }
 0x139   : >> { %v1443_v47 = vpop.f32.mrf.mxu0  ;;  %v1676_v18 = vpop.f32.mrf.mxu1  ;;  %v2664_v29 = vrot.slane %v2662_v3, 4  ;;  %v3262_v3 = vrot.slane %v12839_v57, 5 }
 0x13a   : >> { %v12834_v59 = vadd.f32 %v1676_v18, %v1443_v47  ;;  %2059 = vmatmul.bf16.gmra.mxu2 %v1955_v45  ;;  %v3256_v45 = vsel %vm12701_vm13, %v10881_v41, %v3255_v25  ;;  %v2660_v47 = vsel %vm12341_vm10, %v2655_v23, %v2659_v56  ;;  %v11987_v18 = vld [vmem:[%s12308_s22 + $0x220] sm:$0xff] }
 0x13b   : >> { %2376 = vmatmul.bf16.gmra.mxu3 %v11915_v10  ;;  %v3259_v10 = vsel %vm12701_vm13, %v3257_v62, %v3258_v28  ;;  %v3360_v25 = vunpack.c.l.b16 %v3256_v45  ;;  %4897 = vmatpush.bf16.msra.mxu0 %v11987_v18  ;;  %v2932_v31 = vunpack.c.l.b16 %v2660_v47  ;;  %v11916_v28 = vld [vmem:[#allocation2 + $0x48] sm:$0xff]  ;;  %v3264_v18 = vrot.slane %v3262_v3, 4 }
 0x13c   : >> { %3490 = vmatmul.bf16.gmra.mxu1 %v3386_v1  ;;  %v2675_v1 = vshrl.u32 %v12839_v57, 16  ;;  %v3361_v4 = vunpack.c.l.b16 %v3259_v10  ;;  %v12163_v10 = vld [vmem:[#allocation2 + $0x50] sm:$0x1]  ;;  %v2490_v57 = vld [vmem:[#allocation2 + $0x60] sm:$0xf] }
 0x13d   : >> { %3061 = vmatmul.bf16.gmra.mxu0 %v2957_v21  ;;  %v1483_v46 = vpop.f32.mrf.mxu2  ;;  %v1929_v21 = vunpack.c.l.b16 %v1825_v63  ;;  %v2958_v63 = vpack.c.b16 %v2932_v31, %v2931_v60  ;;  %v1834_v11 = vrot.slane %v12163_v10, 5 }
 0x13e   : >> { %v1716_v49 = vpop.f32.mrf.mxu3  ;;  %v2677_v39 = vrot.slane %v2675_v1, 4  ;;  %v3387_v14 = vpack.c.b16 %v3361_v4, %v3360_v25 }
 0x13f   : >> { %v12841_v61 = vadd.f32 %v1716_v49, %v1483_v46  ;;  %v1956_v8 = vpack.c.b16 %v1930_v22, %v1929_v21  ;;  %v1831_v46 = vrot.slane %v12644_v51, 5  ;;  %v2668_v49 = vor.u32 %v2667_v16, %v2664_v29  ;;  %v12869_v29 = vld [vmem:[#allocation2 + $0x64] sm:$0xf] }
 0x140   : >> { %v2678_v54 = vor.u32 %v2677_v39, %v2673_v38  ;;  %v2683_v51 = vrot.slane %v2681_v44, 5  ;;  %v3265_v21 = vrot.slane %v2489_v35, 5 }
 0x141   : >> { %v1445_v2 = vpop.f32.mrf.mxu0  ;;  %v1678_v53 = vpop.f32.mrf.mxu1  ;;  %v1833_v45 = vrot.slane %v1831_v46, 4  ;;  %v2669_v1 = vrot.slane %v2668_v49, 4  ;;  %v2699_v49 = vshrl.u32 %v12869_v29, 16 }
 0x142   : >> { %v12853_v13 = vadd.f32 %v1678_v53, %v1445_v2  ;;  %v3160_v2 = vld [vmem:[#allocation2 + $0x54] sm:$0xe]  ;;  %v10655_v53 = vrot.slane %v1742_v48, 9  ;;  %v2679_v32 = vrot.slane %v2678_v54, 4  ;;  %v2689_v48 = vshll.u32 %v2490_v57, 16 }
 0x143   : >> { %v10882_v47 = vrot.slane %v3160_v2, 9  ;;  %v1835_v60 = vsel %vm12701_vm13, %v1833_v45, %v1834_v11  ;;  %v2674_v31 = vsel %vm12341_vm10, %v2669_v1, %v2673_v38  ;;  %v2701_v11 = vrot.slane %v2699_v49, 4 }
 0x144   : >> { %v1832_v16 = vsel %vm12701_vm13, %v10655_v53, %v1831_v46  ;;  %v2684_v35 = vsel %vm12341_vm10, %v2679_v32, %v2683_v51  ;;  %v2695_v46 = vshll.u32 %v12869_v29, 16  ;;  %v1932_v44 = vunpack.c.l.b16 %v1835_v60  ;;  %v11917_v32 = vld [vmem:[#allocation2 + $0x54] sm:$0xff] }
 0x145   : >> { %v1485_v40 = vpop.f32.mrf.mxu2  ;;  %v1931_v38 = vunpack.c.l.b16 %v1832_v16  ;;  %v2934_v54 = vunpack.c.l.b16 %v2684_v35  ;;  %v2691_v45 = vrot.slane %v2689_v48, 5  ;;  %v1743_v16 = vld [vmem:[#allocation2 + $0x54] sm:$0xe]  ;;  %v3269_v60 = vrot.slane %v12869_v29, 5  ;;  %v2493_v29 = vld [vmem:[#allocation2 + $0x6c] sm:$0xf] }
 0x146   : >> { %v1718_v41 = vpop.f32.mrf.mxu3  ;;  %v2697_v10 = vrot.slane %v2695_v46, 5 }
 0x147   : >> { %v12861_v62 = vadd.f32 %v1718_v41, %v1485_v40  ;;  %v3263_v41 = vsel %vm12701_vm13, %v10882_v47, %v3262_v3  ;;  %v1957_v51 = vpack.c.b16 %v1932_v44, %v1931_v38  ;;  %v2492_v47 = vld [vmem:[#allocation2 + $0x68] sm:$0x1]  ;;  %v3271_v49 = vrot.slane %v3269_v60, 4  ;;  %v11978_v44 = vld [vmem:[%s12308_s22 + $0x1d8] sm:$0xff] }
 0x148   : >> { %v2705_v35 = vshll.u32 %v2492_v47, 16  ;;  %v3272_v38 = vrot.slane %v2492_v47, 5  ;;  %4469 = vmatpush.bf16.msra.mxu3 %v11978_v44 }
 0x149   : >> { %v1448_v23 = vpop.f32.mrf.mxu0  ;;  %v1681_v56 = vpop.f32.mrf.mxu1 }
 0x14a   : >> { %v12865_v5 = vadd.f32 %v1681_v56, %v1448_v23  ;;  %2064 = vmatmul.bf16.gmra.mxu2 %v1956_v8  ;;  %v3266_v8 = vsel %vm12701_vm13, %v3264_v18, %v3265_v21  ;;  %v3362_v23 = vunpack.c.l.b16 %v3263_v41  ;;  %v1838_v21 = vrot.slane %v12681_v58, 5  ;;  %v3161_v41 = vld [vmem:[#allocation2 + $0x60] sm:$0xe] }
 0x14b   : >> { %2381 = vmatmul.bf16.gmra.mxu3 %v11916_v28  ;;  %v2686_v28 = vshrl.u32 %v2490_v57, 16  ;;  %v3363_v56 = vunpack.c.l.b16 %v3266_v8  ;;  %v11970_v8 = vld [vmem:[%s12308_s22 + $0x198] sm:$0xff]  ;;  %v1841_v58 = vrot.slane %v12688_v7, 5  ;;  %v10883_v46 = vrot.slane %v3161_v41, 9 }
 0x14c   : >> { %3495 = vmatmul.bf16.gmra.mxu1 %v3387_v14  ;;  %v1840_v48 = vrot.slane %v1838_v21, 4  ;;  %3784 = vmatpush.bf16.msra.mxu2 %v11970_v8 }
 0x14d   : >> { %3066 = vmatmul.bf16.gmra.mxu0 %v2958_v63  ;;  %v1488_v22 = vpop.f32.mrf.mxu2  ;;  %v2933_v63 = vunpack.c.l.b16 %v2674_v31  ;;  %v2688_v3 = vrot.slane %v2686_v28, 4  ;;  %v3388_v18 = vpack.c.b16 %v3363_v56, %v3362_v23  ;;  %v10656_v28 = vrot.slane %v1743_v16, 9 }
 0x14e   : >> { %v1721_v25 = vpop.f32.mrf.mxu3 }
 0x14f   : >> { %v12867_v4 = vadd.f32 %v1721_v25, %v1488_v22  ;;  %v2959_v57 = vpack.c.b16 %v2934_v54, %v2933_v63  ;;  %v1839_v7 = vsel %vm12701_vm13, %v10656_v28, %v1838_v21 }
 0x151   : >> { %15724 = vst [vmem:[#allocation10_spill] sm:$0xff] %v12867_v4  ;;  %v1450_v39 = vpop.f32.mrf.mxu0  ;;  %v1683_v40 = vpop.f32.mrf.mxu1 }
 0x152   : >> { %v12883_v14 = vadd.f32 %v1683_v40, %v1450_v39  ;;  %v2692_v39 = vor.u32 %v2691_v45, %v2688_v3  ;;  %v2702_v40 = vor.u32 %v2701_v11, %v2697_v10  ;;  %v1842_v45 = vsel %vm12701_vm13, %v1840_v48, %v1841_v58 }
 0x153   : >> { %v2710_v11 = vshrl.u32 %v2493_v29, 16 }
 0x154   : >> { %v2693_v63 = vrot.slane %v2692_v39, 4  ;;  %v2703_v54 = vrot.slane %v2702_v40, 4  ;;  %v1933_v40 = vunpack.c.l.b16 %v1839_v7  ;;  %v12164_v7 = vld [vmem:[#allocation2 + $0x64] sm:$0xf] }
 0x155   : >> { %v1490_v2 = vpop.f32.mrf.mxu2  ;;  %v2712_v8 = vrot.slane %v2710_v11, 4 }
 0x156   : >> { %v1723_v53 = vpop.f32.mrf.mxu3  ;;  %v2698_v21 = vsel %vm12341_vm10, %v2693_v63, %v2697_v10  ;;  %v11918_v63 = vld [vmem:[#allocation2 + $0x60] sm:$0xff] }
 0x157   : >> { %v12887_v1 = vadd.f32 %v1723_v53, %v1490_v2  ;;  %v2707_v2 = vrot.slane %v2705_v35, 5  ;;  %v12896_v53 = vld [vmem:[#allocation2 + $0x70] sm:$0xf]  ;;  %v1934_v35 = vunpack.c.l.b16 %v1842_v45  ;;  %v2935_v48 = vunpack.c.l.b16 %v2698_v21 }
 0x158   : >> { %v1845_v45 = vrot.slane %v12164_v7, 5  ;;  %v12924_v7 = vld [vmem:[#allocation2 + $0x7c] sm:$0xf] }
 0x159   : >> { %15725 = vst [vmem:[#allocation11_spill] sm:$0xff] %v12887_v1  ;;  %v1453_v22 = vpop.f32.mrf.mxu0  ;;  %v1686_v25 = vpop.f32.mrf.mxu1  ;;  %v2708_v39 = vsel %vm12341_vm10, %v2703_v54, %v2707_v2  ;;  %v1958_v10 = vpack.c.b16 %v1934_v35, %v1933_v40  ;;  %v1744_v2 = vld [vmem:[#allocation2 + $0x60] sm:$0xe]  ;;  %v12165_v35 = vld [vmem:[#allocation2 + $0x68] sm:$0x1]  ;;  %v11985_v1 = vld [vmem:[%s12308_s22 + $0x210] sm:$0xff] }
 0x15a   : >> { %v12891_v31 = vadd.f32 %v1686_v25, %v1453_v22  ;;  %2069 = vmatmul.bf16.gmra.mxu2 %v1957_v51  ;;  %v2713_v51 = vshll.u32 %v2493_v29, 16  ;;  %v3273_v22 = vsel %vm12701_vm13, %v3271_v49, %v3272_v38  ;;  %v2719_v25 = vshll.u32 %v12896_v53, 16  ;;  %v11986_v29 = vld [vmem:[%s12308_s22 + $0x218] sm:$0xff] }
 0x15b   : >> { %2386 = vmatmul.bf16.gmra.mxu3 %v11917_v32  ;;  %v2936_v58 = vunpack.c.l.b16 %v2708_v39  ;;  %4898 = vmatpush.bf16.msra.mxu0 %v11986_v29  ;;  %v10657_v39 = vrot.slane %v1744_v2, 9  ;;  %v1847_v40 = vrot.slane %v1845_v45, 4 }
 0x15c   : >> { %3500 = vmatmul.bf16.gmra.mxu1 %v3388_v18  ;;  %v3270_v18 = vsel %vm12701_vm13, %v10883_v46, %v3269_v60  ;;  %v3365_v60 = vunpack.c.l.b16 %v3273_v22  ;;  %v2715_v28 = vrot.slane %v2713_v51, 5  ;;  %v2495_v46 = vld [vmem:[#allocation2 + $0x74] sm:$0x1]  ;;  %v2721_v49 = vrot.slane %v2719_v25, 5 }
 0x15d   : >> { %3071 = vmatmul.bf16.gmra.mxu0 %v2959_v57  ;;  %v1493_v23 = vpop.f32.mrf.mxu2  ;;  %v2723_v57 = vshrl.u32 %v12896_v53, 16  ;;  %v3364_v41 = vunpack.c.l.b16 %v3270_v18  ;;  %v2729_v11 = vshll.u32 %v2495_v46, 16  ;;  %v3276_v22 = vrot.slane %v12896_v53, 5 }
 0x15e   : >> { %v1726_v56 = vpop.f32.mrf.mxu3 }
 0x15f   : >> { %v12898_v3 = vadd.f32 %v1726_v56, %v1493_v23  ;;  %v2725_v38 = vrot.slane %v2723_v57, 4  ;;  %v3389_v54 = vpack.c.b16 %v3365_v60, %v3364_v41  ;;  %v3162_v57 = vld [vmem:[#allocation2 + $0x6c] sm:$0xe]  ;;  %v1848_v41 = vrot.slane %v12165_v35, 5  ;;  %4899 = vmatpush.bf16.msra.mxu0 %v11985_v1  ;;  %v12169_v1 = vld [vmem:[#allocation2 + $0x80] sm:$0x1] }
 0x160   : >> { %v2731_v29 = vrot.slane %v2729_v11, 5  ;;  %v15738_v52 = vld [vmem:[#allocation11_spill] sm:$0xff] }
 0x161   : >> { %15726 = vst [vmem:[#allocation12_spill] sm:$0xff] %v12898_v3  ;;  %v1455_v32 = vpop.f32.mrf.mxu0  ;;  %v1688_v47 = vpop.f32.mrf.mxu1  ;;  %v2726_v18 = vor.u32 %v2725_v38, %v2721_v49  ;;  %v2501_v3 = vld [vmem:[#allocation2 + $0x8c] sm:$0x1] }
 0x162   : >> { %v12910_v16 = vadd.f32 %v1688_v47, %v1455_v32  ;;  %v2716_v32 = vor.u32 %v2715_v28, %v2712_v8  ;;  %v2960_v47 = vpack.c.b16 %v2936_v58, %v2935_v48  ;;  %v10884_v28 = vrot.slane %v3162_v57, 9 }
 0x163   : >> { %v2727_v8 = vrot.slane %v2726_v18, 4  ;;  %v3278_v48 = vrot.slane %v3276_v22, 4  ;;  %v3279_v58 = vrot.slane %v2495_v46, 5 }
 0x164   : >> { %v2717_v60 = vrot.slane %v2716_v32, 4  ;;  %v3277_v32 = vsel %vm12701_vm13, %v10884_v28, %v3276_v22 }
 0x165   : >> { %v1495_v44 = vpop.f32.mrf.mxu2  ;;  %v2732_v46 = vsel %vm12341_vm10, %v2727_v8, %v2731_v29  ;;  %v3280_v11 = vsel %vm12701_vm13, %v3278_v48, %v3279_v58 }
 0x166   : >> { %v1728_v23 = vpop.f32.mrf.mxu3  ;;  %v2722_v2 = vsel %vm12341_vm10, %v2717_v60, %v2721_v49  ;;  %v3367_v35 = vunpack.c.l.b16 %v3280_v11  ;;  %v2938_v60 = vunpack.c.l.b16 %v2732_v46  ;;  %v3163_v46 = vld [vmem:[#allocation2 + $0x78] sm:$0xe]  ;;  %v3283_v11 = vrot.slane %v12924_v7, 5 }
 0x167   : >> { %v12917_v56 = vadd.f32 %v1728_v23, %v1495_v44  ;;  %v2496_v23 = vld [vmem:[#allocation2 + $0x78] sm:$0xf] }
 0x168   : >> { %v2737_v18 = vshll.u32 %v2496_v23, 16 }
 0x169   : >> { %15727 = vst [vmem:[#allocation13_spill] sm:$0xff] %v12917_v56  ;;  %v1691_v51 = vpop.f32.mrf.mxu1 }
 0x16a   : >> { %v1458_v25 = vpop.f32.mrf.mxu0  ;;  %2074 = vmatmul.bf16.gmra.mxu2 %v1958_v10  ;;  %v1846_v10 = vsel %vm12701_vm13, %v10657_v39, %v1845_v45  ;;  %v2743_v45 = vshll.u32 %v12924_v7, 16  ;;  %v2739_v28 = vrot.slane %v2737_v18, 5 }
 0x16b   : >> { %v12920_v21 = vadd.f32 %v1691_v51, %v1458_v25  ;;  %2391 = vmatmul.bf16.gmra.mxu3 %v11918_v63  ;;  %v1849_v63 = vsel %vm12701_vm13, %v1847_v40, %v1848_v41  ;;  %v2747_v25 = vshrl.u32 %v12924_v7, 16  ;;  %v1935_v39 = vunpack.c.l.b16 %v1846_v10  ;;  %v12949_v7 = vld [vmem:[#allocation2 + $0x88] sm:$0xf] }
 0x16c   : >> { %3505 = vmatmul.bf16.gmra.mxu1 %v3389_v54  ;;  %v1936_v49 = vunpack.c.l.b16 %v1849_v63  ;;  %v3366_v40 = vunpack.c.l.b16 %v3277_v32  ;;  %v2937_v41 = vunpack.c.l.b16 %v2722_v2  ;;  %v12942_v48 = vrot.slane %v2743_v45, 5  ;;  %v1745_v63 = vld [vmem:[#allocation2 + $0x6c] sm:$0xe] }
 0x16d   : >> { %3076 = vmatmul.bf16.gmra.mxu0 %v2960_v47  ;;  %v1498_v38 = vpop.f32.mrf.mxu2  ;;  %v2734_v47 = vshrl.u32 %v2496_v23, 16  ;;  %v2749_v58 = vrot.slane %v2747_v25, 4  ;;  %v11919_v23 = vld [vmem:[#allocation2 + $0x6c] sm:$0xff] }
 0x16e   : >> { %v1731_v53 = vpop.f32.mrf.mxu3  ;;  %v3390_v10 = vpack.c.b16 %v3367_v35, %v3366_v40  ;;  %v2961_v32 = vpack.c.b16 %v2938_v60, %v2937_v41  ;;  %v11969_v40 = vld [vmem:[%s12308_s22 + $0x190] sm:$0xff]  ;;  %v10885_v35 = vrot.slane %v3163_v46, 9  ;;  %v2499_v41 = vld [vmem:[#allocation2 + $0x84] sm:$0xf]  ;;  %v3285_v60 = vrot.slane %v3283_v11, 4 }
 0x16f   : >> { %v12922_v44 = vadd.f32 %v1731_v53, %v1498_v38  ;;  %v2736_v8 = vrot.slane %v2734_v47, 4  ;;  %v1959_v53 = vpack.c.b16 %v1936_v49, %v1935_v39  ;;  %v2750_v45 = vor.u32 %v2749_v58, %v12942_v48  ;;  %3785 = vmatpush.bf16.msra.mxu2 %v11969_v40 }
 0x170   : >> { %v10658_v39 = vrot.slane %v1745_v63, 9  ;;  %v2761_v46 = vshll.u32 %v2499_v41, 16  ;;  %v2767_v40 = vshll.u32 %v12949_v7, 16 }
 0x171   : >> { %15728 = vst [vmem:[#allocation14_spill] sm:$0xff] %v12922_v44  ;;  %v1693_v54 = vpop.f32.mrf.mxu1  ;;  %v12166_v44 = vld [vmem:[#allocation2 + $0x70] sm:$0xf]  ;;  %v2740_v18 = vor.u32 %v2739_v28, %v2736_v8 }
 0x172   : >> { %v1460_v51 = vpop.f32.mrf.mxu0  ;;  %v11977_v8 = vld [vmem:[%s12308_s22 + $0x1d0] sm:$0xff] }
 0x173   : >> { %v12940_v57 = vadd.f32 %v1693_v54, %v1460_v51  ;;  %v1852_v54 = vrot.slane %v12166_v44, 5  ;;  %v2498_v51 = vld [vmem:[#allocation2 + $0x80] sm:$0x1]  ;;  %v12167_v44 = vld [vmem:[#allocation2 + $0x74] sm:$0x1]  ;;  %4470 = vmatpush.bf16.msra.mxu3 %v11977_v8 }
 0x174   : >> { %v2753_v25 = vshll.u32 %v2498_v51, 16 }
 0x175   : >> { %v1500_v29 = vpop.f32.mrf.mxu2  ;;  %v1854_v49 = vrot.slane %v1852_v54, 4 }
 0x176   : >> { %v1733_v22 = vpop.f32.mrf.mxu3 }
 0x177   : >> { %v12944_v38 = vadd.f32 %v1733_v22, %v1500_v29  ;;  %v1855_v29 = vrot.slane %v12167_v44, 5  ;;  %v3286_v22 = vrot.slane %v2498_v51, 5  ;;  %v1853_v44 = vsel %vm12701_vm13, %v10658_v39, %v1852_v54 }
 0x178   : >> { %v3284_v51 = vsel %vm12701_vm13, %v10885_v35, %v3283_v11  ;;  %v1937_v54 = vunpack.c.l.b16 %v1853_v44 }
 0x179   : >> { %15729 = vst [vmem:[#allocation15_spill] sm:$0xff] %v12944_v38  ;;  %v3471_v2 = vpop.f32.mrf.mxu1  ;;  %v2741_v38 = vrot.slane %v2740_v18, 4  ;;  %v2771_v18 = vshrl.u32 %v12949_v7, 16  ;;  %v3368_v35 = vunpack.c.l.b16 %v3284_v51  ;;  %v1746_v51 = vld [vmem:[#allocation2 + $0x78] sm:$0xe] }
 0x17a   : >> { %v3042_v47 = vpop.f32.mrf.mxu0  ;;  %2079 = vmatmul.bf16.gmra.mxu2 %v1959_v53  ;;  %v2751_v53 = vrot.slane %v2750_v45, 4 }
 0x17b   : >> { %2396 = vmatmul.bf16.gmra.mxu3 %v11919_v23  ;;  %v2755_v23 = vrot.slane %v2753_v25, 5  ;;  %v2746_v39 = vsel %vm12341_vm10, %v2741_v38, %v12942_v48  ;;  %v2773_v56 = vrot.slane %v2771_v18, 4 }
 0x17c   : >> { %3510 = vmatmul.bf16.gmra.mxu1 %v3390_v10  ;;  %v1856_v10 = vsel %vm12701_vm13, %v1854_v49, %v1855_v29 }
 0x17d   : >> { %3081 = vmatmul.bf16.gmra.mxu0 %v2961_v32  ;;  %v2040_v28 = vpop.f32.mrf.mxu2  ;;  %v2758_v32 = vshrl.u32 %v2499_v41, 16  ;;  %v2756_v11 = vsel %vm12341_vm10, %v2751_v53, %v2755_v23  ;;  %v1938_v29 = vunpack.c.l.b16 %v1856_v10  ;;  %v12168_v23 = vld [vmem:[#allocation2 + $0x7c] sm:$0xf] }
 0x17e   : >> { %v2357_v58 = vpop.f32.mrf.mxu3  ;;  %v2120_v63 = vadd.f32 %v2040_v28, %v12722_v36  ;;  %v3287_v36 = vsel %vm12701_vm13, %v3285_v60, %v3286_v22  ;;  %v2939_v22 = vunpack.c.l.b16 %v2746_v39  ;;  %v2940_v44 = vunpack.c.l.b16 %v2756_v11 }
 0x17f   : >> { %v2760_v41 = vrot.slane %v2758_v32, 4  ;;  %v3369_v8 = vunpack.c.l.b16 %v3287_v36  ;;  %v1960_v53 = vpack.c.b16 %v1938_v29, %v1937_v54  ;;  %v1859_v10 = vrot.slane %v12168_v23, 5 }
 0x180   : >> { %v2437_v45 = vadd.f32 %v2357_v58, %v2120_v63  ;;  %v2763_v58 = vrot.slane %v2761_v46, 5  ;;  %v12968_v63 = vrot.slane %v2767_v40, 5  ;;  %v3290_v39 = vrot.slane %v12949_v7, 5 }
 0x181   : >> { %v3473_v25 = vpop.f32.mrf.mxu1  ;;  %v3391_v32 = vpack.c.b16 %v3369_v8, %v3368_v35  ;;  %v1861_v54 = vrot.slane %v1859_v10, 4  ;;  %v1862_v29 = vrot.slane %v12169_v1, 5 }
 0x182   : >> { %v3044_v28 = vpop.f32.mrf.mxu0  ;;  %v3122_v49 = vadd.f32 %v3042_v47, %v2437_v45  ;;  %v11920_v47 = vld [vmem:[#allocation2 + $0x78] sm:$0xff]  ;;  %v2764_v46 = vor.u32 %v2763_v58, %v2760_v41  ;;  %v2774_v40 = vor.u32 %v2773_v56, %v12968_v63  ;;  %v2962_v45 = vpack.c.b16 %v2940_v44, %v2939_v22 }
 0x183   : >> { %v3292_v22 = vrot.slane %v3290_v39, 4  ;;  %v3293_v44 = vrot.slane %v2501_v3, 5  ;;  %v1863_v23 = vsel %vm12701_vm13, %v1861_v54, %v1862_v29 }
 0x184   : >> { %v12970_v60 = vadd.f32 %v3471_v2, %v3122_v49  ;;  %v2777_v2 = vshll.u32 %v2501_v3, 16  ;;  %v3164_v49 = vld [vmem:[#allocation2 + $0x84] sm:$0xe]  ;;  %v2765_v35 = vrot.slane %v2764_v46, 4  ;;  %v2775_v41 = vrot.slane %v2774_v40, 4 }
 0x185   : >> { %v2042_v4 = vpop.f32.mrf.mxu2  ;;  %v10886_v58 = vrot.slane %v3164_v49, 9  ;;  %v3294_v46 = vsel %vm12701_vm13, %v3292_v22, %v3293_v44 }
 0x186   : >> { %v2359_v48 = vpop.f32.mrf.mxu3  ;;  %v2121_v38 = vadd.f32 %v2042_v4, %v12740_v12  ;;  %v10659_v4 = vrot.slane %v1746_v51, 9  ;;  %v2779_v8 = vrot.slane %v2777_v2, 5  ;;  %v3371_v54 = vunpack.c.l.b16 %v3294_v46 }
 0x188   : >> { %v2438_v18 = vadd.f32 %v2359_v48, %v2121_v38  ;;  %v2780_v3 = vsel %vm12341_vm10, %v2775_v41, %v2779_v8 }
 0x189   : >> { %v3476_v36 = vpop.f32.mrf.mxu1 }
 0x18a   : >> { %v3047_v11 = vpop.f32.mrf.mxu0  ;;  %2084 = vmatmul.bf16.gmra.mxu2 %v1960_v53  ;;  %v3123_v12 = vadd.f32 %v3044_v28, %v2438_v18  ;;  %v2502_v53 = vld [vmem:[#allocation2 + $0x90] sm:$0xf]  ;;  %v12979_v28 = vld [vmem:[#allocation2 + $0x94] sm:$0xf] }
 0x18b   : >> { %2401 = vmatmul.bf16.gmra.mxu3 %v11920_v47  ;;  %v1860_v47 = vsel %vm12701_vm13, %v10659_v4, %v1859_v10  ;;  %v2782_v10 = vshrl.u32 %v2502_v53, 16  ;;  %v2785_v2 = vshll.u32 %v2502_v53, 16  ;;  %v2791_v18 = vshll.u32 %v12979_v28, 16 }
 0x18c   : >> { %3515 = vmatmul.bf16.gmra.mxu1 %v3391_v32  ;;  %v12976_v56 = vadd.f32 %v3473_v25, %v3123_v12  ;;  %v2770_v25 = vsel %vm12341_vm10, %v2765_v35, %v12968_v63  ;;  %v1939_v63 = vunpack.c.l.b16 %v1860_v47  ;;  %v1940_v12 = vunpack.c.l.b16 %v1863_v23  ;;  %v2504_v47 = vld [vmem:[#allocation2 + $0x98] sm:$0x1] }
 0x18d   : >> { %3086 = vmatmul.bf16.gmra.mxu0 %v2962_v45  ;;  %v2045_v7 = vpop.f32.mrf.mxu2  ;;  %v2795_v45 = vshrl.u32 %v12979_v28, 16  ;;  %v2941_v29 = vunpack.c.l.b16 %v2770_v25  ;;  %v2942_v35 = vunpack.c.l.b16 %v2780_v3  ;;  %v2784_v8 = vrot.slane %v2782_v10, 4 }
 0x18e   : >> { %v2362_v48 = vpop.f32.mrf.mxu3  ;;  %v2122_v38 = vadd.f32 %v2045_v7, %v12750_v42  ;;  %v3291_v42 = vsel %vm12701_vm13, %v10886_v58, %v3290_v39  ;;  %v2787_v58 = vrot.slane %v2785_v2, 5  ;;  %v12998_v22 = vrot.slane %v2791_v18, 5 }
 0x18f   : >> { %v3370_v4 = vunpack.c.l.b16 %v3291_v42  ;;  %v2797_v44 = vrot.slane %v2795_v45, 4  ;;  %v2963_v25 = vpack.c.b16 %v2942_v35, %v2941_v29  ;;  %v3165_v42 = vld [vmem:[#allocation2 + $0x90] sm:$0xe]  ;;  %v3297_v46 = vrot.slane %v12979_v28, 5  ;;  %v2505_v35 = vld [vmem:[#allocation2 + $0x9c] sm:$0xf] }
 0x190   : >> { %v2439_v32 = vadd.f32 %v2362_v48, %v2122_v38  ;;  %v1961_v48 = vpack.c.b16 %v1940_v12, %v1939_v63  ;;  %v11921_v38 = vld [vmem:[#allocation2 + $0x84] sm:$0xff]  ;;  %v2788_v2 = vor.u32 %v2787_v58, %v2784_v8  ;;  %v2801_v45 = vshll.u32 %v2504_v47, 16  ;;  %v12171_v12 = vld [vmem:[#allocation2 + $0x8c] sm:$0x1]  ;;  %v13006_v8 = vld [vmem:[#allocation2 + $0xa0] sm:$0xf] }
 0x191   : >> { %v3478_v51 = vpop.f32.mrf.mxu1  ;;  %v3392_v23 = vpack.c.b16 %v3371_v54, %v3370_v4  ;;  %v2798_v18 = vor.u32 %v2797_v44, %v12998_v22  ;;  %v1869_v4 = vrot.slane %v12171_v12, 5  ;;  %v11968_v54 = vld [vmem:[%s12308_s22 + $0x188] sm:$0xff]  ;;  %v10887_v29 = vrot.slane %v3165_v42, 9 }
 0x192   : >> { %v3049_v40 = vpop.f32.mrf.mxu0  ;;  %v3124_v49 = vadd.f32 %v3047_v11, %v2439_v32  ;;  %v12170_v11 = vld [vmem:[#allocation2 + $0x88] sm:$0xf]  ;;  %v1747_v32 = vld [vmem:[#allocation2 + $0x84] sm:$0xe]  ;;  %v3299_v28 = vrot.slane %v3297_v46, 4  ;;  %3786 = vmatpush.bf16.msra.mxu2 %v11968_v54  ;;  %v2819_v42 = vshrl.u32 %v13006_v8, 16 }
 0x193   : >> { %v1866_v53 = vrot.slane %v12170_v11, 5  ;;  %v11976_v58 = vld [vmem:[%s12308_s22 + $0x1c8] sm:$0xff] }
 0x194   : >> { %v12996_v1 = vadd.f32 %v3476_v36, %v3124_v49  ;;  %v10660_v49 = vrot.slane %v1747_v32, 9  ;;  %v2806_v32 = vshrl.u32 %v2505_v35, 16  ;;  %4471 = vmatpush.bf16.msra.mxu3 %v11976_v58  ;;  %v2821_v58 = vrot.slane %v2819_v42, 4 }
 0x195   : >> { %v2047_v39 = vpop.f32.mrf.mxu2  ;;  %v1868_v63 = vrot.slane %v1866_v53, 4 }
 0x196   : >> { %v2364_v41 = vpop.f32.mrf.mxu3  ;;  %v2123_v7 = vadd.f32 %v2047_v39, %v12768_v27 }
 0x198   : >> { %v2440_v36 = vadd.f32 %v2364_v41, %v2123_v7  ;;  %v3300_v41 = vrot.slane %v2504_v47, 5  ;;  %v3298_v47 = vsel %vm12701_vm13, %v10887_v29, %v3297_v46 }
 0x199   : >> { %v3481_v3 = vpop.f32.mrf.mxu1  ;;  %v3372_v12 = vunpack.c.l.b16 %v3298_v47  ;;  %v1748_v47 = vld [vmem:[#allocation2 + $0x90] sm:$0xe] }
 0x19a   : >> { %v3052_v10 = vpop.f32.mrf.mxu0  ;;  %2089 = vmatmul.bf16.gmra.mxu2 %v1961_v48  ;;  %v3125_v27 = vadd.f32 %v3049_v40, %v2440_v36  ;;  %v2789_v40 = vrot.slane %v2788_v2, 4  ;;  %v2799_v48 = vrot.slane %v2798_v18, 4  ;;  %v2809_v36 = vshll.u32 %v2505_v35, 16 }
 0x19b   : >> { %2406 = vmatmul.bf16.gmra.mxu3 %v11921_v38  ;;  %v2803_v38 = vrot.slane %v2801_v45, 5 }
 0x19c   : >> { %3520 = vmatmul.bf16.gmra.mxu1 %v3392_v23  ;;  %v13004_v39 = vadd.f32 %v3478_v51, %v3125_v27  ;;  %v1867_v23 = vsel %vm12701_vm13, %v10660_v49, %v1866_v53  ;;  %v1870_v51 = vsel %vm12701_vm13, %v1868_v63, %v1869_v4  ;;  %v2794_v27 = vsel %vm12341_vm10, %v2789_v40, %v12998_v22 }
 0x19d   : >> { %3091 = vmatmul.bf16.gmra.mxu0 %v2963_v25  ;;  %v2050_v44 = vpop.f32.mrf.mxu2  ;;  %v2815_v25 = vshll.u32 %v13006_v8, 16  ;;  %v1941_v53 = vunpack.c.l.b16 %v1867_v23  ;;  %v2804_v46 = vsel %vm12341_vm10, %v2799_v48, %v2803_v38  ;;  %v1942_v63 = vunpack.c.l.b16 %v1870_v51  ;;  %v12172_v38 = vld [vmem:[#allocation2 + $0x94] sm:$0xf] }
 0x19e   : >> { %v2367_v7 = vpop.f32.mrf.mxu3  ;;  %v2124_v11 = vadd.f32 %v2050_v44, %v12777_v24  ;;  %v3301_v24 = vsel %vm12701_vm13, %v3299_v28, %v3300_v41  ;;  %v2808_v4 = vrot.slane %v2806_v32, 4  ;;  %v2811_v29 = vrot.slane %v2809_v36, 5 }
 0x19f   : >> { %v3373_v54 = vunpack.c.l.b16 %v3301_v24  ;;  %v13025_v35 = vrot.slane %v2815_v25, 5  ;;  %v2943_v41 = vunpack.c.l.b16 %v2794_v27  ;;  %v2944_v44 = vunpack.c.l.b16 %v2804_v46 }
 0x1a0   : >> { %v2441_v2 = vadd.f32 %v2367_v7, %v2124_v11  ;;  %v2507_v7 = vld [vmem:[#allocation2 + $0xa4] sm:$0x1]  ;;  %v11984_v11 = vld [vmem:[%s12308_s22 + $0x208] sm:$0xff]  ;;  %v1962_v48 = vpack.c.b16 %v1942_v63, %v1941_v53  ;;  %v1873_v51 = vrot.slane %v12172_v38, 5  ;;  %v2812_v36 = vor.u32 %v2811_v29, %v2808_v4 }
 0x1a1   : >> { %v3483_v18 = vpop.f32.mrf.mxu1  ;;  %4900 = vmatpush.bf16.msra.mxu0 %v11984_v11  ;;  %v3393_v32 = vpack.c.b16 %v3373_v54, %v3372_v12  ;;  %v2822_v25 = vor.u32 %v2821_v58, %v13025_v35  ;;  %v3304_v27 = vrot.slane %v13006_v8, 5  ;;  %v10661_v53 = vrot.slane %v1748_v47, 9  ;;  %v12173_v12 = vld [vmem:[#allocation2 + $0x98] sm:$0x1] }
 0x1a2   : >> { %v3054_v45 = vpop.f32.mrf.mxu0  ;;  %v3126_v49 = vadd.f32 %v3052_v10, %v2441_v2  ;;  %v11922_v10 = vld [vmem:[#allocation2 + $0x90] sm:$0xff]  ;;  %v2964_v2 = vpack.c.b16 %v2944_v44, %v2943_v41  ;;  %v1875_v63 = vrot.slane %v1873_v51, 4  ;;  %v1876_v54 = vrot.slane %v12173_v12, 5 }
 0x1a3   : >> { %v2813_v4 = vrot.slane %v2812_v36, 4  ;;  %v2823_v29 = vrot.slane %v2822_v25, 4  ;;  %v3306_v44 = vrot.slane %v3304_v27, 4  ;;  %v3307_v8 = vrot.slane %v2507_v7, 5 }
 0x1a4   : >> { %v13027_v28 = vadd.f32 %v3481_v3, %v3126_v49  ;;  %v2825_v3 = vshll.u32 %v2507_v7, 16  ;;  %v3166_v49 = vld [vmem:[#allocation2 + $0x9c] sm:$0xe]  ;;  %v1874_v47 = vsel %vm12701_vm13, %v10661_v53, %v1873_v51 }
 0x1a5   : >> { %v2052_v23 = vpop.f32.mrf.mxu2  ;;  %v10888_v41 = vrot.slane %v3166_v49, 9  ;;  %v2818_v36 = vsel %vm12341_vm10, %v2813_v4, %v13025_v35  ;;  %v353_v35 = vld [vmem:[#allocation3 + $0x98] sm:$0xff]  ;;  %v1943_v12 = vunpack.c.l.b16 %v1874_v47  ;;  %v13055_v4 = vld [vmem:[#allocation2 + $0xa0] sm:$0xf] }
 0x1a6   : >> { %15730 = vst [vmem:[#allocation16_spill] sm:$0xff] %v13027_v28  ;;  %v2369_v22 = vpop.f32.mrf.mxu3  ;;  %v2125_v40 = vadd.f32 %v2052_v23, %v12796_v15  ;;  %v2508_v23 = vld [vmem:[#allocation2 + $0xa8] sm:$0xf]  ;;  %v2827_v58 = vrot.slane %v2825_v3, 5 }
 0x1a8   : >> { %v2442_v42 = vadd.f32 %v2369_v22, %v2125_v40  ;;  %v2828_v7 = vsel %vm12341_vm10, %v2823_v29, %v2827_v58  ;;  %v1880_v29 = vrot.slane %v13055_v4, 5 }
 0x1a9   : >> { %v3486_v24 = vpop.f32.mrf.mxu1 }
 0x1aa   : >> { %v3057_v46 = vpop.f32.mrf.mxu0  ;;  %2094 = vmatmul.bf16.gmra.mxu2 %v1962_v48  ;;  %v3127_v15 = vadd.f32 %v3054_v45, %v2442_v42  ;;  %v13035_v48 = vld [vmem:[#allocation2 + $0xac] sm:$0xf]  ;;  %v2830_v45 = vshrl.u32 %v2508_v23, 16  ;;  %v3308_v42 = vsel %vm12701_vm13, %v3306_v44, %v3307_v8  ;;  %v2945_v8 = vunpack.c.l.b16 %v2818_v36 }
 0x1ab   : >> { %2411 = vmatmul.bf16.gmra.mxu3 %v11922_v10  ;;  %v2833_v10 = vshll.u32 %v2508_v23, 16  ;;  %v2839_v51 = vshll.u32 %v13035_v48, 16  ;;  %v2843_v53 = vshrl.u32 %v13035_v48, 16  ;;  %v3375_v58 = vunpack.c.l.b16 %v3308_v42  ;;  %v2510_v42 = vld [vmem:[#allocation2 + $0xb0] sm:$0x1] }
 0x1ac   : >> { %3525 = vmatmul.bf16.gmra.mxu1 %v3393_v32  ;;  %v13033_v11 = vadd.f32 %v3483_v18, %v3127_v15  ;;  %v352_v32 = vld [vmem:[#allocation3 + $0x20] sm:$0xff]  ;;  %v1877_v18 = vsel %vm12701_vm13, %v1875_v63, %v1876_v54  ;;  %v2832_v49 = vrot.slane %v2830_v45, 4 }
 0x1ad   : >> { %3096 = vmatmul.bf16.gmra.mxu0 %v2964_v2  ;;  %v2055_v22 = vpop.f32.mrf.mxu2  ;;  %v2835_v15 = vrot.slane %v2833_v10, 5  ;;  %v384_v63 = vpack.c.bf16 %v352_v32, %v352_v32  ;;  %v1944_v54 = vunpack.c.l.b16 %v1877_v18 }
 0x1ae   : >> { %15731 = vst [vmem:[#allocation17_spill] sm:$0xff] %v13033_v11  ;;  %v2372_v40 = vpop.f32.mrf.mxu3  ;;  %v2126_v38 = vadd.f32 %v2055_v22, %v12807_v9  ;;  %v3305_v9 = vsel %vm12701_vm13, %v10888_v41, %v3304_v27  ;;  %v1749_v41 = vld [vmem:[#allocation2 + $0x9c] sm:$0xe]  ;;  %v2946_v22 = vunpack.c.l.b16 %v2828_v7  ;;  %v13060_v11 = vrot.slane %v2839_v51, 5  ;;  %v12175_v51 = vld [vmem:[#allocation2 + $0xa4] sm:$0x1] }
 0x1af   : >> { %v3374_v27 = vunpack.c.l.b16 %v3305_v9  ;;  %v645_v32 = vshrl.u32 %v384_v63, 16  ;;  %v1963_v18 = vpack.c.b16 %v1944_v54, %v1943_v12  ;;  %v10662_v4 = vrot.slane %v1749_v41, 9 }
 0x1b0   : >> { %v2443_v25 = vadd.f32 %v2372_v40, %v2126_v38  ;;  %v385_v40 = vpack.c.bf16 %v353_v35, %v353_v35  ;;  %v2836_v38 = vor.u32 %v2835_v15, %v2832_v49  ;;  %v1882_v9 = vrot.slane %v1880_v29, 4 }
 0x1b1   : >> { %v13047_v3 = vpop.f32.mrf.mxu1  ;;  %v3394_v28 = vpack.c.b16 %v3375_v58, %v3374_v27  ;;  %v647_v36 = vrot.slane %v645_v32, 7  ;;  %v648_v7 = vshll.u32 %v384_v63, 16  ;;  %v1883_v15 = vrot.slane %v12175_v51, 5  ;;  %v11967_v63 = vld [vmem:[%s12308_s22 + $0x180] sm:$0xff]  ;;  %v2511_v58 = vld [vmem:[#allocation2 + $0xb4] sm:$0xf] }
 0x1b2   : >> { %v3059_v2 = vpop.f32.mrf.mxu0  ;;  %v3128_v23 = vadd.f32 %v3057_v46, %v2443_v25  ;;  %v2845_v46 = vrot.slane %v2843_v53, 4  ;;  %v11923_v25 = vld [vmem:[#allocation2 + $0x9c] sm:$0xff]  ;;  %v3167_v53 = vld [vmem:[#allocation2 + $0xa8] sm:$0xe]  ;;  %v2837_v54 = vrot.slane %v2836_v38, 4  ;;  %3787 = vmatpush.bf16.msra.mxu2 %v11967_v63 }
 0x1b3   : >> { %v650_v27 = vor.u32 %v648_v7, %v647_v36  ;;  %v10889_v32 = vrot.slane %v3167_v53, 9  ;;  %v13068_v51 = vld [vmem:[#allocation2 + $0xb8] sm:$0xf] }
 0x1b4   : >> { %v13058_v44 = vadd.f32 %v3486_v24, %v3128_v23  ;;  %v3311_v24 = vrot.slane %v13035_v48, 5  ;;  %v2965_v23 = vpack.c.b16 %v2946_v22, %v2945_v8  ;;  %v2846_v41 = vor.u32 %v2845_v46, %v13060_v11  ;;  %v824_v46 = vld [vmem:[#allocation2 + $0xc8] sm:$0x1] }
 0x1b5   : >> { %v2057_v45 = vpop.f32.mrf.mxu2  ;;  %v651_v8 = vrot.slane %v647_v36, 4 }
 0x1b6   : >> { %15732 = vst [vmem:[#allocation18_spill] sm:$0xff] %v13058_v44  ;;  %v2374_v10 = vpop.f32.mrf.mxu3  ;;  %v2127_v47 = vadd.f32 %v2057_v45, %v12825_v26  ;;  %v653_v44 = vshrl.u32 %v385_v40, 16  ;;  %v820_v26 = vld [vmem:[#allocation2 + $0xc0] sm:$0xf]  ;;  %v2849_v45 = vshll.u32 %v2510_v42, 16 }
 0x1b7   : >> { %v821_v38 = vsel %vm12319_vm6, %v650_v27, %v820_v26  ;;  %v2842_v27 = vsel %vm12341_vm10, %v2837_v54, %v13060_v11 }
 0x1b8   : >> { %v2444_v35 = vadd.f32 %v2374_v10, %v2127_v47  ;;  %v655_v22 = vrot.slane %v653_v44, 7  ;;  %v656_v10 = vshll.u32 %v385_v40, 16  ;;  %v3313_v47 = vrot.slane %v3311_v24, 4  ;;  %822 = vst [vmem:[#allocation2 + $0xc0] sm:$0xf] %v821_v38 }
 0x1b9   : >> { %v13064_v49 = vpop.f32.mrf.mxu1  ;;  %v1881_v40 = vsel %vm12701_vm13, %v10662_v4, %v1880_v29  ;;  %v2851_v53 = vrot.slane %v2849_v45, 5  ;;  %v2857_v29 = vshll.u32 %v2511_v58, 16  ;;  %v2863_v4 = vshll.u32 %v13068_v51, 16 }
 0x1ba   : >> { %v3062_v12 = vpop.f32.mrf.mxu0  ;;  %2099 = vmatmul.bf16.gmra.mxu2 %v1963_v18  ;;  %v3129_v48 = vadd.f32 %v3059_v2, %v2444_v35  ;;  %v3314_v2 = vrot.slane %v2510_v42, 5  ;;  %v11975_v18 = vld [vmem:[%s12308_s22 + $0x1c0] sm:$0xff]  ;;  %v660_v36 = vrot.slane %v655_v22, 4  ;;  %v2847_v35 = vrot.slane %v2846_v41, 4 }
 0x1bb   : >> { %2416 = vmatmul.bf16.gmra.mxu3 %v11923_v25  ;;  %v658_v25 = vor.u32 %v656_v10, %v655_v22  ;;  %v2867_v45 = vshrl.u32 %v13068_v51, 16  ;;  %v2947_v22 = vunpack.c.l.b16 %v2842_v27 }
 0x1bc   : >> { %3530 = vmatmul.bf16.gmra.mxu1 %v3394_v28  ;;  %v13073_v7 = vadd.f32 %v13047_v3, %v3129_v48  ;;  %v1884_v3 = vsel %vm12701_vm13, %v1882_v9, %v1883_v15  ;;  %4472 = vmatpush.bf16.msra.mxu3 %v11975_v18  ;;  %v2854_v48 = vshrl.u32 %v2511_v58, 16  ;;  %v3312_v9 = vsel %vm12701_vm13, %v10889_v32, %v3311_v24 }
 0x1bd   : >> { %3101 = vmatmul.bf16.gmra.mxu0 %v2965_v23  ;;  %v2060_v44 = vpop.f32.mrf.mxu2  ;;  %v659_v42 = vsel %vm12311_vm5, %v651_v8, %v658_v25  ;;  %v825_v23 = vsel %vm12325_vm7, %v660_v36, %v824_v46  ;;  %v3315_v15 = vsel %vm12701_vm13, %v3313_v47, %v3314_v2  ;;  %v2852_v11 = vsel %vm12341_vm10, %v2847_v35, %v2851_v53  ;;  %v2513_v47 = vld [vmem:[#allocation2 + $0xbc] sm:$0x1]  ;;  %v11983_v36 = vld [vmem:[%s12308_s22 + $0x200] sm:$0xff] }
 0x1be   : >> { %v2377_v28 = vpop.f32.mrf.mxu3  ;;  %v2128_v26 = vadd.f32 %v2060_v44, %v12834_v59  ;;  %823 = vst [vmem:[#allocation2 + $0xc4] sm:$0xf] %v659_v42  ;;  %v1945_v58 = vunpack.c.l.b16 %v1881_v40  ;;  %v1946_v8 = vunpack.c.l.b16 %v1884_v3  ;;  %v3376_v10 = vunpack.c.l.b16 %v3312_v9  ;;  %v11924_v40 = vld [vmem:[#allocation2 + $0xa8] sm:$0xff]  ;;  %4901 = vmatpush.bf16.msra.mxu0 %v11983_v36 }
 0x1bf   : >> { %826 = vst [vmem:[#allocation2 + $0xc8] sm:$0x1] %v825_v23  ;;  %v3377_v38 = vunpack.c.l.b16 %v3315_v15  ;;  %v2856_v46 = vrot.slane %v2854_v48, 4  ;;  %v2859_v18 = vrot.slane %v2857_v29, 5  ;;  %v2948_v32 = vunpack.c.l.b16 %v2852_v11  ;;  %v12176_v3 = vld [vmem:[#allocation2 + $0xac] sm:$0xf] }
 0x1c0   : >> { %v2445_v59 = vadd.f32 %v2377_v28, %v2128_v26  ;;  %v2865_v2 = vrot.slane %v2863_v4, 5  ;;  %v2869_v25 = vrot.slane %v2867_v45, 4  ;;  %v1750_v26 = vld [vmem:[#allocation2 + $0xa8] sm:$0xe]  ;;  %v1887_v42 = vrot.slane %v12176_v3, 5 }
 0x1c1   : >> { %v13089_v41 = vpop.f32.mrf.mxu1  ;;  %v3395_v53 = vpack.c.b16 %v3377_v38, %v3376_v10  ;;  %v2860_v23 = vor.u32 %v2859_v18, %v2856_v46  ;;  %v2873_v27 = vshll.u32 %v2513_v47, 16  ;;  %v2966_v48 = vpack.c.b16 %v2948_v32, %v2947_v22  ;;  %v3168_v15 = vld [vmem:[#allocation2 + $0xb4] sm:$0xe]  ;;  %v2514_v36 = vld [vmem:[#allocation2 + $0xc0] sm:$0xf] }
 0x1c2   : >> { %v3064_v63 = vpop.f32.mrf.mxu0  ;;  %v3130_v54 = vadd.f32 %v3062_v12, %v2445_v59  ;;  %v1964_v12 = vpack.c.b16 %v1946_v8, %v1945_v58  ;;  %v2870_v59 = vor.u32 %v2869_v25, %v2865_v2  ;;  %v3318_v4 = vrot.slane %v13068_v51, 5 }
 0x1c3   : >> { %v10663_v45 = vrot.slane %v1750_v26, 9  ;;  %v1889_v11 = vrot.slane %v1887_v42, 4  ;;  %v2861_v8 = vrot.slane %v2860_v23, 4  ;;  %v2875_v10 = vrot.slane %v2873_v27, 5 }
 0x1c4   : >> { %v13099_v24 = vadd.f32 %v13064_v49, %v3130_v54  ;;  %v12177_v54 = vld [vmem:[#allocation2 + $0xb0] sm:$0x1]  ;;  %v2871_v38 = vrot.slane %v2870_v59, 4  ;;  %v10890_v22 = vrot.slane %v3168_v15, 9  ;;  %v3320_v46 = vrot.slane %v3318_v4, 4 }
 0x1c5   : >> { %v2062_v44 = vpop.f32.mrf.mxu2  ;;  %v1890_v58 = vrot.slane %v12177_v54, 5  ;;  %v3321_v18 = vrot.slane %v2513_v47, 5  ;;  %v2878_v3 = vshrl.u32 %v2514_v36, 16 }
 0x1c6   : >> { %v2379_v28 = vpop.f32.mrf.mxu3  ;;  %v2129_v35 = vadd.f32 %v2062_v44, %v12853_v13  ;;  %v13107_v44 = vld [vmem:[#allocation2 + $0xc4] sm:$0xf]  ;;  %v2876_v47 = vsel %vm12341_vm10, %v2871_v38, %v2875_v10 }
 0x1c7   : >> { %v2887_v23 = vshll.u32 %v13107_v44, 16  ;;  %v2891_v27 = vshrl.u32 %v13107_v44, 16  ;;  %v2950_v54 = vunpack.c.l.b16 %v2876_v47 }
 0x1c8   : >> { %v2446_v49 = vadd.f32 %v2379_v28, %v2129_v35  ;;  %v1891_v28 = vsel %vm12701_vm13, %v1889_v11, %v1890_v58  ;;  %v2866_v35 = vsel %vm12341_vm10, %v2861_v8, %v2865_v2  ;;  %v2880_v8 = vrot.slane %v2878_v3, 4 }
 0x1c9   : >> { %v3496_v29 = vpop.f32.mrf.mxu1  ;;  %v2949_v11 = vunpack.c.l.b16 %v2866_v35  ;;  %v13127_v38 = vrot.slane %v2887_v23, 5 }
 0x1ca   : >> { %v3067_v9 = vpop.f32.mrf.mxu0  ;;  %2104 = vmatmul.bf16.gmra.mxu2 %v1964_v12  ;;  %v13104_v13 = vadd.f32 %v3064_v63, %v2446_v49  ;;  %v1888_v63 = vsel %vm12701_vm13, %v10663_v45, %v1887_v42  ;;  %v2881_v42 = vshll.u32 %v2514_v36, 16  ;;  %v12178_v36 = vld [vmem:[#allocation2 + $0xb8] sm:$0xf] }
 0x1cb   : >> { %2421 = vmatmul.bf16.gmra.mxu3 %v11924_v40  ;;  %v1947_v49 = vunpack.c.l.b16 %v1888_v63  ;;  %v1894_v63 = vrot.slane %v12178_v36, 5 }
 0x1cc   : >> { %3535 = vmatmul.bf16.gmra.mxu1 %v3395_v53  ;;  %v3322_v53 = vsel %vm12701_vm13, %v3320_v46, %v3321_v18  ;;  %v2883_v10 = vrot.slane %v2881_v42, 5  ;;  %v3169_v42 = vld [vmem:[#allocation2 + $0xc0] sm:$0xe] }
 0x1cd   : >> { %3106 = vmatmul.bf16.gmra.mxu0 %v2966_v48  ;;  %v2065_v32 = vpop.f32.mrf.mxu2  ;;  %v1948_v48 = vunpack.c.l.b16 %v1891_v28  ;;  %v3379_v15 = vunpack.c.l.b16 %v3322_v53  ;;  %v2967_v28 = vpack.c.b16 %v2950_v54, %v2949_v11  ;;  %v13134_v11 = vld [vmem:[#allocation2 + $0x1c] sm:$0xf] }
 0x1ce   : >> { %v2382_v51 = vpop.f32.mrf.mxu3  ;;  %v2130_v25 = vadd.f32 %v2065_v32, %v12865_v5  ;;  %v3319_v5 = vsel %vm12701_vm13, %v10890_v22, %v3318_v4  ;;  %v2893_v22 = vrot.slane %v2891_v27, 4  ;;  %v11925_v32 = vld [vmem:[#allocation2 + $0xb4] sm:$0xff]  ;;  %v1896_v27 = vrot.slane %v1894_v63, 4 }
 0x1cf   : >> { %v3378_v59 = vunpack.c.l.b16 %v3319_v5  ;;  %v1965_v18 = vpack.c.b16 %v1948_v48, %v1947_v49  ;;  %v2884_v5 = vor.u32 %v2883_v10, %v2880_v8  ;;  %v3901_v48 = vld [vmem:[#allocation2 + $0x18] sm:$0xf] }
 0x1d0   : >> { %v2447_v12 = vadd.f32 %v2382_v51, %v2130_v25  ;;  %v1751_v25 = vld [vmem:[#allocation2 + $0xb4] sm:$0xe]  ;;  %v2894_v53 = vor.u32 %v2893_v22, %v13127_v38 }
 0x1d1   : >> { %v13115_v40 = vpop.f32.mrf.mxu1  ;;  %v3396_v51 = vpack.c.b16 %v3379_v15, %v3378_v59  ;;  %v10664_v23 = vrot.slane %v1751_v25, 9  ;;  %v10891_v59 = vrot.slane %v3169_v42, 9 }
 0x1d2   : >> { %v3069_v26 = vpop.f32.mrf.mxu0  ;;  %v3132_v2 = vadd.f32 %v3067_v9, %v2447_v12  ;;  %v2516_v9 = vld [vmem:[#allocation2 + $0xc8] sm:$0x1]  ;;  %v3325_v12 = vrot.slane %v13107_v44, 5  ;;  %v2895_v8 = vrot.slane %v2894_v53, 4 }
 0x1d3   : >> { %v2897_v3 = vshll.u32 %v2516_v9, 16  ;;  %v3328_v44 = vrot.slane %v2516_v9, 5  ;;  %v1895_v22 = vsel %vm12701_vm13, %v10664_v23, %v1894_v63  ;;  %v3963_v9 = vshrl.u32 %v13134_v11, 16 }
 0x1d4   : >> { %v13125_v45 = vadd.f32 %v3496_v29, %v3132_v2  ;;  %v12179_v2 = vld [vmem:[#allocation2 + $0xbc] sm:$0x1]  ;;  %v3327_v15 = vrot.slane %v3325_v12, 4  ;;  %v1949_v63 = vunpack.c.l.b16 %v1895_v22  ;;  %v11926_v22 = vld [vmem:[#allocation2 + $0xc0] sm:$0xff] }
 0x1d5   : >> { %v2067_v4 = vpop.f32.mrf.mxu2  ;;  %v1897_v49 = vrot.slane %v12179_v2, 5  ;;  %v2899_v10 = vrot.slane %v2897_v3, 5 }
 0x1d6   : >> { %v2384_v58 = vpop.f32.mrf.mxu3  ;;  %v2131_v46 = vadd.f32 %v2067_v4, %v12883_v14 }
 0x1d7   : >> { %v2900_v53 = vsel %vm12341_vm10, %v2895_v8, %v2899_v10 }
 0x1d8   : >> { %v2448_v29 = vadd.f32 %v2384_v58, %v2131_v46  ;;  %v2885_v58 = vrot.slane %v2884_v5, 4  ;;  %v3950_v46 = vshrl.u32 %v3901_v48, 16 }
 0x1d9   : >> { %v3501_v35 = vpop.f32.mrf.mxu1 }
 0x1da   : >> { %v3072_v47 = vpop.f32.mrf.mxu0  ;;  %2109 = vmatmul.bf16.gmra.mxu2 %v1965_v18  ;;  %v13132_v14 = vadd.f32 %v3069_v26, %v2448_v29  ;;  %v3953_v18 = vshll.u32 %v3901_v48, 16  ;;  %v3326_v29 = vsel %vm12701_vm13, %v10891_v59, %v3325_v12  ;;  %v2890_v5 = vsel %vm12341_vm10, %v2885_v58, %v13127_v38  ;;  %v3903_v48 = vld [vmem:[#allocation2 + $0x20] sm:$0x1] }
 0x1db   : >> { %2426 = vmatmul.bf16.gmra.mxu3 %v11925_v32  ;;  %v1898_v32 = vsel %vm12701_vm13, %v1896_v27, %v1897_v49  ;;  %v3952_v23 = vrot.slane %v3950_v46, 4  ;;  %v3380_v2 = vunpack.c.l.b16 %v3326_v29  ;;  %v3965_v59 = vrot.slane %v3963_v9, 4 }
 0x1dc   : >> { %3540 = vmatmul.bf16.gmra.mxu1 %v3396_v51  ;;  %v3959_v51 = vshll.u32 %v13134_v11, 16  ;;  %v1950_v42 = vunpack.c.l.b16 %v1898_v32  ;;  %v3955_v27 = vrot.slane %v3953_v18, 5  ;;  %v4586_v18 = vld [vmem:[#allocation2 + $0x18] sm:$0xe]  ;;  %v4652_v32 = vrot.slane %v13134_v11, 5 }
 0x1dd   : >> { %3111 = vmatmul.bf16.gmra.mxu0 %v2967_v28  ;;  %v2070_v54 = vpop.f32.mrf.mxu2  ;;  %v3562_v0 = vadd.f32 %v13115_v40, %v13132_v14 }
 0x1de   : >> { %v2387_v4 = vpop.f32.mrf.mxu3  ;;  %v2132_v26 = vadd.f32 %v2070_v54, %v12891_v31  ;;  %v3329_v31 = vsel %vm12701_vm13, %v3327_v15, %v3328_v44  ;;  %v3961_v12 = vrot.slane %v3959_v51, 5  ;;  %v2951_v15 = vunpack.c.l.b16 %v2890_v5 }
 0x1df   : >> { %v3381_v49 = vunpack.c.l.b16 %v3329_v31  ;;  %v2952_v44 = vunpack.c.l.b16 %v2900_v53  ;;  %v1966_v58 = vpack.c.b16 %v1950_v42, %v1949_v63  ;;  %v3956_v8 = vor.u32 %v3955_v27, %v3952_v23  ;;  %v13158_v31 = vld [vmem:[#allocation2 + $0x28] sm:$0xf] }
 0x1e0   : >> { %v2449_v25 = vadd.f32 %v2387_v4, %v2132_v26  ;;  %v3966_v46 = vor.u32 %v3965_v59, %v3961_v12  ;;  %v11103_v53 = vrot.slane %v4586_v18, 9  ;;  %v4654_v42 = vrot.slane %v4652_v32, 4 }
 0x1e1   : >> { %v13143_v36 = vpop.f32.mrf.mxu1  ;;  %v3397_v10 = vpack.c.b16 %v3381_v49, %v3380_v2  ;;  %v2968_v51 = vpack.c.b16 %v2952_v44, %v2951_v15  ;;  %v4655_v23 = vrot.slane %v3903_v48, 5  ;;  %v3983_v2 = vshll.u32 %v13158_v31, 16 }
 0x1e2   : >> { %v3074_v28 = vpop.f32.mrf.mxu0  ;;  %v3134_v3 = vadd.f32 %v3072_v47, %v2449_v25  ;;  %v3969_v47 = vshll.u32 %v3903_v48, 16  ;;  %v3987_v49 = vshrl.u32 %v13158_v31, 16  ;;  %v4653_v48 = vsel %vm12701_vm13, %v11103_v53, %v4652_v32 }
 0x1e4   : >> { %v13154_v54 = vadd.f32 %v3501_v35, %v3134_v3  ;;  %v3904_v35 = vld [vmem:[#allocation2 + $0x24] sm:$0xf]  ;;  %v3971_v63 = vrot.slane %v3969_v47, 5  ;;  %v3967_v3 = vrot.slane %v3966_v46, 4  ;;  %v3985_v47 = vrot.slane %v3983_v2, 5 }
 0x1e5   : >> { %v2072_v4 = vpop.f32.mrf.mxu2  ;;  %v3974_v27 = vshrl.u32 %v3904_v35, 16  ;;  %v3977_v11 = vshll.u32 %v3904_v35, 16  ;;  %v3906_v46 = vld [vmem:[#allocation2 + $0x2c] sm:$0x1] }
 0x1e6   : >> { %v2389_v26 = vpop.f32.mrf.mxu3  ;;  %v2133_v38 = vadd.f32 %v2072_v4, %v12910_v16  ;;  %v3957_v16 = vrot.slane %v3956_v8, 4  ;;  %v3972_v4 = vsel %vm12341_vm10, %v3967_v3, %v3971_v63  ;;  %v3993_v53 = vshll.u32 %v3906_v46, 16 }
 0x1e7   : >> { %v3979_v8 = vrot.slane %v3977_v11, 5 }
 0x1e8   : >> { %v2450_v25 = vadd.f32 %v2389_v26, %v2133_v38  ;;  %v4656_v26 = vsel %vm12701_vm13, %v4654_v42, %v4655_v23  ;;  %v3976_v38 = vrot.slane %v3974_v27, 4  ;;  %v11951_v27 = vld [vmem:[#allocation2 + $0x18] sm:$0xff] }
 0x1e9   : >> { %v3506_v9 = vpop.f32.mrf.mxu1  ;;  %v4783_v35 = vunpack.c.l.b16 %v4656_v26  ;;  %v3907_v26 = vld [vmem:[#allocation2 + $0x30] sm:$0xf] }
 0x1ea   : >> { %v3077_v29 = vpop.f32.mrf.mxu0  ;;  %2114 = vmatmul.bf16.gmra.mxu2 %v1966_v58  ;;  %v13160_v5 = vadd.f32 %v3074_v28, %v2450_v25  ;;  %v3962_v28 = vsel %vm12341_vm10, %v3957_v16, %v3961_v12  ;;  %v4354_v25 = vunpack.c.l.b16 %v3972_v4  ;;  %v3980_v32 = vor.u32 %v3979_v8, %v3976_v38  ;;  %v13181_v38 = vld [vmem:[#allocation2 + $0x34] sm:$0xf] }
 0x1eb   : >> { %2431 = vmatmul.bf16.gmra.mxu3 %v11926_v22  ;;  %v4353_v12 = vunpack.c.l.b16 %v3962_v28  ;;  %v4659_v4 = vrot.slane %v13158_v31, 5  ;;  %v4662_v31 = vrot.slane %v3906_v46, 5 }
 0x1ec   : >> { %3545 = vmatmul.bf16.gmra.mxu1 %v3397_v10  ;;  %v3989_v10 = vrot.slane %v3987_v49, 4 }
 0x1ed   : >> { %3116 = vmatmul.bf16.gmra.mxu0 %v2968_v51  ;;  %v2075_v59 = vpop.f32.mrf.mxu2  ;;  %v4782_v51 = vunpack.c.l.b16 %v4653_v48  ;;  %v4385_v11 = vpack.c.b16 %v4354_v25, %v4353_v12  ;;  %v4587_v48 = vld [vmem:[#allocation2 + $0x24] sm:$0xe]  ;;  %v4661_v12 = vrot.slane %v4659_v4, 4  ;;  %v3998_v25 = vshrl.u32 %v3907_v26, 16 }
 0x1ee   : >> { %v2392_v15 = vpop.f32.mrf.mxu3  ;;  %v2134_v44 = vadd.f32 %v2075_v59, %v12920_v21  ;;  %v3990_v63 = vor.u32 %v3989_v10, %v3985_v47 }
 0x1ef   : >> { %v4814_v2 = vpack.c.b16 %v4783_v35, %v4782_v51  ;;  %v4001_v51 = vshll.u32 %v3907_v26, 16  ;;  %v4007_v35 = vshll.u32 %v13181_v38, 16 }
 0x1f0   : >> { %v2451_v58 = vadd.f32 %v2392_v15, %v2134_v44  ;;  %v3981_v15 = vrot.slane %v3980_v32, 4  ;;  %v3995_v44 = vrot.slane %v3993_v53, 5  ;;  %v4011_v32 = vshrl.u32 %v13181_v38, 16 }
 0x1f1   : >> { %v13173_v22 = vpop.f32.mrf.mxu1 }
 0x1f2   : >> { %v3079_v21 = vpop.f32.mrf.mxu0  ;;  %v3136_v18 = vadd.f32 %v3077_v29, %v2451_v58  ;;  %v3991_v29 = vrot.slane %v3990_v63, 4 }
 0x1f4   : >> { %v13175_v16 = vadd.f32 %v3506_v9, %v3136_v18  ;;  %v3996_v58 = vsel %vm12341_vm10, %v3991_v29, %v3995_v44  ;;  %v11104_v18 = vrot.slane %v4587_v48, 9 }
 0x1f5   : >> { %v2077_v3 = vpop.f32.mrf.mxu2 }
 0x1f6   : >> { %v2394_v42 = vpop.f32.mrf.mxu3  ;;  %v2135_v23 = vadd.f32 %v2077_v3, %v12940_v57  ;;  %v3986_v57 = vsel %vm12341_vm10, %v3981_v15, %v3985_v47  ;;  %v4356_v47 = vunpack.c.l.b16 %v3996_v58  ;;  %v3909_v15 = vld [vmem:[#allocation2 + $0x38] sm:$0x1] }
 0x1f7   : >> { %v4355_v53 = vunpack.c.l.b16 %v3986_v57 }
 0x1f8   : >> { %v2452_v49 = vadd.f32 %v2394_v42, %v2135_v23  ;;  %v4660_v42 = vsel %vm12701_vm13, %v11104_v18, %v4659_v4  ;;  %v4663_v23 = vsel %vm12701_vm13, %v4661_v12, %v4662_v31  ;;  %v4017_v12 = vshll.u32 %v3909_v15, 16 }
 0x1f9   : >> { %v3511_v59 = vpop.f32.mrf.mxu1  ;;  %v4784_v44 = vunpack.c.l.b16 %v4660_v42  ;;  %v4785_v48 = vunpack.c.l.b16 %v4663_v23  ;;  %v4386_v58 = vpack.c.b16 %v4356_v47, %v4355_v53  ;;  %v4669_v23 = vrot.slane %v3909_v15, 5 }
 0x1fa   : >> { %v3082_v28 = vpop.f32.mrf.mxu0  ;;  %3788 = vmatmul.bf16.vlgmr.msra.gmra.mxu2 %v11951_v27  ;;  %v13179_v9 = vadd.f32 %v3079_v21, %v2452_v49  ;;  %v4000_v27 = vrot.slane %v3998_v25, 4  ;;  %v4013_v49 = vrot.slane %v4011_v32, 4 }
 0x1fb   : >> { %4473 = vmatmul.bf16.vlgmr.msra.gmra.mxu3 %v4385_v11  ;;  %v4815_v25 = vpack.c.b16 %v4785_v48, %v4784_v44 }
 0x1fd   : >> { %4902 = vmatmul.bf16.vlgmr.msra.gmra.mxu0 %v4814_v2  ;;  %v2080_v8 = vpop.f32.mrf.mxu2  ;;  %v4009_v2 = vrot.slane %v4007_v35, 5 }
 0x1fe   : >> { %v2397_v10 = vpop.f32.mrf.mxu3  ;;  %v2136_v21 = vadd.f32 %v2080_v8, %v12728_v37  ;;  %v4003_v37 = vrot.slane %v4001_v51, 5  ;;  %v11952_v8 = vld [vmem:[#allocation2 + $0x24] sm:$0xff]  ;;  %v3910_v51 = vld [vmem:[#allocation2 + $0x3c] sm:$0xf] }
 0x1ff   : >> { %v4014_v18 = vor.u32 %v4013_v49, %v4009_v2 }
 0x200   : >> { %v2453_v63 = vadd.f32 %v2397_v10, %v2136_v21  ;;  %v4004_v10 = vor.u32 %v4003_v37, %v4000_v27  ;;  %v4588_v21 = vld [vmem:[#allocation2 + $0x30] sm:$0xe]  ;;  %v4022_v27 = vshrl.u32 %v3910_v51, 16 }
 0x201   : >> { %v13194_v11 = vpop.f32.mrf.mxu1  ;;  %v4015_v53 = vrot.slane %v4014_v18, 4  ;;  %v11105_v47 = vrot.slane %v4588_v21, 9 }
 0x202   : >> { %v3084_v3 = vpop.f32.mrf.mxu0  ;;  %v3138_v46 = vadd.f32 %v3082_v28, %v2453_v63  ;;  %v4666_v28 = vrot.slane %v13181_v38, 5  ;;  %v4005_v63 = vrot.slane %v4004_v10, 4 }
 0x204   : >> { %v13196_v29 = vadd.f32 %v3511_v59, %v3138_v46  ;;  %v13200_v59 = vld [vmem:[#allocation2 + $0x40] sm:$0xf]  ;;  %v4668_v42 = vrot.slane %v4666_v28, 4  ;;  %v4025_v46 = vshll.u32 %v3910_v51, 16  ;;  %v4667_v15 = vsel %vm12701_vm13, %v11105_v47, %v4666_v28 }
 0x205   : >> { %v2082_v26 = vpop.f32.mrf.mxu2  ;;  %v4031_v37 = vshll.u32 %v13200_v59, 16  ;;  %v4035_v49 = vshrl.u32 %v13200_v59, 16 }
 0x206   : >> { %v2399_v57 = vpop.f32.mrf.mxu3  ;;  %v2137_v4 = vadd.f32 %v2082_v26, %v12747_v30  ;;  %v4019_v30 = vrot.slane %v4017_v12, 5  ;;  %v4027_v10 = vrot.slane %v4025_v46, 5 }
 0x207   : >> { %v4033_v18 = vrot.slane %v4031_v37, 5  ;;  %v4037_v12 = vrot.slane %v4035_v49, 4 }
 0x208   : >> { %v2454_v31 = vadd.f32 %v2399_v57, %v2137_v4  ;;  %v4020_v57 = vsel %vm12341_vm10, %v4015_v53, %v4019_v30  ;;  %v4024_v4 = vrot.slane %v4022_v27, 4 }
 0x209   : >> { %v3516_v38 = vpop.f32.mrf.mxu1  ;;  %v4358_v51 = vunpack.c.l.b16 %v4020_v57  ;;  %v4038_v30 = vor.u32 %v4037_v12, %v4033_v18 }
 0x20a   : >> { %v3087_v35 = vpop.f32.mrf.mxu0  ;;  %3793 = vmatmul.bf16.gmra.mxu2 %v11952_v8  ;;  %v13202_v32 = vadd.f32 %v3084_v3, %v2454_v31  ;;  %v4010_v3 = vsel %vm12341_vm10, %v4005_v63, %v4009_v2  ;;  %v4786_v2 = vunpack.c.l.b16 %v4667_v15  ;;  %v4028_v53 = vor.u32 %v4027_v10, %v4024_v4  ;;  %v4589_v15 = vld [vmem:[#allocation2 + $0x3c] sm:$0xe]  ;;  %v13223_v4 = vld [vmem:[#allocation2 + $0x4c] sm:$0xf] }
 0x20b   : >> { %4478 = vmatmul.bf16.gmra.mxu3 %v4386_v58  ;;  %v4670_v58 = vsel %vm12701_vm13, %v4668_v42, %v4669_v23  ;;  %v4357_v21 = vunpack.c.l.b16 %v4010_v3  ;;  %v11953_v23 = vld [vmem:[#allocation2 + $0x30] sm:$0xff]  ;;  %v11106_v12 = vrot.slane %v4589_v15, 9 }
 0x20c   : >> { %v4787_v63 = vunpack.c.l.b16 %v4670_v58  ;;  %v3913_v58 = vld [vmem:[#allocation2 + $0x48] sm:$0xf] }
 0x20d   : >> { %4907 = vmatmul.bf16.gmra.mxu0 %v4815_v25  ;;  %v2085_v44 = vpop.f32.mrf.mxu2  ;;  %v3912_v25 = vld [vmem:[#allocation2 + $0x44] sm:$0x1]  ;;  %v4387_v27 = vpack.c.b16 %v4358_v51, %v4357_v21  ;;  %v4046_v21 = vshrl.u32 %v3913_v58, 16  ;;  %v4049_v51 = vshll.u32 %v3913_v58, 16 }
 0x20e   : >> { %v2402_v48 = vpop.f32.mrf.mxu3  ;;  %v2138_v26 = vadd.f32 %v2085_v44, %v12752_v6  ;;  %v4041_v28 = vshll.u32 %v3912_v25, 16  ;;  %v4816_v37 = vpack.c.b16 %v4787_v63, %v4786_v2  ;;  %v4055_v2 = vshll.u32 %v13223_v4, 16 }
 0x20f   : >> { %v4059_v63 = vshrl.u32 %v13223_v4, 16 }
 0x210   : >> { %v2455_v8 = vadd.f32 %v2402_v48, %v2138_v26  ;;  %v4039_v48 = vrot.slane %v4038_v30, 4  ;;  %v4043_v26 = vrot.slane %v4041_v28, 5 }
 0x211   : >> { %v13218_v46 = vpop.f32.mrf.mxu1 }
 0x212   : >> { %v3089_v31 = vpop.f32.mrf.mxu0  ;;  %v3140_v6 = vadd.f32 %v3087_v35, %v2455_v8  ;;  %v4029_v35 = vrot.slane %v4028_v53, 4 }
 0x214   : >> { %v13215_v44 = vadd.f32 %v3516_v38, %v3140_v6  ;;  %v4673_v38 = vrot.slane %v13200_v59, 5  ;;  %v4676_v59 = vrot.slane %v3912_v25, 5  ;;  %v4048_v25 = vrot.slane %v4046_v21, 4  ;;  %v4590_v21 = vld [vmem:[#allocation2 + $0x48] sm:$0xe] }
 0x215   : >> { %v2087_v47 = vpop.f32.mrf.mxu2 }
 0x216   : >> { %v2404_v43 = vpop.f32.mrf.mxu3  ;;  %v2139_v42 = vadd.f32 %v2087_v47, %v12774_v34  ;;  %v4034_v34 = vsel %vm12341_vm10, %v4029_v35, %v4033_v18  ;;  %v4675_v6 = vrot.slane %v4673_v38, 4  ;;  %v3915_v35 = vld [vmem:[#allocation2 + $0x50] sm:$0x1] }
 0x217   : >> { %v4359_v30 = vunpack.c.l.b16 %v4034_v34 }
 0x218   : >> { %v2456_v49 = vadd.f32 %v2404_v43, %v2139_v42  ;;  %v4044_v43 = vsel %vm12341_vm10, %v4039_v48, %v4043_v26  ;;  %v4674_v42 = vsel %vm12701_vm13, %v11106_v12, %v4673_v38 }
 0x219   : >> { %v3521_v18 = vpop.f32.mrf.mxu1  ;;  %v4360_v47 = vunpack.c.l.b16 %v4044_v43  ;;  %v4788_v26 = vunpack.c.l.b16 %v4674_v42 }
 0x21a   : >> { %v3092_v3 = vpop.f32.mrf.mxu0  ;;  %3798 = vmatmul.bf16.gmra.mxu2 %v11953_v23  ;;  %v13221_v57 = vadd.f32 %v3089_v31, %v2456_v49  ;;  %v4677_v23 = vsel %vm12701_vm13, %v4675_v6, %v4676_v59  ;;  %v4061_v49 = vrot.slane %v4059_v63, 4  ;;  %v4680_v6 = vrot.slane %v13223_v4, 5  ;;  %v13240_v63 = vld [vmem:[#allocation2 + $0x58] sm:$0xf] }
 0x21b   : >> { %4483 = vmatmul.bf16.gmra.mxu3 %v4387_v27  ;;  %v4789_v15 = vunpack.c.l.b16 %v4677_v23  ;;  %v4683_v23 = vrot.slane %v3915_v35, 5 }
 0x21c   : >> { %v4682_v42 = vrot.slane %v4680_v6, 4 }
 0x21d   : >> { %4912 = vmatmul.bf16.gmra.mxu0 %v4816_v37  ;;  %v2090_v8 = vpop.f32.mrf.mxu2  ;;  %v4051_v37 = vrot.slane %v4049_v51, 5  ;;  %v4817_v59 = vpack.c.b16 %v4789_v15, %v4788_v26  ;;  %v3916_v51 = vld [vmem:[#allocation2 + $0x54] sm:$0xf] }
 0x21e   : >> { %v2407_v10 = vpop.f32.mrf.mxu3  ;;  %v2140_v31 = vadd.f32 %v2090_v8, %v12784_v17  ;;  %v4057_v17 = vrot.slane %v4055_v2, 5  ;;  %v4388_v8 = vpack.c.b16 %v4360_v47, %v4359_v30  ;;  %v11107_v47 = vrot.slane %v4590_v21, 9 }
 0x21f   : >> { %v4052_v38 = vor.u32 %v4051_v37, %v4048_v25  ;;  %v4070_v25 = vshrl.u32 %v3916_v51, 16  ;;  %v4073_v4 = vshll.u32 %v3916_v51, 16  ;;  %v4083_v37 = vshrl.u32 %v13240_v63, 16 }
 0x220   : >> { %v2457_v53 = vadd.f32 %v2407_v10, %v2140_v31  ;;  %v11954_v10 = vld [vmem:[#allocation2 + $0x3c] sm:$0xff]  ;;  %v4062_v12 = vor.u32 %v4061_v49, %v4057_v17  ;;  %v4065_v31 = vshll.u32 %v3915_v35, 16  ;;  %v4681_v35 = vsel %vm12701_vm13, %v11107_v47, %v4680_v6 }
 0x221   : >> { %v4053_v30 = vrot.slane %v4052_v38, 4  ;;  %v4790_v21 = vunpack.c.l.b16 %v4681_v35  ;;  %v3919_v35 = vld [vmem:[#allocation2 + $0x60] sm:$0xf] }
 0x222   : >> { %v3094_v28 = vpop.f32.mrf.mxu0  ;;  %v3142_v27 = vadd.f32 %v3092_v3, %v2457_v53 }
 0x224   : >> { %v13236_v48 = vadd.f32 %v3521_v18, %v3142_v27  ;;  %v4063_v18 = vrot.slane %v4062_v12, 4  ;;  %v4079_v27 = vshll.u32 %v13240_v63, 16  ;;  %v4085_v12 = vrot.slane %v4083_v37, 4 }
 0x225   : >> { %v2092_v58 = vpop.f32.mrf.mxu2 }
 0x226   : >> { %v2409_v34 = vpop.f32.mrf.mxu3  ;;  %v2141_v43 = vadd.f32 %v2092_v58, %v12804_v55  ;;  %v4067_v55 = vrot.slane %v4065_v31, 5  ;;  %v4081_v38 = vrot.slane %v4079_v27, 5 }
 0x228   : >> { %v2458_v3 = vadd.f32 %v2409_v34, %v2141_v43  ;;  %v4068_v58 = vsel %vm12341_vm10, %v4063_v18, %v4067_v55  ;;  %v4684_v34 = vsel %vm12701_vm13, %v4682_v42, %v4683_v23  ;;  %v4086_v18 = vor.u32 %v4085_v12, %v4081_v38  ;;  %v11955_v23 = vld [vmem:[#allocation2 + $0x48] sm:$0xff] }
 0x229   : >> { %v4791_v51 = vunpack.c.l.b16 %v4684_v34  ;;  %v13261_v34 = vld [vmem:[#allocation2 + $0x64] sm:$0xf] }
 0x22a   : >> { %v3097_v2 = vpop.f32.mrf.mxu0  ;;  %3803 = vmatmul.bf16.gmra.mxu2 %v11954_v10  ;;  %v13242_v53 = vadd.f32 %v3094_v28, %v2458_v3  ;;  %v4058_v28 = vsel %vm12341_vm10, %v4053_v30, %v4057_v17  ;;  %v4075_v10 = vrot.slane %v4073_v4, 5  ;;  %v3918_v3 = vld [vmem:[#allocation2 + $0x5c] sm:$0x1]  ;;  %v4362_v17 = vunpack.c.l.b16 %v4068_v58  ;;  %v4591_v58 = vld [vmem:[#allocation2 + $0x54] sm:$0xe] }
 0x22b   : >> { %4488 = vmatmul.bf16.gmra.mxu3 %v4388_v8  ;;  %v4072_v8 = vrot.slane %v4070_v25, 4  ;;  %v4089_v55 = vshll.u32 %v3918_v3, 16  ;;  %v4818_v4 = vpack.c.b16 %v4791_v51, %v4790_v21  ;;  %v11108_v12 = vrot.slane %v4591_v58, 9 }
 0x22c   : >> { %v4097_v21 = vshll.u32 %v3919_v35, 16  ;;  %v4103_v51 = vshll.u32 %v13261_v34, 16 }
 0x22d   : >> { %4917 = vmatmul.bf16.gmra.mxu0 %v4817_v59  ;;  %v2095_v49 = vpop.f32.mrf.mxu2  ;;  %v4361_v59 = vunpack.c.l.b16 %v4058_v28  ;;  %v4076_v30 = vor.u32 %v4075_v10, %v4072_v8 }
 0x22e   : >> { %v2412_v26 = vpop.f32.mrf.mxu3  ;;  %v2142_v15 = vadd.f32 %v2095_v49, %v12809_v20  ;;  %v4087_v49 = vrot.slane %v4086_v18, 4 }
 0x22f   : >> { %v4389_v25 = vpack.c.b16 %v4362_v17, %v4361_v59  ;;  %v4077_v37 = vrot.slane %v4076_v30, 4  ;;  %v4094_v17 = vshrl.u32 %v3919_v35, 16  ;;  %v4107_v30 = vshrl.u32 %v13261_v34, 16 }
 0x230   : >> { %v2459_v43 = vadd.f32 %v2412_v26, %v2142_v15  ;;  %v4091_v26 = vrot.slane %v4089_v55, 5  ;;  %v4687_v15 = vrot.slane %v13240_v63, 5  ;;  %v4690_v63 = vrot.slane %v3918_v3, 5 }
 0x232   : >> { %v3099_v31 = vpop.f32.mrf.mxu0  ;;  %v13255_v20 = vadd.f32 %v3097_v2, %v2459_v43  ;;  %v4092_v8 = vsel %vm12341_vm10, %v4087_v49, %v4091_v26  ;;  %v4689_v59 = vrot.slane %v4687_v15, 4 }
 0x235   : >> { %v2097_v6 = vpop.f32.mrf.mxu2 }
 0x236   : >> { %v2414_v47 = vpop.f32.mrf.mxu3  ;;  %v2143_v42 = vadd.f32 %v2097_v6, %v12831_v33  ;;  %v4082_v33 = vsel %vm12341_vm10, %v4077_v37, %v4081_v38  ;;  %v4364_v38 = vunpack.c.l.b16 %v4092_v8  ;;  %v11956_v8 = vld [vmem:[#allocation2 + $0x54] sm:$0xff] }
 0x237   : >> { %v4363_v55 = vunpack.c.l.b16 %v4082_v33 }
 0x238   : >> { %v2460_v27 = vadd.f32 %v2414_v47, %v2143_v42  ;;  %v4688_v47 = vsel %vm12701_vm13, %v11108_v12, %v4687_v15  ;;  %v4691_v42 = vsel %vm12701_vm13, %v4689_v59, %v4690_v63  ;;  %v4694_v12 = vrot.slane %v13261_v34, 5  ;;  %v4592_v63 = vld [vmem:[#allocation2 + $0x60] sm:$0xe] }
 0x239   : >> { %v4792_v37 = vunpack.c.l.b16 %v4688_v47  ;;  %v4793_v49 = vunpack.c.l.b16 %v4691_v42  ;;  %v4390_v35 = vpack.c.b16 %v4364_v38, %v4363_v55  ;;  %v11109_v55 = vrot.slane %v4592_v63, 9 }
 0x23a   : >> { %v3102_v2 = vpop.f32.mrf.mxu0  ;;  %3808 = vmatmul.bf16.gmra.mxu2 %v11955_v23  ;;  %v13259_v28 = vadd.f32 %v3099_v31, %v2460_v27  ;;  %v4096_v23 = vrot.slane %v4094_v17, 4  ;;  %v3921_v27 = vld [vmem:[#allocation2 + $0x68] sm:$0x1]  ;;  %v3922_v17 = vld [vmem:[#allocation2 + $0x6c] sm:$0xf]  ;;  %v4696_v38 = vrot.slane %v4694_v12, 4 }
 0x23b   : >> { %4493 = vmatmul.bf16.gmra.mxu3 %v4389_v25  ;;  %v4099_v25 = vrot.slane %v4097_v21, 5  ;;  %v13278_v21 = vld [vmem:[#allocation2 + $0x70] sm:$0xf]  ;;  %v4697_v47 = vrot.slane %v3921_v27, 5  ;;  %v4118_v42 = vshrl.u32 %v3922_v17, 16  ;;  %v4121_v34 = vshll.u32 %v3922_v17, 16 }
 0x23c   : >> { %15733 = vst [vmem:[#allocation19_spill] sm:$0xff] %v13259_v28 }
 0x23d   : >> { %4922 = vmatmul.bf16.gmra.mxu0 %v4818_v4  ;;  %v2100_v43 = vpop.f32.mrf.mxu2  ;;  %v4109_v4 = vrot.slane %v4107_v30, 4 }
 0x23e   : >> { %v2417_v10 = vpop.f32.mrf.mxu3  ;;  %v2144_v31 = vadd.f32 %v2100_v43, %v12841_v61  ;;  %v4105_v61 = vrot.slane %v4103_v51, 5  ;;  %v4100_v43 = vor.u32 %v4099_v25, %v4096_v23  ;;  %v4127_v23 = vshll.u32 %v13278_v21, 16 }
 0x23f   : >> { %v4131_v25 = vshrl.u32 %v13278_v21, 16 }
 0x240   : >> { %v2461_v18 = vadd.f32 %v2417_v10, %v2144_v31  ;;  %v4110_v15 = vor.u32 %v4109_v4, %v4105_v61  ;;  %v4113_v10 = vshll.u32 %v3921_v27, 16  ;;  %v4101_v30 = vrot.slane %v4100_v43, 4 }
 0x241   : >> { %v4695_v27 = vsel %vm12701_vm13, %v11109_v55, %v4694_v12  ;;  %v4123_v43 = vrot.slane %v4121_v34, 5 }
 0x242   : >> { %v3104_v6 = vpop.f32.mrf.mxu0  ;;  %v13274_v3 = vadd.f32 %v3102_v2, %v2461_v18  ;;  %v4819_v2 = vpack.c.b16 %v4793_v49, %v4792_v37  ;;  %v4111_v18 = vrot.slane %v4110_v15, 4  ;;  %v15736_v49 = vld [vmem:[#allocation10_spill] sm:$0xff]  ;;  %v4129_v15 = vrot.slane %v4127_v23, 5 }
 0x244   : >> { %15734 = vst [vmem:[#allocation20_spill] sm:$0xff] %v13274_v3 }
 0x245   : >> { %v2102_v26 = vpop.f32.mrf.mxu2 }
 0x246   : >> { %v2419_v58 = vpop.f32.mrf.mxu3  ;;  %v2145_v33 = vadd.f32 %v2102_v26, %v12861_v62  ;;  %v4115_v62 = vrot.slane %v4113_v10, 5  ;;  %v4133_v10 = vrot.slane %v4131_v25, 4 }
 0x248   : >> { %v2462_v59 = vadd.f32 %v2419_v58, %v2145_v33  ;;  %v4116_v58 = vsel %vm12341_vm10, %v4111_v18, %v4115_v62  ;;  %v4120_v33 = vrot.slane %v4118_v42, 4  ;;  %v4134_v62 = vor.u32 %v4133_v10, %v4129_v15 }
 0x24a   : >> { %v3107_v31 = vpop.f32.mrf.mxu0  ;;  %3813 = vmatmul.bf16.gmra.mxu2 %v11956_v8  ;;  %v13280_v51 = vadd.f32 %v3104_v6, %v2462_v59  ;;  %v4106_v6 = vsel %vm12341_vm10, %v4101_v30, %v4105_v61  ;;  %v4366_v61 = vunpack.c.l.b16 %v4116_v58  ;;  %v4794_v30 = vunpack.c.l.b16 %v4695_v27  ;;  %v4593_v27 = vld [vmem:[#allocation2 + $0x6c] sm:$0xe] }
 0x24b   : >> { %4498 = vmatmul.bf16.gmra.mxu3 %v4390_v35  ;;  %v4698_v35 = vsel %vm12701_vm13, %v4696_v38, %v4697_v47  ;;  %v4365_v17 = vunpack.c.l.b16 %v4106_v6  ;;  %v4124_v18 = vor.u32 %v4123_v43, %v4120_v33  ;;  %v11957_v47 = vld [vmem:[#allocation2 + $0x60] sm:$0xff]  ;;  %v4701_v6 = vrot.slane %v13278_v21, 5  ;;  %v13299_v33 = vld [vmem:[#allocation2 + $0x7c] sm:$0xf] }
 0x24c   : >> { %15735 = vst [vmem:[#allocation21_spill] sm:$0xff] %v13280_v51  ;;  %v11965_v51 = vld [vmem:[#allocation2 + $0xc0] sm:$0xff] }
 0x24d   : >> { %4927 = vmatmul.bf16.gmra.mxu0 %v4819_v2  ;;  %v2105_v4 = vpop.f32.mrf.mxu2  ;;  %v3924_v2 = vld [vmem:[#allocation2 + $0x74] sm:$0x1]  ;;  %v4391_v42 = vpack.c.b16 %v4366_v61, %v4365_v17  ;;  %v4125_v25 = vrot.slane %v4124_v18, 4  ;;  %v11110_v17 = vrot.slane %v4593_v27, 9  ;;  %v4703_v61 = vrot.slane %v4701_v6, 4 }
 0x24e   : >> { %v2422_v37 = vpop.f32.mrf.mxu3  ;;  %v2146_v26 = vadd.f32 %v2105_v4, %v15736_v49  ;;  %v4795_v4 = vunpack.c.l.b16 %v4698_v35  ;;  %v4137_v49 = vshll.u32 %v3924_v2, 16  ;;  %v3925_v35 = vld [vmem:[#allocation2 + $0x78] sm:$0xf]  ;;  %v4704_v21 = vrot.slane %v3924_v2, 5 }
 0x24f   : >> { %v4145_v18 = vshll.u32 %v3925_v35, 16 }
 0x250   : >> { %v2463_v8 = vadd.f32 %v2422_v37, %v2146_v26  ;;  %v4820_v34 = vpack.c.b16 %v4795_v4, %v4794_v30  ;;  %v4135_v37 = vrot.slane %v4134_v62, 4  ;;  %v4139_v26 = vrot.slane %v4137_v49, 5  ;;  %v15740_v4 = vld [vmem:[#allocation12_spill] sm:$0xff] }
 0x251   : >> { %v4142_v30 = vshrl.u32 %v3925_v35, 16  ;;  %v4151_v62 = vshll.u32 %v13299_v33, 16  ;;  %v4155_v49 = vshrl.u32 %v13299_v33, 16 }
 0x252   : >> { %v3109_v59 = vpop.f32.mrf.mxu0  ;;  %v13293_v63 = vadd.f32 %v3107_v31, %v2463_v8  ;;  %v4140_v8 = vsel %vm12341_vm10, %v4135_v37, %v4139_v26  ;;  %v3927_v26 = vld [vmem:[#allocation2 + $0x80] sm:$0x1] }
 0x253   : >> { %v4157_v37 = vrot.slane %v4155_v49, 4  ;;  %v13316_v49 = vld [vmem:[#allocation2 + $0x88] sm:$0xf] }
 0x254   : >> { %15737 = vst [vmem:[#allocation10_spill] sm:$0xff] %v13293_v63 }
 0x255   : >> { %v2107_v12 = vpop.f32.mrf.mxu2 }
 0x256   : >> { %v2424_v55 = vpop.f32.mrf.mxu3  ;;  %v2147_v38 = vadd.f32 %v2107_v12, %v15738_v52  ;;  %v4130_v52 = vsel %vm12341_vm10, %v4125_v25, %v4129_v15  ;;  %v4368_v15 = vunpack.c.l.b16 %v4140_v8  ;;  %v4153_v25 = vrot.slane %v4151_v62, 5 }
 0x258   : >> { %v2464_v23 = vadd.f32 %v2424_v55, %v2147_v38  ;;  %v4367_v55 = vunpack.c.l.b16 %v4130_v52 }
 0x25a   : >> { %v3112_v31 = vpop.f32.mrf.mxu0  ;;  %3818 = vmatmul.bf16.gmra.mxu2 %v11957_v47  ;;  %v13297_v58 = vadd.f32 %v3109_v59, %v2464_v23  ;;  %v4702_v47 = vsel %vm12701_vm13, %v11110_v17, %v4701_v6  ;;  %v4147_v23 = vrot.slane %v4145_v18, 5  ;;  %v4392_v52 = vpack.c.b16 %v4368_v15, %v4367_v55  ;;  %v3928_v18 = vld [vmem:[#allocation2 + $0x84] sm:$0xf] }
 0x25b   : >> { %4503 = vmatmul.bf16.gmra.mxu3 %v4391_v42  ;;  %v4705_v42 = vsel %vm12701_vm13, %v4703_v61, %v4704_v21  ;;  %v4796_v27 = vunpack.c.l.b16 %v4702_v47  ;;  %v4158_v6 = vor.u32 %v4157_v37, %v4153_v25  ;;  %v4161_v17 = vshll.u32 %v3927_v26, 16 }
 0x25c   : >> { %15739 = vst [vmem:[#allocation11_spill] sm:$0xff] %v13297_v58  ;;  %v4797_v35 = vunpack.c.l.b16 %v4705_v42  ;;  %v4708_v61 = vrot.slane %v13299_v33, 5  ;;  %v4166_v37 = vshrl.u32 %v3928_v18, 16  ;;  %v4169_v33 = vshll.u32 %v3928_v18, 16  ;;  %v3930_v18 = vld [vmem:[#allocation2 + $0x8c] sm:$0x1] }
 0x25d   : >> { %4932 = vmatmul.bf16.gmra.mxu0 %v4820_v34  ;;  %v2110_v43 = vpop.f32.mrf.mxu2  ;;  %v4144_v34 = vrot.slane %v4142_v30, 4  ;;  %v4594_v30 = vld [vmem:[#allocation2 + $0x78] sm:$0xe]  ;;  %v4159_v15 = vrot.slane %v4158_v6, 4  ;;  %v4163_v47 = vrot.slane %v4161_v17, 5  ;;  %v15746_v58 = vld [vmem:[#allocation15_spill] sm:$0xff] }
 0x25e   : >> { %v2427_v10 = vpop.f32.mrf.mxu3  ;;  %v2148_v59 = vadd.f32 %v2110_v43, %v15740_v4  ;;  %v15742_v4 = vld [vmem:[#allocation13_spill] sm:$0xff]  ;;  %v11111_v42 = vrot.slane %v4594_v30, 9  ;;  %v4171_v17 = vrot.slane %v4169_v33, 5 }
 0x25f   : >> { %v4148_v50 = vor.u32 %v4147_v23, %v4144_v34  ;;  %v4710_v34 = vrot.slane %v4708_v61, 4  ;;  %v4711_v23 = vrot.slane %v3927_v26, 5 }
 0x260   : >> { %v2465_v12 = vadd.f32 %v2427_v10, %v2148_v59  ;;  %v11958_v59 = vld [vmem:[#allocation2 + $0x6c] sm:$0xff]  ;;  %v4709_v26 = vsel %vm12701_vm13, %v11111_v42, %v4708_v61 }
 0x261   : >> { %v4149_v55 = vrot.slane %v4148_v50, 4  ;;  %v4164_v50 = vsel %vm12341_vm10, %v4159_v15, %v4163_v47 }
 0x262   : >> { %v3114_v38 = vpop.f32.mrf.mxu0  ;;  %v13312_v2 = vadd.f32 %v3112_v31, %v2465_v12  ;;  %v4821_v31 = vpack.c.b16 %v4797_v35, %v4796_v27  ;;  %v4175_v27 = vshll.u32 %v13316_v49, 16  ;;  %v4179_v35 = vshrl.u32 %v13316_v49, 16 }
 0x264   : >> { %15741 = vst [vmem:[#allocation12_spill] sm:$0xff] %v13312_v2  ;;  %v4185_v2 = vshll.u32 %v3930_v18, 16 }
 0x265   : >> { %v2112_v43 = vpop.f32.mrf.mxu2 }
 0x266   : >> { %v2429_v10 = vpop.f32.mrf.mxu3  ;;  %v2149_v8 = vadd.f32 %v2112_v43, %v15742_v4  ;;  %v15744_v4 = vld [vmem:[#allocation14_spill] sm:$0xff] }
 0x268   : >> { %v2466_v21 = vadd.f32 %v2429_v10, %v2149_v8 }
 0x26a   : >> { %v3117_v62 = vpop.f32.mrf.mxu0  ;;  %3823 = vmatmul.bf16.gmra.mxu2 %v11958_v59  ;;  %v13318_v12 = vadd.f32 %v3114_v38, %v2466_v21  ;;  %v4154_v38 = vsel %vm12341_vm10, %v4149_v55, %v4153_v25  ;;  %v4168_v59 = vrot.slane %v4166_v37, 4  ;;  %v4177_v21 = vrot.slane %v4175_v27, 5 }
 0x26b   : >> { %4508 = vmatmul.bf16.gmra.mxu3 %v4392_v52  ;;  %v4712_v52 = vsel %vm12701_vm13, %v4710_v34, %v4711_v23  ;;  %v4370_v25 = vunpack.c.l.b16 %v4164_v50  ;;  %v4798_v55 = vunpack.c.l.b16 %v4709_v26  ;;  %v11959_v23 = vld [vmem:[#allocation2 + $0x78] sm:$0xff]  ;;  %v4595_v26 = vld [vmem:[#allocation2 + $0x84] sm:$0xe] }
 0x26c   : >> { %15743 = vst [vmem:[#allocation13_spill] sm:$0xff] %v13318_v12  ;;  %v4799_v12 = vunpack.c.l.b16 %v4712_v52  ;;  %v4172_v15 = vor.u32 %v4171_v17, %v4168_v59  ;;  %v3931_v52 = vld [vmem:[#allocation2 + $0x90] sm:$0xf]  ;;  %v13337_v59 = vld [vmem:[#allocation2 + $0x94] sm:$0xf]  ;;  %v11112_v17 = vrot.slane %v4595_v26, 9 }
 0x26d   : >> { %4937 = vmatmul.bf16.gmra.mxu0 %v4821_v31  ;;  %v2115_v43 = vpop.f32.mrf.mxu2  ;;  %v4181_v31 = vrot.slane %v4179_v35, 4 }
 0x26e   : >> { %v2432_v10 = vpop.f32.mrf.mxu3  ;;  %v2150_v8 = vadd.f32 %v2115_v43, %v15744_v4  ;;  %v4369_v4 = vunpack.c.l.b16 %v4154_v38  ;;  %v4822_v33 = vpack.c.b16 %v4799_v12, %v4798_v55  ;;  %v4173_v35 = vrot.slane %v4172_v15, 4 }
 0x26f   : >> { %v4182_v47 = vor.u32 %v4181_v31, %v4177_v21  ;;  %v4715_v38 = vrot.slane %v13316_v49, 5  ;;  %v4718_v49 = vrot.slane %v3930_v18, 5  ;;  %v4199_v55 = vshll.u32 %v13337_v59, 16 }
 0x270   : >> { %v2467_v6 = vadd.f32 %v2432_v10, %v2150_v8  ;;  %v4393_v37 = vpack.c.b16 %v4370_v25, %v4369_v4  ;;  %v4187_v8 = vrot.slane %v4185_v2, 5  ;;  %v4190_v4 = vshrl.u32 %v3931_v52, 16 }
 0x271   : >> { %v4183_v10 = vrot.slane %v4182_v47, 4  ;;  %v4717_v31 = vrot.slane %v4715_v38, 4  ;;  %v4193_v25 = vshll.u32 %v3931_v52, 16  ;;  %v4203_v15 = vshrl.u32 %v13337_v59, 16 }
 0x272   : >> { %v3119_v30 = vpop.f32.mrf.mxu0  ;;  %v13331_v43 = vadd.f32 %v3117_v62, %v2467_v6 }
 0x273   : >> { %v4188_v12 = vsel %vm12341_vm10, %v4183_v10, %v4187_v8 }
 0x274   : >> { %15745 = vst [vmem:[#allocation14_spill] sm:$0xff] %v13331_v43 }
 0x275   : >> { %v2117_v61 = vpop.f32.mrf.mxu2 }
 0x276   : >> { %v2434_v42 = vpop.f32.mrf.mxu3  ;;  %v2151_v34 = vadd.f32 %v2117_v61, %v15746_v58  ;;  %v4178_v58 = vsel %vm12341_vm10, %v4173_v35, %v4177_v21  ;;  %v4372_v21 = vunpack.c.l.b16 %v4188_v12  ;;  %v3933_v35 = vld [vmem:[#allocation2 + $0x98] sm:$0x1] }
 0x277   : >> { %v4371_v61 = vunpack.c.l.b16 %v4178_v58 }
 0x278   : >> { %v2468_v27 = vadd.f32 %v2434_v42, %v2151_v34  ;;  %v4716_v34 = vsel %vm12701_vm13, %v11112_v17, %v4715_v38  ;;  %v4209_v17 = vshll.u32 %v3933_v35, 16 }
 0x279   : >> { %v4800_v10 = vunpack.c.l.b16 %v4716_v34  ;;  %v4394_v58 = vpack.c.b16 %v4372_v21, %v4371_v61 }
 0x27a   : >> { %v4903_v62 = vpop.f32.mrf.mxu0  ;;  %3828 = vmatmul.bf16.gmra.mxu2 %v11959_v23  ;;  %v13335_v50 = vadd.f32 %v3119_v30, %v2468_v27  ;;  %v4719_v23 = vsel %vm12701_vm13, %v4717_v31, %v4718_v49  ;;  %v4205_v27 = vrot.slane %v4203_v15, 4  ;;  %v4722_v31 = vrot.slane %v13337_v59, 5 }
 0x27b   : >> { %4513 = vmatmul.bf16.gmra.mxu3 %v4393_v37  ;;  %v4192_v37 = vrot.slane %v4190_v4, 4  ;;  %v4801_v8 = vunpack.c.l.b16 %v4719_v23  ;;  %v4596_v4 = vld [vmem:[#allocation2 + $0x90] sm:$0xe]  ;;  %v4725_v23 = vrot.slane %v3933_v35, 5 }
 0x27c   : >> { %15747 = vst [vmem:[#allocation15_spill] sm:$0xff] %v13335_v50  ;;  %v11113_v21 = vrot.slane %v4596_v4, 9  ;;  %v4724_v34 = vrot.slane %v4722_v31, 4 }
 0x27d   : >> { %4942 = vmatmul.bf16.gmra.mxu0 %v4822_v33  ;;  %v3789_v6 = vpop.f32.mrf.mxu2  ;;  %v4195_v33 = vrot.slane %v4193_v25, 5 }
 0x27e   : >> { %v4474_v2 = vpop.f32.mrf.mxu3  ;;  %v3869_v30 = vadd.f32 %v3789_v6, %v12970_v60  ;;  %v4201_v60 = vrot.slane %v4199_v55, 5  ;;  %v11960_v6 = vld [vmem:[#allocation2 + $0x84] sm:$0xff]  ;;  %v13354_v55 = vld [vmem:[#allocation2 + $0xa0] sm:$0xf]  ;;  %v4723_v35 = vsel %vm12701_vm13, %v11113_v21, %v4722_v31 }
 0x280   : >> { %v4554_v47 = vadd.f32 %v4474_v2, %v3869_v30  ;;  %v4196_v2 = vor.u32 %v4195_v33, %v4192_v37  ;;  %v4206_v38 = vor.u32 %v4205_v27, %v4201_v60  ;;  %v3934_v30 = vld [vmem:[#allocation2 + $0x9c] sm:$0xf]  ;;  %v4223_v33 = vshll.u32 %v13354_v55, 16 }
 0x281   : >> { %v4214_v37 = vshrl.u32 %v3934_v30, 16  ;;  %v4217_v59 = vshll.u32 %v3934_v30, 16  ;;  %v4227_v27 = vshrl.u32 %v13354_v55, 16  ;;  %v4802_v30 = vunpack.c.l.b16 %v4723_v35  ;;  %v4597_v35 = vld [vmem:[#allocation2 + $0x9c] sm:$0xe] }
 0x282   : >> { %v4905_v42 = vpop.f32.mrf.mxu0  ;;  %v13350_v18 = vadd.f32 %v4903_v62, %v4554_v47  ;;  %v4823_v62 = vpack.c.b16 %v4801_v8, %v4800_v10  ;;  %v4197_v47 = vrot.slane %v4196_v2, 4  ;;  %v4207_v61 = vrot.slane %v4206_v38, 4 }
 0x283   : >> { %v4219_v2 = vrot.slane %v4217_v59, 5  ;;  %v4225_v38 = vrot.slane %v4223_v33, 5 }
 0x284   : >> { %15748 = vst [vmem:[#allocation22_spill] sm:$0xff] %v13350_v18 }
 0x285   : >> { %v3791_v26 = vpop.f32.mrf.mxu2 }
 0x286   : >> { %v4476_v52 = vpop.f32.mrf.mxu3  ;;  %v3870_v12 = vadd.f32 %v3791_v26, %v12976_v56  ;;  %v4211_v56 = vrot.slane %v4209_v17, 5  ;;  %v4202_v26 = vsel %vm12341_vm10, %v4197_v47, %v4201_v60  ;;  %v4229_v17 = vrot.slane %v4227_v27, 4 }
 0x287   : >> { %v4373_v4 = vunpack.c.l.b16 %v4202_v26  ;;  %v4729_v26 = vrot.slane %v13354_v55, 5 }
 0x288   : >> { %v4555_v49 = vadd.f32 %v4476_v52, %v3870_v12  ;;  %v4212_v52 = vsel %vm12341_vm10, %v4207_v61, %v4211_v56  ;;  %v4216_v12 = vrot.slane %v4214_v37, 4  ;;  %v4230_v56 = vor.u32 %v4229_v17, %v4225_v38 }
 0x289   : >> { %v4374_v60 = vunpack.c.l.b16 %v4212_v52 }
 0x28a   : >> { %v4908_v25 = vpop.f32.mrf.mxu0  ;;  %v13356_v15 = vadd.f32 %v4905_v42, %v4555_v49  ;;  %3833 = vmatmul.bf16.gmra.mxu2 %v11960_v6  ;;  %v4220_v61 = vor.u32 %v4219_v2, %v4216_v12  ;;  %v13375_v12 = vld [vmem:[#allocation2 + $0xac] sm:$0xf] }
 0x28b   : >> { %4518 = vmatmul.bf16.gmra.mxu3 %v4394_v58  ;;  %v4726_v58 = vsel %vm12701_vm13, %v4724_v34, %v4725_v23  ;;  %v11961_v23 = vld [vmem:[#allocation2 + $0x90] sm:$0xff]  ;;  %v4395_v37 = vpack.c.b16 %v4374_v60, %v4373_v4  ;;  %v11114_v4 = vrot.slane %v4597_v35, 9  ;;  %v4731_v60 = vrot.slane %v4729_v26, 4 }
 0x28c   : >> { %15749 = vst [vmem:[#allocation23_spill] sm:$0xff] %v13356_v15  ;;  %v4803_v47 = vunpack.c.l.b16 %v4726_v58  ;;  %v4221_v27 = vrot.slane %v4220_v61, 4  ;;  %v3937_v58 = vld [vmem:[#allocation2 + $0xa8] sm:$0xf] }
 0x28d   : >> { %4947 = vmatmul.bf16.gmra.mxu0 %v4823_v62  ;;  %v3794_v10 = vpop.f32.mrf.mxu2  ;;  %v3936_v62 = vld [vmem:[#allocation2 + $0xa4] sm:$0x1]  ;;  %v4241_v61 = vshll.u32 %v3937_v58, 16 }
 0x28e   : >> { %v4479_v8 = vpop.f32.mrf.mxu3  ;;  %v3871_v42 = vadd.f32 %v3794_v10, %v12996_v1  ;;  %v4233_v10 = vshll.u32 %v3936_v62, 16  ;;  %v4824_v59 = vpack.c.b16 %v4803_v47, %v4802_v30  ;;  %v4732_v55 = vrot.slane %v3936_v62, 5  ;;  %v15751_v30 = vld [vmem:[#allocation16_spill] sm:$0xff] }
 0x290   : >> { %v4556_v6 = vadd.f32 %v4479_v8, %v3871_v42  ;;  %v4231_v8 = vrot.slane %v4230_v56, 4  ;;  %v4235_v42 = vrot.slane %v4233_v10, 5  ;;  %v4247_v56 = vshll.u32 %v13375_v12, 16 }
 0x291   : >> { %v4251_v10 = vshrl.u32 %v13375_v12, 16 }
 0x292   : >> { %v4910_v49 = vpop.f32.mrf.mxu0  ;;  %v13369_v1 = vadd.f32 %v4908_v25, %v4556_v6  ;;  %v4236_v6 = vsel %vm12341_vm10, %v4231_v8, %v4235_v42  ;;  %v3939_v42 = vld [vmem:[#allocation2 + $0xb0] sm:$0x1] }
 0x293   : >> { %v4253_v8 = vrot.slane %v4251_v10, 4  ;;  %v13392_v10 = vld [vmem:[#allocation2 + $0xb8] sm:$0xf] }
 0x295   : >> { %v3796_v31 = vpop.f32.mrf.mxu2 }
 0x296   : >> { %v4481_v21 = vpop.f32.mrf.mxu3  ;;  %v3872_v34 = vadd.f32 %v3796_v31, %v13004_v39  ;;  %v4226_v39 = vsel %vm12341_vm10, %v4221_v27, %v4225_v38  ;;  %v4376_v38 = vunpack.c.l.b16 %v4236_v6  ;;  %v4249_v27 = vrot.slane %v4247_v56, 5 }
 0x298   : >> { %v4557_v33 = vadd.f32 %v4481_v21, %v3872_v34  ;;  %v4375_v21 = vunpack.c.l.b16 %v4226_v39 }
 0x29a   : >> { %v4913_v25 = vpop.f32.mrf.mxu0  ;;  %v13373_v52 = vadd.f32 %v4910_v49, %v4557_v33  ;;  %3838 = vmatmul.bf16.gmra.mxu2 %v11961_v23  ;;  %v4238_v49 = vshrl.u32 %v3937_v58, 16  ;;  %v4730_v23 = vsel %vm12701_vm13, %v11114_v4, %v4729_v26  ;;  %v4243_v33 = vrot.slane %v4241_v61, 5  ;;  %v3940_v61 = vld [vmem:[#allocation2 + $0xb4] sm:$0xf] }
 0x29b   : >> { %4523 = vmatmul.bf16.gmra.mxu3 %v4395_v37  ;;  %v4733_v37 = vsel %vm12701_vm13, %v4731_v60, %v4732_v55  ;;  %v4804_v35 = vunpack.c.l.b16 %v4730_v23  ;;  %v4396_v39 = vpack.c.b16 %v4376_v38, %v4375_v21  ;;  %v4254_v26 = vor.u32 %v4253_v8, %v4249_v27 }
 0x29c   : >> { %15750 = vst [vmem:[#allocation24_spill] sm:$0xff] %v13373_v52  ;;  %v4805_v58 = vunpack.c.l.b16 %v4733_v37  ;;  %v4257_v4 = vshll.u32 %v3939_v42, 16  ;;  %v4736_v60 = vrot.slane %v13375_v12, 5  ;;  %v4262_v8 = vshrl.u32 %v3940_v61, 16 }
 0x29d   : >> { %4952 = vmatmul.bf16.gmra.mxu0 %v4824_v59  ;;  %v3799_v2 = vpop.f32.mrf.mxu2  ;;  %v4240_v59 = vrot.slane %v4238_v49, 4  ;;  %v4598_v49 = vld [vmem:[#allocation2 + $0xa8] sm:$0xe]  ;;  %v4255_v38 = vrot.slane %v4254_v26, 4  ;;  %v4265_v12 = vshll.u32 %v3940_v61, 16 }
 0x29e   : >> { %v4484_v17 = vpop.f32.mrf.mxu3  ;;  %v3873_v47 = vadd.f32 %v3799_v2, %v15751_v30  ;;  %v15752_v30 = vld [vmem:[#allocation17_spill] sm:$0xff]  ;;  %v4259_v23 = vrot.slane %v4257_v4, 5  ;;  %v11115_v37 = vrot.slane %v4598_v49, 9 }
 0x29f   : >> { %v4244_v50 = vor.u32 %v4243_v33, %v4240_v59  ;;  %v4738_v59 = vrot.slane %v4736_v60, 4  ;;  %v4739_v33 = vrot.slane %v3939_v42, 5  ;;  %v4267_v4 = vrot.slane %v4265_v12, 5  ;;  %v3942_v61 = vld [vmem:[#allocation2 + $0xbc] sm:$0x1] }
 0x2a0   : >> { %v4558_v31 = vadd.f32 %v4484_v17, %v3873_v47  ;;  %v11962_v47 = vld [vmem:[#allocation2 + $0x9c] sm:$0xff]  ;;  %v4737_v42 = vsel %vm12701_vm13, %v11115_v37, %v4736_v60  ;;  %v4281_v63 = vshll.u32 %v3942_v61, 16 }
 0x2a1   : >> { %v4245_v21 = vrot.slane %v4244_v50, 4  ;;  %v4260_v50 = vsel %vm12341_vm10, %v4255_v38, %v4259_v23 }
 0x2a2   : >> { %v4915_v34 = vpop.f32.mrf.mxu0  ;;  %v13388_v62 = vadd.f32 %v4913_v25, %v4558_v31  ;;  %v4825_v25 = vpack.c.b16 %v4805_v58, %v4804_v35  ;;  %v4271_v35 = vshll.u32 %v13392_v10, 16  ;;  %v4275_v58 = vshrl.u32 %v13392_v10, 16 }
 0x2a5   : >> { %v3801_v2 = vpop.f32.mrf.mxu2 }
 0x2a6   : >> { %v4486_v17 = vpop.f32.mrf.mxu3  ;;  %v3874_v6 = vadd.f32 %v3801_v2, %v15752_v30  ;;  %v15753_v30 = vld [vmem:[#allocation18_spill] sm:$0xff] }
 0x2a8   : >> { %v4559_v55 = vadd.f32 %v4486_v17, %v3874_v6  ;;  %v4740_v6 = vsel %vm12701_vm13, %v4738_v59, %v4739_v33  ;;  %v11963_v33 = vld [vmem:[#allocation2 + $0xa8] sm:$0xff] }
 0x2a9   : >> { %v4807_v43 = vunpack.c.l.b16 %v4740_v6  ;;  %v3943_v6 = vld [vmem:[#allocation2 + $0xc0] sm:$0xf] }
 0x2aa   : >> { %v4918_v56 = vpop.f32.mrf.mxu0  ;;  %v13394_v31 = vadd.f32 %v4915_v34, %v4559_v55  ;;  %3843 = vmatmul.bf16.gmra.mxu2 %v11962_v47  ;;  %v4264_v47 = vrot.slane %v4262_v8, 4  ;;  %v4273_v55 = vrot.slane %v4271_v35, 5 }
 0x2ab   : >> { %4528 = vmatmul.bf16.gmra.mxu3 %v4396_v39  ;;  %v4250_v39 = vsel %vm12341_vm10, %v4245_v21, %v4249_v27  ;;  %v4378_v27 = vunpack.c.l.b16 %v4260_v50  ;;  %v4806_v21 = vunpack.c.l.b16 %v4737_v42  ;;  %v4599_v42 = vld [vmem:[#allocation2 + $0xb4] sm:$0xe] }
 0x2ac   : >> { %v4268_v38 = vor.u32 %v4267_v4, %v4264_v47  ;;  %v13413_v47 = vld [vmem:[#allocation2 + $0xc4] sm:$0xf]  ;;  %v11116_v4 = vrot.slane %v4599_v42, 9 }
 0x2ad   : >> { %4957 = vmatmul.bf16.gmra.mxu0 %v4825_v25  ;;  %v3804_v2 = vpop.f32.mrf.mxu2  ;;  %v4277_v25 = vrot.slane %v4275_v58, 4  ;;  %v4826_v12 = vpack.c.b16 %v4807_v43, %v4806_v21  ;;  %v4295_v21 = vshll.u32 %v13413_v47, 16 }
 0x2ae   : >> { %v4489_v17 = vpop.f32.mrf.mxu3  ;;  %v3875_v34 = vadd.f32 %v3804_v2, %v15753_v30  ;;  %v4377_v30 = vunpack.c.l.b16 %v4250_v39  ;;  %v4269_v58 = vrot.slane %v4268_v38, 4  ;;  %v4743_v39 = vrot.slane %v13392_v10, 5 }
 0x2af   : >> { %v4278_v23 = vor.u32 %v4277_v25, %v4273_v55  ;;  %v4746_v10 = vrot.slane %v3942_v61, 5  ;;  %v4299_v38 = vshrl.u32 %v13413_v47, 16 }
 0x2b0   : >> { %v4560_v26 = vadd.f32 %v4489_v17, %v3875_v34  ;;  %v4397_v8 = vpack.c.b16 %v4378_v27, %v4377_v30  ;;  %v4283_v34 = vrot.slane %v4281_v63, 5  ;;  %v4745_v25 = vrot.slane %v4743_v39, 4 }
 0x2b1   : >> { %v4279_v17 = vrot.slane %v4278_v23, 4  ;;  %v4289_v27 = vshll.u32 %v3943_v6, 16 }
 0x2b2   : >> { %v4920_v49 = vpop.f32.mrf.mxu0  ;;  %v13407_v2 = vadd.f32 %v4918_v56, %v4560_v26 }
 0x2b3   : >> { %v4284_v43 = vsel %vm12341_vm10, %v4279_v17, %v4283_v34 }
 0x2b5   : >> { %v3806_v60 = vpop.f32.mrf.mxu2 }
 0x2b6   : >> { %v4491_v37 = vpop.f32.mrf.mxu3  ;;  %v3876_v59 = vadd.f32 %v3806_v60, %v13073_v7  ;;  %v4274_v7 = vsel %vm12341_vm10, %v4269_v58, %v4273_v55  ;;  %v4380_v55 = vunpack.c.l.b16 %v4284_v43  ;;  %v3945_v58 = vld [vmem:[#allocation2 + $0xc8] sm:$0x1] }
 0x2b7   : >> { %v4379_v60 = vunpack.c.l.b16 %v4274_v7  ;;  %v11964_v7 = vld [vmem:[#allocation2 + $0xb4] sm:$0xff] }
 0x2b8   : >> { %v4561_v35 = vadd.f32 %v4491_v37, %v3876_v59  ;;  %v4744_v59 = vsel %vm12701_vm13, %v11116_v4, %v4743_v39 }
 0x2b9   : >> { %v4808_v17 = vunpack.c.l.b16 %v4744_v59  ;;  %v4398_v43 = vpack.c.b16 %v4380_v55, %v4379_v60  ;;  %v4753_v55 = vrot.slane %v3945_v58, 5 }
 0x2ba   : >> { %v4923_v56 = vpop.f32.mrf.mxu0  ;;  %v13411_v50 = vadd.f32 %v4920_v49, %v4561_v35  ;;  %3848 = vmatmul.bf16.gmra.mxu2 %v11963_v33  ;;  %v4286_v49 = vshrl.u32 %v3943_v6, 16  ;;  %v4747_v33 = vsel %vm12701_vm13, %v4745_v25, %v4746_v10  ;;  %v4301_v35 = vrot.slane %v4299_v38, 4  ;;  %v3947_v38 = vld [vmem:[#allocation2 + $0xd0] sm:$0xf] }
 0x2bb   : >> { %4533 = vmatmul.bf16.gmra.mxu3 %v4397_v8  ;;  %v4809_v34 = vunpack.c.l.b16 %v4747_v33 }
 0x2bc   : >> { %v4288_v61 = vrot.slane %v4286_v49, 4 }
 0x2bd   : >> { %4962 = vmatmul.bf16.gmra.mxu0 %v4826_v12  ;;  %v3809_v26 = vpop.f32.mrf.mxu2  ;;  %v4297_v12 = vrot.slane %v4295_v21, 5  ;;  %v4827_v4 = vpack.c.b16 %v4809_v34, %v4808_v17  ;;  %v3946_v21 = vld [vmem:[#allocation2 + $0xcc] sm:$0xf]  ;;  %v4319_v34 = vshll.u32 %v3947_v38, 16 }
 0x2be   : >> { %v4494_v63 = vpop.f32.mrf.mxu3  ;;  %v3877_v30 = vadd.f32 %v3809_v26, %v13099_v24  ;;  %v4291_v24 = vrot.slane %v4289_v27, 5  ;;  %v4600_v27 = vld [vmem:[#allocation2 + $0xc0] sm:$0xe]  ;;  %v4313_v17 = vshll.u32 %v3946_v21, 16 }
 0x2bf   : >> { %v4302_v39 = vor.u32 %v4301_v35, %v4297_v12  ;;  %v11117_v33 = vrot.slane %v4600_v27, 9  ;;  %v4310_v35 = vshrl.u32 %v3946_v21, 16 }
 0x2c0   : >> { %v4562_v23 = vadd.f32 %v4494_v63, %v3877_v30  ;;  %v4292_v26 = vor.u32 %v4291_v24, %v4288_v61  ;;  %v4305_v63 = vshll.u32 %v3945_v58, 16 }
 0x2c1   : >> { %v4303_v49 = vrot.slane %v4302_v39, 4 }
 0x2c2   : >> { %v13422_v37 = vpop.f32.mrf.mxu0  ;;  %v13428_v8 = vadd.f32 %v4923_v56, %v4562_v23  ;;  %v4750_v56 = vrot.slane %v13413_v47, 5  ;;  %v4293_v10 = vrot.slane %v4292_v26, 4  ;;  %v4307_v30 = vrot.slane %v4305_v63, 5 }
 0x2c4   : >> { %v4752_v60 = vrot.slane %v4750_v56, 4  ;;  %v4298_v24 = vsel %vm12341_vm10, %v4293_v10, %v4297_v12  ;;  %v4308_v47 = vsel %vm12341_vm10, %v4303_v49, %v4307_v30  ;;  %v4751_v39 = vsel %vm12701_vm13, %v11117_v33, %v4750_v56 }
 0x2c5   : >> { %v13430_v42 = vpop.f32.mrf.mxu2  ;;  %v4381_v63 = vunpack.c.l.b16 %v4298_v24  ;;  %v4382_v12 = vunpack.c.l.b16 %v4308_v47  ;;  %v4315_v10 = vrot.slane %v4313_v17, 5  ;;  %v4321_v49 = vrot.slane %v4319_v34, 5  ;;  %v4601_v47 = vld [vmem:[#allocation2 + $0xcc] sm:$0xe] }
 0x2c6   : >> { %v13432_v6 = vpop.f32.mrf.mxu3  ;;  %v4754_v58 = vsel %vm12701_vm13, %v4752_v60, %v4753_v55  ;;  %v4810_v27 = vunpack.c.l.b16 %v4751_v39  ;;  %v4757_v24 = vrot.slane %v3947_v38, 5  ;;  %v11118_v39 = vrot.slane %v4601_v47, 9 }
 0x2c7   : >> { %v4811_v21 = vunpack.c.l.b16 %v4754_v58  ;;  %v4399_v56 = vpack.c.b16 %v4382_v12, %v4381_v63 }
 0x2c8   : >> { %v4759_v58 = vrot.slane %v4757_v24, 4 }
 0x2ca   : >> { %v4928_v25 = vpop.f32.mrf.mxu0  ;;  %3853 = vmatmul.bf16.gmra.mxu2 %v11964_v7  ;;  %v4323_v7 = vshrl.u32 %v3947_v38, 16 }
 0x2cb   : >> { %4538 = vmatmul.bf16.gmra.mxu3 %v4398_v43 }
 0x2cc   : >> { %v4325_v30 = vrot.slane %v4323_v7, 4 }
 0x2cd   : >> { %4967 = vmatmul.bf16.gmra.mxu0 %v4827_v4  ;;  %v3814_v23 = vpop.f32.mrf.mxu2  ;;  %v4312_v4 = vrot.slane %v4310_v35, 4 }
 0x2ce   : >> { %v4499_v59 = vpop.f32.mrf.mxu3  ;;  %v3879_v61 = vadd.f32 %v3814_v23, %v13125_v45  ;;  %v3948_v23 = vld [vmem:[#allocation2 + $0xd4] sm:$0x1]  ;;  %v4326_v3 = vor.u32 %v4325_v30, %v4321_v49 }
 0x2cf   : >> { %v4316_v33 = vor.u32 %v4315_v10, %v4312_v4  ;;  %v4329_v60 = vshll.u32 %v3948_v23, 16  ;;  %v4760_v28 = vrot.slane %v3948_v23, 5 }
 0x2d0   : >> { %v4564_v43 = vadd.f32 %v4499_v59, %v3879_v61  ;;  %v4327_v17 = vrot.slane %v4326_v3, 4  ;;  %v4758_v3 = vsel %vm12701_vm13, %v11118_v39, %v4757_v24  ;;  %v12022_v24 = vld [vmem:[%s12308_s22 + $0x2b8] sm:$0xff] }
 0x2d1   : >> { %v4317_v35 = vrot.slane %v4316_v33, 4  ;;  %v4331_v34 = vrot.slane %v4329_v60, 5  ;;  %v4761_v10 = vsel %vm12701_vm13, %v4759_v58, %v4760_v28  ;;  %v11966_v33 = vld [vmem:[#allocation2 + $0xcc] sm:$0xff]  ;;  %6351 = vmatpush.bf16.msra.mxu1 %v12022_v24 }
 0x2d2   : >> { %v13440_v26 = vpop.f32.mrf.mxu0  ;;  %v13446_v45 = vadd.f32 %v4928_v25, %v4564_v43  ;;  %v4828_v25 = vpack.c.b16 %v4811_v21, %v4810_v27  ;;  %v4812_v21 = vunpack.c.l.b16 %v4758_v3  ;;  %v4813_v23 = vunpack.c.l.b16 %v4761_v10 }
 0x2d3   : >> { %v4322_v12 = vsel %vm12341_vm10, %v4317_v35, %v4321_v49  ;;  %v4332_v38 = vsel %vm12341_vm10, %v4327_v17, %v4331_v34 }
 0x2d4   : >> { %v4383_v27 = vunpack.c.l.b16 %v4322_v12 }
 0x2d5   : >> { %v13448_v59 = vpop.f32.mrf.mxu2 }
 0x2d6   : >> { %v13450_v61 = vpop.f32.mrf.mxu3 }
 0x2da   : >> { %v4933_v55 = vpop.f32.mrf.mxu0  ;;  %3858 = vmatmul.bf16.gmra.mxu2 %v11965_v51 }
 0x2db   : >> { %4543 = vmatmul.bf16.gmra.mxu3 %v4399_v56 }
 0x2dd   : >> { %4972 = vmatmul.bf16.gmra.mxu0 %v4828_v25  ;;  %v3819_v7 = vpop.f32.mrf.mxu2  ;;  %v4829_v25 = vpack.c.b16 %v4813_v23, %v4812_v21  ;;  %v13488_v21 = vpop.f32.mrf.mxu1  ;;  %v12021_v23 = vld [vmem:[%s12308_s22 + $0x2b0] sm:$0xff] }
 0x2de   : >> { %v4504_v43 = vpop.f32.mrf.mxu3  ;;  %v3881_v63 = vadd.f32 %v3819_v7, %v13154_v54  ;;  %v4384_v54 = vunpack.c.l.b16 %v4332_v38  ;;  %6352 = vmatpush.bf16.msra.mxu1 %v12021_v23 }
 0x2e0   : >> { %v4566_v51 = vadd.f32 %v4504_v43, %v3881_v63  ;;  %v4400_v60 = vpack.c.b16 %v4384_v54, %v4383_v27 }
 0x2e2   : >> { %v13457_v4 = vpop.f32.mrf.mxu0  ;;  %v13463_v30 = vadd.f32 %v4933_v55, %v4566_v51 }
 0x2e5   : >> { %v13465_v49 = vpop.f32.mrf.mxu2 }
 0x2e6   : >> { %v13467_v56 = vpop.f32.mrf.mxu3 }
 0x2ea   : >> { %v4938_v47 = vpop.f32.mrf.mxu0  ;;  %3863 = vmatmul.bf16.gmra.mxu2 %v11966_v33 }
 0x2eb   : >> { %4548 = vmatmul.bf16.gmra.mxu3 %v4400_v60 }
 0x2ed   : >> { %4977 = vmatmul.bf16.gmra.mxu0 %v4829_v25  ;;  %v3824_v35 = vpop.f32.mrf.mxu2 }
 0x2ee   : >> { %v4509_v28 = vpop.f32.mrf.mxu3  ;;  %v3883_v55 = vadd.f32 %v3824_v35, %v13175_v16 }
 0x2f0   : >> { %v4568_v17 = vadd.f32 %v4509_v28, %v3883_v55  ;;  %v3526_v55 = vpop.f32.mrf.mxu1 }
 0x2f2   : >> { %v13471_v34 = vpop.f32.mrf.mxu0  ;;  %v13473_v7 = vadd.f32 %v4938_v47, %v4568_v17 }
 0x2f5   : >> { %v13475_v43 = vpop.f32.mrf.mxu2 }
 0x2f6   : >> { %v13477_v39 = vpop.f32.mrf.mxu3 }
 0x2fa   : >> { %v4943_v58 = vpop.f32.mrf.mxu0 }
 0x2fd   : >> { %v3829_v63 = vpop.f32.mrf.mxu2 }
 0x2fe   : >> { %v4514_v12 = vpop.f32.mrf.mxu3  ;;  %v3885_v38 = vadd.f32 %v3829_v63, %v13196_v29 }
 0x300   : >> { %v4570_v51 = vadd.f32 %v4514_v12, %v3885_v38  ;;  %v13499_v38 = vpop.f32.mrf.mxu1 }
 0x302   : >> { %v13480_v3 = vpop.f32.mrf.mxu0  ;;  %v13482_v16 = vadd.f32 %v4943_v58, %v4570_v51 }
 0x305   : >> { %v13484_v10 = vpop.f32.mrf.mxu2 }
 0x306   : >> { %v13486_v27 = vpop.f32.mrf.mxu3 }
 0x308   : >> { %v3531_v19 = vpop.f32.mrf.mxu1 }
 0x30a   : >> { %v4948_v54 = vpop.f32.mrf.mxu0 }
 0x30d   : >> { %v3834_v33 = vpop.f32.mrf.mxu2 }
 0x30e   : >> { %v4519_v60 = vpop.f32.mrf.mxu3  ;;  %v3887_v25 = vadd.f32 %v3834_v33, %v13215_v44 }
 0x310   : >> { %v4572_v47 = vadd.f32 %v4519_v60, %v3887_v25  ;;  %v5015_v60 = vadd.f32 %v13356_v15, %v13350_v18 }
 0x312   : >> { %v13492_v29 = vpop.f32.mrf.mxu0  ;;  %v13494_v24 = vadd.f32 %v4948_v54, %v4572_v47  ;;  %v3560_v47 = vadd.f32 %v13089_v41, %v13104_v13  ;;  %v3880_v13 = vadd.f32 %v13448_v59, %v3562_v0  ;;  %v3566_v0 = vadd.f32 %v13173_v22, %v13179_v9 }
 0x314   : >> { %v4565_v14 = vadd.f32 %v13450_v61, %v3880_v13  ;;  %v3568_v61 = vadd.f32 %v13194_v11, %v13202_v32 }
 0x315   : >> { %v3836_v35 = vpop.f32.mrf.mxu2 }
 0x316   : >> { %v13496_v28 = vpop.f32.mrf.mxu3 }
 0x31a   : >> { %v4953_v17 = vpop.f32.mrf.mxu0 }
 0x31d   : >> { %v3839_v58 = vpop.f32.mrf.mxu2 }
 0x31e   : >> { %v4524_v63 = vpop.f32.mrf.mxu3  ;;  %v3889_v12 = vadd.f32 %v3839_v58, %v13236_v48  ;;  %v5016_v48 = vadd.f32 %v5015_v60, %v13369_v1 }
 0x320   : >> { %v4574_v51 = vadd.f32 %v4524_v63, %v3889_v12  ;;  %v5017_v58 = vadd.f32 %v5016_v48, %v13373_v52  ;;  %v3878_v63 = vadd.f32 %v13430_v42, %v3560_v47  ;;  %v3564_v42 = vadd.f32 %v13143_v36, %v13160_v5  ;;  %v3533_v48 = vpop.f32.mrf.mxu1 }
 0x321   : >> { %v13539_v5 = vadd.f32 %v13440_v26, %v4565_v14  ;;  %v3573_v14 = vadd.f32 %v3526_v55, %v13255_v20 }
 0x322   : >> { %v13501_v44 = vpop.f32.mrf.mxu0  ;;  %v13503_v23 = vadd.f32 %v4953_v17, %v4574_v51  ;;  %v12020_v17 = vld [vmem:[%s12308_s22 + $0x2a8] sm:$0xff]  ;;  %v5018_v15 = vadd.f32 %v5017_v58, %v13388_v62  ;;  %v4563_v41 = vadd.f32 %v13432_v6, %v3878_v63 }
 0x323   : >> { %6353 = vmatpush.bf16.msra.mxu1 %v12020_v17 }
 0x324   : >> { %v5019_v18 = vadd.f32 %v5018_v15, %v13394_v31  ;;  %v13530_v40 = vadd.f32 %v13422_v37, %v4563_v41  ;;  %v3882_v15 = vadd.f32 %v13465_v49, %v3564_v42  ;;  %v3884_v37 = vadd.f32 %v13475_v43, %v3566_v0 }
 0x325   : >> { %v3841_v33 = vpop.f32.mrf.mxu2 }
 0x326   : >> { %v13505_v54 = vpop.f32.mrf.mxu3  ;;  %v5020_v47 = vadd.f32 %v5019_v18, %v13407_v2  ;;  %v4567_v18 = vadd.f32 %v13467_v56, %v3882_v15  ;;  %v4569_v9 = vadd.f32 %v13477_v39, %v3884_v37  ;;  %v3570_v56 = vadd.f32 %v13218_v46, %v13221_v57 }
 0x327   : >> { %v3572_v39 = vadd.f32 %v13488_v21, %v13242_v53  ;;  %v15755_v21 = vld [vmem:[#allocation20_spill] sm:$0xff] }
 0x328   : >> { %v5021_v52 = vadd.f32 %v5020_v47, %v13411_v50  ;;  %v13548_v22 = vadd.f32 %v13457_v4, %v4567_v18  ;;  %v3536_v43 = vpop.f32.mrf.mxu1  ;;  %v13557_v32 = vadd.f32 %v13471_v34, %v4569_v9  ;;  %v3888_v42 = vadd.f32 %v3836_v35, %v3570_v56 }
 0x329   : >> { %v3890_v34 = vadd.f32 %v3841_v33, %v3572_v39  ;;  %v3575_v18 = vadd.f32 %v3531_v19, %v15755_v21 }
 0x32a   : >> { %v13509_v25 = vpop.f32.mrf.mxu0  ;;  %v5022_v59 = vadd.f32 %v5021_v52, %v13428_v8  ;;  %v3886_v52 = vadd.f32 %v13484_v10, %v3568_v61  ;;  %v4573_v15 = vadd.f32 %v13496_v28, %v3888_v42  ;;  %v15756_v61 = vld [vmem:[#allocation21_spill] sm:$0xff] }
 0x32b   : >> { %v4575_v28 = vadd.f32 %v13505_v54, %v3890_v34 }
 0x32c   : >> { %v5023_v36 = vadd.f32 %v5022_v59, %v13530_v40  ;;  %v4571_v4 = vadd.f32 %v13486_v27, %v3886_v52  ;;  %v15754_v27 = vld [vmem:[#allocation19_spill] sm:$0xff] }
 0x32d   : >> { %v3844_v12 = vpop.f32.mrf.mxu2  ;;  %v3574_v35 = vadd.f32 %v13499_v38, %v15754_v27  ;;  %v13583_v56 = vadd.f32 %v13501_v44, %v4575_v28 }
 0x32e   : >> { %v4529_v51 = vpop.f32.mrf.mxu3  ;;  %v5024_v49 = vadd.f32 %v5023_v36, %v13446_v45  ;;  %v13566_v57 = vadd.f32 %v13480_v3, %v4571_v4  ;;  %v3891_v53 = vadd.f32 %v3844_v12, %v3573_v14  ;;  %v13575_v3 = vadd.f32 %v13492_v29, %v4573_v15  ;;  %v15757_v12 = vld [vmem:[#allocation10_spill] sm:$0xff]  ;;  %v15758_v15 = vld [vmem:[#allocation11_spill] sm:$0xff] }
 0x32f   : >> { %v3577_v52 = vadd.f32 %v3536_v43, %v15757_v12 }
 0x330   : >> { %v5025_v17 = vadd.f32 %v5024_v49, %v13539_v5  ;;  %v3538_v20 = vpop.f32.mrf.mxu1  ;;  %v3576_v49 = vadd.f32 %v3533_v48, %v15756_v61 }
 0x331   : >> { %v3578_v34 = vadd.f32 %v3538_v20, %v15758_v15 }
 0x332   : >> { %v13523_v60 = vpop.f32.mrf.mxu0  ;;  %v5026_v13 = vadd.f32 %v5025_v17, %v13463_v30  ;;  %v4576_v17 = vadd.f32 %v4529_v51, %v3891_v53 }
 0x334   : >> { %v5027_v11 = vadd.f32 %v5026_v13, %v13548_v22  ;;  %v13588_v48 = vadd.f32 %v13509_v25, %v4576_v17 }
 0x335   : >> { %v3846_v6 = vpop.f32.mrf.mxu2 }
 0x336   : >> { %v4531_v58 = vpop.f32.mrf.mxu3  ;;  %v5028_v10 = vadd.f32 %v5027_v11, %v13473_v7  ;;  %v3892_v33 = vadd.f32 %v3846_v6, %v3574_v35  ;;  %v12019_v11 = vld [vmem:[%s12308_s22 + $0x2a0] sm:$0xff] }
 0x337   : >> { %6354 = vmatpush.bf16.msra.mxu1 %v12019_v11 }
 0x338   : >> { %v5029_v46 = vadd.f32 %v5028_v10, %v13557_v32  ;;  %v4577_v13 = vadd.f32 %v4531_v58, %v3892_v33  ;;  %v3541_v58 = vpop.f32.mrf.mxu1 }
 0x33a   : >> { %v4963_v63 = vpop.f32.mrf.mxu0  ;;  %v5030_v36 = vadd.f32 %v5029_v46, %v13482_v16  ;;  %v13592_v43 = vadd.f32 %v13523_v60, %v4577_v13 }
 0x33c   : >> { %v5031_v55 = vadd.f32 %v5030_v36, %v13566_v57 }
 0x33d   : >> { %v3849_v26 = vpop.f32.mrf.mxu2 }
 0x33e   : >> { %v4534_v41 = vpop.f32.mrf.mxu3  ;;  %v5032_v38 = vadd.f32 %v5031_v55, %v13494_v24  ;;  %v3893_v9 = vadd.f32 %v3849_v26, %v3575_v18  ;;  %v15759_v55 = vld [vmem:[#allocation12_spill] sm:$0xff] }
 0x33f   : >> { %v3579_v28 = vadd.f32 %v3541_v58, %v15759_v55 }
 0x340   : >> { %v5033_v19 = vadd.f32 %v5032_v38, %v13575_v3  ;;  %v4578_v42 = vadd.f32 %v4534_v41, %v3893_v9  ;;  %v3543_v33 = vpop.f32.mrf.mxu1  ;;  %v15760_v9 = vld [vmem:[#allocation13_spill] sm:$0xff] }
 0x341   : >> { %v3580_v12 = vadd.f32 %v3543_v33, %v15760_v9 }
 0x342   : >> { %v4965_v47 = vpop.f32.mrf.mxu0  ;;  %v5034_v6 = vadd.f32 %v5033_v19, %v13503_v23  ;;  %v13595_v14 = vadd.f32 %v4963_v63, %v4578_v42 }
 0x344   : >> { %v5035_v26 = vadd.f32 %v5034_v6, %v13583_v56  ;;  %v15761_v6 = vld [vmem:[#allocation14_spill] sm:$0xff] }
 0x345   : >> { %v3851_v0 = vpop.f32.mrf.mxu2 }
 0x346   : >> { %v4536_v59 = vpop.f32.mrf.mxu3  ;;  %v3894_v29 = vadd.f32 %v3851_v0, %v3576_v49  ;;  %v5036_v10 = vadd.f32 %v5035_v26, %v13588_v48 }
 0x348   : >> { %v4579_v44 = vadd.f32 %v4536_v59, %v3894_v29  ;;  %v5037_v25 = vadd.f32 %v5036_v10, %v13592_v43  ;;  %v3546_v11 = vpop.f32.mrf.mxu1 }
 0x349   : >> { %v3581_v42 = vadd.f32 %v3546_v11, %v15761_v6 }
 0x34a   : >> { %v4968_v37 = vpop.f32.mrf.mxu0  ;;  %v13599_v41 = vadd.f32 %v4965_v47, %v4579_v44  ;;  %v5038_v35 = vadd.f32 %v5037_v25, %v13595_v14  ;;  %v15762_v25 = vld [vmem:[#allocation15_spill] sm:$0xff] }
 0x34c   : >> { %v5039_v59 = vadd.f32 %v5038_v35, %v13599_v41 }
 0x34d   : >> { %v3854_v4 = vpop.f32.mrf.mxu2 }
 0x34e   : >> { %v4539_v54 = vpop.f32.mrf.mxu3  ;;  %v3895_v51 = vadd.f32 %v3854_v4, %v3577_v52 }
 0x350   : >> { %v4580_v46 = vadd.f32 %v4539_v54, %v3895_v51 }
 0x352   : >> { %v4970_v39 = vpop.f32.mrf.mxu0  ;;  %v5009_v60 = vadd.f32 %v4968_v37, %v4580_v46  ;;  %v3548_v46 = vpop.f32.mrf.mxu1 }
 0x354   : >> { %v5040_v21 = vadd.f32 %v5039_v59, %v5009_v60 }
 0x355   : >> { %v3856_v0 = vpop.f32.mrf.mxu2 }
 0x356   : >> { %v4541_v27 = vpop.f32.mrf.mxu3  ;;  %v3896_v36 = vadd.f32 %v3856_v0, %v3578_v34  ;;  %v12226_v34 = vmov 256.0   ;;  %v3582_v0 = vadd.f32 %v3548_v46, %v15762_v25 }
 0x357   : >> { %12145 = vrcp.f32 %v12226_v34 }
 0x358   : >> { %v4581_v53 = vadd.f32 %v4541_v27, %v3896_v36 }
 0x35a   : >> { %v5010_v18 = vadd.f32 %v4970_v39, %v4581_v53  ;;  %v4973_v63 = vpop.f32.mrf.mxu0 }
 0x35c   : >> { %v5041_v20 = vadd.f32 %v5040_v21, %v5010_v18 }
 0x35d   : >> { %v3859_v61 = vpop.f32.mrf.mxu2  ;;  %v12146_v53 = vpop.eup %12145 }
 0x35e   : >> { %v4544_v49 = vpop.f32.mrf.mxu3  ;;  %v3897_v47 = vadd.f32 %v3859_v61, %v3579_v28  ;;  %v5053_v28 = vmul.f32 256.0, %v12146_v53  ;;  %vm5057_vm14 = vweird.f32 %v12146_v53 }
 0x360   : >> { %v4582_v38 = vadd.f32 %v4544_v49, %v3897_v47  ;;  %v5054_v61 = vsub.f32 1.0, %v5053_v28 }
 0x362   : >> { %v5011_v17 = vadd.f32 %v4973_v63, %v4582_v38  ;;  %v4975_v37 = vpop.f32.mrf.mxu0  ;;  %v5055_v38 = vmul.f32 %v12146_v53, %v5054_v61 }
 0x364   : >> { %v5042_v52 = vadd.f32 %v5041_v20, %v5011_v17 }
 0x365   : >> { %v3861_v19 = vpop.f32.mrf.mxu2 }
 0x366   : >> { %v4546_v13 = vpop.f32.mrf.mxu3  ;;  %v3898_v29 = vadd.f32 %v3861_v19, %v3580_v12 }
 0x368   : >> { %v4583_v4 = vadd.f32 %v4546_v13, %v3898_v29 }
 0x36a   : >> { %v5012_v54 = vadd.f32 %v4975_v37, %v4583_v4  ;;  %v4978_v58 = vpop.f32.mrf.mxu0 }
 0x36c   : >> { %v5043_v51 = vadd.f32 %v5042_v52, %v5012_v54  ;;  %v5056_v52 = vadd.f32 %v12146_v53, %v5055_v38 }
 0x36d   : >> { %v3864_v26 = vpop.f32.mrf.mxu2 }
 0x36e   : >> { %v4549_v44 = vpop.f32.mrf.mxu3  ;;  %v3899_v39 = vadd.f32 %v3864_v26, %v3581_v42  ;;  %v13607_v19 = vsel %vm5057_vm14, %v12146_v53, %v5056_v52  ;;  %v15765_v26 = vld [vmem:[#allocation22_spill] sm:$0xff] }
 0x36f   : >> { %15763 = vst [vmem:[#allocation16_spill] sm:$0xff] %v13607_v19 }
 0x370   : >> { %v4584_v10 = vadd.f32 %v4549_v44, %v3899_v39 }
 0x372   : >> { %v5013_v15 = vadd.f32 %v4978_v58, %v4584_v10  ;;  %v4980_v63 = vpop.f32.mrf.mxu0  ;;  %v15767_v58 = vld [vmem:[#allocation24_spill] sm:$0xff] }
 0x374   : >> { %v5044_v27 = vadd.f32 %v5043_v51, %v5013_v15 }
 0x375   : >> { %v3866_v35 = vpop.f32.mrf.mxu2 }
 0x376   : >> { %v3900_v36 = vadd.f32 %v3866_v35, %v3582_v0  ;;  %v4551_v59 = vpop.f32.mrf.mxu3 }
 0x378   : >> { %v4585_v21 = vadd.f32 %v4551_v59, %v3900_v36 }
 0x37a   : >> { %v5014_v55 = vadd.f32 %v4980_v63, %v4585_v21 }
 0x37c   : >> { %v5045_v33 = vadd.f32 %v5044_v27, %v5014_v55 }
 0x37e   : >> { %v5046_v20 = vrot.slane %v5045_v33, 4 }
 0x380   : >> { %v5047_v49 = vadd.f32 %v5046_v20, %v5045_v33 }
 0x382   : >> { %v5048_v47 = vrot.slane %v5047_v49, 2 }
 0x384   : >> { %v5049_v9 = vadd.f32 %v5048_v47, %v5047_v49 }
 0x386   : >> { %v5050_v12 = vrot.slane %v5049_v9, 1 }
 0x388   : >> { %v5051_v37 = vadd.f32 %v5050_v12, %v5049_v9 }
 0x38a   : >> { %v13610_v13 = vmul.f32 %v13607_v19, %v5051_v37 }
 0x38c   : >> { %v13613_v29 = vsub.f32 %v5009_v60, %v13610_v13  ;;  %v13616_v11 = vsub.f32 %v5010_v18, %v13610_v13  ;;  %v13619_v4 = vsub.f32 %v5011_v17, %v13610_v13  ;;  %v13622_v6 = vsub.f32 %v5012_v54, %v13610_v13  ;;  %v15766_v60 = vld [vmem:[#allocation23_spill] sm:$0xff] }
 0x38d   : >> { %v13625_v42 = vsub.f32 %v5013_v15, %v13610_v13  ;;  %v13628_v51 = vsub.f32 %v5014_v55, %v13610_v13  ;;  %v13632_v44 = vsub.f32 %v15765_v26, %v13610_v13  ;;  %v13636_v18 = vsub.f32 %v15766_v60, %v13610_v13 }
 0x38e   : >> { %v13640_v17 = vsub.f32 %v13369_v1, %v13610_v13  ;;  %v13648_v10 = vsub.f32 %v15767_v58, %v13610_v13  ;;  %v13652_v46 = vsub.f32 %v13388_v62, %v13610_v13  ;;  %v13658_v1 = vsub.f32 %v13394_v31, %v13610_v13 }
 0x38f   : >> { %15764 = vst [vmem:[#allocation17_spill] sm:$0xff] %v13628_v51  ;;  %v5092_v54 = vmul.f32 %v13632_v44, %v13632_v44  ;;  %v5093_v39 = vmul.f32 %v13636_v18, %v13636_v18  ;;  %v13664_v27 = vsub.f32 %v13407_v2, %v13610_v13  ;;  %v13670_v36 = vsub.f32 %v13411_v50, %v13610_v13 }
 0x390   : >> { %v5094_v15 = vmul.f32 %v13640_v17, %v13640_v17  ;;  %v5095_v25 = vmul.f32 %v13648_v10, %v13648_v10  ;;  %v5096_v62 = vmul.f32 %v13652_v46, %v13652_v46  ;;  %v5097_v31 = vmul.f32 %v13658_v1, %v13658_v1 }
 0x391   : >> { %v5124_v34 = vadd.f32 %v5093_v39, %v5092_v54  ;;  %v13676_v53 = vsub.f32 %v13428_v8, %v13610_v13  ;;  %v5098_v2 = vmul.f32 %v13664_v27, %v13664_v27  ;;  %v13682_v63 = vsub.f32 %v13530_v40, %v13610_v13 }
 0x392   : >> { %v5099_v50 = vmul.f32 %v13670_v36, %v13670_v36  ;;  %v13688_v28 = vsub.f32 %v13446_v45, %v13610_v13  ;;  %v13694_v20 = vsub.f32 %v13539_v5, %v13610_v13  ;;  %v13700_v49 = vsub.f32 %v13463_v30, %v13610_v13 }
 0x393   : >> { %v5125_v0 = vadd.f32 %v5124_v34, %v5094_v15  ;;  %v5100_v8 = vmul.f32 %v13676_v53, %v13676_v53  ;;  %v5101_v40 = vmul.f32 %v13682_v63, %v13682_v63  ;;  %v13706_v38 = vsub.f32 %v13548_v22, %v13610_v13 }
 0x394   : >> { %v5102_v45 = vmul.f32 %v13688_v28, %v13688_v28  ;;  %v5103_v5 = vmul.f32 %v13694_v20, %v13694_v20  ;;  %v13712_v12 = vsub.f32 %v13473_v7, %v13610_v13  ;;  %v5104_v30 = vmul.f32 %v13700_v49, %v13700_v49 }
 0x395   : >> { %v5126_v35 = vadd.f32 %v5125_v0, %v5095_v25  ;;  %v13718_v37 = vsub.f32 %v13557_v32, %v13610_v13  ;;  %v5105_v22 = vmul.f32 %v13706_v38, %v13706_v38  ;;  %v13724_v60 = vsub.f32 %v13482_v16, %v13610_v13 }
 0x396   : >> { %v5106_v7 = vmul.f32 %v13712_v12, %v13712_v12  ;;  %v13730_v39 = vsub.f32 %v13566_v57, %v13610_v13  ;;  %v13736_v15 = vsub.f32 %v13494_v24, %v13610_v13  ;;  %v13742_v25 = vsub.f32 %v13575_v3, %v13610_v13 }
 0x397   : >> { %v5127_v59 = vadd.f32 %v5126_v35, %v5096_v62  ;;  %v5107_v32 = vmul.f32 %v13718_v37, %v13718_v37  ;;  %v5108_v16 = vmul.f32 %v13724_v60, %v13724_v60  ;;  %v13748_v62 = vsub.f32 %v13503_v23, %v13610_v13 }
 0x398   : >> { %v5109_v57 = vmul.f32 %v13730_v39, %v13730_v39  ;;  %v5110_v24 = vmul.f32 %v13736_v15, %v13736_v15  ;;  %v5111_v3 = vmul.f32 %v13742_v25, %v13742_v25 }
 0x399   : >> { %v5128_v21 = vadd.f32 %v5127_v59, %v5097_v31  ;;  %v13754_v31 = vsub.f32 %v13583_v56, %v13610_v13  ;;  %v5112_v23 = vmul.f32 %v13748_v62, %v13748_v62 }
 0x39b   : >> { %v5129_v55 = vadd.f32 %v5128_v21, %v5098_v2  ;;  %v13760_v2 = vsub.f32 %v13588_v48, %v13610_v13  ;;  %v5113_v56 = vmul.f32 %v13754_v31, %v13754_v31 }
 0x39d   : >> { %v5130_v33 = vadd.f32 %v5129_v55, %v5099_v50  ;;  %v13766_v50 = vsub.f32 %v13592_v43, %v13610_v13  ;;  %v5114_v48 = vmul.f32 %v13760_v2, %v13760_v2 }
 0x39f   : >> { %v5131_v61 = vadd.f32 %v5130_v33, %v5100_v8  ;;  %v13772_v8 = vsub.f32 %v13595_v14, %v13610_v13  ;;  %v5115_v43 = vmul.f32 %v13766_v50, %v13766_v50 }
 0x3a1   : >> { %v5132_v47 = vadd.f32 %v5131_v61, %v5101_v40  ;;  %v13778_v40 = vsub.f32 %v13599_v41, %v13610_v13  ;;  %v5119_v41 = vmul.f32 %v13616_v11, %v13616_v11 }
 0x3a3   : >> { %v5133_v9 = vadd.f32 %v5132_v47, %v5102_v45  ;;  %v5116_v45 = vmul.f32 %v13772_v8, %v13772_v8  ;;  %v5117_v14 = vmul.f32 %v13778_v40, %v13778_v40 }
 0x3a5   : >> { %v5134_v52 = vadd.f32 %v5133_v9, %v5103_v5  ;;  %v5118_v9 = vmul.f32 %v13613_v29, %v13613_v29 }
 0x3a7   : >> { %v5135_v26 = vadd.f32 %v5134_v52, %v5104_v30  ;;  %v5120_v52 = vmul.f32 %v13619_v4, %v13619_v4 }
 0x3a9   : >> { %v5136_v54 = vadd.f32 %v5135_v26, %v5105_v22  ;;  %v5121_v26 = vmul.f32 %v13622_v6, %v13622_v6 }
 0x3ab   : >> { %v5137_v58 = vadd.f32 %v5136_v54, %v5106_v7  ;;  %v5122_v54 = vmul.f32 %v13625_v42, %v13625_v42 }
 0x3ad   : >> { %v5138_v34 = vadd.f32 %v5137_v58, %v5107_v32  ;;  %v5123_v58 = vmul.f32 %v13628_v51, %v13628_v51 }
 0x3af   : >> { %v5139_v0 = vadd.f32 %v5138_v34, %v5108_v16 }
 0x3b1   : >> { %v5140_v35 = vadd.f32 %v5139_v0, %v5109_v57 }
 0x3b3   : >> { %v5141_v59 = vadd.f32 %v5140_v35, %v5110_v24 }
 0x3b5   : >> { %v5142_v21 = vadd.f32 %v5141_v59, %v5111_v3 }
 0x3b7   : >> { %v5143_v55 = vadd.f32 %v5142_v21, %v5112_v23 }
 0x3b9   : >> { %v5144_v33 = vadd.f32 %v5143_v55, %v5113_v56 }
 0x3bb   : >> { %v5145_v61 = vadd.f32 %v5144_v33, %v5114_v48 }
 0x3bd   : >> { %v5146_v47 = vadd.f32 %v5145_v61, %v5115_v43 }
 0x3bf   : >> { %v5147_v5 = vadd.f32 %v5146_v47, %v5116_v45 }
 0x3c1   : >> { %v5148_v30 = vadd.f32 %v5147_v5, %v5117_v14 }
 0x3c3   : >> { %v5149_v13 = vadd.f32 %v5148_v30, %v5118_v9  ;;  %v12014_v9 = vld [vmem:[%s12308_s22 + $0x278] sm:$0xff] }
 0x3c4   : >> { %6584 = vmatpush.bf16.msrb.mxu2 %v12014_v9 }
 0x3c5   : >> { %v5150_v22 = vadd.f32 %v5149_v13, %v5119_v41  ;;  %v12018_v13 = vld [vmem:[%s12308_s22 + $0x298] sm:$0xff] }
 0x3c6   : >> { %6355 = vmatpush.bf16.msra.mxu1 %v12018_v13 }
 0x3c7   : >> { %v5151_v7 = vadd.f32 %v5150_v22, %v5120_v52 }
 0x3c9   : >> { %v5152_v32 = vadd.f32 %v5151_v7, %v5121_v26 }
 0x3cb   : >> { %v5153_v16 = vadd.f32 %v5152_v32, %v5122_v54  ;;  %v12012_v32 = vld [vmem:[%s12308_s22 + $0x268] sm:$0xff] }
 0x3cd   : >> { %v5154_v34 = vadd.f32 %v5153_v16, %v5123_v58 }
 0x3cf   : >> { %v5155_v57 = vrot.slane %v5154_v34, 4 }
 0x3d1   : >> { %v5156_v0 = vadd.f32 %v5155_v57, %v5154_v34 }
 0x3d3   : >> { %v5157_v24 = vrot.slane %v5156_v0, 2 }
 0x3d5   : >> { %v5158_v35 = vadd.f32 %v5157_v24, %v5156_v0  ;;  %v12028_v24 = vld [vmem:[%s12308_s22 + $0x2e8] sm:$0xff] }
 0x3d7   : >> { %v5159_v3 = vrot.slane %v5158_v35, 1 }
 0x3d9   : >> { %v5160_v59 = vadd.f32 %v5159_v3, %v5158_v35 }
 0x3db   : >> { %v5161_v23 = vmul.f32 %v5160_v59, %v13607_v19 }
 0x3dd   : >> { %v5162_v21 = vadd.f32 1e-05, %v5161_v23 }
 0x3df   : >> { %12147 = vrsqrt.f32 %v5162_v21  ;;  %vm5169_vm0 = vweird.f32 %v5162_v21 }
 0x3e5   : >> { %v12148_v56 = vpop.eup %12147 }
 0x3e6   : >> { %v5164_v55 = vmul.f32 %v12148_v56, %v5162_v21  ;;  %vm5170_vm15 = vweird.f32 %v12148_v56 }
 0x3e7   : >> { %vm5171_vm1 = vmor %vm5169_vm0, %vm5170_vm15 }
 0x3e8   : >> { %v5165_v48 = vmul.f32 %v12148_v56, %v5164_v55 }
 0x3ea   : >> { %v5166_v33 = vmul.f32 0.5, %v5165_v48 }
 0x3ec   : >> { %v5167_v43 = vsub.f32 1.5, %v5166_v33  ;;  %v12011_v33 = vld [vmem:[%s12308_s22 + $0x260] sm:$0xff] }
 0x3ee   : >> { %v5168_v61 = vmul.f32 %v12148_v56, %v5167_v43 }
 0x3f0   : >> { %v13799_v45 = vsel %vm5171_vm1, %v12148_v56, %v5168_v61 }
 0x3f1   : >> { %15768 = vst [vmem:[#allocation18_spill] sm:$0xff] %v13799_v45  ;;  %v13803_v47 = vmul.f32 %v13799_v45, %v13632_v44  ;;  %v13807_v14 = vmul.f32 %v13799_v45, %v13636_v18  ;;  %v13811_v5 = vmul.f32 %v13799_v45, %v13640_v17  ;;  %v13816_v30 = vmul.f32 %v13799_v45, %v13648_v10 }
 0x3f2   : >> { %v13820_v41 = vmul.f32 %v13799_v45, %v13652_v46  ;;  %v13824_v44 = vmul.f32 %v13799_v45, %v13658_v1  ;;  %v13828_v18 = vmul.f32 %v13799_v45, %v13664_v27  ;;  %v13832_v17 = vmul.f32 %v13799_v45, %v13670_v36  ;;  %v12030_v27 = vld [vmem:[%s12308_s22 + $0x2f8] sm:$0xff] }
 0x3f3   : >> { %v13836_v10 = vmul.f32 %v13799_v45, %v13676_v53  ;;  %v13840_v46 = vmul.f32 %v13799_v45, %v13682_v63  ;;  %v13844_v1 = vmul.f32 %v13799_v45, %v13688_v28  ;;  %v13850_v36 = vmul.f32 %v13799_v45, %v13694_v20  ;;  %6965 = vmatpush.bf16.msrb.mxu3 %v12030_v27 }
 0x3f4   : >> { %v13854_v52 = vmul.f32 %v13799_v45, %v13700_v49  ;;  %v13858_v53 = vmul.f32 %v13799_v45, %v13706_v38  ;;  %v13862_v63 = vmul.f32 %v13799_v45, %v13712_v12  ;;  %v13866_v28 = vmul.f32 %v13799_v45, %v13718_v37  ;;  %v12013_v12 = vld [vmem:[%s12308_s22 + $0x270] sm:$0xff] }
 0x3f5   : >> { %v13870_v20 = vmul.f32 %v13799_v45, %v13724_v60  ;;  %v13874_v49 = vmul.f32 %v13799_v45, %v13730_v39  ;;  %v13878_v38 = vmul.f32 %v13799_v45, %v13736_v15  ;;  %v13883_v22 = vmul.f32 %v13799_v45, %v13742_v25  ;;  %6585 = vmatpush.bf16.msrb.mxu2 %v12013_v12 }
 0x3f6   : >> { %v13887_v37 = vmul.f32 %v13799_v45, %v13748_v62  ;;  %v13891_v60 = vmul.f32 %v13799_v45, %v13754_v31  ;;  %v13895_v39 = vmul.f32 %v13799_v45, %v13760_v2  ;;  %v13899_v15 = vmul.f32 %v13799_v45, %v13766_v50  ;;  %v12029_v2 = vld [vmem:[%s12308_s22 + $0x2f0] sm:$0xff] }
 0x3f7   : >> { %v13903_v25 = vmul.f32 %v13799_v45, %v13772_v8  ;;  %v13907_v62 = vmul.f32 %v13799_v45, %v13778_v40  ;;  %v13911_v31 = vmul.f32 %v13799_v45, %v13613_v29  ;;  %v13916_v26 = vmul.f32 %v13799_v45, %v13616_v11  ;;  %6966 = vmatpush.bf16.msrb.mxu3 %v12029_v2 }
 0x3f8   : >> { %v13920_v50 = vmul.f32 %v13799_v45, %v13619_v4  ;;  %v13924_v8 = vmul.f32 %v13799_v45, %v13622_v6  ;;  %v13928_v40 = vmul.f32 %v13799_v45, %v13625_v42  ;;  %v5205_v29 = vmax.f32 %v13803_v47, 0.0  ;;  %v5669_v45 = vld [vmem:[#allocation2 + $0x24] sm:$0xf] }
 0x3f9   : >> { %v5206_v7 = vmax.f32 %v13807_v14, 0.0  ;;  %v5207_v11 = vmax.f32 %v13811_v5, 0.0  ;;  %v5208_v54 = vmax.f32 %v13816_v30, 0.0  ;;  %v5209_v4 = vmax.f32 %v13820_v41, 0.0  ;;  %6586 = vmatpush.bf16.msrb.mxu2 %v12012_v32 }
 0x3fa   : >> { %v5210_v58 = vmax.f32 %v13824_v44, 0.0  ;;  %v5211_v6 = vmax.f32 %v13828_v18, 0.0  ;;  %v5212_v16 = vmax.f32 %v13832_v17, 0.0  ;;  %v5213_v42 = vmax.f32 %v13836_v10, 0.0  ;;  %v12027_v44 = vld [vmem:[%s12308_s22 + $0x2e0] sm:$0xff] }
 0x3fb   : >> { %v5214_v34 = vmax.f32 %v13840_v46, 0.0  ;;  %v5215_v57 = vmax.f32 %v13844_v1, 0.0  ;;  %v5216_v0 = vmax.f32 %v13850_v36, 0.0  ;;  %v5217_v35 = vmax.f32 %v13854_v52, 0.0  ;;  %6967 = vmatpush.bf16.msrb.mxu3 %v12028_v24  ;;  %v12010_v52 = vld [vmem:[%s12308_s22 + $0x258] sm:$0xff] }
 0x3fc   : >> { %v5218_v3 = vmax.f32 %v13858_v53, 0.0  ;;  %v5219_v59 = vmax.f32 %v13862_v63, 0.0  ;;  %v5220_v23 = vmax.f32 %v13866_v28, 0.0  ;;  %v5221_v21 = vmax.f32 %v13870_v20, 0.0 }
 0x3fd   : >> { %v5222_v56 = vmax.f32 %v13874_v49, 0.0  ;;  %v5223_v55 = vmax.f32 %v13878_v38, 0.0  ;;  %v5224_v48 = vmax.f32 %v13883_v22, 0.0  ;;  %v5225_v43 = vmax.f32 %v13887_v37, 0.0  ;;  %6587 = vmatpush.bf16.msrb.mxu2 %v12011_v33  ;;  %v12026_v37 = vld [vmem:[%s12308_s22 + $0x2d8] sm:$0xff] }
 0x3fe   : >> { %v5226_v61 = vmax.f32 %v13891_v60, 0.0  ;;  %v5227_v47 = vmax.f32 %v13895_v39, 0.0  ;;  %v5228_v14 = vmax.f32 %v13899_v15, 0.0  ;;  %v5229_v5 = vmax.f32 %v13903_v25, 0.0  ;;  %v12054_v60 = vld [vmem:[%s12308_s22 + $0x338] sm:$0xff] }
 0x3ff   : >> { %v5230_v9 = vmax.f32 %v13907_v62, 0.0  ;;  %v5231_v30 = vmax.f32 %v13911_v31, 0.0  ;;  %v5232_v41 = vmax.f32 %v13916_v26, 0.0  ;;  %v5233_v18 = vmax.f32 %v13920_v50, 0.0  ;;  %6968 = vmatpush.bf16.msrb.mxu3 %v12027_v44  ;;  %7282 = vmatpush.bf16.msrb.mxu0 %v12054_v60 }
 0x400   : >> { %v5234_v17 = vmax.f32 %v13924_v8, 0.0  ;;  %v5235_v10 = vmax.f32 %v13928_v40, 0.0  ;;  %v13965_v46 = vpack.c.bf16 %v5205_v29, %v5205_v29  ;;  %v13967_v1 = vpack.c.bf16 %v5206_v7, %v5206_v7  ;;  %v12009_v8 = vld [vmem:[%s12308_s22 + $0x250] sm:$0xff] }
 0x401   : >> { %v13969_v13 = vpack.c.bf16 %v5207_v11, %v5207_v11  ;;  %v13971_v27 = vpack.c.bf16 %v5208_v54, %v5208_v54  ;;  %v13973_v36 = vpack.c.bf16 %v5209_v4, %v5209_v4  ;;  %v13976_v53 = vpack.c.bf16 %v5210_v58, %v5210_v58  ;;  %6588 = vmatpush.bf16.msrb.mxu2 %v12010_v52  ;;  %v12007_v52 = vld [vmem:[%s12308_s22 + $0x240] sm:$0xff] }
 0x402   : >> { %v13978_v63 = vpack.c.bf16 %v5211_v6, %v5211_v6  ;;  %v13980_v28 = vpack.c.bf16 %v5212_v16, %v5212_v16  ;;  %v13982_v20 = vpack.c.bf16 %v5213_v42, %v5213_v42  ;;  %v13984_v49 = vpack.c.bf16 %v5214_v34, %v5214_v34  ;;  %v12025_v6 = vld [vmem:[%s12308_s22 + $0x2d0] sm:$0xff] }
 0x403   : >> { %v13986_v38 = vpack.c.bf16 %v5215_v57, %v5215_v57  ;;  %v13988_v12 = vpack.c.bf16 %v5216_v0, %v5216_v0  ;;  %v13990_v22 = vpack.c.bf16 %v5217_v35, %v5217_v35  ;;  %v13994_v39 = vpack.c.bf16 %v5218_v3, %v5218_v3  ;;  %6969 = vmatpush.bf16.msrb.mxu3 %v12026_v37  ;;  %v12053_v16 = vld [vmem:[%s12308_s22 + $0x330] sm:$0xff] }
 0x404   : >> { %v13996_v15 = vpack.c.bf16 %v5219_v59, %v5219_v59  ;;  %v13998_v25 = vpack.c.bf16 %v5220_v23, %v5220_v23  ;;  %v5336_v62 = vshrl.u32 %v13965_v46, 16  ;;  %v14001_v31 = vpack.c.bf16 %v5221_v21, %v5221_v21  ;;  %7283 = vmatpush.bf16.msrb.mxu0 %v12053_v16  ;;  %v12008_v23 = vld [vmem:[%s12308_s22 + $0x248] sm:$0xff]  ;;  %v12051_v16 = vld [vmem:[%s12308_s22 + $0x320] sm:$0xff] }
 0x405   : >> { %15769 = vst [vmem:[#allocation19_spill] sm:$0xff] %v13988_v12  ;;  %v14003_v2 = vpack.c.bf16 %v5222_v56, %v5222_v56  ;;  %v5353_v26 = vshrl.u32 %v13969_v13, 16  ;;  %v5361_v50 = vshrl.u32 %v13971_v27, 16  ;;  %v14008_v40 = vpack.c.bf16 %v5223_v55, %v5223_v55  ;;  %6589 = vmatpush.bf16.msrb.mxu2 %v12009_v8 }
 0x406   : >> { %15770 = vst [vmem:[#allocation20_spill] sm:$0xff] %v13994_v39  ;;  %v14010_v29 = vpack.c.bf16 %v5224_v48, %v5224_v48  ;;  %v14012_v7 = vpack.c.bf16 %v5225_v43, %v5225_v43  ;;  %v14014_v11 = vpack.c.bf16 %v5226_v61, %v5226_v61  ;;  %v14016_v54 = vpack.c.bf16 %v5227_v47, %v5227_v47 }
 0x407   : >> { %15771 = vst [vmem:[#allocation21_spill] sm:$0xff] %v13998_v25  ;;  %v14018_v32 = vpack.c.bf16 %v5228_v14, %v5228_v14  ;;  %v5370_v4 = vshrl.u32 %v13973_v36, 16  ;;  %v5378_v58 = vshrl.u32 %v13976_v53, 16  ;;  %v14024_v42 = vpack.c.bf16 %v5229_v5, %v5229_v5  ;;  %6970 = vmatpush.bf16.msrb.mxu3 %v12025_v6  ;;  %v12017_v14 = vld [vmem:[%s12308_s22 + $0x290] sm:$0xff]  ;;  %v12024_v5 = vld [vmem:[%s12308_s22 + $0x2c8] sm:$0xff]  ;;  %v12023_v6 = vld [vmem:[%s12308_s22 + $0x2c0] sm:$0xff] }
 0x408   : >> { %15772 = vst [vmem:[#allocation10_spill] sm:$0xff] %v14003_v2  ;;  %v14026_v34 = vpack.c.bf16 %v5230_v9, %v5230_v9  ;;  %v14028_v57 = vpack.c.bf16 %v5231_v30, %v5231_v30  ;;  %v14030_v0 = vrot.slane %v5336_v62, 7  ;;  %v14032_v24 = vpack.c.bf16 %v5232_v41, %v5232_v41  ;;  %6356 = vmatpush.bf16.msra.mxu1 %v12017_v14  ;;  %v11991_v14 = vld [vmem:[#allocation2] sm:$0xff] }
 0x409   : >> { %v14034_v35 = vpack.c.bf16 %v5233_v18, %v5233_v18  ;;  %v14036_v3 = vrot.slane %v5353_v26, 7  ;;  %v14038_v59 = vrot.slane %v5361_v50, 7  ;;  %v14041_v21 = vpack.c.bf16 %v5234_v17, %v5234_v17  ;;  %6590 = vmatpush.bf16.msrb.mxu2 %v12008_v23  ;;  %v12052_v18 = vld [vmem:[%s12308_s22 + $0x328] sm:$0xff]  ;;  %v5662_v50 = vld [vmem:[#allocation2 + $0x18] sm:$0xf] }
 0x40a   : >> { %v14043_v56 = vpack.c.bf16 %v5235_v10, %v5235_v10  ;;  %v5339_v55 = vshll.u32 %v13965_v46, 16  ;;  %v5387_v48 = vshrl.u32 %v13978_v63, 16  ;;  %v5356_v33 = vshll.u32 %v13969_v13, 16  ;;  %7284 = vmatpush.bf16.msrb.mxu0 %v12052_v18 }
 0x40b   : >> { %v14048_v43 = vrot.slane %v5370_v4, 7  ;;  %v14050_v61 = vrot.slane %v5378_v58, 7  ;;  %v5395_v47 = vshrl.u32 %v13980_v28, 16  ;;  %v5373_v41 = vshll.u32 %v13973_v36, 16  ;;  %6971 = vmatpush.bf16.msrb.mxu3 %v12024_v5  ;;  %v12016_v58 = vld [vmem:[%s12308_s22 + $0x288] sm:$0xff] }
 0x40c   : >> { %v14056_v9 = vor.u32 %v5339_v55, %v14030_v0  ;;  %v5404_v44 = vshrl.u32 %v13982_v20, 16  ;;  %v14063_v17 = vor.u32 %v5356_v33, %v14036_v3  ;;  %v5412_v46 = vshrl.u32 %v13984_v49, 16  ;;  %6357 = vmatpush.bf16.msra.mxu1 %v12016_v58 }
 0x40d   : >> { %v5421_v13 = vshrl.u32 %v13986_v38, 16  ;;  %v14069_v37 = vrot.slane %v5387_v48, 7  ;;  %v5429_v36 = vshrl.u32 %v13988_v12, 16  ;;  %v5438_v60 = vshrl.u32 %v13990_v22, 16  ;;  %6591 = vmatpush.bf16.msrb.mxu2 %v12007_v52 }
 0x40e   : >> { %v5497_v62 = vshrl.u32 %v14010_v29, 16  ;;  %v14075_v26 = vor.u32 %v5373_v41, %v14048_v43  ;;  %v5390_v8 = vshll.u32 %v13978_v63, 16  ;;  %v14079_v4 = vrot.slane %v5395_v47, 7  ;;  %7285 = vmatpush.bf16.msrb.mxu0 %v12051_v16 }
 0x40f   : >> { %v14084_v23 = vrot.slane %v5404_v44, 7  ;;  %v5407_v55 = vshll.u32 %v13982_v20, 16  ;;  %v5500_v33 = vshll.u32 %v14010_v29, 16  ;;  %v14090_v5 = vrot.slane %v5412_v46, 7  ;;  %6972 = vmatpush.bf16.msrb.mxu3 %v12023_v6 }
 0x410   : >> { %v14087_v48 = vrot.slane %v5497_v62, 7  ;;  %v14092_v41 = vrot.slane %v5421_v13, 7  ;;  %v5424_v63 = vshll.u32 %v13986_v38, 16  ;;  %v5514_v47 = vshrl.u32 %v14014_v11, 16  ;;  %6592 = vmatmul.bf16.vlgmr.msrb.gmra.mxu2 %v11991_v14  ;;  %v12015_v62 = vld [vmem:[%s12308_s22 + $0x280] sm:$0xff] }
 0x411   : >> { %15773 = vst [vmem:[#allocation11_spill] sm:$0xff] %v14084_v23  ;;  %v14097_v44 = vor.u32 %v5390_v8, %v14069_v37  ;;  %v14099_v20 = vrot.slane %v5429_v36, 7  ;;  %v14101_v18 = vrot.slane %v5438_v60, 7  ;;  %v5446_v46 = vshrl.u32 %v13994_v39, 16  ;;  %v12050_v8 = vld [vmem:[%s12308_s22 + $0x318] sm:$0xff]  ;;  %6358 = vmatpush.bf16.msra.mxu1 %v12015_v62 }
 0x412   : >> { %15774 = vst [vmem:[#allocation12_spill] sm:$0xff] %v14092_v41  ;;  %v14104_v29 = vor.u32 %v5500_v33, %v14087_v48  ;;  %v14107_v13 = vrot.slane %v5514_v47, 7  ;;  %v5517_v38 = vshll.u32 %v14014_v11, 16  ;;  %v5531_v52 = vshrl.u32 %v14018_v32, 16  ;;  %7286 = vmatpush.bf16.msrb.mxu0 %v12050_v8  ;;  %v5655_v62 = vld [vmem:[#allocation2 + $0xc] sm:$0xf] }
 0x413   : >> { %15775 = vst [vmem:[#allocation13_spill] sm:$0xff] %v14101_v18  ;;  %v14115_v60 = vor.u32 %v5407_v55, %v14084_v23  ;;  %v5455_v58 = vshrl.u32 %v13996_v15, 16  ;;  %v5463_v6 = vshrl.u32 %v13998_v25, 16  ;;  %v14121_v14 = vor.u32 %v5424_v63, %v14092_v41  ;;  %v5673_v25 = vld [vmem:[#allocation2 + $0x2c] sm:$0x1] }
 0x414   : >> { %15776 = vst [vmem:[#allocation14_spill] sm:$0xff] %v14104_v29  ;;  %v5441_v11 = vshll.u32 %v13990_v22, 16  ;;  %v14125_v16 = vor.u32 %v5517_v38, %v14107_v13  ;;  %v5458_v47 = vshll.u32 %v13996_v15, 16  ;;  %v14128_v55 = vrot.slane %v5531_v52, 7  ;;  %v12049_v38 = vld [vmem:[%s12308_s22 + $0x310] sm:$0xff] }
 0x415   : >> { %v5534_v30 = vshll.u32 %v14018_v32, 16  ;;  %v5548_v36 = vshrl.u32 %v14026_v34, 16  ;;  %v14136_v63 = vrot.slane %v5446_v46, 7  ;;  %v5565_v22 = vshrl.u32 %v14032_v24, 16  ;;  %v5683_v23 = vld [vmem:[#allocation2 + $0x3c] sm:$0xf] }
 0x416   : >> { %15777 = vst [vmem:[#allocation15_spill] sm:$0xff] %v14125_v16  ;;  %v14134_v33 = vor.u32 %v5441_v11, %v14101_v18  ;;  %v14140_v10 = vrot.slane %v5455_v58, 7  ;;  %v14142_v15 = vrot.slane %v5463_v6, 7  ;;  %v5472_v32 = vshrl.u32 %v14001_v31, 16  ;;  %v5666_v58 = vld [vmem:[#allocation2 + $0x20] sm:$0x1]  ;;  %7287 = vmatpush.bf16.msrb.mxu0 %v12049_v38 }
 0x417   : >> { %v14146_v52 = vor.u32 %v5534_v30, %v14128_v55  ;;  %v5480_v11 = vshrl.u32 %v14003_v2, 16  ;;  %v14149_v46 = vrot.slane %v5548_v36, 7  ;;  %v5551_v8 = vshll.u32 %v14026_v34, 16  ;;  %v12062_v2 = vld [vmem:[%s12308_s22 + $0x378] sm:$0xff]  ;;  %v5676_v18 = vld [vmem:[#allocation2 + $0x30] sm:$0xf] }
 0x418   : >> { %15778 = vst [vmem:[#allocation22_spill] sm:$0xff] %v14140_v10  ;;  %v14152_v19 = vrot.slane %v5565_v22, 7  ;;  %v5489_v6 = vshrl.u32 %v14008_v40, 16  ;;  %v5506_v51 = vshrl.u32 %v14012_v7, 16  ;;  %v5568_v30 = vshll.u32 %v14032_v24, 16  ;;  %v12048_v22 = vld [vmem:[%s12308_s22 + $0x308] sm:$0xff]  ;;  %7967 = vmatpush.bf16.msrb.mxu1 %v12062_v2 }
 0x419   : >> { %15779 = vst [vmem:[#allocation23_spill] sm:$0xff] %v14142_v15  ;;  %v5475_v29 = vshll.u32 %v14001_v31, 16  ;;  %v5523_v36 = vshrl.u32 %v14016_v54, 16  ;;  %v14162_v34 = vor.u32 %v5551_v8, %v14149_v46  ;;  %v14167_v41 = vor.u32 %v5458_v47, %v14140_v10  ;;  %v5680_v16 = vld [vmem:[#allocation2 + $0x38] sm:$0x1] }
 0x41a   : >> { %15780 = vst [vmem:[#allocation24_spill] sm:$0xff] %v14146_v52  ;;  %v5582_v52 = vshrl.u32 %v14041_v21, 16  ;;  %v14170_v24 = vor.u32 %v5568_v30, %v14152_v19  ;;  %v5585_v31 = vshll.u32 %v14041_v21, 16  ;;  %v14175_v12 = vrot.slane %v5472_v32, 7  ;;  %v5687_v30 = vld [vmem:[#allocation2 + $0x44] sm:$0x1]  ;;  %7288 = vmatpush.bf16.msrb.mxu0 %v12048_v22 }
 0x41b   : >> { %15781 = vst [vmem:[#allocation25_spill] sm:$0xff] %v14162_v34  ;;  %v14177_v8 = vrot.slane %v5480_v11, 7  ;;  %v5656_v34 = vsel %vm12319_vm6, %v14056_v9, %v5655_v62  ;;  %v5663_v47 = vsel %vm12319_vm6, %v14063_v17, %v5662_v50  ;;  %v14188_v21 = vrot.slane %v5506_v51, 7  ;;  %v5690_v11 = vld [vmem:[#allocation2 + $0x48] sm:$0xf] }
 0x41c   : >> { %15782 = vst [vmem:[#allocation26_spill] sm:$0xff] %v14170_v24  ;;  %v14172_v39 = vrot.slane %v5582_v52, 7  ;;  %v5470_v52 = vrot.slane %v14142_v15, 4  ;;  %v14186_v24 = vrot.slane %v5489_v6, 7  ;;  %v5492_v10 = vshll.u32 %v14008_v40, 16 }
 0x41d   : >> { %15783 = vst [vmem:[#allocation27_spill] sm:$0xff] %v14175_v12  ;;  %v14194_v9 = vrot.slane %v5523_v36, 7  ;;  %v15789_v62 = vrot.slane %v14038_v59, 4  ;;  %v5670_v50 = vsel %vm12319_vm6, %v14075_v26, %v5669_v45  ;;  %v5694_v51 = vld [vmem:[#allocation2 + $0x50] sm:$0x1]  ;;  %v5540_v40 = vshrl.u32 %v14024_v42, 16 }
 0x41e   : >> { %15785 = vst [vmem:[#allocation6_spill] sm:$0xff] %v14186_v24  ;;  %v14191_v32 = vor.u32 %v5585_v31, %v14172_v39  ;;  %v5697_v6 = vld [vmem:[#allocation2 + $0x54] sm:$0xf]  ;;  %v5701_v31 = vld [vmem:[#allocation2 + $0x5c] sm:$0x1]  ;;  %v15791_v36 = vrot.slane %v14050_v61, 4  ;;  %v14215_v22 = vor.u32 %v5475_v29, %v14175_v12  ;;  %v5684_v29 = vsel %vm12319_vm6, %v14115_v60, %v5683_v23 }
 0x41f   : >> { %15786 = vst [vmem:[#allocation28_spill] sm:$0xff] %v14188_v21  ;;  %v5667_v2 = vsel %vm12325_vm7, %v15789_v62, %v5666_v58  ;;  %v5677_v58 = vsel %vm12319_vm6, %v14097_v44, %v5676_v18  ;;  %v14212_v45 = vld [vmem:[#allocation2 + $0x60] sm:$0xf]  ;;  %v5708_v26 = vld [vmem:[#allocation2 + $0x68] sm:$0x1]  ;;  %v15792_v62 = vrot.slane %v14079_v4, 4  ;;  %v14224_v44 = vor.u32 %v5492_v10, %v14186_v24 }
 0x420   : >> { %15787 = vst [vmem:[#allocation29_spill] sm:$0xff] %v14191_v32  ;;  %v5674_v32 = vsel %vm12325_vm7, %v15791_v36, %v5673_v25  ;;  %v5768_v36 = vld [vmem:[#allocation2 + $0x4] sm:$0xf]  ;;  %v5543_v10 = vshll.u32 %v14024_v42, 16  ;;  %v5767_v18 = vld [vmem:[#allocation2] sm:$0xf] }
 0x421   : >> { %5657 = vst [vmem:[#allocation2 + $0xc] sm:$0xf] %v5656_v34  ;;  %v5509_v34 = vshll.u32 %v14012_v7, 16  ;;  %v5681_v25 = vsel %vm12325_vm7, %v15792_v62, %v5680_v16  ;;  %v6673_v7 = vld [vmem:[#allocation2] sm:$0xe]  ;;  %v15793_v62 = vrot.slane %v14090_v5, 4 }
 0x422   : >> { %15788 = vst [vmem:[#allocation30_spill] sm:$0xff] %v14194_v9  ;;  %v12047_v12 = vld [vmem:[%s12308_s22 + $0x300] sm:$0xff]  ;;  %v5557_v23 = vshrl.u32 %v14028_v57, 16  ;;  %v15794_v16 = vrot.slane %v14099_v20, 4  ;;  %v5836_v42 = vshrl.u32 %v5767_v18, 16  ;;  %v5839_v60 = vshll.u32 %v5767_v18, 16 }
 0x423   : >> { %5664 = vst [vmem:[#allocation2 + $0x18] sm:$0xf] %v5663_v47  ;;  %v5526_v47 = vshll.u32 %v14016_v54, 16  ;;  %v5819_v54 = vld [vmem:[#allocation2 + $0x8] sm:$0x1]  ;;  %7289 = vmatpush.bf16.msrb.mxu0 %v12047_v12 }
 0x424   : >> { %5668 = vst [vmem:[#allocation2 + $0x20] sm:$0x1] %v5667_v2  ;;  %v14228_v2 = vor.u32 %v5509_v34, %v14188_v21  ;;  %v5688_v34 = vsel %vm12325_vm7, %v15793_v62, %v5687_v30  ;;  %v14243_v21 = vrot.slane %v5540_v40, 7  ;;  %v5695_v30 = vsel %vm12325_vm7, %v15794_v16, %v5694_v51  ;;  %v5725_v15 = vld [vmem:[#allocation2 + $0x84] sm:$0xf] }
 0x425   : >> { %5671 = vst [vmem:[#allocation2 + $0x24] sm:$0xf] %v5670_v50  ;;  %v14236_v50 = vor.u32 %v5526_v47, %v14194_v9  ;;  %v5711_v47 = vld [vmem:[#allocation2 + $0x6c] sm:$0xf]  ;;  %v5698_v40 = vsel %vm12319_vm6, %v14134_v33, %v5697_v6  ;;  %v11333_v51 = vrot.slane %v6673_v7, 9  ;;  %v6723_v16 = vrot.slane %v5768_v36, 5 }
 0x426   : >> { %5675 = vst [vmem:[#allocation2 + $0x2c] sm:$0x1] %v5674_v32  ;;  %v5691_v32 = vsel %vm12319_vm6, %v14121_v14, %v5690_v11  ;;  %v5715_v14 = vld [vmem:[#allocation2 + $0x74] sm:$0x1]  ;;  %v5705_v11 = vsel %vm12319_vm6, %v14167_v41, %v14212_v45  ;;  %v5718_v33 = vld [vmem:[#allocation2 + $0x78] sm:$0xf]  ;;  %v5712_v18 = vsel %vm12319_vm6, %v14215_v22, %v5711_v47 }
 0x427   : >> { %5678 = vst [vmem:[#allocation2 + $0x30] sm:$0xf] %v5677_v58  ;;  %v15795_v58 = vrot.slane %v14136_v63, 4  ;;  %v6726_v6 = vrot.slane %v5819_v54, 5  ;;  %v6724_v9 = vsel %vm12701_vm13, %v11333_v51, %v6723_v16  ;;  %v6725_v24 = vrot.slane %v6723_v16, 4 }
 0x428   : >> { %5682 = vst [vmem:[#allocation2 + $0x38] sm:$0x1] %v5681_v25  ;;  %v5709_v25 = vsel %vm12325_vm7, %v5470_v52, %v5708_v26  ;;  %v5849_v41 = vshrl.u32 %v5768_v36, 16  ;;  %v5855_v45 = vshll.u32 %v5819_v54, 16  ;;  %v6853_v52 = vunpack.c.l.b16 %v6724_v9  ;;  %v5736_v16 = vld [vmem:[#allocation2 + $0x98] sm:$0x1] }
 0x429   : >> { %v5702_v62 = vsel %vm12325_vm7, %v15795_v58, %v5701_v31  ;;  %5685 = vst [vmem:[#allocation2 + $0x3c] sm:$0xf] %v5684_v29  ;;  %v5845_v31 = vshll.u32 %v5768_v36, 16  ;;  %v5722_v29 = vld [vmem:[#allocation2 + $0x80] sm:$0x1]  ;;  %v5838_v26 = vrot.slane %v5836_v42, 4  ;;  %v5719_v22 = vsel %vm12319_vm6, %v14224_v44, %v5718_v33 }
 0x42a   : >> { %5689 = vst [vmem:[#allocation2 + $0x44] sm:$0x1] %v5688_v34  ;;  %v5841_v7 = vrot.slane %v5839_v60, 5  ;;  %v5729_v34 = vld [vmem:[#allocation2 + $0x8c] sm:$0x1]  ;;  %v5851_v51 = vrot.slane %v5849_v41, 4  ;;  %v5726_v44 = vsel %vm12319_vm6, %v14228_v2, %v5725_v15 }
 0x42b   : >> { %5692 = vst [vmem:[#allocation2 + $0x48] sm:$0xf] %v5691_v32  ;;  %v5847_v12 = vrot.slane %v5845_v31, 5  ;;  %v5574_v32 = vshrl.u32 %v14034_v35, 16  ;;  %v5732_v36 = vld [vmem:[#allocation2 + $0x90] sm:$0xf] }
 0x42c   : >> { %5696 = vst [vmem:[#allocation2 + $0x50] sm:$0x1] %v5695_v30  ;;  %v6727_v30 = vsel %vm12701_vm13, %v6725_v24, %v6726_v6  ;;  %v14276_v54 = vrot.slane %v5557_v23, 7  ;;  %v15797_v9 = vrot.slane %v14177_v8, 4  ;;  %v5591_v31 = vshrl.u32 %v14043_v56, 16 }
 0x42d   : >> { %5699 = vst [vmem:[#allocation2 + $0x54] sm:$0xf] %v5698_v40  ;;  %v6854_v42 = vunpack.c.l.b16 %v6727_v30  ;;  %v5842_v40 = vor.u32 %v5841_v7, %v5838_v26  ;;  %v5852_v24 = vor.u32 %v5851_v51, %v5847_v12  ;;  %v5857_v47 = vrot.slane %v5855_v45, 5  ;;  %v5739_v23 = vld [vmem:[#allocation2 + $0x9c] sm:$0xf] }
 0x42e   : >> { %5703 = vst [vmem:[#allocation2 + $0x5c] sm:$0x1] %v5702_v62  ;;  %v5716_v60 = vsel %vm12325_vm7, %v15797_v9, %v5715_v14  ;;  %v5545_v62 = vor.u32 %v5543_v10, %v14243_v21  ;;  %v15798_v6 = vrot.slane %v14087_v48, 4  ;;  %v14291_v26 = vrot.slane %v5574_v32, 7  ;;  %v5743_v33 = vld [vmem:[#allocation2 + $0xa4] sm:$0x1] }
 0x42f   : >> { %5706 = vst [vmem:[#allocation2 + $0x60] sm:$0xf] %v5705_v11  ;;  %v6885_v11 = vpack.c.b16 %v6854_v42, %v6853_v52  ;;  %v5843_v41 = vrot.slane %v5842_v40, 4  ;;  %v5577_v7 = vshll.u32 %v14034_v35, 16  ;;  %v5555_v10 = vrot.slane %v14149_v46, 4 }
 0x430   : >> { %5710 = vst [vmem:[#allocation2 + $0x68] sm:$0x1] %v5709_v25  ;;  %v5723_v14 = vsel %vm12325_vm7, %v15798_v6, %v5722_v29  ;;  %v5853_v25 = vrot.slane %v5852_v24, 4  ;;  %v15799_v48 = vshll.u32 %v14028_v57, 16  ;;  %v15800_v45 = vrot.slane %v14107_v13, 4 }
 0x431   : >> { %5713 = vst [vmem:[#allocation2 + $0x6c] sm:$0xf] %v5712_v18  ;;  %6973 = vmatmul.bf16.vlgmr.msrb.gmra.mxu3 %v6885_v11  ;;  %v5848_v32 = vsel %vm12341_vm10, %v5843_v41, %v5847_v12  ;;  %v5746_v15 = vld [vmem:[#allocation2 + $0xa8] sm:$0xf]  ;;  %v14307_v2 = vrot.slane %v5591_v31, 7  ;;  %v5733_v46 = vsel %vm12319_vm6, %v14236_v50, %v5732_v36  ;;  %v5572_v51 = vrot.slane %v14152_v19, 4 }
 0x432   : >> { %5717 = vst [vmem:[#allocation2 + $0x74] sm:$0x1] %v5716_v60  ;;  %v5562_v29 = vor.u32 %v15799_v48, %v14276_v54  ;;  %v5730_v52 = vsel %vm12325_vm7, %v15800_v45, %v5729_v34  ;;  %v5858_v57 = vsel %vm12341_vm10, %v5853_v25, %v5857_v47  ;;  %v6239_v13 = vunpack.c.l.b16 %v5848_v32  ;;  %v5750_v18 = vld [vmem:[#allocation2 + $0xb0] sm:$0x1]  ;;  %v5753_v42 = vld [vmem:[#allocation2 + $0xb4] sm:$0xf] }
 0x433   : >> { %5720 = vst [vmem:[#allocation2 + $0x78] sm:$0xf] %v5719_v22  ;;  %v15802_v34 = vshrl.u32 %v13967_v1, 16  ;;  %v15803_v12 = vrot.slane %v14128_v55, 4  ;;  %v6240_v60 = vunpack.c.l.b16 %v5858_v57  ;;  %v5579_v50 = vor.u32 %v5577_v7, %v14291_v26  ;;  %v5757_v31 = vld [vmem:[#allocation2 + $0xbc] sm:$0x1] }
 0x434   : >> { %5724 = vst [vmem:[#allocation2 + $0x80] sm:$0x1] %v5723_v14  ;;  %v5594_v36 = vshll.u32 %v14043_v56, 16  ;;  %v5740_v40 = vsel %vm12319_vm6, %v5545_v62, %v5739_v23  ;;  %v5347_v22 = vshll.u32 %v13967_v1, 16  ;;  %v5589_v19 = vrot.slane %v14172_v39, 4  ;;  %v15806_v32 = vld [vmem:[#allocation11_spill] sm:$0xff] }
 0x435   : >> { %v5346_v30 = vrot.slane %v15802_v34, 7  ;;  %v5737_v9 = vsel %vm12325_vm7, %v15803_v12, %v5736_v16  ;;  %5727 = vst [vmem:[#allocation2 + $0x84] sm:$0xf] %v5726_v44  ;;  %v5744_v55 = vsel %vm12325_vm7, %v5555_v10, %v5743_v33  ;;  %v6271_v16 = vpack.c.b16 %v6240_v60, %v6239_v13  ;;  %v5760_v24 = vld [vmem:[#allocation2 + $0xc0] sm:$0xf]  ;;  %v15808_v13 = vld [vmem:[#allocation12_spill] sm:$0xff] }
 0x436   : >> { %5731 = vst [vmem:[#allocation2 + $0x8c] sm:$0x1] %v5730_v52  ;;  %v5364_v47 = vshll.u32 %v13971_v27, 16  ;;  %v5596_v6 = vor.u32 %v5594_v36, %v14307_v2  ;;  %v5747_v56 = vsel %vm12319_vm6, %v5562_v29, %v5746_v15  ;;  %v5342_v23 = vrot.slane %v14030_v0, 4  ;;  %v5769_v14 = vld [vmem:[#allocation2 + $0xc] sm:$0xf] }
 0x437   : >> { %5734 = vst [vmem:[#allocation2 + $0x90] sm:$0xf] %v5733_v46  ;;  %v5349_v62 = vor.u32 %v5347_v22, %v5346_v30  ;;  %v5381_v1 = vshll.u32 %v13976_v53, 16  ;;  %v5751_v39 = vsel %vm12325_vm7, %v5572_v51, %v5750_v18  ;;  %6359 = vmatmul.bf16.vlgmr.msra.gmra.mxu1 %v6271_v16  ;;  %v5351_v11 = vrot.slane %v5346_v30, 4  ;;  %v5659_v33 = vld [vmem:[#allocation2 + $0x14] sm:$0x1] }
 0x438   : >> { %5738 = vst [vmem:[#allocation2 + $0x98] sm:$0x1] %v5737_v9  ;;  %v5359_v27 = vrot.slane %v14036_v3, 4  ;;  %v5366_v41 = vor.u32 %v5364_v47, %v14038_v59  ;;  %v5754_v7 = vsel %vm12319_vm6, %v5579_v50, %v5753_v42  ;;  %v5376_v0 = vrot.slane %v14048_v43, 4  ;;  %v15807_v46 = vld [vmem:[#allocation20_spill] sm:$0xff]  ;;  %v15809_v18 = vld [vmem:[#allocation13_spill] sm:$0xff] }
 0x439   : >> { %5741 = vst [vmem:[#allocation2 + $0x9c] sm:$0xf] %v5740_v40  ;;  %v5383_v44 = vor.u32 %v5381_v1, %v14050_v61  ;;  %v5398_v53 = vshll.u32 %v13980_v28, 16  ;;  %v5758_v25 = vsel %vm12325_vm7, %v5589_v19, %v5757_v31  ;;  %v5415_v10 = vshll.u32 %v13984_v49, 16  ;;  %v15804_v61 = vld [vmem:[#allocation19_spill] sm:$0xff]  ;;  %v15810_v40 = vld [vmem:[#allocation21_spill] sm:$0xff] }
 0x43a   : >> { %5745 = vst [vmem:[#allocation2 + $0xa4] sm:$0x1] %v5744_v55  ;;  %v5761_v3 = vsel %vm12319_vm6, %v5596_v6, %v5760_v24  ;;  %v5860_v59 = vshrl.u32 %v5769_v14, 16  ;;  %v5863_v48 = vshll.u32 %v5769_v14, 16  ;;  %v5393_v29 = vrot.slane %v14069_v37, 4  ;;  %v15811_v22 = vld [vmem:[#allocation10_spill] sm:$0xff] }
 0x43b   : >> { %5748 = vst [vmem:[#allocation2 + $0xa8] sm:$0xf] %v5747_v56  ;;  %v5400_v43 = vor.u32 %v5398_v53, %v14079_v4  ;;  %v5432_v45 = vshll.u32 %v15804_v61, 16  ;;  %v5350_v52 = vsel %vm12311_vm5, %v5342_v23, %v5349_v62  ;;  %v5410_v15 = vrot.slane %v15806_v32, 4  ;;  %v6674_v42 = vld [vmem:[#allocation2 + $0xc] sm:$0xe] }
 0x43c   : >> { %5752 = vst [vmem:[#allocation2 + $0xb0] sm:$0x1] %v5751_v39  ;;  %v5417_v49 = vor.u32 %v5415_v10, %v14090_v5  ;;  %v5449_v38 = vshll.u32 %v15807_v46, 16  ;;  %v5660_v57 = vsel %vm12325_vm7, %v5351_v11, %v5659_v33  ;;  %v5427_v37 = vrot.slane %v15808_v13, 4  ;;  %v12061_v55 = vld [vmem:[%s12308_s22 + $0x370] sm:$0xff]  ;;  %v15812_v16 = vld [vmem:[#allocation22_spill] sm:$0xff] }
 0x43d   : >> { %5755 = vst [vmem:[#allocation2 + $0xb4] sm:$0xf] %v5754_v7  ;;  %v5434_v4 = vor.u32 %v5432_v45, %v14099_v20  ;;  %v5444_v34 = vrot.slane %v15809_v18, 4  ;;  %v5367_v30 = vsel %vm12311_vm5, %v5359_v27, %v5366_v41  ;;  %v5862_v5 = vrot.slane %v5860_v59, 4  ;;  %v5771_v6 = vld [vmem:[#allocation2 + $0x18] sm:$0xf]  ;;  %7968 = vmatpush.bf16.msrb.mxu1 %v12061_v55 }
 0x43e   : >> { %5759 = vst [vmem:[#allocation2 + $0xbc] sm:$0x1] %v5758_v25  ;;  %v5451_v51 = vor.u32 %v5449_v38, %v14136_v63  ;;  %v5865_v12 = vrot.slane %v5863_v48, 5  ;;  %v5384_v9 = vsel %vm12311_vm5, %v5376_v0, %v5383_v44  ;;  %v5401_v60 = vsel %vm12311_vm5, %v5393_v29, %v5400_v43  ;;  %v15813_v56 = vld [vmem:[#allocation23_spill] sm:$0xff] }
 0x43f   : >> { %5762 = vst [vmem:[#allocation2 + $0xc0] sm:$0xf] %v5761_v3  ;;  %v5418_v20 = vsel %vm12311_vm5, %v5410_v15, %v5417_v49  ;;  %v5435_v63 = vsel %vm12311_vm5, %v5427_v37, %v5434_v4  ;;  %v5466_v31 = vshll.u32 %v15810_v40, 16  ;;  %v5483_v19 = vshll.u32 %v15811_v22, 16  ;;  %v15814_v0 = vld [vmem:[#allocation27_spill] sm:$0xff] }
 0x440   : >> { %5658 = vst [vmem:[#allocation2 + $0x10] sm:$0xf] %v5350_v52  ;;  %v5866_v50 = vor.u32 %v5865_v12, %v5862_v5  ;;  %v5452_v36 = vsel %vm12311_vm5, %v5444_v34, %v5451_v51  ;;  %v5461_v24 = vrot.slane %v15812_v16, 4  ;;  %v11334_v47 = vrot.slane %v6674_v42, 9  ;;  %v5821_v42 = vld [vmem:[#allocation2 + $0x20] sm:$0x1] }
 0x441   : >> { %5661 = vst [vmem:[#allocation2 + $0x14] sm:$0x1] %v5660_v57  ;;  %v5468_v23 = vor.u32 %v5466_v31, %v15813_v56  ;;  %v5478_v44 = vrot.slane %v15814_v0, 4  ;;  %v5485_v53 = vor.u32 %v5483_v19, %v14177_v8  ;;  %v5884_v43 = vshrl.u32 %v5771_v6, 16  ;;  %v5773_v56 = vld [vmem:[#allocation2 + $0x24] sm:$0xf] }
 0x442   : >> { %5665 = vst [vmem:[#allocation2 + $0x1c] sm:$0xf] %v5367_v30  ;;  %v5867_v27 = vrot.slane %v5866_v50, 4  ;;  %v5887_v61 = vshll.u32 %v5771_v6, 16  ;;  %v6740_v22 = vrot.slane %v5821_v42, 5  ;;  %v5903_v19 = vshll.u32 %v5821_v42, 16 }
 0x443   : >> { %5672 = vst [vmem:[#allocation2 + $0x28] sm:$0xf] %v5384_v9  ;;  %v5469_v38 = vsel %vm12311_vm5, %v5461_v24, %v5468_v23  ;;  %v5486_v37 = vsel %vm12311_vm5, %v5478_v44, %v5485_v53  ;;  %v5886_v34 = vrot.slane %v5884_v43, 4 }
 0x444   : >> { %5679 = vst [vmem:[#allocation2 + $0x34] sm:$0xf] %v5401_v60  ;;  %v5889_v30 = vrot.slane %v5887_v61, 5  ;;  %v5822_v61 = vld [vmem:[#allocation2 + $0x2c] sm:$0x1] }
 0x445   : >> { %5686 = vst [vmem:[#allocation2 + $0x40] sm:$0xf] %v5418_v20 }
 0x446   : >> { %5693 = vst [vmem:[#allocation2 + $0x4c] sm:$0xf] %v5435_v63  ;;  %v6675_v63 = vld [vmem:[#allocation2 + $0x18] sm:$0xe] }
 0x447   : >> { %v11992_v62 = vld [vmem:[#allocation2 + $0xc] sm:$0xff]  ;;  %5700 = vst [vmem:[#allocation2 + $0x58] sm:$0xf] %v5452_v36  ;;  %v5890_v36 = vor.u32 %v5889_v30, %v5886_v34  ;;  %v11335_v31 = vrot.slane %v6675_v63, 9 }
 0x448   : >> { %v12031_v1 = vld [vmem:[#allocation2 + $0xc] sm:$0xff]  ;;  %v5820_v14 = vld [vmem:[#allocation2 + $0x14] sm:$0x1]  ;;  %6597 = vmatmul.bf16.gmra.mxu2 %v11992_v62  ;;  %5707 = vst [vmem:[#allocation2 + $0x64] sm:$0xf] %v5469_v38  ;;  %v5927_v38 = vshll.u32 %v5822_v61, 16 }
 0x449   : >> { %v5770_v39 = vld [vmem:[#allocation2 + $0x10] sm:$0xf]  ;;  %7290 = vmatmul.bf16.vlgmr.msrb.gmra.mxu0 %v12031_v1  ;;  %v6733_v25 = vrot.slane %v5820_v14, 5  ;;  %v5879_v33 = vshll.u32 %v5820_v14, 16  ;;  %v5772_v10 = vld [vmem:[#allocation2 + $0x1c] sm:$0xf] }
 0x44a   : >> { %v6730_v11 = vrot.slane %v5770_v39, 5  ;;  %v5869_v41 = vshll.u32 %v5770_v39, 16  ;;  %v5873_v7 = vshrl.u32 %v5770_v39, 16  ;;  %v5893_v45 = vshll.u32 %v5772_v10, 16  ;;  %5714 = vst [vmem:[#allocation2 + $0x70] sm:$0xf] %v5486_v37 }
 0x44b   : >> { %v5897_v15 = vshrl.u32 %v5772_v10, 16  ;;  %v5881_v13 = vrot.slane %v5879_v33, 5  ;;  %v6737_v5 = vrot.slane %v5772_v10, 5  ;;  %v11993_v55 = vld [vmem:[#allocation2 + $0x18] sm:$0xff]  ;;  %v5774_v23 = vld [vmem:[#allocation2 + $0x28] sm:$0xf] }
 0x44c   : >> { %v6731_v3 = vsel %vm12701_vm13, %v11334_v47, %v6730_v11  ;;  %v6732_v59 = vrot.slane %v6730_v11, 4  ;;  %v5871_v48 = vrot.slane %v5869_v41, 5  ;;  %v5875_v29 = vrot.slane %v5873_v7, 4  ;;  %v12032_v16 = vld [vmem:[#allocation2 + $0x18] sm:$0xff]  ;;  %v5775_v37 = vld [vmem:[#allocation2 + $0x30] sm:$0xf] }
 0x44d   : >> { %v6855_v49 = vunpack.c.l.b16 %v6731_v3  ;;  %v5895_v12 = vrot.slane %v5893_v45, 5  ;;  %v5899_v9 = vrot.slane %v5897_v15, 4  ;;  %v6739_v50 = vrot.slane %v6737_v5, 4  ;;  %v6676_v45 = vld [vmem:[#allocation2 + $0x24] sm:$0xe]  ;;  %v12060_v15 = vld [vmem:[%s12308_s22 + $0x368] sm:$0xff] }
 0x44e   : >> { %v6734_v52 = vsel %vm12701_vm13, %v6732_v59, %v6733_v25  ;;  %v5872_v8 = vsel %vm12341_vm10, %v5867_v27, %v5871_v48  ;;  %v5876_v32 = vor.u32 %v5875_v29, %v5871_v48  ;;  %v5891_v47 = vrot.slane %v5890_v36, 4  ;;  %7969 = vmatpush.bf16.msrb.mxu1 %v12060_v15  ;;  %v5776_v30 = vld [vmem:[#allocation2 + $0x34] sm:$0xf] }
 0x44f   : >> { %v6856_v46 = vunpack.c.l.b16 %v6734_v52  ;;  %v6241_v18 = vunpack.c.l.b16 %v5872_v8  ;;  %v5900_v40 = vor.u32 %v5899_v9, %v5895_v12  ;;  %v6741_v24 = vsel %vm12701_vm13, %v6739_v50, %v6740_v22 }
 0x450   : >> { %v5877_v57 = vrot.slane %v5876_v32, 4  ;;  %v6738_v62 = vsel %vm12701_vm13, %v11335_v31, %v6737_v5  ;;  %v5905_v1 = vrot.slane %v5903_v19, 5  ;;  %v6858_v39 = vunpack.c.l.b16 %v6741_v24 }
 0x451   : >> { %v6886_v4 = vpack.c.b16 %v6856_v46, %v6855_v49  ;;  %v5901_v6 = vrot.slane %v5900_v40, 4  ;;  %v5908_v14 = vshrl.u32 %v5773_v56, 16  ;;  %v5911_v11 = vshll.u32 %v5773_v56, 16 }
 0x452   : >> { %v5882_v51 = vsel %vm12341_vm10, %v5877_v57, %v5881_v13  ;;  %v5896_v27 = vsel %vm12341_vm10, %v5891_v47, %v5895_v12  ;;  %v5917_v7 = vshll.u32 %v5774_v23, 16  ;;  %v5921_v0 = vshrl.u32 %v5774_v23, 16  ;;  %v11994_v57 = vld [vmem:[#allocation2 + $0x24] sm:$0xff] }
 0x453   : >> { %6978 = vmatmul.bf16.gmra.mxu3 %v6886_v4  ;;  %v6242_v60 = vunpack.c.l.b16 %v5882_v51  ;;  %v5906_v41 = vsel %vm12341_vm10, %v5901_v6, %v5905_v1  ;;  %v6857_v44 = vunpack.c.l.b16 %v6738_v62  ;;  %v6243_v25 = vunpack.c.l.b16 %v5896_v27  ;;  %v12033_v13 = vld [vmem:[#allocation2 + $0x24] sm:$0xff]  ;;  %v5823_v62 = vld [vmem:[#allocation2 + $0x38] sm:$0x1]  ;;  %v6677_v1 = vld [vmem:[#allocation2 + $0x30] sm:$0xe] }
 0x454   : >> { %v6244_v33 = vunpack.c.l.b16 %v5906_v41  ;;  %v5910_v10 = vrot.slane %v5908_v14, 4  ;;  %v6744_v3 = vrot.slane %v5774_v23, 5  ;;  %v5913_v59 = vrot.slane %v5911_v11, 5  ;;  %v15815_v6 = vld [vmem:[#allocation6_spill] sm:$0xff]  ;;  %v15816_v14 = vld [vmem:[#allocation28_spill] sm:$0xff] }
 0x455   : >> { %v6272_v20 = vpack.c.b16 %v6242_v60, %v6241_v18  ;;  %v6887_v53 = vpack.c.b16 %v6858_v39, %v6857_v44  ;;  %v5919_v48 = vrot.slane %v5917_v7, 5  ;;  %v5923_v29 = vrot.slane %v5921_v0, 4 }
 0x456   : >> { %v6273_v43 = vpack.c.b16 %v6244_v33, %v6243_v25  ;;  %v6746_v52 = vrot.slane %v6744_v3, 4  ;;  %v5914_v8 = vor.u32 %v5913_v59, %v5910_v10  ;;  %v11336_v49 = vrot.slane %v6676_v45, 9  ;;  %v15817_v25 = vld [vmem:[#allocation14_spill] sm:$0xff]  ;;  %v11995_v10 = vld [vmem:[#allocation2 + $0x30] sm:$0xff]  ;;  %v15819_v45 = vld [vmem:[#allocation15_spill] sm:$0xff] }
 0x457   : >> { %6364 = vmatmul.bf16.gmra.mxu1 %v6272_v20  ;;  %v5924_v32 = vor.u32 %v5923_v29, %v5919_v48  ;;  %v6747_v46 = vrot.slane %v5822_v61, 5  ;;  %v5929_v5 = vrot.slane %v5927_v38, 5  ;;  %v5932_v12 = vshrl.u32 %v5775_v37, 16 }
 0x458   : >> { %6602 = vmatmul.bf16.gmra.mxu2 %v11993_v55  ;;  %v5915_v18 = vrot.slane %v5914_v8, 4  ;;  %v6745_v51 = vsel %vm12701_vm13, %v11336_v49, %v6744_v3  ;;  %v5935_v60 = vshll.u32 %v5775_v37, 16  ;;  %v5941_v63 = vshll.u32 %v5776_v30, 16  ;;  %v12034_v3 = vld [vmem:[#allocation2 + $0x30] sm:$0xff] }
 0x459   : >> { %7295 = vmatmul.bf16.gmra.mxu0 %v12032_v16  ;;  %v6748_v4 = vsel %vm12701_vm13, %v6746_v52, %v6747_v46  ;;  %v5925_v34 = vrot.slane %v5924_v32, 4  ;;  %v5945_v50 = vshrl.u32 %v5776_v30, 16  ;;  %v6859_v36 = vunpack.c.l.b16 %v6745_v51  ;;  %v5778_v32 = vld [vmem:[#allocation2 + $0x40] sm:$0xf] }
 0x45a   : >> { %v6860_v9 = vunpack.c.l.b16 %v6748_v4  ;;  %v5920_v20 = vsel %vm12341_vm10, %v5915_v18, %v5919_v48  ;;  %v5934_v40 = vrot.slane %v5932_v12, 4  ;;  %v5937_v55 = vrot.slane %v5935_v60, 5  ;;  %v15818_v48 = vld [vmem:[#allocation30_spill] sm:$0xff] }
 0x45b   : >> { %v5930_v42 = vsel %vm12341_vm10, %v5925_v34, %v5929_v5  ;;  %v6245_v22 = vunpack.c.l.b16 %v5920_v20  ;;  %v6751_v16 = vrot.slane %v5776_v30, 5  ;;  %v5943_v24 = vrot.slane %v5941_v63, 5  ;;  %v15820_v30 = vld [vmem:[#allocation24_spill] sm:$0xff] }
 0x45c   : >> { %v6888_v31 = vpack.c.b16 %v6860_v9, %v6859_v36  ;;  %v6246_v19 = vunpack.c.l.b16 %v5930_v42  ;;  %v5947_v47 = vrot.slane %v5945_v50, 4  ;;  %v5495_v56 = vrot.slane %v15815_v6, 4 }
 0x45d   : >> { %v5938_v39 = vor.u32 %v5937_v55, %v5934_v40  ;;  %v5512_v11 = vrot.slane %v15816_v14, 4  ;;  %v6753_v27 = vrot.slane %v6751_v16, 4  ;;  %v11337_v7 = vrot.slane %v6677_v1, 9  ;;  %v15822_v40 = vld [vmem:[#allocation26_spill] sm:$0xff] }
 0x45e   : >> { %v6274_v23 = vpack.c.b16 %v6246_v19, %v6245_v22  ;;  %v5948_v41 = vor.u32 %v5947_v47, %v5943_v24  ;;  %v6754_v0 = vrot.slane %v5823_v62, 5  ;;  %v5951_v44 = vshll.u32 %v5823_v62, 16  ;;  %v15823_v22 = vld [vmem:[#allocation29_spill] sm:$0xff]  ;;  %v15825_v1 = vld [vmem:[#allocation18_spill] sm:$0xff] }
 0x45f   : >> { %v5503_v33 = vsel %vm12311_vm5, %v5495_v56, %v15817_v25  ;;  %v5939_v59 = vrot.slane %v5938_v39, 4  ;;  %v5529_v29 = vrot.slane %v15818_v48, 4  ;;  %v5520_v52 = vsel %vm12311_vm5, %v5512_v11, %v15819_v45  ;;  %v15824_v62 = vld [vmem:[#allocation17_spill] sm:$0xff] }
 0x460   : >> { %5721 = vst [vmem:[#allocation2 + $0x7c] sm:$0xf] %v5503_v33  ;;  %v5949_v61 = vrot.slane %v5948_v41, 4  ;;  %v5546_v8 = vrot.slane %v14243_v21, 4  ;;  %v6752_v15 = vsel %vm12701_vm13, %v11337_v7, %v6751_v16  ;;  %v5953_v49 = vrot.slane %v5951_v44, 5  ;;  %v11996_v41 = vld [vmem:[#allocation2 + $0x3c] sm:$0xff] }
 0x461   : >> { %5728 = vst [vmem:[#allocation2 + $0x88] sm:$0xf] %v5520_v52  ;;  %v5944_v4 = vsel %vm12341_vm10, %v5939_v59, %v5943_v24  ;;  %v5965_v18 = vshll.u32 %v5778_v32, 16  ;;  %v5969_v34 = vshrl.u32 %v5778_v32, 16  ;;  %v5537_v51 = vsel %vm12311_vm5, %v5529_v29, %v15820_v30  ;;  %v5824_v16 = vld [vmem:[#allocation2 + $0x44] sm:$0x1] }
 0x462   : >> { %v5954_v21 = vsel %vm12341_vm10, %v5949_v61, %v5953_v49  ;;  %v6861_v5 = vunpack.c.l.b16 %v6752_v15  ;;  %5735 = vst [vmem:[#allocation2 + $0x94] sm:$0xf] %v5537_v51  ;;  %v6247_v20 = vunpack.c.l.b16 %v5944_v4  ;;  %v6758_v63 = vrot.slane %v5778_v32, 5  ;;  %v6678_v24 = vld [vmem:[#allocation2 + $0x3c] sm:$0xe] }
 0x463   : >> { %6983 = vmatmul.bf16.gmra.mxu3 %v6887_v53  ;;  %v5777_v53 = vld [vmem:[#allocation2 + $0x3c] sm:$0xf]  ;;  %v6248_v42 = vunpack.c.l.b16 %v5954_v21  ;;  %v5967_v50 = vrot.slane %v5965_v18, 5  ;;  %v5971_v36 = vrot.slane %v5969_v34, 4  ;;  %v5204_v39 = vmul.f32 %v15825_v1, %v15824_v62  ;;  %v5780_v33 = vld [vmem:[#allocation2 + $0x4c] sm:$0xf] }
 0x464   : >> { %v5956_v46 = vshrl.u32 %v5777_v53, 16  ;;  %v5959_v38 = vshll.u32 %v5777_v53, 16  ;;  %v6760_v47 = vrot.slane %v6758_v63, 4  ;;  %v11338_v14 = vrot.slane %v6678_v24, 9  ;;  %v12035_v7 = vld [vmem:[#allocation2 + $0x3c] sm:$0xff] }
 0x465   : >> { %v6275_v55 = vpack.c.b16 %v6248_v42, %v6247_v20  ;;  %v5972_v56 = vor.u32 %v5971_v36, %v5967_v50  ;;  %v6761_v11 = vrot.slane %v5824_v16, 5  ;;  %v5989_v52 = vshll.u32 %v5780_v33, 16  ;;  %v5825_v30 = vld [vmem:[#allocation2 + $0x50] sm:$0x1]  ;;  %v6679_v51 = vld [vmem:[#allocation2 + $0x48] sm:$0xe] }
 0x466   : >> { %v5958_v12 = vrot.slane %v5956_v46, 4  ;;  %v5961_v9 = vrot.slane %v5959_v38, 5  ;;  %v5999_v20 = vshll.u32 %v5825_v30, 16  ;;  %v11997_v42 = vld [vmem:[#allocation2 + $0x48] sm:$0xff] }
 0x467   : >> { %6369 = vmatmul.bf16.gmra.mxu1 %v6273_v43  ;;  %v6755_v43 = vsel %vm12701_vm13, %v6753_v27, %v6754_v0  ;;  %v5975_v27 = vshll.u32 %v5824_v16, 16  ;;  %v5779_v0 = vld [vmem:[#allocation2 + $0x48] sm:$0xf]  ;;  %v6762_v44 = vsel %vm12701_vm13, %v6760_v47, %v6761_v11  ;;  %v5973_v25 = vrot.slane %v5972_v56, 4 }
 0x468   : >> { %6607 = vmatmul.bf16.gmra.mxu2 %v11994_v57  ;;  %v5563_v57 = vrot.slane %v14276_v54, 4  ;;  %v6862_v37 = vunpack.c.l.b16 %v6755_v43  ;;  %v15821_v54 = vld [vmem:[#allocation25_spill] sm:$0xff]  ;;  %v5962_v6 = vor.u32 %v5961_v9, %v5958_v12  ;;  %v5980_v48 = vshrl.u32 %v5779_v0, 16 }
 0x469   : >> { %7300 = vmatmul.bf16.gmra.mxu0 %v12033_v13  ;;  %v5580_v13 = vrot.slane %v14291_v26, 4  ;;  %v5554_v26 = vsel %vm12311_vm5, %v5546_v8, %v15821_v54  ;;  %v5977_v59 = vrot.slane %v5975_v27, 5  ;;  %v6864_v29 = vunpack.c.l.b16 %v6762_v44 }
 0x46a   : >> { %v6889_v60 = vpack.c.b16 %v6862_v37, %v6861_v5  ;;  %5742 = vst [vmem:[#allocation2 + $0xa0] sm:$0xf] %v5554_v26  ;;  %v5963_v53 = vrot.slane %v5962_v6, 4  ;;  %v5983_v43 = vshll.u32 %v5779_v0, 16  ;;  %v5993_v8 = vshrl.u32 %v5780_v33, 16 }
 0x46b   : >> { %v5588_v19 = vsel %vm12311_vm5, %v5580_v13, %v15823_v22  ;;  %v5978_v45 = vsel %vm12341_vm10, %v5973_v25, %v5977_v59  ;;  %v5982_v49 = vrot.slane %v5980_v48, 4  ;;  %v6765_v37 = vrot.slane %v5780_v33, 5  ;;  %v5781_v22 = vld [vmem:[#allocation2 + $0x54] sm:$0xf] }
 0x46c   : >> { %5756 = vst [vmem:[#allocation2 + $0xb8] sm:$0xf] %v5588_v19  ;;  %v5968_v61 = vsel %vm12341_vm10, %v5963_v53, %v5967_v50  ;;  %v5985_v13 = vrot.slane %v5983_v43, 5  ;;  %v5991_v4 = vrot.slane %v5989_v52, 5  ;;  %v5995_v21 = vrot.slane %v5993_v8, 4 }
 0x46d   : >> { %v6249_v38 = vunpack.c.l.b16 %v5968_v61  ;;  %v6767_v12 = vrot.slane %v6765_v37, 4  ;;  %v11339_v26 = vrot.slane %v6679_v51, 9  ;;  %v5782_v19 = vld [vmem:[#allocation2 + $0x58] sm:$0xf]  ;;  %v6001_v24 = vrot.slane %v5999_v20, 5 }
 0x46e   : >> { %v5986_v5 = vor.u32 %v5985_v13, %v5982_v49  ;;  %v5996_v9 = vor.u32 %v5995_v21, %v5991_v4  ;;  %v5597_v47 = vrot.slane %v14307_v2, 4  ;;  %v6007_v1 = vshll.u32 %v5781_v22, 16  ;;  %v6680_v59 = vld [vmem:[#allocation2 + $0x54] sm:$0xe]  ;;  %v12058_v61 = vld [vmem:[%s12308_s22 + $0x358] sm:$0xff] }
 0x46f   : >> { %v6766_v16 = vsel %vm12701_vm13, %v11339_v26, %v6765_v37  ;;  %v6772_v27 = vrot.slane %v5782_v19, 5 }
 0x470   : >> { %v5987_v50 = vrot.slane %v5986_v5, 4  ;;  %v6865_v11 = vunpack.c.l.b16 %v6766_v16  ;;  %v6009_v53 = vrot.slane %v6007_v1, 5 }
 0x471   : >> { %v6774_v48 = vrot.slane %v6772_v27, 4 }
 0x472   : >> { %v5992_v56 = vsel %vm12341_vm10, %v5987_v50, %v5991_v4 }
 0x473   : >> { %6988 = vmatmul.bf16.gmra.mxu3 %v6888_v31  ;;  %v5571_v31 = vsel %vm12311_vm5, %v5563_v57, %v15822_v40  ;;  %v6250_v57 = vunpack.c.l.b16 %v5978_v45  ;;  %v11340_v45 = vrot.slane %v6680_v59, 9 }
 0x474   : >> { %5749 = vst [vmem:[#allocation2 + $0xac] sm:$0xf] %v5571_v31  ;;  %v5997_v31 = vrot.slane %v5996_v9, 4 }
 0x475   : >> { %v6276_v34 = vpack.c.b16 %v6250_v57, %v6249_v38  ;;  %v5783_v38 = vld [vmem:[#allocation2 + $0x60] sm:$0xf]  ;;  %v5784_v57 = vld [vmem:[#allocation2 + $0x64] sm:$0xf]  ;;  %v6773_v13 = vsel %vm12701_vm13, %v11340_v45, %v6772_v27 }
 0x476   : >> { %v6002_v62 = vsel %vm12341_vm10, %v5997_v31, %v6001_v24  ;;  %v6028_v21 = vshrl.u32 %v5783_v38, 16  ;;  %v6037_v51 = vshll.u32 %v5784_v57, 16  ;;  %v6041_v5 = vshrl.u32 %v5784_v57, 16 }
 0x477   : >> { %6374 = vmatmul.bf16.gmra.mxu1 %v6274_v23  ;;  %v12059_v23 = vld [vmem:[%s12308_s22 + $0x360] sm:$0xff]  ;;  %v6252_v0 = vunpack.c.l.b16 %v6002_v62  ;;  %v6779_v20 = vrot.slane %v5784_v57, 5 }
 0x478   : >> { %6612 = vmatmul.bf16.gmra.mxu2 %v11995_v10  ;;  %7970 = vmatpush.bf16.msrb.mxu1 %v12059_v23  ;;  %v5236_v10 = vmax.f32 %v5204_v39, 0.0  ;;  %v6004_v23 = vshrl.u32 %v5781_v22, 16  ;;  %v6013_v39 = vshll.u32 %v5782_v19, 16  ;;  %v6039_v50 = vrot.slane %v6037_v51, 5  ;;  %v5827_v22 = vld [vmem:[#allocation2 + $0x68] sm:$0x1] }
 0x479   : >> { %7305 = vmatmul.bf16.gmra.mxu0 %v12034_v3  ;;  %v6759_v3 = vsel %vm12701_vm13, %v11338_v14, %v6758_v63  ;;  %v12036_v63 = vld [vmem:[#allocation2 + $0x48] sm:$0xff]  ;;  %v6017_v14 = vshrl.u32 %v5782_v19, 16  ;;  %v6047_v62 = vshll.u32 %v5827_v22, 16 }
 0x47a   : >> { %v6863_v32 = vunpack.c.l.b16 %v6759_v3  ;;  %v5334_v15 = vpack.c.bf16 %v5236_v10, %v5236_v10  ;;  %v6006_v44 = vrot.slane %v6004_v23, 4  ;;  %v6015_v2 = vrot.slane %v6013_v39, 5  ;;  %v5826_v3 = vld [vmem:[#allocation2 + $0x5c] sm:$0x1]  ;;  %v11999_v39 = vld [vmem:[#allocation2 + $0x60] sm:$0xff] }
 0x47b   : >> { %v6019_v25 = vrot.slane %v6017_v14, 4  ;;  %v6775_v52 = vrot.slane %v5826_v3, 5  ;;  %v6023_v8 = vshll.u32 %v5826_v3, 16  ;;  %v12038_v14 = vld [vmem:[#allocation2 + $0x60] sm:$0xff] }
 0x47c   : >> { %v6890_v46 = vpack.c.b16 %v6864_v29, %v6863_v32  ;;  %v5599_v18 = vshrl.u32 %v5334_v15, 16  ;;  %v5602_v36 = vshll.u32 %v5334_v15, 16  ;;  %v6010_v29 = vor.u32 %v6009_v53, %v6006_v44  ;;  %v11998_v32 = vld [vmem:[#allocation2 + $0x54] sm:$0xff]  ;;  %7971 = vmatpush.bf16.msrb.mxu1 %v12058_v61  ;;  %v5786_v53 = vld [vmem:[#allocation2 + $0x70] sm:$0xf] }
 0x47d   : >> { %v6020_v43 = vor.u32 %v6019_v25, %v6015_v2  ;;  %v12037_v15 = vld [vmem:[#allocation2 + $0x54] sm:$0xff]  ;;  %v6776_v28 = vsel %vm12701_vm13, %v6774_v48, %v6775_v52  ;;  %v6025_v37 = vrot.slane %v6023_v8, 5  ;;  %v6049_v25 = vrot.slane %v6047_v62, 5 }
 0x47e   : >> { %v14454_v54 = vrot.slane %v5599_v18, 7  ;;  %v6011_v49 = vrot.slane %v6010_v29, 4  ;;  %v6868_v4 = vunpack.c.l.b16 %v6776_v28  ;;  %v6031_v18 = vshll.u32 %v5783_v38, 16 }
 0x47f   : >> { %v6065_v61 = vshrl.u32 %v5786_v53, 16 }
 0x483   : >> { %6993 = vmatmul.bf16.gmra.mxu3 %v6889_v60  ;;  %v6768_v60 = vrot.slane %v5825_v30, 5 }
 0x485   : >> { %v6769_v40 = vsel %vm12701_vm13, %v6767_v12, %v6768_v60  ;;  %v6867_v12 = vunpack.c.l.b16 %v6773_v13  ;;  %v6067_v13 = vrot.slane %v6065_v61, 4 }
 0x486   : >> { %v6866_v6 = vunpack.c.l.b16 %v6769_v40  ;;  %v6681_v40 = vld [vmem:[#allocation2 + $0x60] sm:$0xe] }
 0x487   : >> { %6379 = vmatmul.bf16.gmra.mxu1 %v6275_v55  ;;  %v5604_v55 = vor.u32 %v5602_v36, %v14454_v54  ;;  %v6892_v9 = vpack.c.b16 %v6868_v4, %v6867_v12  ;;  %v6043_v36 = vrot.slane %v6041_v5, 4  ;;  %v11341_v16 = vrot.slane %v6681_v40, 9  ;;  %v6682_v4 = vld [vmem:[#allocation2 + $0x6c] sm:$0xe] }
 0x488   : >> { %6617 = vmatmul.bf16.gmra.mxu2 %v11996_v41  ;;  %v6891_v41 = vpack.c.b16 %v6866_v6, %v6865_v11  ;;  %v6782_v6 = vrot.slane %v5827_v22, 5  ;;  %v5787_v22 = vld [vmem:[#allocation2 + $0x78] sm:$0xf] }
 0x489   : >> { %7310 = vmatmul.bf16.gmra.mxu0 %v12035_v7  ;;  %v6251_v7 = vunpack.c.l.b16 %v5992_v56  ;;  %v5605_v33 = vsel %vm12311_vm5, %v5597_v47, %v5604_v55  ;;  %v6781_v55 = vrot.slane %v6779_v20, 4  ;;  %v6044_v47 = vor.u32 %v6043_v36, %v6039_v50 }
 0x48a   : >> { %5763 = vst [vmem:[#allocation2 + $0xc4] sm:$0xf] %v5605_v33  ;;  %v6780_v27 = vsel %vm12701_vm13, %v11341_v16, %v6779_v20 }
 0x48b   : >> { %v6277_v10 = vpack.c.b16 %v6252_v0, %v6251_v7  ;;  %v6783_v11 = vsel %vm12701_vm13, %v6781_v55, %v6782_v6  ;;  %v6045_v7 = vrot.slane %v6044_v47, 4  ;;  %v5785_v0 = vld [vmem:[#allocation2 + $0x6c] sm:$0xf]  ;;  %v6869_v33 = vunpack.c.l.b16 %v6780_v27 }
 0x48c   : >> { %v6055_v3 = vshll.u32 %v5785_v0, 16  ;;  %v6076_v47 = vshrl.u32 %v5787_v22, 16  ;;  %v6079_v6 = vshll.u32 %v5787_v22, 16 }
 0x48d   : >> { %v6050_v29 = vsel %vm12341_vm10, %v6045_v7, %v6049_v25 }
 0x48e   : >> { %v6256_v28 = vunpack.c.l.b16 %v6050_v29  ;;  %v6057_v38 = vrot.slane %v6055_v3, 5 }
 0x493   : >> { %6998 = vmatmul.bf16.gmra.mxu3 %v6890_v46  ;;  %v6021_v46 = vrot.slane %v6020_v43, 4  ;;  %v6593_v31 = vpop.f32.mrf.mxu2  ;;  %v6061_v43 = vshll.u32 %v5786_v53, 16 }
 0x495   : >> { %v6026_v30 = vsel %vm12341_vm10, %v6021_v46, %v6025_v37  ;;  %v6063_v57 = vrot.slane %v6061_v43, 5 }
 0x496   : >> { %v6254_v60 = vunpack.c.l.b16 %v6026_v30  ;;  %v11342_v30 = vrot.slane %v6682_v4, 9 }
 0x497   : >> { %6384 = vmatmul.bf16.gmra.mxu1 %v6276_v34  ;;  %v6016_v34 = vsel %vm12341_vm10, %v6011_v49, %v6015_v2  ;;  %v6870_v2 = vunpack.c.l.b16 %v6783_v11  ;;  %v6786_v49 = vrot.slane %v5786_v53, 5  ;;  %v6068_v5 = vor.u32 %v6067_v13, %v6063_v57  ;;  %v5789_v13 = vld [vmem:[#allocation2 + $0x84] sm:$0xf] }
 0x498   : >> { %6622 = vmatmul.bf16.gmra.mxu2 %v11997_v42  ;;  %v6253_v26 = vunpack.c.l.b16 %v6016_v34  ;;  %v6030_v42 = vrot.slane %v6028_v21, 4  ;;  %v5828_v21 = vld [vmem:[#allocation2 + $0x74] sm:$0x1]  ;;  %v6081_v53 = vrot.slane %v6079_v6, 5 }
 0x499   : >> { %7315 = vmatmul.bf16.gmra.mxu0 %v12036_v63  ;;  %v6033_v63 = vrot.slane %v6031_v18, 5  ;;  %v6893_v45 = vpack.c.b16 %v6870_v2, %v6869_v33  ;;  %v6788_v34 = vrot.slane %v6786_v49, 4  ;;  %v6789_v12 = vrot.slane %v5828_v21, 5 }
 0x49a   : >> { %v6278_v19 = vpack.c.b16 %v6254_v60, %v6253_v26  ;;  %v6071_v60 = vshll.u32 %v5828_v21, 16  ;;  %v6787_v36 = vsel %vm12701_vm13, %v11342_v30, %v6786_v49 }
 0x49b   : >> { %v6034_v24 = vor.u32 %v6033_v63, %v6030_v42  ;;  %v6595_v59 = vpop.f32.mrf.mxu2  ;;  %v12000_v42 = vld [vmem:[#allocation2 + $0x6c] sm:$0xff] }
 0x49c   : >> { %v12039_v63 = vld [vmem:[#allocation2 + $0x6c] sm:$0xff]  ;;  %v6073_v16 = vrot.slane %v6071_v60, 5 }
 0x4a3   : >> { %7003 = vmatmul.bf16.gmra.mxu3 %v6891_v41  ;;  %v6035_v41 = vrot.slane %v6034_v24, 4  ;;  %v6871_v24 = vunpack.c.l.b16 %v6787_v36 }
 0x4a5   : >> { %v6040_v48 = vsel %vm12341_vm10, %v6035_v41, %v6039_v50  ;;  %v6790_v50 = vsel %vm12701_vm13, %v6788_v34, %v6789_v12 }
 0x4a6   : >> { %v6872_v55 = vunpack.c.l.b16 %v6790_v50 }
 0x4a7   : >> { %6389 = vmatmul.bf16.gmra.mxu1 %v6277_v10  ;;  %v6052_v10 = vshrl.u32 %v5785_v0, 16  ;;  %v6078_v0 = vrot.slane %v6076_v47, 4 }
 0x4a8   : >> { %6627 = vmatmul.bf16.gmra.mxu2 %v11998_v32  ;;  %v6894_v11 = vpack.c.b16 %v6872_v55, %v6871_v24 }
 0x4a9   : >> { %7320 = vmatmul.bf16.gmra.mxu0 %v12037_v15  ;;  %v6255_v15 = vunpack.c.l.b16 %v6040_v48  ;;  %v6054_v46 = vrot.slane %v6052_v10, 4  ;;  %v6683_v48 = vld [vmem:[#allocation2 + $0x78] sm:$0xe] }
 0x4ab   : >> { %v6279_v18 = vpack.c.b16 %v6256_v28, %v6255_v15  ;;  %v6058_v51 = vor.u32 %v6057_v38, %v6054_v46  ;;  %v11343_v15 = vrot.slane %v6683_v48, 9  ;;  %v12001_v38 = vld [vmem:[#allocation2 + $0x78] sm:$0xff] }
 0x4ad   : >> { %v6059_v40 = vrot.slane %v6058_v51, 4 }
 0x4b3   : >> { %7008 = vmatmul.bf16.gmra.mxu3 %v6892_v9  ;;  %v12057_v9 = vld [vmem:[%s12308_s22 + $0x350] sm:$0xff] }
 0x4b4   : >> { %v6360_v56 = vpop.f32.mrf.mxu1  ;;  %v6974_v23 = vpop.f32.mrf.mxu3  ;;  %7972 = vmatpush.bf16.msrb.mxu1 %v12057_v9 }
 0x4b5   : >> { %v6594_v1 = vadd.f32 %v6593_v31, %v6360_v56  ;;  %v6069_v31 = vrot.slane %v6068_v5, 4  ;;  %v6100_v5 = vshrl.u32 %v5789_v13, 16 }
 0x4b7   : >> { %6394 = vmatmul.bf16.gmra.mxu1 %v6278_v19  ;;  %v7054_v44 = vadd.f32 %v6974_v23, %v6594_v1  ;;  %v5788_v19 = vld [vmem:[#allocation2 + $0x7c] sm:$0xf]  ;;  %v6064_v23 = vsel %vm12341_vm10, %v6059_v40, %v6063_v57  ;;  %v6074_v62 = vsel %vm12341_vm10, %v6069_v31, %v6073_v16  ;;  %v6102_v55 = vrot.slane %v6100_v5, 4 }
 0x4b8   : >> { %6632 = vmatmul.bf16.gmra.mxu2 %v11999_v39  ;;  %v6085_v1 = vshll.u32 %v5788_v19, 16  ;;  %v6089_v39 = vshrl.u32 %v5788_v19, 16  ;;  %v6257_v41 = vunpack.c.l.b16 %v6064_v23  ;;  %v6258_v7 = vunpack.c.l.b16 %v6074_v62  ;;  %v12040_v57 = vld [vmem:[#allocation2 + $0x78] sm:$0xff] }
 0x4b9   : >> { %7325 = vmatmul.bf16.gmra.mxu0 %v12038_v14 }
 0x4ba   : >> { %v6087_v2 = vrot.slane %v6085_v1, 5  ;;  %v6091_v25 = vrot.slane %v6089_v39, 4  ;;  %v6280_v3 = vpack.c.b16 %v6258_v7, %v6257_v41  ;;  %v5830_v41 = vld [vmem:[#allocation2 + $0x8c] sm:$0x1]  ;;  %v6684_v7 = vld [vmem:[#allocation2 + $0x84] sm:$0xe] }
 0x4bb   : >> { %v6803_v48 = vrot.slane %v5830_v41, 5 }
 0x4bc   : >> { %v6362_v52 = vpop.f32.mrf.mxu1  ;;  %v6976_v8 = vpop.f32.mrf.mxu3 }
 0x4bd   : >> { %v6596_v32 = vadd.f32 %v6595_v59, %v6362_v52  ;;  %v5829_v59 = vld [vmem:[#allocation2 + $0x80] sm:$0x1]  ;;  %v6092_v52 = vor.u32 %v6091_v25, %v6087_v2 }
 0x4be   : >> { %v6796_v28 = vrot.slane %v5829_v59, 5  ;;  %v6095_v49 = vshll.u32 %v5829_v59, 16  ;;  %v11344_v59 = vrot.slane %v6684_v7, 9 }
 0x4bf   : >> { %v7055_v37 = vadd.f32 %v6976_v8, %v6596_v32  ;;  %v6093_v21 = vrot.slane %v6092_v52, 4  ;;  %v5791_v52 = vld [vmem:[#allocation2 + $0x90] sm:$0xf] }
 0x4c0   : >> { %v6097_v51 = vrot.slane %v6095_v49, 5 }
 0x4c2   : >> { %v6098_v50 = vsel %vm12341_vm10, %v6093_v21, %v6097_v51 }
 0x4c3   : >> { %7013 = vmatmul.bf16.gmra.mxu3 %v6893_v45  ;;  %v6082_v45 = vor.u32 %v6081_v53, %v6078_v0  ;;  %v6260_v6 = vunpack.c.l.b16 %v6098_v50 }
 0x4c5   : >> { %v6083_v4 = vrot.slane %v6082_v45, 4  ;;  %v12041_v45 = vld [vmem:[#allocation2 + $0x84] sm:$0xff] }
 0x4c6   : >> { %v7291_v26 = vpop.f32.mrf.mxu0 }
 0x4c7   : >> { %6399 = vmatmul.bf16.gmra.mxu1 %v6279_v18  ;;  %v14486_v20 = vadd.f32 %v7291_v26, %v7054_v44  ;;  %v6793_v44 = vrot.slane %v5788_v19, 5  ;;  %v5790_v18 = vld [vmem:[#allocation2 + $0x88] sm:$0xf]  ;;  %v6103_v26 = vshll.u32 %v5789_v13, 16  ;;  %v6124_v13 = vshrl.u32 %v5791_v52, 16 }
 0x4c8   : >> { %6637 = vmatmul.bf16.gmra.mxu2 %v12000_v42  ;;  %v6109_v36 = vshll.u32 %v5790_v18, 16  ;;  %v6113_v40 = vshrl.u32 %v5790_v18, 16 }
 0x4c9   : >> { %7330 = vmatmul.bf16.gmra.mxu0 %v12039_v63  ;;  %v6795_v61 = vrot.slane %v6793_v44, 4  ;;  %v6794_v30 = vsel %vm12701_vm13, %v11343_v15, %v6793_v44  ;;  %v6088_v63 = vsel %vm12341_vm10, %v6083_v4, %v6087_v2  ;;  %v6105_v23 = vrot.slane %v6103_v26, 5 }
 0x4ca   : >> { %v6873_v22 = vunpack.c.l.b16 %v6794_v30  ;;  %v6259_v47 = vunpack.c.l.b16 %v6088_v63  ;;  %v6111_v62 = vrot.slane %v6109_v36, 5  ;;  %v6115_v1 = vrot.slane %v6113_v40, 4 }
 0x4cb   : >> { %v6598_v56 = vpop.f32.mrf.mxu2  ;;  %v6106_v2 = vor.u32 %v6105_v23, %v6102_v55  ;;  %v6126_v63 = vrot.slane %v6124_v13, 4 }
 0x4cc   : >> { %v6116_v25 = vor.u32 %v6115_v1, %v6111_v62 }
 0x4ce   : >> { %v7293_v14 = vpop.f32.mrf.mxu0  ;;  %v6117_v15 = vrot.slane %v6116_v25, 4  ;;  %v12003_v25 = vld [vmem:[#allocation2 + $0x90] sm:$0xff] }
 0x4cf   : >> { %v14496_v27 = vadd.f32 %v7293_v14, %v7055_v37  ;;  %v6797_v37 = vsel %vm12701_vm13, %v6795_v61, %v6796_v28  ;;  %v12002_v61 = vld [vmem:[#allocation2 + $0x84] sm:$0xff]  ;;  %v5792_v28 = vld [vmem:[#allocation2 + $0x94] sm:$0xf] }
 0x4d0   : >> { %v6874_v9 = vunpack.c.l.b16 %v6797_v37  ;;  %v6127_v37 = vshll.u32 %v5791_v52, 16  ;;  %v6133_v5 = vshll.u32 %v5792_v28, 16 }
 0x4d2   : >> { %v6895_v24 = vpack.c.b16 %v6874_v9, %v6873_v22  ;;  %v6129_v50 = vrot.slane %v6127_v37, 5 }
 0x4d3   : >> { %7018 = vmatmul.bf16.gmra.mxu3 %v6894_v11  ;;  %v6600_v43 = vpop.f32.mrf.mxu2  ;;  %v6281_v11 = vpack.c.b16 %v6260_v6, %v6259_v47  ;;  %v5831_v6 = vld [vmem:[#allocation2 + $0x98] sm:$0x1] }
 0x4d4   : >> { %v6365_v33 = vpop.f32.mrf.mxu1  ;;  %v6130_v1 = vor.u32 %v6129_v50, %v6126_v63 }
 0x4d5   : >> { %v6599_v10 = vadd.f32 %v6598_v56, %v6365_v33  ;;  %v6800_v56 = vrot.slane %v5790_v18, 5 }
 0x4d6   : >> { %v6979_v29 = vpop.f32.mrf.mxu3  ;;  %v7296_v32 = vpop.f32.mrf.mxu0 }
 0x4d7   : >> { %v7056_v8 = vadd.f32 %v6979_v29, %v6599_v10  ;;  %6404 = vmatmul.bf16.gmra.mxu1 %v6280_v3  ;;  %v6802_v53 = vrot.slane %v6800_v56, 4  ;;  %v12056_v10 = vld [vmem:[%s12308_s22 + $0x348] sm:$0xff]  ;;  %v6119_v29 = vshll.u32 %v5830_v41, 16 }
 0x4d8   : >> { %6642 = vmatmul.bf16.gmra.mxu2 %v12001_v38  ;;  %7973 = vmatpush.bf16.msrb.mxu1 %v12056_v10  ;;  %v6801_v38 = vsel %vm12701_vm13, %v11344_v59, %v6800_v56 }
 0x4d9   : >> { %v14498_v46 = vadd.f32 %v7296_v32, %v7056_v8  ;;  %7335 = vmatmul.bf16.gmra.mxu0 %v12040_v57  ;;  %v6804_v8 = vsel %vm12701_vm13, %v6802_v53, %v6803_v48  ;;  %v6107_v32 = vrot.slane %v6106_v2, 4  ;;  %v6121_v57 = vrot.slane %v6119_v29, 5  ;;  %v5793_v29 = vld [vmem:[#allocation2 + $0x9c] sm:$0xf] }
 0x4da   : >> { %v6876_v21 = vunpack.c.l.b16 %v6804_v8  ;;  %v6875_v26 = vunpack.c.l.b16 %v6801_v38  ;;  %v6143_v53 = vshll.u32 %v5831_v6, 16  ;;  %v12070_v38 = vld [vmem:[%s12308_s22 + $0x3b8] sm:$0xff] }
 0x4db   : >> { %v6603_v42 = vpop.f32.mrf.mxu2  ;;  %v6112_v30 = vsel %vm12341_vm10, %v6107_v32, %v6111_v62  ;;  %v6122_v51 = vsel %vm12341_vm10, %v6117_v15, %v6121_v57  ;;  %8396 = vmatpush.bf16.msra.mxu2 %v12070_v38 }
 0x4dc   : >> { %v6367_v34 = vpop.f32.mrf.mxu1  ;;  %v6896_v40 = vpack.c.b16 %v6876_v21, %v6875_v26  ;;  %v6262_v22 = vunpack.c.l.b16 %v6122_v51  ;;  %v6145_v8 = vrot.slane %v6143_v53, 5  ;;  %v5795_v53 = vld [vmem:[#allocation2 + $0xa8] sm:$0xf] }
 0x4dd   : >> { %v6601_v12 = vadd.f32 %v6600_v43, %v6367_v34 }
 0x4de   : >> { %v6981_v60 = vpop.f32.mrf.mxu3  ;;  %v7298_v19 = vpop.f32.mrf.mxu0 }
 0x4df   : >> { %v7057_v31 = vadd.f32 %v6981_v60, %v6601_v12  ;;  %v6137_v12 = vshrl.u32 %v5792_v28, 16 }
 0x4e1   : >> { %v14508_v16 = vadd.f32 %v7298_v19, %v7057_v31  ;;  %v6261_v31 = vunpack.c.l.b16 %v6112_v30  ;;  %v6135_v19 = vrot.slane %v6133_v5, 5  ;;  %v6139_v55 = vrot.slane %v6137_v12, 4 }
 0x4e3   : >> { %7023 = vmatmul.bf16.gmra.mxu3 %v6895_v24  ;;  %v6605_v44 = vpop.f32.mrf.mxu2  ;;  %v6685_v24 = vld [vmem:[#allocation2 + $0x90] sm:$0xe]  ;;  %v6282_v23 = vpack.c.b16 %v6262_v22, %v6261_v31  ;;  %v6140_v41 = vor.u32 %v6139_v55, %v6135_v19  ;;  %v6686_v31 = vld [vmem:[#allocation2 + $0x9c] sm:$0xe] }
 0x4e4   : >> { %v6370_v39 = vpop.f32.mrf.mxu1 }
 0x4e5   : >> { %v6604_v14 = vadd.f32 %v6603_v42, %v6370_v39  ;;  %v6807_v42 = vrot.slane %v5792_v28, 5  ;;  %v6141_v48 = vrot.slane %v6140_v41, 4 }
 0x4e6   : >> { %v6984_v0 = vpop.f32.mrf.mxu3  ;;  %v7301_v3 = vpop.f32.mrf.mxu0 }
 0x4e7   : >> { %v7058_v33 = vadd.f32 %v6984_v0, %v6604_v14  ;;  %6409 = vmatmul.bf16.gmra.mxu1 %v6281_v11  ;;  %v6809_v62 = vrot.slane %v6807_v42, 4  ;;  %v11345_v11 = vrot.slane %v6685_v24, 9  ;;  %v6810_v0 = vrot.slane %v5831_v6, 5  ;;  %v12094_v6 = vld [vmem:[%s12308_s22 + $0x3f8] sm:$0xff] }
 0x4e8   : >> { %6647 = vmatmul.bf16.gmra.mxu2 %v12002_v61  ;;  %v5794_v61 = vld [vmem:[#allocation2 + $0xa0] sm:$0xf]  ;;  %v6146_v37 = vsel %vm12341_vm10, %v6141_v48, %v6145_v8  ;;  %8713 = vmatpush.bf16.msra.mxu3 %v12094_v6 }
 0x4e9   : >> { %v14511_v43 = vadd.f32 %v7301_v3, %v7058_v33  ;;  %7340 = vmatmul.bf16.gmra.mxu0 %v12041_v45  ;;  %v12042_v33 = vld [vmem:[#allocation2 + $0x90] sm:$0xff]  ;;  %v6811_v10 = vsel %vm12701_vm13, %v6809_v62, %v6810_v0  ;;  %v6131_v3 = vrot.slane %v6130_v1, 4  ;;  %v6808_v59 = vsel %vm12701_vm13, %v11345_v11, %v6807_v42  ;;  %v12067_v48 = vld [vmem:[%s12308_s22 + $0x3a0] sm:$0xff] }
 0x4ea   : >> { %v6878_v52 = vunpack.c.l.b16 %v6811_v10  ;;  %v6877_v15 = vunpack.c.l.b16 %v6808_v59  ;;  %v6157_v21 = vshll.u32 %v5794_v61, 16  ;;  %v6814_v26 = vrot.slane %v5794_v61, 5  ;;  %v12004_v10 = vld [vmem:[#allocation2 + $0x9c] sm:$0xff] }
 0x4eb   : >> { %v6608_v34 = vpop.f32.mrf.mxu2  ;;  %v6136_v28 = vsel %vm12341_vm10, %v6131_v3, %v6135_v19  ;;  %v5832_v19 = vld [vmem:[#allocation2 + $0xa4] sm:$0x1]  ;;  %v11346_v1 = vrot.slane %v6686_v31, 9  ;;  %v12043_v3 = vld [vmem:[#allocation2 + $0x9c] sm:$0xff] }
 0x4ec   : >> { %v6372_v49 = vpop.f32.mrf.mxu1  ;;  %v6897_v51 = vpack.c.b16 %v6878_v52, %v6877_v15  ;;  %v6263_v12 = vunpack.c.l.b16 %v6136_v28  ;;  %v14537_v50 = vrot.slane %v6157_v21, 5  ;;  %v6817_v41 = vrot.slane %v5832_v19, 5  ;;  %v14551_v52 = vld [vmem:[#allocation2 + $0xac] sm:$0xf] }
 0x4ed   : >> { %v6606_v4 = vadd.f32 %v6605_v44, %v6372_v49  ;;  %v6148_v49 = vshrl.u32 %v5793_v29, 16  ;;  %v6172_v28 = vshrl.u32 %v5795_v53, 16 }
 0x4ee   : >> { %v6986_v18 = vpop.f32.mrf.mxu3  ;;  %v7303_v60 = vpop.f32.mrf.mxu0 }
 0x4ef   : >> { %v7059_v9 = vadd.f32 %v6986_v18, %v6606_v4  ;;  %v6151_v4 = vshll.u32 %v5793_v29, 16  ;;  %v6161_v18 = vshrl.u32 %v5794_v61, 16  ;;  %v6150_v42 = vrot.slane %v6148_v49, 4 }
 0x4f0   : >> { %v6815_v29 = vsel %vm12701_vm13, %v11346_v1, %v6814_v26 }
 0x4f1   : >> { %v14521_v36 = vadd.f32 %v7303_v60, %v7059_v9  ;;  %v6264_v9 = vunpack.c.l.b16 %v6146_v37  ;;  %v12069_v60 = vld [vmem:[%s12308_s22 + $0x3b0] sm:$0xff]  ;;  %v6153_v63 = vrot.slane %v6151_v4, 5  ;;  %v6879_v38 = vunpack.c.l.b16 %v6815_v29  ;;  %v12066_v37 = vld [vmem:[%s12308_s22 + $0x398] sm:$0xff] }
 0x4f2   : >> { %8397 = vmatpush.bf16.msra.mxu2 %v12069_v60  ;;  %v12102_v4 = vld [vmem:[%s12308_s22 + $0x438] sm:$0xff] }
 0x4f3   : >> { %7028 = vmatmul.bf16.gmra.mxu3 %v6896_v40  ;;  %v6610_v14 = vpop.f32.mrf.mxu2  ;;  %v6163_v40 = vrot.slane %v6161_v18, 4  ;;  %v6283_v24 = vpack.c.b16 %v6264_v9, %v6263_v12  ;;  %v6185_v12 = vshrl.u32 %v14551_v52, 16  ;;  %9398 = vmatpush.bf16.msra.mxu0 %v12102_v4 }
 0x4f4   : >> { %v6375_v47 = vpop.f32.mrf.mxu1 }
 0x4f5   : >> { %v6609_v56 = vadd.f32 %v6608_v34, %v6375_v47  ;;  %v6816_v47 = vrot.slane %v6814_v26, 4  ;;  %v6187_v6 = vrot.slane %v6185_v12, 4  ;;  %v12088_v12 = vld [vmem:[%s12308_s22 + $0x3c8] sm:$0xff] }
 0x4f6   : >> { %v6989_v39 = vpop.f32.mrf.mxu3  ;;  %v7306_v44 = vpop.f32.mrf.mxu0 }
 0x4f7   : >> { %v7060_v7 = vadd.f32 %v6989_v39, %v6609_v56  ;;  %6414 = vmatmul.bf16.gmra.mxu1 %v6282_v23  ;;  %v12068_v56 = vld [vmem:[%s12308_s22 + $0x3a8] sm:$0xff]  ;;  %v6154_v39 = vor.u32 %v6153_v63, %v6150_v42  ;;  %v6818_v59 = vsel %vm12701_vm13, %v6816_v47, %v6817_v41  ;;  %v6174_v42 = vrot.slane %v6172_v28, 4  ;;  %v12091_v63 = vld [vmem:[%s12308_s22 + $0x3e0] sm:$0xff] }
 0x4f8   : >> { %6652 = vmatmul.bf16.gmra.mxu2 %v12003_v25  ;;  %v12093_v25 = vld [vmem:[%s12308_s22 + $0x3f0] sm:$0xff]  ;;  %v12064_v41 = vld [vmem:[%s12308_s22 + $0x388] sm:$0xff]  ;;  %v12099_v28 = vld [vmem:[%s12308_s22 + $0x420] sm:$0xff] }
 0x4f9   : >> { %v14523_v2 = vadd.f32 %v7306_v44, %v7060_v7  ;;  %7345 = vmatmul.bf16.gmra.mxu0 %v12042_v33  ;;  %v12055_v7 = vld [vmem:[%s12308_s22 + $0x340] sm:$0xff]  ;;  %v6167_v44 = vshll.u32 %v5832_v19, 16  ;;  %8398 = vmatpush.bf16.msra.mxu2 %v12068_v56  ;;  %v6155_v61 = vrot.slane %v6154_v39, 4  ;;  %v12065_v19 = vld [vmem:[%s12308_s22 + $0x390] sm:$0xff] }
 0x4fa   : >> { %7974 = vmatpush.bf16.msrb.mxu1 %v12055_v7  ;;  %8714 = vmatpush.bf16.msra.mxu3 %v12093_v25  ;;  %v12100_v7 = vld [vmem:[%s12308_s22 + $0x428] sm:$0xff] }
 0x4fb   : >> { %v6613_v13 = vpop.f32.mrf.mxu2  ;;  %v6169_v15 = vrot.slane %v6167_v44, 5 }
 0x4fc   : >> { %v6377_v45 = vpop.f32.mrf.mxu1 }
 0x4fd   : >> { %v6611_v32 = vadd.f32 %v6610_v14, %v6377_v45  ;;  %v6164_v14 = vor.u32 %v6163_v40, %v14537_v50  ;;  %8399 = vmatpush.bf16.msra.mxu2 %v12067_v48 }
 0x4fe   : >> { %v6991_v57 = vpop.f32.mrf.mxu3  ;;  %v7308_v30 = vpop.f32.mrf.mxu0 }
 0x4ff   : >> { %v7061_v34 = vadd.f32 %v6991_v57, %v6611_v32  ;;  %v6165_v45 = vrot.slane %v6164_v14, 4  ;;  %v6880_v32 = vunpack.c.l.b16 %v6818_v59  ;;  %v6175_v57 = vshll.u32 %v5795_v53, 16  ;;  %v12005_v59 = vld [vmem:[#allocation2 + $0xa8] sm:$0xff] }
 0x501   : >> { %v14534_v5 = vadd.f32 %v7308_v30, %v7061_v34  ;;  %v6160_v34 = vsel %vm12341_vm10, %v6155_v61, %v14537_v50  ;;  %v6170_v30 = vsel %vm12341_vm10, %v6165_v45, %v6169_v15  ;;  %v6898_v60 = vpack.c.b16 %v6880_v32, %v6879_v38  ;;  %8400 = vmatpush.bf16.msra.mxu2 %v12066_v37  ;;  %v12089_v45 = vld [vmem:[%s12308_s22 + $0x3d0] sm:$0xff]  ;;  %v12063_v15 = vld [vmem:[%s12308_s22 + $0x380] sm:$0xff] }
 0x502   : >> { %v6265_v50 = vunpack.c.l.b16 %v6160_v34  ;;  %v6266_v31 = vunpack.c.l.b16 %v6170_v30 }
 0x503   : >> { %7033 = vmatmul.bf16.gmra.mxu3 %v6897_v51  ;;  %v6615_v62 = vpop.f32.mrf.mxu2  ;;  %v6181_v51 = vshll.u32 %v14551_v52, 16 }
 0x504   : >> { %v6380_v22 = vpop.f32.mrf.mxu1  ;;  %v6284_v39 = vpack.c.b16 %v6266_v31, %v6265_v50 }
 0x505   : >> { %v6614_v55 = vadd.f32 %v6613_v13, %v6380_v22  ;;  %v12092_v13 = vld [vmem:[%s12308_s22 + $0x3e8] sm:$0xff]  ;;  %v6177_v22 = vrot.slane %v6175_v57, 5  ;;  %v14569_v47 = vrot.slane %v6181_v51, 5  ;;  %8401 = vmatpush.bf16.msra.mxu2 %v12065_v19  ;;  %v5797_v57 = vld [vmem:[#allocation2 + $0xb4] sm:$0xf] }
 0x506   : >> { %v6994_v23 = vpop.f32.mrf.mxu3  ;;  %v7311_v0 = vpop.f32.mrf.mxu0  ;;  %8715 = vmatpush.bf16.msra.mxu3 %v12092_v13  ;;  %v14582_v13 = vld [vmem:[#allocation2 + $0xb8] sm:$0xf]  ;;  %v6196_v51 = vshrl.u32 %v5797_v57, 16 }
 0x507   : >> { %v7062_v11 = vadd.f32 %v6994_v23, %v6614_v55  ;;  %6419 = vmatmul.bf16.gmra.mxu1 %v6283_v24  ;;  %v12101_v55 = vld [vmem:[%s12308_s22 + $0x430] sm:$0xff]  ;;  %v6821_v24 = vrot.slane %v14551_v52, 5  ;;  %v6178_v14 = vor.u32 %v6177_v22, %v6174_v42  ;;  %v6188_v25 = vor.u32 %v6187_v6, %v14569_v47 }
 0x508   : >> { %6657 = vmatmul.bf16.gmra.mxu2 %v12004_v10  ;;  %9399 = vmatpush.bf16.msra.mxu0 %v12101_v55  ;;  %v5833_v23 = vld [vmem:[#allocation2 + $0xb0] sm:$0x1]  ;;  %v6205_v50 = vshll.u32 %v14582_v13, 16  ;;  %v6209_v31 = vshrl.u32 %v14582_v13, 16 }
 0x509   : >> { %v14544_v33 = vadd.f32 %v7311_v0, %v7062_v11  ;;  %7350 = vmatmul.bf16.gmra.mxu0 %v12043_v3  ;;  %v12090_v11 = vld [vmem:[%s12308_s22 + $0x3d8] sm:$0xff]  ;;  %v6823_v53 = vrot.slane %v6821_v24, 4  ;;  %v6824_v29 = vrot.slane %v5833_v23, 5  ;;  %v6191_v61 = vshll.u32 %v5833_v23, 16  ;;  %8402 = vmatpush.bf16.msra.mxu2 %v12064_v41 }
 0x50a   : >> { %8716 = vmatpush.bf16.msra.mxu3 %v12091_v63  ;;  %v6179_v32 = vrot.slane %v6178_v14, 4  ;;  %v6189_v38 = vrot.slane %v6188_v25, 4  ;;  %v6199_v63 = vshll.u32 %v5797_v57, 16  ;;  %v6198_v14 = vrot.slane %v6196_v51, 4  ;;  %v5834_v25 = vld [vmem:[#allocation2 + $0xbc] sm:$0x1] }
 0x50b   : >> { %v6618_v18 = vpop.f32.mrf.mxu2  ;;  %v14600_v41 = vrot.slane %v6205_v50, 5  ;;  %v7403_v57 = vld [vmem:[#allocation2 + $0xc] sm:$0xf] }
 0x50c   : >> { %v6382_v8 = vpop.f32.mrf.mxu1  ;;  %9400 = vmatpush.bf16.msra.mxu0 %v12100_v7  ;;  %v6184_v30 = vsel %vm12341_vm10, %v6179_v32, %v14569_v47  ;;  %v12087_v47 = vld [vmem:[%s12308_s22 + $0x3c0] sm:$0xff]  ;;  %v6211_v7 = vrot.slane %v6209_v31, 4  ;;  %v14612_v31 = vld [vmem:[#allocation2 + $0x14] sm:$0x1] }
 0x50d   : >> { %v6616_v49 = vadd.f32 %v6615_v62, %v6382_v8  ;;  %v6687_v62 = vld [vmem:[#allocation2 + $0xa8] sm:$0xe]  ;;  %8403 = vmatpush.bf16.msra.mxu2 %v12063_v15  ;;  %v6267_v23 = vunpack.c.l.b16 %v6184_v30  ;;  %v12110_v15 = vld [vmem:[%s12308_s22 + $0x478] sm:$0xff] }
 0x50e   : >> { %v6996_v21 = vpop.f32.mrf.mxu3  ;;  %v7313_v26 = vpop.f32.mrf.mxu0  ;;  %v11347_v48 = vrot.slane %v6687_v62, 9  ;;  %8717 = vmatpush.bf16.msra.mxu3 %v12090_v11  ;;  %v12044_v8 = vld [vmem:[#allocation2 + $0xa8] sm:$0xff]  ;;  %v6201_v11 = vrot.slane %v6199_v63, 5  ;;  %9827 = vmatpush.bf16.msra.mxu1 %v12110_v15 }
 0x50f   : >> { %v7063_v9 = vadd.f32 %v6996_v21, %v6616_v49  ;;  %v6825_v49 = vsel %vm12701_vm13, %v6823_v53, %v6824_v29  ;;  %v6193_v21 = vrot.slane %v6191_v61, 5 }
 0x510   : >> { %v6822_v4 = vsel %vm12701_vm13, %v11347_v48, %v6821_v24  ;;  %v6882_v34 = vunpack.c.l.b16 %v6825_v49  ;;  %9401 = vmatpush.bf16.msra.mxu0 %v12099_v28  ;;  %v6828_v24 = vrot.slane %v14582_v13, 5  ;;  %v6202_v61 = vor.u32 %v6201_v11, %v6198_v14 }
 0x511   : >> { %v14564_v40 = vadd.f32 %v7313_v26, %v7063_v9  ;;  %v12098_v9 = vld [vmem:[%s12308_s22 + $0x418] sm:$0xff]  ;;  %v6194_v42 = vsel %vm12341_vm10, %v6189_v38, %v6193_v21  ;;  %v6881_v19 = vunpack.c.l.b16 %v6822_v4  ;;  %v6831_v49 = vrot.slane %v5834_v25, 5 }
 0x512   : >> { %8718 = vmatpush.bf16.msra.mxu3 %v12089_v45  ;;  %v6268_v62 = vunpack.c.l.b16 %v6194_v42  ;;  %v6830_v29 = vrot.slane %v6828_v24, 4  ;;  %v6212_v45 = vor.u32 %v6211_v7, %v14600_v41  ;;  %v6215_v38 = vshll.u32 %v5834_v25, 16  ;;  %v12045_v4 = vld [vmem:[#allocation2 + $0xb4] sm:$0xff] }
 0x513   : >> { %7038 = vmatmul.bf16.gmra.mxu3 %v6898_v60  ;;  %v6620_v44 = vpop.f32.mrf.mxu2  ;;  %v6203_v51 = vrot.slane %v6202_v61, 4 }
 0x514   : >> { %v6385_v56 = vpop.f32.mrf.mxu1  ;;  %9402 = vmatpush.bf16.msra.mxu0 %v12098_v9  ;;  %v6285_v53 = vpack.c.b16 %v6268_v62, %v6267_v23  ;;  %v6832_v30 = vsel %vm12701_vm13, %v6830_v29, %v6831_v49  ;;  %v8088_v9 = vld [vmem:[#allocation2 + $0xc] sm:$0xe]  ;;  %v6217_v50 = vrot.slane %v6215_v38, 5 }
 0x515   : >> { %v6619_v1 = vadd.f32 %v6618_v18, %v6385_v56  ;;  %v6899_v56 = vpack.c.b16 %v6882_v34, %v6881_v19  ;;  %v12095_v34 = vld [vmem:[%s12308_s22 + $0x400] sm:$0xff]  ;;  %v6884_v19 = vunpack.c.l.b16 %v6832_v30 }
 0x516   : >> { %v6999_v0 = vpop.f32.mrf.mxu3  ;;  %v7316_v3 = vpop.f32.mrf.mxu0  ;;  %8719 = vmatpush.bf16.msra.mxu3 %v12088_v12  ;;  %v6213_v12 = vrot.slane %v6212_v45, 4 }
 0x517   : >> { %v7064_v10 = vadd.f32 %v6999_v0, %v6619_v1  ;;  %6424 = vmatmul.bf16.gmra.mxu1 %v6284_v39  ;;  %v12097_v1 = vld [vmem:[%s12308_s22 + $0x410] sm:$0xff] }
 0x518   : >> { %6662 = vmatmul.bf16.gmra.mxu2 %v12005_v59  ;;  %v6688_v39 = vld [vmem:[#allocation2 + $0xb4] sm:$0xe]  ;;  %9403 = vmatpush.bf16.msra.mxu0 %v12097_v1  ;;  %v6208_v1 = vsel %vm12341_vm10, %v6203_v51, %v14600_v41 }
 0x519   : >> { %v14576_v52 = vadd.f32 %v7316_v3, %v7064_v10  ;;  %7355 = vmatmul.bf16.gmra.mxu0 %v12044_v8  ;;  %v11348_v10 = vrot.slane %v6688_v39, 9  ;;  %v12096_v3 = vld [vmem:[%s12308_s22 + $0x408] sm:$0xff]  ;;  %v7404_v8 = vld [vmem:[#allocation2 + $0x10] sm:$0xf]  ;;  %v6218_v39 = vsel %vm12341_vm10, %v6213_v12, %v6217_v50  ;;  %v6269_v45 = vunpack.c.l.b16 %v6208_v1  ;;  %v8089_v50 = vld [vmem:[#allocation2 + $0x18] sm:$0xe] }
 0x51a   : >> { %8720 = vmatpush.bf16.msra.mxu3 %v12087_v47  ;;  %v8834_v47 = vld [vmem:[#allocation2 + $0x18] sm:$0xf]  ;;  %v7461_v14 = vshll.u32 %v7404_v8, 16  ;;  %v7465_v11 = vshrl.u32 %v7404_v8, 16  ;;  %v6270_v41 = vunpack.c.l.b16 %v6218_v39  ;;  %v12046_v39 = vld [vmem:[#allocation2 + $0xc0] sm:$0xff] }
 0x51b   : >> { %v6623_v60 = vpop.f32.mrf.mxu2  ;;  %v6829_v21 = vsel %vm12701_vm13, %v11348_v10, %v6828_v24  ;;  %v8883_v10 = vshrl.u32 %v8834_v47, 16 }
 0x51c   : >> { %v6387_v37 = vpop.f32.mrf.mxu1  ;;  %9404 = vmatpush.bf16.msra.mxu0 %v12096_v3  ;;  %v6883_v63 = vunpack.c.l.b16 %v6829_v21  ;;  %v8886_v3 = vshll.u32 %v8834_v47, 16  ;;  %v7463_v15 = vrot.slane %v7461_v14, 5  ;;  %v6286_v51 = vpack.c.b16 %v6270_v41, %v6269_v45 }
 0x51d   : >> { %v6621_v18 = vadd.f32 %v6620_v44, %v6387_v37  ;;  %v12006_v37 = vld [vmem:[#allocation2 + $0xb4] sm:$0xff] }
 0x51e   : >> { %v7001_v26 = vpop.f32.mrf.mxu3  ;;  %v7318_v55 = vpop.f32.mrf.mxu0  ;;  %v6900_v61 = vpack.c.b16 %v6884_v19, %v6883_v63  ;;  %v14628_v63 = vld [vmem:[#allocation2 + $0x20] sm:$0x1] }
 0x51f   : >> { %v7065_v22 = vadd.f32 %v7001_v26, %v6621_v18  ;;  %v8154_v18 = vrot.slane %v7404_v8, 5  ;;  %v7452_v26 = vshrl.u32 %v7403_v57, 16  ;;  %v7467_v8 = vrot.slane %v7465_v11, 4 }
 0x520   : >> { %9405 = vmatpush.bf16.msra.mxu0 %v12095_v34  ;;  %v11567_v11 = vrot.slane %v8089_v50, 9 }
 0x521   : >> { %v14597_v6 = vadd.f32 %v7318_v55, %v7065_v22  ;;  %v11566_v55 = vrot.slane %v8088_v9, 9  ;;  %v8156_v24 = vrot.slane %v8154_v18, 4 }
 0x523   : >> { %7043 = vmatmul.bf16.gmra.mxu3 %v6899_v56  ;;  %v6625_v48 = vpop.f32.mrf.mxu2  ;;  %v8835_v56 = vld [vmem:[#allocation2 + $0x1c] sm:$0xf]  ;;  %v8155_v49 = vsel %vm12701_vm13, %v11566_v55, %v8154_v18  ;;  %v8836_v55 = vld [vmem:[#allocation2 + $0x20] sm:$0x1] }
 0x524   : >> { %v6390_v0 = vpop.f32.mrf.mxu1  ;;  %v8284_v18 = vunpack.c.l.b16 %v8155_v49 }
 0x525   : >> { %v6624_v44 = vadd.f32 %v6623_v60, %v6390_v0  ;;  %v7455_v60 = vshll.u32 %v7403_v57, 16  ;;  %v8157_v0 = vrot.slane %v14612_v31, 5 }
 0x526   : >> { %v7004_v59 = vpop.f32.mrf.mxu3  ;;  %v7321_v28 = vpop.f32.mrf.mxu0 }
 0x527   : >> { %v7066_v32 = vadd.f32 %v7004_v59, %v6624_v44  ;;  %6429 = vmatmul.bf16.gmra.mxu1 %v6285_v53  ;;  %v7454_v44 = vrot.slane %v7452_v26, 4  ;;  %v7457_v53 = vrot.slane %v7455_v60, 5  ;;  %v8892_v59 = vshll.u32 %v8835_v56, 16 }
 0x528   : >> { %6667 = vmatmul.bf16.gmra.mxu2 %v12006_v37  ;;  %v8885_v37 = vrot.slane %v8883_v10, 4 }
 0x529   : >> { %v14605_v13 = vadd.f32 %v7321_v28, %v7066_v32  ;;  %7360 = vmatmul.bf16.gmra.mxu0 %v12045_v4  ;;  %v8158_v32 = vsel %vm12701_vm13, %v8156_v24, %v8157_v0  ;;  %v7407_v28 = vld [vmem:[#allocation2 + $0x1c] sm:$0xf]  ;;  %v7458_v38 = vor.u32 %v7457_v53, %v7454_v44  ;;  %v8888_v4 = vrot.slane %v8886_v3, 5  ;;  %v7406_v24 = vld [vmem:[#allocation2 + $0x18] sm:$0xf] }
 0x52a   : >> { %v14626_v21 = vrot.slane %v8892_v59, 5  ;;  %v8285_v12 = vunpack.c.l.b16 %v8158_v32  ;;  %v8161_v9 = vrot.slane %v7407_v28, 5  ;;  %v8164_v44 = vrot.slane %v14628_v63, 5 }
 0x52b   : >> { %v6628_v62 = vpop.f32.mrf.mxu2  ;;  %v7459_v19 = vrot.slane %v7458_v38, 4  ;;  %v8902_v53 = vshll.u32 %v8836_v55, 16  ;;  %v7485_v3 = vshll.u32 %v7407_v28, 16  ;;  %v7489_v59 = vshrl.u32 %v7407_v28, 16  ;;  %v8837_v38 = vld [vmem:[#allocation2 + $0x24] sm:$0xf] }
 0x52c   : >> { %v6392_v42 = vpop.f32.mrf.mxu1  ;;  %v8316_v14 = vpack.c.b16 %v8285_v12, %v8284_v18  ;;  %v8910_v18 = vshll.u32 %v8837_v38, 16  ;;  %v12071_v55 = vld [vmem:[#allocation2 + $0x18] sm:$0xff] }
 0x52d   : >> { %v6626_v22 = vadd.f32 %v6625_v48, %v6392_v42  ;;  %v8896_v48 = vshrl.u32 %v8835_v56, 16  ;;  %v7468_v42 = vor.u32 %v7467_v8, %v7463_v15  ;;  %v7471_v56 = vshll.u32 %v14612_v31, 16 }
 0x52e   : >> { %v7006_v23 = vpop.f32.mrf.mxu3  ;;  %v7323_v25 = vpop.f32.mrf.mxu0  ;;  %v7464_v10 = vsel %vm12341_vm10, %v7459_v19, %v7463_v15  ;;  %v7479_v31 = vshll.u32 %v7406_v24, 16  ;;  %v8162_v8 = vsel %vm12701_vm13, %v11567_v11, %v8161_v9 }
 0x52f   : >> { %v7067_v7 = vadd.f32 %v7006_v23, %v6626_v22  ;;  %v8898_v34 = vrot.slane %v8896_v48, 4  ;;  %v8889_v23 = vor.u32 %v8888_v4, %v8885_v37  ;;  %v7469_v0 = vrot.slane %v7468_v42, 4 }
 0x530   : >> { %v7855_v4 = vunpack.c.l.b16 %v7464_v10  ;;  %v7481_v12 = vrot.slane %v7479_v31, 5 }
 0x531   : >> { %v14620_v29 = vadd.f32 %v7323_v25, %v7067_v7  ;;  %v8163_v7 = vrot.slane %v8161_v9, 4  ;;  %v7476_v25 = vshrl.u32 %v7406_v24, 16  ;;  %v8890_v45 = vrot.slane %v8889_v23, 4 }
 0x533   : >> { %7048 = vmatmul.bf16.gmra.mxu3 %v6900_v61  ;;  %v6630_v60 = vpop.f32.mrf.mxu2  ;;  %v7473_v61 = vrot.slane %v7471_v56, 5  ;;  %v8165_v49 = vsel %vm12701_vm13, %v8163_v7, %v8164_v44  ;;  %v7478_v28 = vrot.slane %v7476_v25, 4  ;;  %v8895_v9 = vsel %vm12341_vm10, %v8890_v45, %v14626_v21 }
 0x534   : >> { %v6395_v57 = vpop.f32.mrf.mxu1  ;;  %v8287_v23 = vunpack.c.l.b16 %v8165_v49  ;;  %v8286_v7 = vunpack.c.l.b16 %v8162_v8 }
 0x535   : >> { %v6629_v30 = vadd.f32 %v6628_v62, %v6395_v57  ;;  %v8899_v62 = vor.u32 %v8898_v34, %v14626_v21  ;;  %v7474_v15 = vsel %vm12341_vm10, %v7469_v0, %v7473_v61  ;;  %v8904_v34 = vrot.slane %v8902_v53, 5  ;;  %v7410_v0 = vld [vmem:[#allocation2 + $0x28] sm:$0xf] }
 0x536   : >> { %v7009_v26 = vpop.f32.mrf.mxu3  ;;  %v7326_v47 = vpop.f32.mrf.mxu0  ;;  %v7856_v24 = vunpack.c.l.b16 %v7474_v15  ;;  %v8912_v53 = vrot.slane %v8910_v18, 5  ;;  %v8317_v45 = vpack.c.b16 %v8287_v23, %v8286_v7  ;;  %v12109_v15 = vld [vmem:[%s12308_s22 + $0x470] sm:$0xff] }
 0x537   : >> { %v7068_v22 = vadd.f32 %v7009_v26, %v6629_v30  ;;  %6434 = vmatmul.bf16.gmra.mxu1 %v6286_v51  ;;  %v8900_v41 = vrot.slane %v8899_v62, 4  ;;  %v8838_v30 = vld [vmem:[#allocation2 + $0x28] sm:$0xf]  ;;  %v14643_v26 = vrot.slane %v7485_v3, 5  ;;  %v9286_v62 = vunpack.c.l.b16 %v8895_v9 }
 0x538   : >> { %8404 = vmatmul.bf16.vlgmr.msra.gmra.mxu2 %v8316_v14  ;;  %v8920_v56 = vshrl.u32 %v8838_v30, 16  ;;  %v7482_v14 = vor.u32 %v7481_v12, %v7478_v28  ;;  %v7887_v10 = vpack.c.b16 %v7856_v24, %v7855_v4  ;;  %v7513_v9 = vshrl.u32 %v7410_v0, 16  ;;  %9828 = vmatpush.bf16.msra.mxu1 %v12109_v15 }
 0x539   : >> { %v14632_v1 = vadd.f32 %v7326_v47, %v7068_v22  ;;  %7365 = vmatmul.bf16.gmra.mxu0 %v12046_v39  ;;  %v8905_v50 = vsel %vm12341_vm10, %v8900_v41, %v8904_v34  ;;  %v8907_v22 = vshrl.u32 %v8837_v38, 16  ;;  %v8916_v47 = vshll.u32 %v8838_v30, 16  ;;  %v8090_v38 = vld [vmem:[#allocation2 + $0x24] sm:$0xe] }
 0x53a   : >> { %v9287_v39 = vunpack.c.l.b16 %v8905_v50  ;;  %v8922_v3 = vrot.slane %v8920_v56, 4  ;;  %v7495_v41 = vshll.u32 %v14628_v63, 16  ;;  %v7483_v49 = vrot.slane %v7482_v14, 4 }
 0x53b   : >> { %v6633_v37 = vpop.f32.mrf.mxu2  ;;  %v8909_v44 = vrot.slane %v8907_v22, 4  ;;  %v14653_v31 = vrot.slane %v8916_v47, 5  ;;  %v7411_v22 = vld [vmem:[#allocation2 + $0x2c] sm:$0x1]  ;;  %v11568_v18 = vrot.slane %v8090_v38, 9 }
 0x53c   : >> { %v6397_v48 = vpop.f32.mrf.mxu1  ;;  %v9318_v8 = vpack.c.b16 %v9287_v39, %v9286_v62  ;;  %v7497_v63 = vrot.slane %v7495_v41, 5  ;;  %v7488_v50 = vsel %vm12341_vm10, %v7483_v49, %v14643_v26  ;;  %v12072_v49 = vld [vmem:[#allocation2 + $0x24] sm:$0xff] }
 0x53d   : >> { %v6631_v32 = vadd.f32 %v6630_v60, %v6397_v48  ;;  %v7491_v60 = vrot.slane %v7489_v59, 4  ;;  %v7409_v59 = vld [vmem:[#allocation2 + $0x24] sm:$0xf]  ;;  %v8913_v4 = vor.u32 %v8912_v53, %v8909_v44  ;;  %v8171_v53 = vrot.slane %v7411_v22, 5 }
 0x53e   : >> { %v7011_v57 = vpop.f32.mrf.mxu3  ;;  %v7328_v42 = vpop.f32.mrf.mxu0  ;;  %v7500_v30 = vshrl.u32 %v7409_v59, 16 }
 0x53f   : >> { %v7069_v51 = vadd.f32 %v7011_v57, %v6631_v32  ;;  %v7492_v21 = vor.u32 %v7491_v60, %v14643_v26  ;;  %v8168_v57 = vrot.slane %v7410_v0, 5  ;;  %v8923_v60 = vor.u32 %v8922_v3, %v14653_v31  ;;  %v8840_v3 = vld [vmem:[#allocation2 + $0x30] sm:$0xf] }
 0x540   : >> { %v8914_v23 = vrot.slane %v8913_v4, 4  ;;  %v7502_v62 = vrot.slane %v7500_v30, 4 }
 0x541   : >> { %v14650_v19 = vadd.f32 %v7328_v42, %v7069_v51  ;;  %v7493_v28 = vrot.slane %v7492_v21, 4  ;;  %v7503_v51 = vshll.u32 %v7409_v59, 16  ;;  %v7509_v42 = vshll.u32 %v7410_v0, 16  ;;  %v8841_v59 = vld [vmem:[#allocation2 + $0x34] sm:$0xf] }
 0x542   : >> { %v7515_v21 = vrot.slane %v7513_v9, 4  ;;  %v8919_v38 = vsel %vm12341_vm10, %v8914_v23, %v14653_v31  ;;  %v8940_v4 = vshll.u32 %v8841_v59, 16  ;;  %v8944_v30 = vshrl.u32 %v8841_v59, 16  ;;  %v8842_v59 = vld [vmem:[#allocation2 + $0x38] sm:$0x1] }
 0x543   : >> { %8721 = vmatmul.bf16.vlgmr.msra.gmra.mxu3 %v12071_v55  ;;  %v6635_v61 = vpop.f32.mrf.mxu2  ;;  %v8170_v55 = vrot.slane %v8168_v57, 4  ;;  %v7498_v56 = vsel %vm12341_vm10, %v7493_v28, %v7497_v63  ;;  %v7505_v39 = vrot.slane %v7503_v51, 5  ;;  %v14665_v7 = vrot.slane %v7509_v42, 5 }
 0x544   : >> { %v6400_v11 = vpop.f32.mrf.mxu1  ;;  %v7858_v41 = vunpack.c.l.b16 %v7498_v56  ;;  %v8931_v28 = vshrl.u32 %v8840_v3, 16  ;;  %v14682_v56 = vld [vmem:[#allocation2 + $0x38] sm:$0x1] }
 0x545   : >> { %v6634_v25 = vadd.f32 %v6633_v37, %v6400_v11  ;;  %v8839_v37 = vld [vmem:[#allocation2 + $0x2c] sm:$0x1]  ;;  %v8924_v11 = vrot.slane %v8923_v60, 4  ;;  %v7516_v15 = vor.u32 %v7515_v21, %v14665_v7  ;;  %v7519_v60 = vshll.u32 %v7411_v22, 16 }
 0x546   : >> { %v7014_v48 = vpop.f32.mrf.mxu3  ;;  %v7331_v34 = vpop.f32.mrf.mxu0  ;;  %v8926_v24 = vshll.u32 %v8839_v37, 16  ;;  %v8934_v37 = vshll.u32 %v8840_v3, 16  ;;  %v8946_v21 = vrot.slane %v8944_v30, 4  ;;  %v5606_v22 = vrot.slane %v14454_v54, 4 }
 0x547   : >> { %v7070_v32 = vadd.f32 %v7014_v48, %v6634_v25  ;;  %7975 = vmatmul.bf16.vlgmr.msrb.gmra.mxu1 %v7887_v10  ;;  %v8169_v25 = vsel %vm12701_vm13, %v11568_v18, %v8168_v57  ;;  %v8178_v3 = vrot.slane %v14682_v56, 5 }
 0x548   : >> { %8409 = vmatmul.bf16.gmra.mxu2 %v8317_v45  ;;  %v8928_v10 = vrot.slane %v8926_v24, 5  ;;  %v7857_v45 = vunpack.c.l.b16 %v7488_v50  ;;  %v8288_v51 = vunpack.c.l.b16 %v8169_v25 }
 0x549   : >> { %v14657_v12 = vadd.f32 %v7331_v34, %v7070_v32  ;;  %9406 = vmatmul.bf16.vlgmr.msra.gmra.mxu0 %v9318_v8  ;;  %v7506_v32 = vor.u32 %v7505_v39, %v7502_v62  ;;  %v14679_v34 = vld [vmem:[#allocation2 + $0x34] sm:$0xf]  ;;  %v8933_v39 = vrot.slane %v8931_v28, 4 }
 0x54a   : >> { %v8929_v57 = vsel %vm12341_vm10, %v8924_v11, %v8928_v10  ;;  %v7888_v9 = vpack.c.b16 %v7858_v41, %v7857_v45  ;;  %v8175_v31 = vrot.slane %v14679_v34, 5  ;;  %v14684_v11 = vrot.slane %v8940_v4, 5 }
 0x54b   : >> { %v6638_v44 = vpop.f32.mrf.mxu2  ;;  %v7507_v50 = vrot.slane %v7506_v32, 4  ;;  %v9289_v24 = vunpack.c.l.b16 %v8929_v57  ;;  %v7533_v28 = vshll.u32 %v14679_v34, 16 }
 0x54c   : >> { %v6402_v47 = vpop.f32.mrf.mxu1  ;;  %v8177_v32 = vrot.slane %v8175_v31, 4 }
 0x54d   : >> { %v6636_v14 = vadd.f32 %v6635_v61, %v6402_v47  ;;  %v8172_v61 = vsel %vm12701_vm13, %v8170_v55, %v8171_v53  ;;  %v9288_v55 = vunpack.c.l.b16 %v8919_v38  ;;  %v7517_v47 = vrot.slane %v7516_v15, 4 }
 0x54e   : >> { %v7016_v0 = vpop.f32.mrf.mxu3  ;;  %v7333_v48 = vpop.f32.mrf.mxu0  ;;  %v8289_v63 = vunpack.c.l.b16 %v8172_v61  ;;  %v7521_v53 = vrot.slane %v7519_v60, 5  ;;  %v7512_v10 = vsel %vm12341_vm10, %v7507_v50, %v14665_v7  ;;  %v8091_v61 = vld [vmem:[#allocation2 + $0x30] sm:$0xe]  ;;  %v8947_v38 = vor.u32 %v8946_v21, %v14684_v11  ;;  %v8843_v50 = vld [vmem:[#allocation2 + $0x3c] sm:$0xf] }
 0x54f   : >> { %v7071_v26 = vadd.f32 %v7016_v0, %v6636_v14  ;;  %v8936_v14 = vrot.slane %v8934_v37, 5  ;;  %v9319_v41 = vpack.c.b16 %v9289_v24, %v9288_v55  ;;  %v8950_v7 = vshll.u32 %v8842_v59, 16 }
 0x550   : >> { %v7522_v54 = vsel %vm12341_vm10, %v7517_v47, %v7521_v53  ;;  %v7537_v37 = vshrl.u32 %v14679_v34, 16  ;;  %v7543_v34 = vshll.u32 %v14682_v56, 16 }
 0x551   : >> { %v14671_v8 = vadd.f32 %v7333_v48, %v7071_v26  ;;  %v7412_v26 = vld [vmem:[#allocation2 + $0x30] sm:$0xf]  ;;  %v5764_v48 = vld [vmem:[#allocation2 + $0xc8] sm:$0x1]  ;;  %v8952_v17 = vrot.slane %v8950_v7, 5 }
 0x552   : >> { %v7524_v57 = vshrl.u32 %v7412_v26, 16  ;;  %v7527_v15 = vshll.u32 %v7412_v26, 16  ;;  %v5765_v4 = vsel %vm12325_vm7, %v5606_v22, %v5764_v48  ;;  %v14704_v22 = vrot.slane %v7533_v28, 5 }
 0x553   : >> { %8726 = vmatmul.bf16.gmra.mxu3 %v12072_v49  ;;  %v6640_v62 = vpop.f32.mrf.mxu2  ;;  %v8937_v49 = vor.u32 %v8936_v14, %v8933_v39  ;;  %5766 = vst [vmem:[#allocation2 + $0xc8] sm:$0x1] %v5765_v4  ;;  %v8958_v26 = vshll.u32 %v8843_v50, 16 }
 0x554   : >> { %v6405_v42 = vpop.f32.mrf.mxu1  ;;  %v7526_v39 = vrot.slane %v7524_v57, 4  ;;  %v7529_v14 = vrot.slane %v7527_v15, 5 }
 0x555   : >> { %v6639_v18 = vadd.f32 %v6638_v44, %v6405_v42  ;;  %v8318_v44 = vpack.c.b16 %v8289_v63, %v8288_v51  ;;  %v11569_v51 = vrot.slane %v8091_v61, 9  ;;  %v7859_v42 = vunpack.c.l.b16 %v7512_v10  ;;  %v14717_v61 = vld [vmem:[#allocation2 + $0x40] sm:$0xf] }
 0x556   : >> { %v7019_v23 = vpop.f32.mrf.mxu3  ;;  %v7336_v25 = vpop.f32.mrf.mxu0  ;;  %v8179_v63 = vsel %vm12701_vm13, %v8177_v32, %v8178_v3  ;;  %v8938_v47 = vrot.slane %v8937_v49, 4  ;;  %v12073_v3 = vld [vmem:[#allocation2 + $0x30] sm:$0xff] }
 0x557   : >> { %v7072_v0 = vadd.f32 %v7019_v23, %v6639_v18  ;;  %7980 = vmatmul.bf16.gmra.mxu1 %v7888_v9  ;;  %v7860_v9 = vunpack.c.l.b16 %v7522_v54  ;;  %v8844_v18 = vld [vmem:[#allocation2 + $0x40] sm:$0xf]  ;;  %v8948_v23 = vrot.slane %v8947_v38, 4  ;;  %v8176_v59 = vsel %vm12701_vm13, %v11569_v51, %v8175_v31 }
 0x558   : >> { %8414 = vmatmul.bf16.gmra.mxu2 %v8318_v44  ;;  %v8968_v44 = vshrl.u32 %v8844_v18, 16  ;;  %v8943_v48 = vsel %vm12341_vm10, %v8938_v47, %v14684_v11  ;;  %v7530_v54 = vor.u32 %v7529_v14, %v7526_v39  ;;  %v8291_v49 = vunpack.c.l.b16 %v8179_v63  ;;  %v12108_v47 = vld [vmem:[%s12308_s22 + $0x468] sm:$0xff]  ;;  %v14725_v14 = vld [vmem:[#allocation2 + $0x44] sm:$0x1] }
 0x559   : >> { %v14691_v45 = vadd.f32 %v7336_v25, %v7072_v0  ;;  %9411 = vmatmul.bf16.gmra.mxu0 %v9319_v41  ;;  %v7539_v0 = vrot.slane %v7537_v37, 4  ;;  %v8964_v25 = vshll.u32 %v8844_v18, 16  ;;  %v8953_v41 = vsel %vm12341_vm10, %v8948_v23, %v8952_v17  ;;  %v8845_v18 = vld [vmem:[#allocation2 + $0x44] sm:$0x1]  ;;  %9829 = vmatpush.bf16.msra.mxu1 %v12108_v47 }
 0x55a   : >> { %v7889_v32 = vpack.c.b16 %v7860_v9, %v7859_v42  ;;  %v8960_v31 = vrot.slane %v8958_v26, 5  ;;  %v8970_v11 = vrot.slane %v8968_v44, 4  ;;  %v9290_v37 = vunpack.c.l.b16 %v8943_v48 }
 0x55b   : >> { %v6643_v24 = vpop.f32.mrf.mxu2  ;;  %v7540_v38 = vor.u32 %v7539_v0, %v14704_v22  ;;  %v14721_v7 = vrot.slane %v8964_v25, 5  ;;  %v9291_v4 = vunpack.c.l.b16 %v8953_v41  ;;  %v8182_v51 = vrot.slane %v14717_v61, 5 }
 0x55c   : >> { %v6407_v30 = vpop.f32.mrf.mxu1  ;;  %v8290_v9 = vunpack.c.l.b16 %v8176_v59  ;;  %v7531_v63 = vrot.slane %v7530_v54, 4  ;;  %v8974_v44 = vshll.u32 %v8845_v18, 16  ;;  %v8185_v41 = vrot.slane %v14725_v14, 5 }
 0x55d   : >> { %v6641_v60 = vadd.f32 %v6640_v62, %v6407_v30  ;;  %v8955_v62 = vshrl.u32 %v8843_v50, 16  ;;  %v8092_v30 = vld [vmem:[#allocation2 + $0x3c] sm:$0xe]  ;;  %v7541_v56 = vrot.slane %v7540_v38, 4  ;;  %v8971_v17 = vor.u32 %v8970_v11, %v14721_v7 }
 0x55e   : >> { %v7021_v55 = vpop.f32.mrf.mxu3  ;;  %v7338_v53 = vpop.f32.mrf.mxu0  ;;  %v8319_v39 = vpack.c.b16 %v8291_v49, %v8290_v9  ;;  %v8184_v26 = vrot.slane %v8182_v51, 4  ;;  %v7536_v25 = vsel %vm12341_vm10, %v7531_v63, %v14704_v22  ;;  %v7557_v54 = vshll.u32 %v14717_v61, 16 }
 0x55f   : >> { %v7073_v21 = vadd.f32 %v7021_v55, %v6641_v60  ;;  %v8957_v15 = vrot.slane %v8955_v62, 4  ;;  %v7415_v55 = vld [vmem:[#allocation2 + $0x3c] sm:$0xf]  ;;  %v7545_v62 = vrot.slane %v7543_v34, 5  ;;  %v8972_v34 = vrot.slane %v8971_v17, 4 }
 0x560   : >> { %v7551_v59 = vshll.u32 %v7415_v55, 16  ;;  %v7861_v22 = vunpack.c.l.b16 %v7536_v25  ;;  %v8186_v11 = vsel %vm12701_vm13, %v8184_v26, %v8185_v41  ;;  %v7418_v17 = vld [vmem:[#allocation2 + $0x48] sm:$0xf] }
 0x561   : >> { %v14706_v10 = vadd.f32 %v7338_v53, %v7073_v21  ;;  %v8961_v21 = vor.u32 %v8960_v31, %v8957_v15  ;;  %v9320_v53 = vpack.c.b16 %v9291_v4, %v9290_v37  ;;  %v7546_v48 = vsel %vm12341_vm10, %v7541_v56, %v7545_v62 }
 0x562   : >> { %v7553_v63 = vrot.slane %v7551_v59, 5  ;;  %v8293_v26 = vunpack.c.l.b16 %v8186_v11 }
 0x563   : >> { %8731 = vmatmul.bf16.gmra.mxu3 %v12073_v3  ;;  %v6645_v42 = vpop.f32.mrf.mxu2  ;;  %v7548_v3 = vshrl.u32 %v7415_v55, 16  ;;  %v8962_v38 = vrot.slane %v8961_v21, 4 }
 0x564   : >> { %v6410_v57 = vpop.f32.mrf.mxu1 }
 0x565   : >> { %v6644_v28 = vadd.f32 %v6643_v24, %v6410_v57  ;;  %v11570_v24 = vrot.slane %v8092_v30, 9  ;;  %v8846_v57 = vld [vmem:[#allocation2 + $0x48] sm:$0xf]  ;;  %v7862_v30 = vunpack.c.l.b16 %v7546_v48  ;;  %v7550_v9 = vrot.slane %v7548_v3, 4 }
 0x566   : >> { %v7024_v60 = vpop.f32.mrf.mxu3  ;;  %v7341_v23 = vpop.f32.mrf.mxu0  ;;  %v8979_v18 = vshrl.u32 %v8846_v57, 16  ;;  %v8982_v47 = vshll.u32 %v8846_v57, 16 }
 0x567   : >> { %v7074_v50 = vadd.f32 %v7024_v60, %v6644_v28  ;;  %7985 = vmatmul.bf16.gmra.mxu1 %v7889_v32  ;;  %v7561_v32 = vshrl.u32 %v14717_v61, 16  ;;  %v8183_v31 = vsel %vm12701_vm13, %v11570_v24, %v8182_v51  ;;  %v8847_v28 = vld [vmem:[#allocation2 + $0x4c] sm:$0xf]  ;;  %v8976_v60 = vrot.slane %v8974_v44, 5  ;;  %v12074_v24 = vld [vmem:[#allocation2 + $0x3c] sm:$0xff] }
 0x568   : >> { %8419 = vmatmul.bf16.gmra.mxu2 %v8319_v39  ;;  %v8967_v51 = vsel %vm12341_vm10, %v8962_v38, %v14721_v7  ;;  %v8992_v21 = vshrl.u32 %v8847_v28, 16  ;;  %v8292_v62 = vunpack.c.l.b16 %v8183_v31  ;;  %v7554_v25 = vor.u32 %v7553_v63, %v7550_v9  ;;  %v7419_v44 = vld [vmem:[#allocation2 + $0x4c] sm:$0xf] }
 0x569   : >> { %v14728_v0 = vadd.f32 %v7341_v23, %v7074_v50  ;;  %9416 = vmatmul.bf16.gmra.mxu0 %v9320_v53  ;;  %v14742_v50 = vrot.slane %v7557_v54, 5  ;;  %v7563_v56 = vrot.slane %v7561_v32, 4  ;;  %v8977_v55 = vsel %vm12341_vm10, %v8972_v34, %v8976_v60  ;;  %v8093_v54 = vld [vmem:[#allocation2 + $0x48] sm:$0xe] }
 0x56a   : >> { %v8988_v23 = vshll.u32 %v8847_v28, 16  ;;  %v7890_v53 = vpack.c.b16 %v7862_v30, %v7861_v22  ;;  %v9292_v3 = vunpack.c.l.b16 %v8967_v51  ;;  %v9293_v59 = vunpack.c.l.b16 %v8977_v55  ;;  %v7420_v55 = vld [vmem:[#allocation2 + $0x50] sm:$0x1] }
 0x56b   : >> { %v6648_v4 = vpop.f32.mrf.mxu2  ;;  %v7564_v7 = vor.u32 %v7563_v56, %v14742_v50  ;;  %v8981_v48 = vrot.slane %v8979_v18, 4  ;;  %v8984_v32 = vrot.slane %v8982_v47, 5  ;;  %v7572_v38 = vshrl.u32 %v7418_v17, 16  ;;  %v8848_v18 = vld [vmem:[#allocation2 + $0x50] sm:$0x1] }
 0x56c   : >> { %v6412_v49 = vpop.f32.mrf.mxu1  ;;  %v7575_v34 = vshll.u32 %v7418_v17, 16  ;;  %v7581_v22 = vshll.u32 %v7419_v44, 16  ;;  %v7585_v31 = vshrl.u32 %v7419_v44, 16  ;;  %v7567_v30 = vshll.u32 %v14725_v14, 16 }
 0x56d   : >> { %v6646_v15 = vadd.f32 %v6645_v42, %v6412_v49  ;;  %v14752_v49 = vrot.slane %v8988_v23, 5  ;;  %v8189_v60 = vrot.slane %v7419_v44, 5  ;;  %v9321_v63 = vpack.c.b16 %v9293_v59, %v9292_v3  ;;  %v8849_v44 = vld [vmem:[#allocation2 + $0x54] sm:$0xf] }
 0x56e   : >> { %v7026_v37 = vpop.f32.mrf.mxu3  ;;  %v7343_v42 = vpop.f32.mrf.mxu0  ;;  %v11571_v56 = vrot.slane %v8093_v54, 9  ;;  %v7565_v51 = vrot.slane %v7564_v7, 4  ;;  %v8985_v47 = vor.u32 %v8984_v32, %v8981_v48  ;;  %v7577_v23 = vrot.slane %v7575_v34, 5  ;;  %v8850_v54 = vld [vmem:[#allocation2 + $0x58] sm:$0xf] }
 0x56f   : >> { %v7075_v61 = vadd.f32 %v7026_v37, %v6646_v15  ;;  %v8994_v15 = vrot.slane %v8992_v21, 4  ;;  %v8320_v37 = vpack.c.b16 %v8293_v26, %v8292_v62  ;;  %v14758_v17 = vrot.slane %v7581_v22, 5 }
 0x570   : >> { %v7587_v14 = vrot.slane %v7585_v31, 4  ;;  %v7569_v62 = vrot.slane %v7567_v30, 5  ;;  %v8191_v26 = vrot.slane %v8189_v60, 4  ;;  %v8190_v48 = vsel %vm12701_vm13, %v11571_v56, %v8189_v60 }
 0x571   : >> { %v14749_v39 = vadd.f32 %v7343_v42, %v7075_v61  ;;  %v7555_v61 = vrot.slane %v7554_v25, 4  ;;  %v8995_v21 = vor.u32 %v8994_v15, %v14752_v49  ;;  %v8192_v25 = vrot.slane %v7420_v55, 5  ;;  %v14768_v15 = vld [vmem:[#allocation2 + $0x58] sm:$0xf] }
 0x572   : >> { %v7570_v7 = vsel %vm12341_vm10, %v7565_v51, %v7569_v62  ;;  %v9006_v30 = vshll.u32 %v8849_v44, 16  ;;  %v9012_v60 = vshll.u32 %v8850_v54, 16  ;;  %v8196_v51 = vrot.slane %v14768_v15, 5 }
 0x573   : >> { %8736 = vmatmul.bf16.gmra.mxu3 %v12074_v24  ;;  %v6650_v28 = vpop.f32.mrf.mxu2  ;;  %v7560_v59 = vsel %vm12341_vm10, %v7555_v61, %v14742_v50  ;;  %v8996_v34 = vrot.slane %v8995_v21, 4  ;;  %v8193_v50 = vsel %vm12701_vm13, %v8191_v26, %v8192_v25  ;;  %v9016_v61 = vshrl.u32 %v8850_v54, 16 }
 0x574   : >> { %v6415_v41 = vpop.f32.mrf.mxu1  ;;  %v9008_v26 = vrot.slane %v9006_v30, 5 }
 0x575   : >> { %v6649_v57 = vadd.f32 %v6648_v4, %v6415_v41  ;;  %v7574_v4 = vrot.slane %v7572_v38, 4  ;;  %v8986_v38 = vrot.slane %v8985_v47, 4 }
 0x576   : >> { %v7029_v11 = vpop.f32.mrf.mxu3  ;;  %v7346_v42 = vpop.f32.mrf.mxu0 }
 0x577   : >> { %v7076_v9 = vadd.f32 %v7029_v11, %v6649_v57  ;;  %7990 = vmatmul.bf16.gmra.mxu1 %v7890_v53  ;;  %v8998_v53 = vshll.u32 %v8848_v18, 16  ;;  %v7578_v41 = vor.u32 %v7577_v23, %v7574_v4  ;;  %v7588_v57 = vor.u32 %v7587_v14, %v14758_v17  ;;  %v12075_v4 = vld [vmem:[#allocation2 + $0x48] sm:$0xff] }
 0x578   : >> { %8424 = vmatmul.bf16.gmra.mxu2 %v8320_v37  ;;  %v9003_v37 = vshrl.u32 %v8849_v44, 16  ;;  %v7864_v18 = vunpack.c.l.b16 %v7570_v7  ;;  %v8991_v23 = vsel %vm12341_vm10, %v8986_v38, %v14752_v49  ;;  %v14780_v44 = vld [vmem:[#allocation2 + $0x5c] sm:$0x1]  ;;  %v8198_v38 = vrot.slane %v8196_v51, 4 }
 0x579   : >> { %v14755_v24 = vadd.f32 %v7346_v42, %v7076_v9  ;;  %9421 = vmatmul.bf16.gmra.mxu0 %v9321_v63  ;;  %v9000_v11 = vrot.slane %v8998_v53, 5  ;;  %v7591_v63 = vshll.u32 %v7420_v55, 16  ;;  %v7579_v42 = vrot.slane %v7578_v41, 4 }
 0x57a   : >> { %v7589_v14 = vrot.slane %v7588_v57, 4  ;;  %v8295_v55 = vunpack.c.l.b16 %v8193_v50  ;;  %v9005_v62 = vrot.slane %v9003_v37, 4  ;;  %v8294_v53 = vunpack.c.l.b16 %v8190_v48 }
 0x57b   : >> { %v6653_v31 = vpop.f32.mrf.mxu2  ;;  %v9001_v21 = vsel %vm12341_vm10, %v8996_v34, %v9000_v11  ;;  %v7593_v25 = vrot.slane %v7591_v63, 5  ;;  %v9294_v41 = vunpack.c.l.b16 %v8991_v23  ;;  %v7584_v49 = vsel %vm12341_vm10, %v7579_v42, %v14758_v17  ;;  %v7421_v63 = vld [vmem:[#allocation2 + $0x54] sm:$0xf] }
 0x57c   : >> { %v6417_v3 = vpop.f32.mrf.mxu1  ;;  %v9295_v54 = vunpack.c.l.b16 %v9001_v21  ;;  %v8321_v37 = vpack.c.b16 %v8295_v55, %v8294_v53  ;;  %v8199_v30 = vrot.slane %v14780_v44, 5  ;;  %v9532_v21 = vld [vmem:[#allocation2 + $0xb4] sm:$0xe]  ;;  %v7596_v55 = vshrl.u32 %v7421_v63, 16  ;;  %v8874_v53 = vld [vmem:[#allocation2 + $0xb8] sm:$0xf] }
 0x57d   : >> { %v6651_v32 = vadd.f32 %v6650_v28, %v6417_v3  ;;  %v7863_v28 = vunpack.c.l.b16 %v7560_v59  ;;  %v14782_v3 = vrot.slane %v9012_v60, 5  ;;  %v9018_v59 = vrot.slane %v9016_v61, 4 }
 0x57e   : >> { %v7031_v22 = vpop.f32.mrf.mxu3  ;;  %v7348_v56 = vpop.f32.mrf.mxu0  ;;  %v7594_v48 = vsel %vm12341_vm10, %v7589_v14, %v7593_v25  ;;  %v14790_v61 = vunpack.c.l.b16 %v7584_v49  ;;  %v11812_v49 = vrot.slane %v9532_v21, 9 }
 0x57f   : >> { %v7077_v9 = vadd.f32 %v7031_v22, %v6651_v32  ;;  %v8094_v32 = vld [vmem:[#allocation2 + $0x54] sm:$0xe]  ;;  %v7891_v57 = vpack.c.b16 %v7864_v18, %v7863_v28  ;;  %v8851_v22 = vld [vmem:[#allocation2 + $0x5c] sm:$0x1]  ;;  %v9322_v18 = vpack.c.b16 %v9295_v54, %v9294_v41  ;;  %v14794_v42 = vunpack.c.l.b16 %v7594_v48 }
 0x580   : >> { %v11572_v17 = vrot.slane %v8094_v32, 9  ;;  %v9022_v23 = vshll.u32 %v8851_v22, 16  ;;  %v8875_v54 = vld [vmem:[#allocation2 + $0xbc] sm:$0x1]  ;;  %v9533_v32 = vld [vmem:[#allocation2 + $0xc0] sm:$0xe] }
 0x581   : >> { %v14773_v47 = vadd.f32 %v7348_v56, %v7077_v9  ;;  %v9009_v9 = vor.u32 %v9008_v26, %v9005_v62  ;;  %v9019_v56 = vor.u32 %v9018_v59, %v14782_v3  ;;  %v7599_v62 = vshll.u32 %v7421_v63, 16  ;;  %v8852_v22 = vld [vmem:[#allocation2 + $0x60] sm:$0xf] }
 0x582   : >> { %v7605_v26 = vshll.u32 %v14768_v15, 16  ;;  %v7609_v59 = vshrl.u32 %v14768_v15, 16  ;;  %v9024_v48 = vrot.slane %v9022_v23, 5  ;;  %v8878_v23 = vld [vmem:[#allocation2 + $0xc8] sm:$0x1] }
 0x583   : >> { %8741 = vmatmul.bf16.gmra.mxu3 %v12075_v4  ;;  %v6655_v11 = vpop.f32.mrf.mxu2  ;;  %v14798_v4 = vsel %vm12701_vm13, %v8198_v38, %v8199_v30  ;;  %v9010_v25 = vrot.slane %v9009_v9, 4  ;;  %v9020_v41 = vrot.slane %v9019_v56, 4  ;;  %v7601_v30 = vrot.slane %v7599_v62, 5 }
 0x584   : >> { %v6420_v7 = vpop.f32.mrf.mxu1  ;;  %v14811_v9 = vrot.slane %v7605_v26, 5  ;;  %v9030_v62 = vshll.u32 %v8852_v22, 16 }
 0x585   : >> { %v6654_v34 = vadd.f32 %v6653_v31, %v6420_v7  ;;  %v12107_v31 = vld [vmem:[%s12308_s22 + $0x460] sm:$0xff]  ;;  %v14806_v7 = vsel %vm12701_vm13, %v11572_v17, %v8196_v51 }
 0x586   : >> { %v7034_v50 = vpop.f32.mrf.mxu3  ;;  %v7351_v28 = vpop.f32.mrf.mxu0  ;;  %9830 = vmatpush.bf16.msra.mxu1 %v12107_v31  ;;  %v8877_v51 = vld [vmem:[#allocation2 + $0xc4] sm:$0xf] }
 0x587   : >> { %v7078_v60 = vadd.f32 %v7034_v50, %v6654_v34  ;;  %7995 = vmatmul.bf16.gmra.mxu1 %v7891_v57  ;;  %v7892_v34 = vpack.c.b16 %v14794_v42, %v14790_v61  ;;  %v8297_v57 = vunpack.c.l.b16 %v14798_v4  ;;  %v9676_v50 = vrot.slane %v8874_v53, 5  ;;  %v8853_v17 = vld [vmem:[#allocation2 + $0x64] sm:$0xf] }
 0x588   : >> { %8429 = vmatmul.bf16.gmra.mxu2 %v8321_v37  ;;  %v7598_v37 = vrot.slane %v7596_v55, 4  ;;  %v11813_v61 = vrot.slane %v9533_v32, 9  ;;  %v9015_v42 = vsel %vm12341_vm10, %v9010_v25, %v14782_v3  ;;  %v7611_v4 = vrot.slane %v7609_v59, 4 }
 0x589   : >> { %v14800_v14 = vadd.f32 %v7351_v28, %v7078_v60  ;;  %9426 = vmatmul.bf16.gmra.mxu0 %v9322_v18  ;;  %v9677_v56 = vsel %vm12701_vm13, %v11812_v49, %v9676_v50  ;;  %v9678_v31 = vrot.slane %v9676_v50, 4  ;;  %v9679_v28 = vrot.slane %v8875_v54, 5  ;;  %v12076_v54 = vld [vmem:[#allocation2 + $0x54] sm:$0xff] }
 0x58a   : >> { %v9027_v55 = vshrl.u32 %v8852_v22, 16  ;;  %v9683_v53 = vrot.slane %v8877_v51, 5  ;;  %v9036_v32 = vshll.u32 %v8853_v17, 16  ;;  %v9686_v59 = vrot.slane %v8878_v23, 5 }
 0x58b   : >> { %v6658_v60 = vpop.f32.mrf.mxu2  ;;  %v9680_v26 = vsel %vm12701_vm13, %v9678_v31, %v9679_v28  ;;  %v7615_v22 = vshll.u32 %v14780_v44, 16  ;;  %v9296_v28 = vunpack.c.l.b16 %v9015_v42 }
 0x58c   : >> { %v6422_v38 = vpop.f32.mrf.mxu1  ;;  %v9742_v50 = vunpack.c.l.b16 %v9680_v26  ;;  %v9684_v3 = vsel %vm12701_vm13, %v11813_v61, %v9683_v53  ;;  %v9685_v25 = vrot.slane %v9683_v53, 4  ;;  %v9038_v53 = vrot.slane %v9036_v32, 5 }
 0x58d   : >> { %v6656_v15 = vadd.f32 %v6655_v11, %v6422_v38  ;;  %v9025_v11 = vsel %vm12341_vm10, %v9020_v41, %v9024_v48  ;;  %v9741_v38 = vunpack.c.l.b16 %v9677_v56  ;;  %v7602_v41 = vor.u32 %v7601_v30, %v7598_v37 }
 0x58e   : >> { %v7036_v63 = vpop.f32.mrf.mxu3  ;;  %v7353_v21 = vpop.f32.mrf.mxu0  ;;  %v7612_v48 = vor.u32 %v7611_v4, %v14811_v9  ;;  %v9297_v56 = vunpack.c.l.b16 %v9025_v11  ;;  %v9743_v23 = vunpack.c.l.b16 %v9684_v3  ;;  %v8296_v4 = vunpack.c.l.b16 %v14806_v7 }
 0x58f   : >> { %v7079_v18 = vadd.f32 %v7036_v63, %v6656_v15  ;;  %v9040_v15 = vshrl.u32 %v8853_v17, 16  ;;  %v14828_v63 = vld [vmem:[#allocation2 + $0x64] sm:$0xf]  ;;  %v14830_v51 = vpack.c.b16 %v9742_v50, %v9741_v38  ;;  %v9687_v17 = vsel %vm12701_vm13, %v9685_v25, %v9686_v59 }
 0x590   : >> { %v9744_v26 = vunpack.c.l.b16 %v9687_v17  ;;  %v8203_v44 = vrot.slane %v14828_v63, 5  ;;  %v7603_v42 = vrot.slane %v7602_v41, 4  ;;  %v7613_v11 = vrot.slane %v7612_v48, 4  ;;  %v7424_v17 = vld [vmem:[#allocation2 + $0x60] sm:$0xf] }
 0x591   : >> { %v14822_v49 = vadd.f32 %v7353_v21, %v7079_v18  ;;  %15826 = vst [vmem:[#allocation7_spill] sm:$0xff] %v14830_v51  ;;  %v9029_v18 = vrot.slane %v9027_v55, 4  ;;  %v9032_v21 = vrot.slane %v9030_v62, 5  ;;  %v8322_v25 = vpack.c.b16 %v8297_v57, %v8296_v4  ;;  %v8854_v62 = vld [vmem:[#allocation2 + $0x68] sm:$0x1] }
 0x592   : >> { %v14836_v55 = vpack.c.b16 %v9744_v26, %v9743_v23  ;;  %v9323_v59 = vpack.c.b16 %v9297_v56, %v9296_v28  ;;  %v8205_v51 = vrot.slane %v8203_v44, 4  ;;  %v9046_v48 = vshll.u32 %v8854_v62, 16  ;;  %v8856_v62 = vld [vmem:[#allocation2 + $0x70] sm:$0xf] }
 0x593   : >> { %8746 = vmatmul.bf16.gmra.mxu3 %v12076_v54  ;;  %v6660_v30 = vpop.f32.mrf.mxu2  ;;  %v9042_v54 = vrot.slane %v9040_v15, 4  ;;  %v9033_v7 = vor.u32 %v9032_v21, %v9029_v18  ;;  %v8095_v15 = vld [vmem:[#allocation2 + $0x60] sm:$0xe]  ;;  %v7620_v28 = vshrl.u32 %v7424_v17, 16  ;;  %v7629_v56 = vshll.u32 %v14828_v63, 16 }
 0x594   : >> { %v6425_v31 = vpop.f32.mrf.mxu1  ;;  %15827 = vst [vmem:[#allocation9_spill] sm:$0xff] %v14836_v55  ;;  %v7633_v18 = vshrl.u32 %v14828_v63, 16  ;;  %v11573_v4 = vrot.slane %v8095_v15, 9 }
 0x595   : >> { %v6659_v61 = vadd.f32 %v6658_v60, %v6425_v31  ;;  %v14838_v60 = vld [vmem:[#allocation2 + $0x68] sm:$0x1]  ;;  %v7617_v31 = vrot.slane %v7615_v22, 5  ;;  %v9043_v32 = vor.u32 %v9042_v54, %v9038_v53  ;;  %v7623_v22 = vshll.u32 %v7424_v17, 16 }
 0x596   : >> { %v7039_v37 = vpop.f32.mrf.mxu3  ;;  %v7356_v50 = vpop.f32.mrf.mxu0  ;;  %v8206_v41 = vrot.slane %v14838_v60, 5  ;;  %v9034_v23 = vrot.slane %v9033_v7, 4  ;;  %v14852_v55 = vrot.slane %v7629_v56, 5  ;;  %v7635_v63 = vrot.slane %v7633_v18, 4  ;;  %v12077_v7 = vld [vmem:[#allocation2 + $0x60] sm:$0xff] }
 0x597   : >> { %v7080_v38 = vadd.f32 %v7039_v37, %v6659_v61  ;;  %8000 = vmatmul.bf16.gmra.mxu1 %v7892_v34  ;;  %v7608_v34 = vsel %vm12341_vm10, %v7603_v42, %v14811_v9  ;;  %v7618_v57 = vsel %vm12341_vm10, %v7613_v11, %v7617_v31  ;;  %v9044_v54 = vrot.slane %v9043_v32, 4 }
 0x598   : >> { %8434 = vmatmul.bf16.gmra.mxu2 %v8322_v25  ;;  %v8207_v9 = vsel %vm12701_vm13, %v8205_v51, %v8206_v41  ;;  %v7867_v11 = vunpack.c.l.b16 %v7608_v34  ;;  %v9048_v25 = vrot.slane %v9046_v48, 5  ;;  %v7622_v31 = vrot.slane %v7620_v28, 4 }
 0x599   : >> { %v14840_v3 = vadd.f32 %v7356_v50, %v7080_v38  ;;  %9431 = vmatmul.bf16.gmra.mxu0 %v9323_v59  ;;  %v8855_v38 = vld [vmem:[#allocation2 + $0x6c] sm:$0xf]  ;;  %v7868_v50 = vunpack.c.l.b16 %v7618_v57  ;;  %v7625_v17 = vrot.slane %v7623_v22, 5  ;;  %v9039_v15 = vsel %vm12341_vm10, %v9034_v23, %v9038_v53  ;;  %v14863_v23 = vld [vmem:[#allocation2 + $0x70] sm:$0xf] }
 0x59a   : >> { %v9051_v51 = vshrl.u32 %v8855_v38, 16  ;;  %v9054_v32 = vshll.u32 %v8855_v38, 16  ;;  %v9049_v34 = vsel %vm12341_vm10, %v9044_v54, %v9048_v25  ;;  %v9060_v57 = vshll.u32 %v8856_v62, 16 }
 0x59b   : >> { %v6663_v37 = vpop.f32.mrf.mxu2  ;;  %v9064_v41 = vshrl.u32 %v8856_v62, 16  ;;  %v8204_v48 = vsel %vm12701_vm13, %v11573_v4, %v8203_v44  ;;  %v7893_v22 = vpack.c.b16 %v7868_v50, %v7867_v11  ;;  %v9298_v56 = vunpack.c.l.b16 %v9039_v15  ;;  %v7427_v11 = vld [vmem:[#allocation2 + $0x6c] sm:$0xf] }
 0x59c   : >> { %v6427_v61 = vpop.f32.mrf.mxu1  ;;  %v7626_v18 = vor.u32 %v7625_v17, %v7622_v31  ;;  %v9299_v53 = vunpack.c.l.b16 %v9049_v34  ;;  %v9053_v38 = vrot.slane %v9051_v51, 4  ;;  %v8298_v62 = vunpack.c.l.b16 %v8204_v48  ;;  %v8857_v51 = vld [vmem:[#allocation2 + $0x74] sm:$0x1]  ;;  %v12106_v34 = vld [vmem:[%s12308_s22 + $0x458] sm:$0xff] }
 0x59d   : >> { %v6661_v21 = vadd.f32 %v6660_v30, %v6427_v61  ;;  %v8299_v61 = vunpack.c.l.b16 %v8207_v9  ;;  %v9066_v44 = vrot.slane %v9064_v41, 4  ;;  %v7639_v9 = vshll.u32 %v14838_v60, 16  ;;  %9831 = vmatpush.bf16.msra.mxu1 %v12106_v34  ;;  %v8859_v34 = vld [vmem:[#allocation2 + $0x7c] sm:$0xf] }
 0x59e   : >> { %v7041_v26 = vpop.f32.mrf.mxu3  ;;  %v7358_v59 = vpop.f32.mrf.mxu0  ;;  %v8210_v17 = vrot.slane %v14863_v23, 5  ;;  %v7644_v48 = vshrl.u32 %v7427_v11, 16 }
 0x59f   : >> { %v7081_v42 = vadd.f32 %v7041_v26, %v6661_v21  ;;  %v7636_v21 = vor.u32 %v7635_v63, %v14852_v55  ;;  %v8323_v31 = vpack.c.b16 %v8299_v61, %v8298_v62  ;;  %v7641_v60 = vrot.slane %v7639_v9, 5 }
 0x5a0   : >> { %v7647_v61 = vshll.u32 %v7427_v11, 16 }
 0x5a1   : >> { %v14854_v30 = vadd.f32 %v7358_v59, %v7081_v42  ;;  %v9056_v42 = vrot.slane %v9054_v32, 5  ;;  %v14865_v59 = vrot.slane %v9060_v57, 5  ;;  %v7637_v15 = vrot.slane %v7636_v21, 4  ;;  %v14872_v57 = vld [vmem:[#allocation2 + $0x74] sm:$0x1] }
 0x5a2   : >> { %v9070_v21 = vshll.u32 %v8857_v51, 16  ;;  %v8213_v9 = vrot.slane %v14872_v57, 5 }
 0x5a3   : >> { %8751 = vmatmul.bf16.gmra.mxu3 %v12077_v7  ;;  %v6665_v25 = vpop.f32.mrf.mxu2  ;;  %v9324_v7 = vpack.c.b16 %v9299_v53, %v9298_v56  ;;  %v9057_v32 = vor.u32 %v9056_v42, %v9053_v38  ;;  %v9067_v41 = vor.u32 %v9066_v44, %v14865_v59  ;;  %v8212_v56 = vrot.slane %v8210_v17, 4 }
 0x5a4   : >> { %v6430_v28 = vpop.f32.mrf.mxu1  ;;  %v7642_v42 = vsel %vm12341_vm10, %v7637_v15, %v7641_v60 }
 0x5a5   : >> { %v6664_v26 = vadd.f32 %v6663_v37, %v6430_v28  ;;  %v7627_v37 = vrot.slane %v7626_v18, 4  ;;  %v8096_v28 = vld [vmem:[#allocation2 + $0x6c] sm:$0xe]  ;;  %v7657_v18 = vshrl.u32 %v14863_v23, 16  ;;  %v9068_v11 = vrot.slane %v9067_v41, 4 }
 0x5a6   : >> { %v7044_v54 = vpop.f32.mrf.mxu3  ;;  %v7361_v50 = vpop.f32.mrf.mxu0  ;;  %v8214_v15 = vsel %vm12701_vm13, %v8212_v56, %v8213_v9 }
 0x5a7   : >> { %v7082_v4 = vadd.f32 %v7044_v54, %v6664_v26  ;;  %8005 = vmatmul.bf16.gmra.mxu1 %v7893_v22  ;;  %v7653_v22 = vshll.u32 %v14863_v23, 16  ;;  %v7632_v38 = vsel %vm12341_vm10, %v7627_v37, %v14852_v55  ;;  %v9058_v54 = vrot.slane %v9057_v32, 4 }
 0x5a8   : >> { %8439 = vmatmul.bf16.gmra.mxu2 %v8323_v31  ;;  %v7646_v23 = vrot.slane %v7644_v48, 4  ;;  %v7869_v55 = vunpack.c.l.b16 %v7632_v38  ;;  %v7870_v37 = vunpack.c.l.b16 %v7642_v42  ;;  %v9072_v32 = vrot.slane %v9070_v21, 5 }
 0x5a9   : >> { %v14869_v63 = vadd.f32 %v7361_v50, %v7082_v4  ;;  %9436 = vmatmul.bf16.gmra.mxu0 %v9324_v7  ;;  %v11574_v4 = vrot.slane %v8096_v28, 9  ;;  %v8858_v50 = vld [vmem:[#allocation2 + $0x78] sm:$0xf]  ;;  %v7649_v7 = vrot.slane %v7647_v61, 5  ;;  %v14883_v51 = vrot.slane %v7653_v22, 5  ;;  %v12078_v28 = vld [vmem:[#allocation2 + $0x6c] sm:$0xff] }
 0x5aa   : >> { %v9063_v41 = vsel %vm12341_vm10, %v9058_v54, %v14865_v59  ;;  %v9075_v48 = vshrl.u32 %v8858_v50, 16  ;;  %v9078_v61 = vshll.u32 %v8858_v50, 16  ;;  %v9073_v22 = vsel %vm12341_vm10, %v9068_v11, %v9072_v32  ;;  %v14898_v54 = vld [vmem:[#allocation2 + $0x7c] sm:$0xf] }
 0x5ab   : >> { %15828 = vst [vmem:[#allocation8_spill] sm:$0xff] %v14869_v63  ;;  %v6668_v44 = vpop.f32.mrf.mxu2  ;;  %v8211_v38 = vsel %vm12701_vm13, %v11574_v4, %v8210_v17  ;;  %v7650_v56 = vor.u32 %v7649_v7, %v7646_v23  ;;  %v8301_v9 = vunpack.c.l.b16 %v8214_v15  ;;  %v7663_v59 = vshll.u32 %v14872_v57, 16  ;;  %v8860_v57 = vld [vmem:[#allocation2 + $0x80] sm:$0x1] }
 0x5ac   : >> { %v6432_v26 = vpop.f32.mrf.mxu1  ;;  %v9077_v11 = vrot.slane %v9075_v48, 4  ;;  %v9080_v32 = vrot.slane %v9078_v61, 5  ;;  %v7430_v61 = vld [vmem:[#allocation2 + $0x78] sm:$0xf] }
 0x5ad   : >> { %v6666_v53 = vadd.f32 %v6665_v25, %v6432_v26  ;;  %v7659_v25 = vrot.slane %v7657_v18, 4  ;;  %v9084_v18 = vshll.u32 %v8859_v34, 16  ;;  %v7651_v23 = vrot.slane %v7650_v56, 4 }
 0x5ae   : >> { %v7046_v62 = vpop.f32.mrf.mxu3  ;;  %v7363_v26 = vpop.f32.mrf.mxu0  ;;  %v9081_v48 = vor.u32 %v9080_v32, %v9077_v11 }
 0x5af   : >> { %v7083_v31 = vadd.f32 %v7046_v62, %v6666_v53  ;;  %v9088_v53 = vshrl.u32 %v8859_v34, 16  ;;  %v7660_v21 = vor.u32 %v7659_v25, %v14883_v51  ;;  %v7894_v62 = vpack.c.b16 %v7870_v37, %v7869_v55 }
 0x5b0   : >> { %v9086_v63 = vrot.slane %v9084_v18, 5  ;;  %v8217_v25 = vrot.slane %v14898_v54, 5  ;;  %v7656_v18 = vsel %vm12341_vm10, %v7651_v23, %v14883_v51  ;;  %v9082_v11 = vrot.slane %v9081_v48, 4  ;;  %v8861_v23 = vld [vmem:[#allocation2 + $0x84] sm:$0xf] }
 0x5b1   : >> { %v14887_v60 = vadd.f32 %v7363_v26, %v7083_v31  ;;  %v9300_v31 = vunpack.c.l.b16 %v9063_v41  ;;  %v9301_v26 = vunpack.c.l.b16 %v9073_v22  ;;  %v9090_v17 = vrot.slane %v9088_v53, 4  ;;  %v14903_v22 = vld [vmem:[#allocation2 + $0x80] sm:$0x1] }
 0x5b2   : >> { %v7661_v7 = vrot.slane %v7660_v21, 4  ;;  %v7665_v41 = vrot.slane %v7663_v59, 5  ;;  %v8219_v56 = vrot.slane %v8217_v25, 4  ;;  %v9094_v21 = vshll.u32 %v8860_v57, 16 }
 0x5b3   : >> { %15829 = vst [vmem:[#allocation19_spill] sm:$0xff] %v14887_v60  ;;  %8756 = vmatmul.bf16.gmra.mxu3 %v12078_v28  ;;  %v6670_v28 = vpop.f32.mrf.mxu2  ;;  %v8300_v60 = vunpack.c.l.b16 %v8211_v38  ;;  %v9091_v38 = vor.u32 %v9090_v17, %v9086_v63  ;;  %v7681_v59 = vshrl.u32 %v14898_v54, 16  ;;  %v7871_v51 = vunpack.c.l.b16 %v7656_v18 }
 0x5b4   : >> { %v6435_v42 = vpop.f32.mrf.mxu1  ;;  %v7666_v53 = vsel %vm12341_vm10, %v7661_v7, %v7665_v41  ;;  %v9096_v57 = vrot.slane %v9094_v21, 5  ;;  %v9099_v18 = vshrl.u32 %v8861_v23, 16 }
 0x5b5   : >> { %v6669_v50 = vadd.f32 %v6668_v44, %v6435_v42  ;;  %v8324_v37 = vpack.c.b16 %v8301_v9, %v8300_v60  ;;  %v9325_v44 = vpack.c.b16 %v9301_v26, %v9300_v31  ;;  %v8097_v60 = vld [vmem:[#allocation2 + $0x78] sm:$0xe]  ;;  %v7671_v9 = vshll.u32 %v7430_v61, 16 }
 0x5b6   : >> { %v7049_v34 = vpop.f32.mrf.mxu3  ;;  %v7366_v55 = vpop.f32.mrf.mxu0  ;;  %v7677_v31 = vshll.u32 %v14898_v54, 16  ;;  %v8220_v26 = vrot.slane %v14903_v22, 5  ;;  %v11575_v17 = vrot.slane %v8097_v60, 9  ;;  %v9102_v60 = vshll.u32 %v8861_v23, 16  ;;  %v14927_v23 = vld [vmem:[#allocation2 + $0x88] sm:$0xf] }
 0x5b7   : >> { %v7084_v4 = vadd.f32 %v7049_v34, %v6669_v50  ;;  %8010 = vmatmul.bf16.gmra.mxu1 %v7894_v62  ;;  %v7668_v62 = vshrl.u32 %v7430_v61, 16  ;;  %v7673_v54 = vrot.slane %v7671_v9, 5 }
 0x5b8   : >> { %8444 = vmatmul.bf16.gmra.mxu2 %v8324_v37  ;;  %v8221_v37 = vsel %vm12701_vm13, %v8219_v56, %v8220_v26 }
 0x5b9   : >> { %v14901_v15 = vadd.f32 %v7366_v55, %v7084_v4  ;;  %9441 = vmatmul.bf16.gmra.mxu0 %v9325_v44  ;;  %v9092_v4 = vrot.slane %v9091_v38, 4  ;;  %v7872_v55 = vunpack.c.l.b16 %v7666_v53  ;;  %v8862_v44 = vld [vmem:[#allocation2 + $0x88] sm:$0xf]  ;;  %v7670_v61 = vrot.slane %v7668_v62, 4 }
 0x5ba   : >> { %v9087_v38 = vsel %vm12341_vm10, %v9082_v11, %v9086_v63  ;;  %v9108_v56 = vshll.u32 %v8862_v44, 16  ;;  %v9112_v21 = vshrl.u32 %v8862_v44, 16  ;;  %v8218_v62 = vsel %vm12701_vm13, %v11575_v17, %v8217_v25 }
 0x5bb   : >> { %15830 = vst [vmem:[#allocation5_spill] sm:$0xff] %v14901_v15  ;;  %v8405_v34 = vpop.f32.mrf.mxu2  ;;  %v12079_v15 = vld [vmem:[#allocation2 + $0x78] sm:$0xff]  ;;  %v9097_v53 = vsel %vm12341_vm10, %v9092_v4, %v9096_v57  ;;  %v8303_v9 = vunpack.c.l.b16 %v8221_v37  ;;  %v7674_v26 = vor.u32 %v7673_v54, %v7670_v61  ;;  %v9104_v4 = vrot.slane %v9102_v60, 5  ;;  %v8863_v60 = vld [vmem:[#allocation2 + $0x8c] sm:$0x1] }
 0x5bc   : >> { %v6437_v42 = vpop.f32.mrf.mxu1  ;;  %v9303_v11 = vunpack.c.l.b16 %v9097_v53  ;;  %v9114_v25 = vrot.slane %v9112_v21, 4  ;;  %v8224_v54 = vrot.slane %v14927_v23, 5 }
 0x5bd   : >> { %v6671_v50 = vadd.f32 %v6670_v28, %v6437_v42  ;;  %v14915_v28 = vrot.slane %v7677_v31, 5  ;;  %v7683_v42 = vrot.slane %v7681_v59, 4  ;;  %v7895_v59 = vpack.c.b16 %v7872_v55, %v7871_v51  ;;  %v7433_v55 = vld [vmem:[#allocation2 + $0x84] sm:$0xf] }
 0x5be   : >> { %v7051_v32 = vpop.f32.mrf.mxu3  ;;  %v7368_v41 = vpop.f32.mrf.mxu0  ;;  %v7687_v51 = vshll.u32 %v14903_v22, 16  ;;  %v7695_v21 = vshll.u32 %v7433_v55, 16 }
 0x5bf   : >> { %v7085_v7 = vadd.f32 %v7051_v32, %v6671_v50  ;;  %v9302_v50 = vunpack.c.l.b16 %v9087_v38  ;;  %v7684_v32 = vor.u32 %v7683_v42, %v14915_v28 }
 0x5c0   : >> { %v7689_v22 = vrot.slane %v7687_v51, 5 }
 0x5c1   : >> { %v14917_v48 = vadd.f32 %v7368_v41, %v7085_v7  ;;  %v9101_v7 = vrot.slane %v9099_v18, 4  ;;  %v14929_v41 = vrot.slane %v9108_v56, 5  ;;  %v9326_v38 = vpack.c.b16 %v9303_v11, %v9302_v50 }
 0x5c2   : >> { %v7685_v18 = vrot.slane %v7684_v32, 4  ;;  %v8098_v32 = vld [vmem:[#allocation2 + $0x84] sm:$0xe]  ;;  %v9118_v11 = vshll.u32 %v8863_v60, 16 }
 0x5c3   : >> { %8761 = vmatmul.bf16.gmra.mxu3 %v12079_v15  ;;  %v8407_v44 = vpop.f32.mrf.mxu2  ;;  %v8302_v15 = vunpack.c.l.b16 %v8218_v62  ;;  %v9105_v53 = vor.u32 %v9104_v4, %v9101_v7  ;;  %v12105_v62 = vld [vmem:[%s12308_s22 + $0x450] sm:$0xff]  ;;  %v9115_v56 = vor.u32 %v9114_v25, %v14929_v41 }
 0x5c4   : >> { %v7976_v31 = vpop.f32.mrf.mxu1  ;;  %9832 = vmatpush.bf16.msra.mxu1 %v12105_v62  ;;  %v8865_v62 = vld [vmem:[#allocation2 + $0x94] sm:$0xf] }
 0x5c5   : >> { %v8056_v63 = vadd.f32 %v7976_v31, %v14486_v20  ;;  %v8325_v61 = vpack.c.b16 %v8303_v9, %v8302_v15  ;;  %v7675_v20 = vrot.slane %v7674_v26, 4  ;;  %v7692_v31 = vshrl.u32 %v7433_v55, 16 }
 0x5c6   : >> { %v8722_v57 = vpop.f32.mrf.mxu3  ;;  %v9407_v37 = vpop.f32.mrf.mxu0  ;;  %v7701_v9 = vshll.u32 %v14927_v23, 16  ;;  %v7705_v26 = vshrl.u32 %v14927_v23, 16  ;;  %v9106_v15 = vrot.slane %v9105_v53, 4  ;;  %v9116_v23 = vrot.slane %v9115_v56, 4 }
 0x5c7   : >> { %v8485_v17 = vadd.f32 %v8405_v34, %v8056_v63  ;;  %8015 = vmatmul.bf16.gmra.mxu1 %v7895_v59  ;;  %v14937_v59 = vld [vmem:[#allocation2 + $0x8c] sm:$0x1]  ;;  %v8226_v63 = vrot.slane %v8224_v54, 4  ;;  %v7680_v4 = vsel %vm12341_vm10, %v7675_v20, %v14915_v28  ;;  %v7694_v55 = vrot.slane %v7692_v31, 4 }
 0x5c8   : >> { %8449 = vmatmul.bf16.gmra.mxu2 %v8325_v61  ;;  %v8227_v51 = vrot.slane %v14937_v59, 5  ;;  %v8864_v61 = vld [vmem:[#allocation2 + $0x90] sm:$0xf]  ;;  %v14948_v60 = vrot.slane %v7701_v9, 5  ;;  %v7873_v28 = vunpack.c.l.b16 %v7680_v4  ;;  %v9120_v53 = vrot.slane %v9118_v11, 5 }
 0x5c9   : >> { %v8802_v42 = vadd.f32 %v8722_v57, %v8485_v17  ;;  %9446 = vmatmul.bf16.gmra.mxu0 %v9326_v38  ;;  %v7690_v57 = vsel %vm12341_vm10, %v7685_v18, %v7689_v22  ;;  %v11576_v38 = vrot.slane %v8098_v32, 9  ;;  %v9111_v56 = vsel %vm12341_vm10, %v9106_v15, %v14929_v41 }
 0x5ca   : >> { %v7874_v20 = vunpack.c.l.b16 %v7690_v57  ;;  %v8228_v18 = vsel %vm12701_vm13, %v8226_v63, %v8227_v51  ;;  %v9123_v31 = vshrl.u32 %v8864_v61, 16  ;;  %v9136_v32 = vshrl.u32 %v8865_v62, 16  ;;  %v14963_v51 = vld [vmem:[#allocation2 + $0x94] sm:$0xf] }
 0x5cb   : >> { %v14935_v34 = vadd.f32 %v9407_v37, %v8802_v42  ;;  %v8410_v17 = vpop.f32.mrf.mxu2  ;;  %v7697_v37 = vrot.slane %v7695_v21, 5  ;;  %v9121_v21 = vsel %vm12341_vm10, %v9116_v23, %v9120_v53  ;;  %v8225_v63 = vsel %vm12701_vm13, %v11576_v38, %v8224_v54  ;;  %v8866_v53 = vld [vmem:[#allocation2 + $0x98] sm:$0x1] }
 0x5cc   : >> { %v7978_v50 = vpop.f32.mrf.mxu1  ;;  %v7896_v57 = vpack.c.b16 %v7874_v20, %v7873_v28  ;;  %v9304_v41 = vunpack.c.l.b16 %v9111_v56  ;;  %v7711_v15 = vshll.u32 %v14937_v59, 16  ;;  %v9138_v38 = vrot.slane %v9136_v32, 4 }
 0x5cd   : >> { %15831 = vst [vmem:[#allocation11_spill] sm:$0xff] %v14935_v34  ;;  %v8057_v7 = vadd.f32 %v7978_v50, %v14496_v27  ;;  %v7707_v27 = vrot.slane %v7705_v26, 4  ;;  %v12080_v34 = vld [vmem:[#allocation2 + $0x84] sm:$0xff]  ;;  %v7698_v9 = vor.u32 %v7697_v37, %v7694_v55  ;;  %v9132_v26 = vshll.u32 %v8865_v62, 16 }
 0x5ce   : >> { %v8724_v25 = vpop.f32.mrf.mxu3  ;;  %v9409_v50 = vpop.f32.mrf.mxu0  ;;  %v9305_v55 = vunpack.c.l.b16 %v9121_v21  ;;  %v9125_v37 = vrot.slane %v9123_v31, 4  ;;  %v8304_v62 = vunpack.c.l.b16 %v8225_v63  ;;  %v8231_v20 = vrot.slane %v14963_v51, 5  ;;  %v7436_v31 = vld [vmem:[#allocation2 + $0x90] sm:$0xf] }
 0x5cf   : >> { %v8486_v42 = vadd.f32 %v8407_v44, %v8057_v7  ;;  %v9126_v44 = vshll.u32 %v8864_v61, 16  ;;  %v7708_v11 = vor.u32 %v7707_v27, %v14948_v60  ;;  %v9134_v54 = vrot.slane %v9132_v26, 5  ;;  %v8099_v63 = vld [vmem:[#allocation2 + $0x90] sm:$0xe] }
 0x5d0   : >> { %v9327_v56 = vpack.c.b16 %v9305_v55, %v9304_v41  ;;  %v7719_v41 = vshll.u32 %v7436_v31, 16 }
 0x5d1   : >> { %v8803_v22 = vadd.f32 %v8724_v25, %v8486_v42  ;;  %v8305_v25 = vunpack.c.l.b16 %v8228_v18  ;;  %v9128_v61 = vrot.slane %v9126_v44, 5  ;;  %v7709_v28 = vrot.slane %v7708_v11, 4 }
 0x5d2   : >> { %v9139_v26 = vor.u32 %v9138_v38, %v9134_v54  ;;  %v8233_v11 = vrot.slane %v8231_v20, 4 }
 0x5d3   : >> { %v14957_v7 = vadd.f32 %v9409_v50, %v8803_v22  ;;  %8766 = vmatmul.bf16.gmra.mxu3 %v12080_v34  ;;  %v8412_v34 = vpop.f32.mrf.mxu2  ;;  %v7699_v50 = vrot.slane %v7698_v9, 4  ;;  %v8326_v59 = vpack.c.b16 %v8305_v25, %v8304_v62  ;;  %v9129_v21 = vor.u32 %v9128_v61, %v9125_v37  ;;  %v14970_v9 = vld [vmem:[#allocation2 + $0x98] sm:$0x1] }
 0x5d4   : >> { %v7981_v4 = vpop.f32.mrf.mxu1  ;;  %v7716_v25 = vshrl.u32 %v7436_v31, 16  ;;  %v8234_v55 = vrot.slane %v14970_v9, 5  ;;  %v9140_v38 = vrot.slane %v9139_v26, 4 }
 0x5d5   : >> { %v8058_v23 = vadd.f32 %v7981_v4, %v14498_v46  ;;  %v7713_v46 = vrot.slane %v7711_v15, 5  ;;  %v7704_v44 = vsel %vm12341_vm10, %v7699_v50, %v14948_v60  ;;  %v9142_v4 = vshll.u32 %v8866_v53, 16 }
 0x5d6   : >> { %v8727_v42 = vpop.f32.mrf.mxu3  ;;  %v9412_v18 = vpop.f32.mrf.mxu0  ;;  %v7725_v15 = vshll.u32 %v14963_v51, 16  ;;  %v7729_v60 = vshrl.u32 %v14963_v51, 16  ;;  %v9130_v37 = vrot.slane %v9129_v21, 4  ;;  %v7875_v62 = vunpack.c.l.b16 %v7704_v44 }
 0x5d7   : >> { %v8487_v27 = vadd.f32 %v8410_v17, %v8058_v23  ;;  %8020 = vmatmul.bf16.gmra.mxu1 %v7896_v57  ;;  %v7714_v32 = vsel %vm12341_vm10, %v7709_v28, %v7713_v46  ;;  %v11577_v50 = vrot.slane %v8099_v63, 9  ;;  %v9144_v53 = vrot.slane %v9142_v4, 5 }
 0x5d8   : >> { %8454 = vmatmul.bf16.gmra.mxu2 %v8326_v59  ;;  %v8235_v59 = vsel %vm12701_vm13, %v8233_v11, %v8234_v55  ;;  %v7718_v51 = vrot.slane %v7716_v25, 4  ;;  %v7721_v46 = vrot.slane %v7719_v41, 5  ;;  %v7731_v31 = vrot.slane %v7729_v60, 4 }
 0x5d9   : >> { %v8804_v22 = vadd.f32 %v8727_v42, %v8487_v27  ;;  %9451 = vmatmul.bf16.gmra.mxu0 %v9327_v56  ;;  %v8867_v27 = vld [vmem:[#allocation2 + $0x9c] sm:$0xf]  ;;  %v9135_v44 = vsel %vm12341_vm10, %v9130_v37, %v9134_v54  ;;  %v8232_v25 = vsel %vm12701_vm13, %v11577_v50, %v8231_v20  ;;  %v8307_v41 = vunpack.c.l.b16 %v8235_v59 }
 0x5da   : >> { %v9147_v26 = vshrl.u32 %v8867_v27, 16  ;;  %v9150_v63 = vshll.u32 %v8867_v27, 16  ;;  %v7722_v55 = vor.u32 %v7721_v46, %v7718_v51  ;;  %v14994_v27 = vld [vmem:[#allocation2 + $0xa0] sm:$0xf]  ;;  %v7439_v50 = vld [vmem:[#allocation2 + $0x9c] sm:$0xf] }
 0x5db   : >> { %v14972_v17 = vadd.f32 %v9412_v18, %v8804_v22  ;;  %v8415_v42 = vpop.f32.mrf.mxu2  ;;  %v7876_v18 = vunpack.c.l.b16 %v7714_v32  ;;  %v8868_v22 = vld [vmem:[#allocation2 + $0xa0] sm:$0xf] }
 0x5dc   : >> { %v7983_v57 = vpop.f32.mrf.mxu1  ;;  %v9156_v32 = vshll.u32 %v8868_v22, 16  ;;  %v9160_v11 = vshrl.u32 %v8868_v22, 16 }
 0x5dd   : >> { %v8059_v23 = vadd.f32 %v7983_v57, %v14508_v16  ;;  %v14982_v16 = vrot.slane %v7725_v15, 5  ;;  %v12081_v57 = vld [vmem:[#allocation2 + $0x90] sm:$0xff]  ;;  %v7897_v60 = vpack.c.b16 %v7876_v18, %v7875_v62  ;;  %v7735_v18 = vshll.u32 %v14970_v9, 16 }
 0x5de   : >> { %v8729_v61 = vpop.f32.mrf.mxu3  ;;  %v9414_v56 = vpop.f32.mrf.mxu0  ;;  %v9162_v20 = vrot.slane %v9160_v11, 4  ;;  %v12104_v11 = vld [vmem:[%s12308_s22 + $0x448] sm:$0xff]  ;;  %v7753_v9 = vshrl.u32 %v14994_v27, 16 }
 0x5df   : >> { %v8488_v28 = vadd.f32 %v8412_v34, %v8059_v23  ;;  %v9145_v34 = vsel %vm12341_vm10, %v9140_v38, %v9144_v53  ;;  %v9306_v23 = vunpack.c.l.b16 %v9135_v44  ;;  %v7732_v54 = vor.u32 %v7731_v31, %v14982_v16  ;;  %9833 = vmatpush.bf16.msra.mxu1 %v12104_v11 }
 0x5e0   : >> { %v9149_v38 = vrot.slane %v9147_v26, 4  ;;  %v8238_v31 = vrot.slane %v14994_v27, 5  ;;  %v15000_v26 = vld [vmem:[#allocation2 + $0xa4] sm:$0x1] }
 0x5e1   : >> { %v8805_v21 = vadd.f32 %v8729_v61, %v8488_v28  ;;  %v9307_v61 = vunpack.c.l.b16 %v9145_v34  ;;  %v9152_v28 = vrot.slane %v9150_v63, 5  ;;  %v7733_v46 = vrot.slane %v7732_v54, 4  ;;  %v8869_v63 = vld [vmem:[#allocation2 + $0xa4] sm:$0x1] }
 0x5e3   : >> { %v14988_v4 = vadd.f32 %v9414_v56, %v8805_v21  ;;  %8771 = vmatmul.bf16.gmra.mxu3 %v12081_v57  ;;  %v8417_v22 = vpop.f32.mrf.mxu2  ;;  %v8306_v56 = vunpack.c.l.b16 %v8232_v25  ;;  %v14996_v21 = vrot.slane %v9156_v32, 5  ;;  %v9328_v44 = vpack.c.b16 %v9307_v61, %v9306_v23 }
 0x5e4   : >> { %v7986_v15 = vpop.f32.mrf.mxu1  ;;  %v9153_v34 = vor.u32 %v9152_v28, %v9149_v38  ;;  %v7740_v32 = vshrl.u32 %v7439_v50, 16  ;;  %v8241_v61 = vrot.slane %v15000_v26, 5  ;;  %v9166_v38 = vshll.u32 %v8869_v63, 16  ;;  %v8870_v28 = vld [vmem:[#allocation2 + $0xa8] sm:$0xf] }
 0x5e5   : >> { %15832 = vst [vmem:[#allocation20_spill] sm:$0xff] %v14988_v4  ;;  %v8060_v37 = vadd.f32 %v7986_v15, %v14511_v43  ;;  %v8327_v51 = vpack.c.b16 %v8307_v41, %v8306_v56  ;;  %v7723_v43 = vrot.slane %v7722_v55, 4  ;;  %v9163_v25 = vor.u32 %v9162_v20, %v14996_v21  ;;  %v8100_v55 = vld [vmem:[#allocation2 + $0x9c] sm:$0xe] }
 0x5e6   : >> { %v8732_v53 = vpop.f32.mrf.mxu3  ;;  %v9417_v59 = vpop.f32.mrf.mxu0  ;;  %v7749_v15 = vshll.u32 %v14994_v27, 16  ;;  %v9154_v56 = vrot.slane %v9153_v34, 4  ;;  %v7742_v20 = vrot.slane %v7740_v32, 4  ;;  %v9171_v63 = vshrl.u32 %v8870_v28, 16 }
 0x5e7   : >> { %v8489_v62 = vadd.f32 %v8415_v42, %v8060_v37  ;;  %8025 = vmatmul.bf16.gmra.mxu1 %v7897_v60  ;;  %v7743_v42 = vshll.u32 %v7439_v50, 16  ;;  %v7737_v60 = vrot.slane %v7735_v18, 5  ;;  %v7728_v54 = vsel %vm12341_vm10, %v7723_v43, %v14982_v16  ;;  %v8871_v43 = vld [vmem:[#allocation2 + $0xac] sm:$0xf] }
 0x5e8   : >> { %8459 = vmatmul.bf16.gmra.mxu2 %v8327_v51  ;;  %v8240_v37 = vrot.slane %v8238_v31, 4  ;;  %v9164_v18 = vrot.slane %v9163_v25, 4  ;;  %v15015_v51 = vrot.slane %v7749_v15, 5  ;;  %v7755_v16 = vrot.slane %v7753_v9, 4 }
 0x5e9   : >> { %v8806_v57 = vadd.f32 %v8732_v53, %v8489_v62  ;;  %9456 = vmatmul.bf16.gmra.mxu0 %v9328_v44  ;;  %v7738_v27 = vsel %vm12341_vm10, %v7733_v46, %v7737_v60  ;;  %v11578_v44 = vrot.slane %v8100_v55, 9  ;;  %v9174_v11 = vshll.u32 %v8870_v28, 16  ;;  %v12082_v60 = vld [vmem:[#allocation2 + $0x9c] sm:$0xff] }
 0x5ea   : >> { %v7877_v4 = vunpack.c.l.b16 %v7728_v54  ;;  %v8242_v46 = vsel %vm12701_vm13, %v8240_v37, %v8241_v61  ;;  %v9168_v34 = vrot.slane %v9166_v38, 5  ;;  %v9159_v25 = vsel %vm12341_vm10, %v9154_v56, %v14996_v21  ;;  %v15029_v37 = vld [vmem:[#allocation2 + $0xac] sm:$0xf] }
 0x5eb   : >> { %v15006_v41 = vadd.f32 %v9417_v59, %v8806_v57  ;;  %v8420_v62 = vpop.f32.mrf.mxu2  ;;  %v7745_v59 = vrot.slane %v7743_v42, 5  ;;  %v9180_v42 = vshll.u32 %v8871_v43, 16  ;;  %v9184_v15 = vshrl.u32 %v8871_v43, 16 }
 0x5ec   : >> { %v7988_v23 = vpop.f32.mrf.mxu1  ;;  %v7756_v55 = vor.u32 %v7755_v16, %v15015_v51  ;;  %v8239_v54 = vsel %vm12701_vm13, %v11578_v44, %v8238_v31  ;;  %v9173_v61 = vrot.slane %v9171_v63, 4  ;;  %v9176_v38 = vrot.slane %v9174_v11, 5 }
 0x5ed   : >> { %15833 = vst [vmem:[#allocation12_spill] sm:$0xff] %v15006_v41  ;;  %v8061_v53 = vadd.f32 %v7988_v23, %v14521_v36  ;;  %v7878_v36 = vunpack.c.l.b16 %v7738_v27  ;;  %v7746_v9 = vor.u32 %v7745_v59, %v7742_v20  ;;  %v9308_v27 = vunpack.c.l.b16 %v9159_v25 }
 0x5ee   : >> { %v8734_v50 = vpop.f32.mrf.mxu3  ;;  %v9419_v41 = vpop.f32.mrf.mxu0  ;;  %v7759_v56 = vshll.u32 %v15000_v26, 16  ;;  %v7757_v31 = vrot.slane %v7756_v55, 4  ;;  %v8308_v63 = vunpack.c.l.b16 %v8239_v54  ;;  %v9177_v11 = vor.u32 %v9176_v38, %v9173_v61 }
 0x5ef   : >> { %v8490_v57 = vadd.f32 %v8417_v22, %v8061_v53  ;;  %v9169_v22 = vsel %vm12341_vm10, %v9164_v18, %v9168_v34  ;;  %v7898_v21 = vpack.c.b16 %v7878_v36, %v7877_v4  ;;  %v8309_v53 = vunpack.c.l.b16 %v8242_v46  ;;  %v15036_v4 = vld [vmem:[#allocation2 + $0xb0] sm:$0x1]  ;;  %v7442_v46 = vld [vmem:[#allocation2 + $0xa8] sm:$0xf] }
 0x5f0   : >> { %v15033_v18 = vrot.slane %v9180_v42, 5  ;;  %v7747_v43 = vrot.slane %v7746_v9, 4  ;;  %v7761_v26 = vrot.slane %v7759_v56, 5  ;;  %v9190_v9 = vshll.u32 %v15036_v4, 16 }
 0x5f1   : >> { %v8807_v32 = vadd.f32 %v8734_v50, %v8490_v57  ;;  %v9309_v50 = vunpack.c.l.b16 %v9169_v22  ;;  %v8245_v57 = vrot.slane %v15029_v37, 5  ;;  %v8328_v34 = vpack.c.b16 %v8309_v53, %v8308_v63 }
 0x5f2   : >> { %v7752_v42 = vsel %vm12341_vm10, %v7747_v43, %v15015_v51  ;;  %v9178_v54 = vrot.slane %v9177_v11, 4  ;;  %v7764_v61 = vshrl.u32 %v7442_v46, 16  ;;  %v7767_v38 = vshll.u32 %v7442_v46, 16 }
 0x5f3   : >> { %v15025_v23 = vadd.f32 %v9419_v41, %v8807_v32  ;;  %8776 = vmatmul.bf16.gmra.mxu3 %v12082_v60  ;;  %v9186_v41 = vrot.slane %v9184_v15, 4  ;;  %v8422_v16 = vpop.f32.mrf.mxu2  ;;  %v9329_v32 = vpack.c.b16 %v9309_v50, %v9308_v27  ;;  %v15038_v60 = vld [vmem:[#allocation2 + $0xb0] sm:$0x1]  ;;  %v8101_v15 = vld [vmem:[#allocation2 + $0xa8] sm:$0xe]  ;;  %v8247_v22 = vrot.slane %v8245_v57, 4 }
 0x5f4   : >> { %v7991_v28 = vpop.f32.mrf.mxu1  ;;  %v7773_v53 = vshll.u32 %v15029_v37, 16  ;;  %v7777_v51 = vshrl.u32 %v15029_v37, 16  ;;  %v11579_v56 = vrot.slane %v8101_v15, 9  ;;  %v8873_v50 = vld [vmem:[#allocation2 + $0xb4] sm:$0xf]  ;;  %v7879_v43 = vunpack.c.l.b16 %v7752_v42  ;;  %v12083_v42 = vld [vmem:[#allocation2 + $0xa8] sm:$0xff] }
 0x5f5   : >> { %v8062_v20 = vadd.f32 %v7991_v28, %v14523_v2  ;;  %v9187_v25 = vor.u32 %v9186_v41, %v15033_v18  ;;  %v9192_v63 = vrot.slane %v9190_v9, 5  ;;  %v7769_v37 = vrot.slane %v7767_v38, 5  ;;  %v12180_v15 = vld [vmem:[#allocation2 + $0xb8] sm:$0xf] }
 0x5f6   : >> { %v8737_v59 = vpop.f32.mrf.mxu3  ;;  %v9422_v36 = vpop.f32.mrf.mxu0  ;;  %v8246_v9 = vsel %vm12701_vm13, %v11579_v56, %v8245_v57 }
 0x5f7   : >> { %v8491_v44 = vadd.f32 %v8420_v62, %v8062_v20  ;;  %8030 = vmatmul.bf16.gmra.mxu1 %v7898_v21  ;;  %v7762_v62 = vsel %vm12341_vm10, %v7757_v31, %v7761_v26  ;;  %v8248_v21 = vrot.slane %v15038_v60, 5  ;;  %v9188_v20 = vrot.slane %v9187_v25, 4 }
 0x5f8   : >> { %8464 = vmatmul.bf16.gmra.mxu2 %v8328_v34  ;;  %v7880_v31 = vunpack.c.l.b16 %v7762_v62  ;;  %v7766_v26 = vrot.slane %v7764_v61, 4  ;;  %v9195_v34 = vshrl.u32 %v8873_v50, 16 }
 0x5f9   : >> { %v8808_v2 = vadd.f32 %v8737_v59, %v8491_v44  ;;  %9461 = vmatmul.bf16.gmra.mxu0 %v9329_v32  ;;  %v8249_v44 = vsel %vm12701_vm13, %v8247_v22, %v8248_v21  ;;  %v9198_v32 = vshll.u32 %v8873_v50, 16  ;;  %v9193_v62 = vsel %vm12341_vm10, %v9188_v20, %v9192_v63 }
 0x5fa   : >> { %v9204_v22 = vshll.u32 %v12180_v15, 16  ;;  %v7770_v38 = vor.u32 %v7769_v37, %v7766_v26  ;;  %v9311_v21 = vunpack.c.l.b16 %v9193_v62 }
 0x5fb   : >> { %v15047_v55 = vadd.f32 %v9422_v36, %v8808_v2  ;;  %v8425_v59 = vpop.f32.mrf.mxu2  ;;  %v9183_v36 = vsel %vm12341_vm10, %v9178_v54, %v15033_v18  ;;  %v7779_v2 = vrot.slane %v7777_v51, 4  ;;  %v8311_v54 = vunpack.c.l.b16 %v8249_v44  ;;  %v15067_v51 = vld [vmem:[#allocation2 + $0xb8] sm:$0xf] }
 0x5fc   : >> { %v7993_v28 = vpop.f32.mrf.mxu1  ;;  %v9310_v61 = vunpack.c.l.b16 %v9183_v36  ;;  %v9200_v20 = vrot.slane %v9198_v32, 5  ;;  %v15070_v63 = vrot.slane %v9204_v22, 5  ;;  %v7783_v44 = vshll.u32 %v15038_v60, 16  ;;  %v7445_v36 = vld [vmem:[#allocation2 + $0xb4] sm:$0xf]  ;;  %v12103_v22 = vld [vmem:[%s12308_s22 + $0x440] sm:$0xff] }
 0x5fd   : >> { %v8063_v27 = vadd.f32 %v7993_v28, %v14534_v5  ;;  %v15058_v5 = vrot.slane %v7773_v53, 5  ;;  %v7771_v37 = vrot.slane %v7770_v38, 4  ;;  %v7788_v62 = vshrl.u32 %v7445_v36, 16  ;;  %9834 = vmatpush.bf16.msra.mxu1 %v12103_v22 }
 0x5fe   : >> { %v8739_v41 = vpop.f32.mrf.mxu3  ;;  %v9424_v46 = vpop.f32.mrf.mxu0 }
 0x5ff   : >> { %v8492_v11 = vadd.f32 %v8422_v16, %v8063_v27  ;;  %v9208_v16 = vshrl.u32 %v12180_v15, 16  ;;  %v7780_v53 = vor.u32 %v7779_v2, %v15058_v5  ;;  %v9197_v27 = vrot.slane %v9195_v34, 4 }
 0x600   : >> { %v8252_v2 = vrot.slane %v15067_v51, 5  ;;  %v7791_v15 = vshll.u32 %v7445_v36, 16  ;;  %v7776_v60 = vsel %vm12341_vm10, %v7771_v37, %v15058_v5  ;;  %v7790_v5 = vrot.slane %v7788_v62, 4 }
 0x601   : >> { %v8809_v25 = vadd.f32 %v8739_v41, %v8492_v11  ;;  %v7899_v41 = vpack.c.b16 %v7880_v31, %v7879_v43  ;;  %v9210_v57 = vrot.slane %v9208_v16, 4  ;;  %v9201_v43 = vor.u32 %v9200_v20, %v9197_v27 }
 0x602   : >> { %v7785_v16 = vrot.slane %v7783_v44, 5  ;;  %v7797_v20 = vshll.u32 %v15067_v51, 16  ;;  %v7881_v37 = vunpack.c.l.b16 %v7776_v60 }
 0x603   : >> { %v15064_v18 = vadd.f32 %v9424_v46, %v8809_v25  ;;  %8781 = vmatmul.bf16.gmra.mxu3 %v12083_v42  ;;  %v8427_v11 = vpop.f32.mrf.mxu2  ;;  %v8310_v46 = vunpack.c.l.b16 %v8246_v9  ;;  %v9330_v25 = vpack.c.b16 %v9311_v21, %v9310_v61  ;;  %v9211_v42 = vor.u32 %v9210_v57, %v15070_v63  ;;  %v12181_v61 = vld [vmem:[#allocation2 + $0xbc] sm:$0x1] }
 0x604   : >> { %v7996_v28 = vpop.f32.mrf.mxu1  ;;  %v9214_v38 = vshll.u32 %v12181_v61, 16  ;;  %v9202_v27 = vrot.slane %v9201_v43, 4  ;;  %v12182_v61 = vld [vmem:[#allocation2 + $0xc4] sm:$0xf] }
 0x605   : >> { %v8064_v50 = vadd.f32 %v7996_v28, %v14544_v33  ;;  %v8329_v32 = vpack.c.b16 %v8311_v54, %v8310_v46  ;;  %v7781_v33 = vrot.slane %v7780_v53, 4  ;;  %v8254_v54 = vrot.slane %v8252_v2, 4  ;;  %v8102_v53 = vld [vmem:[#allocation2 + $0xb4] sm:$0xe] }
 0x606   : >> { %v8742_v56 = vpop.f32.mrf.mxu3  ;;  %v9427_v34 = vpop.f32.mrf.mxu0  ;;  %v9212_v57 = vrot.slane %v9211_v42, 4  ;;  %v12084_v42 = vld [vmem:[#allocation2 + $0xb4] sm:$0xff]  ;;  %v9207_v62 = vsel %vm12341_vm10, %v9202_v27, %v15070_v63 }
 0x607   : >> { %v8493_v26 = vadd.f32 %v8425_v59, %v8064_v50  ;;  %8035 = vmatmul.bf16.gmra.mxu1 %v7899_v41  ;;  %v15081_v59 = vld [vmem:[#allocation2 + $0xbc] sm:$0x1]  ;;  %v7786_v21 = vsel %vm12341_vm10, %v7781_v33, %v7785_v16  ;;  %v7801_v50 = vshrl.u32 %v15067_v51, 16 }
 0x608   : >> { %8469 = vmatmul.bf16.gmra.mxu2 %v8329_v32  ;;  %v8255_v36 = vrot.slane %v15081_v59, 5  ;;  %v9216_v32 = vrot.slane %v9214_v38, 5  ;;  %v7882_v43 = vunpack.c.l.b16 %v7786_v21  ;;  %v9228_v38 = vshll.u32 %v12182_v61, 16 }
 0x609   : >> { %v8810_v31 = vadd.f32 %v8742_v56, %v8493_v26  ;;  %9466 = vmatmul.bf16.gmra.mxu0 %v9330_v25  ;;  %v7793_v56 = vrot.slane %v7791_v15, 5  ;;  %v8876_v25 = vld [vmem:[#allocation2 + $0xc0] sm:$0xf]  ;;  %v7803_v22 = vrot.slane %v7801_v50, 4  ;;  %v7807_v63 = vshll.u32 %v15081_v59, 16 }
 0x60a   : >> { %v8256_v51 = vsel %vm12701_vm13, %v8254_v54, %v8255_v36  ;;  %v9219_v16 = vshrl.u32 %v8876_v25, 16  ;;  %v9222_v60 = vshll.u32 %v8876_v25, 16 }
 0x60b   : >> { %v15076_v9 = vadd.f32 %v9427_v34, %v8810_v31  ;;  %v8430_v44 = vpop.f32.mrf.mxu2  ;;  %v11580_v34 = vrot.slane %v8102_v53, 9  ;;  %v7799_v31 = vrot.slane %v7797_v20, 5  ;;  %v7794_v15 = vor.u32 %v7793_v56, %v7790_v5 }
 0x60c   : >> { %v7998_v28 = vpop.f32.mrf.mxu1  ;;  %v7900_v20 = vpack.c.b16 %v7882_v43, %v7881_v37  ;;  %v8313_v50 = vunpack.c.l.b16 %v8256_v51  ;;  %v9224_v25 = vrot.slane %v9222_v60, 5  ;;  %v7448_v60 = vld [vmem:[#allocation2 + $0xc0] sm:$0xf] }
 0x60d   : >> { %v8065_v41 = vadd.f32 %v7998_v28, %v14564_v40  ;;  %v9232_v28 = vshrl.u32 %v12182_v61, 16  ;;  %v8253_v54 = vsel %vm12701_vm13, %v11580_v34, %v8252_v2  ;;  %v7795_v56 = vrot.slane %v7794_v15, 4 }
 0x60e   : >> { %v8744_v46 = vpop.f32.mrf.mxu3  ;;  %v9429_v33 = vpop.f32.mrf.mxu0  ;;  %v8312_v37 = vunpack.c.l.b16 %v8253_v54 }
 0x60f   : >> { %v8494_v26 = vadd.f32 %v8427_v11, %v8065_v41  ;;  %v9217_v11 = vsel %vm12341_vm10, %v9212_v57, %v9216_v32  ;;  %v7804_v41 = vor.u32 %v7803_v22, %v7799_v31  ;;  %v9312_v57 = vunpack.c.l.b16 %v9207_v62 }
 0x610   : >> { %v9313_v5 = vunpack.c.l.b16 %v9217_v11  ;;  %v9221_v32 = vrot.slane %v9219_v16, 4  ;;  %v9234_v2 = vrot.slane %v9232_v28, 4  ;;  %v8330_v22 = vpack.c.b16 %v8313_v50, %v8312_v37 }
 0x611   : >> { %v8811_v40 = vadd.f32 %v8744_v46, %v8494_v26  ;;  %v15102_v46 = vld [vmem:[#allocation2 + $0xc4] sm:$0xf]  ;;  %v7805_v51 = vrot.slane %v7804_v41, 4  ;;  %v7800_v62 = vsel %vm12341_vm10, %v7795_v56, %v7799_v31  ;;  %v7809_v11 = vrot.slane %v7807_v63, 5 }
 0x612   : >> { %v8259_v59 = vrot.slane %v15102_v46, 5  ;;  %v9225_v15 = vor.u32 %v9224_v25, %v9221_v32  ;;  %v7883_v41 = vunpack.c.l.b16 %v7800_v62  ;;  %v7812_v63 = vshrl.u32 %v7448_v60, 16 }
 0x613   : >> { %v15096_v21 = vadd.f32 %v9429_v33, %v8811_v40  ;;  %8786 = vmatmul.bf16.gmra.mxu3 %v12084_v42  ;;  %v8432_v26 = vpop.f32.mrf.mxu2  ;;  %v15104_v33 = vrot.slane %v9228_v38, 5  ;;  %v9331_v40 = vpack.c.b16 %v9313_v5, %v9312_v57  ;;  %v8103_v42 = vld [vmem:[#allocation2 + $0xc0] sm:$0xe]  ;;  %v7810_v54 = vsel %vm12341_vm10, %v7805_v51, %v7809_v11  ;;  %v8879_v57 = vld [vmem:[#allocation2 + $0xcc] sm:$0xf] }
 0x614   : >> { %v8001_v53 = vpop.f32.mrf.mxu1  ;;  %v8261_v50 = vrot.slane %v8259_v59, 4  ;;  %v15117_v5 = vld [vmem:[#allocation2 + $0xd0] sm:$0xf]  ;;  %v9226_v32 = vrot.slane %v9225_v15, 4 }
 0x615   : >> { %v8066_v27 = vadd.f32 %v8001_v53, %v14576_v52  ;;  %v9235_v16 = vor.u32 %v9234_v2, %v15104_v33  ;;  %v15114_v53 = vld [vmem:[#allocation2 + $0xc8] sm:$0x1]  ;;  %15834 = vst [vmem:[#allocation13_spill] sm:$0xff] %v15117_v5  ;;  %v7821_v2 = vshll.u32 %v15102_v46, 16  ;;  %v9256_v62 = vshrl.u32 %v15117_v5, 16 }
 0x616   : >> { %v8747_v36 = vpop.f32.mrf.mxu3  ;;  %v9432_v43 = vpop.f32.mrf.mxu0  ;;  %v8262_v51 = vrot.slane %v15114_v53, 5 }
 0x617   : >> { %v8495_v34 = vadd.f32 %v8430_v44, %v8066_v27  ;;  %8040 = vmatmul.bf16.gmra.mxu1 %v7900_v20  ;;  %v12183_v44 = vld [vmem:[#allocation2 + $0xc8] sm:$0x1]  ;;  %v11581_v20 = vrot.slane %v8103_v42, 9  ;;  %v7815_v27 = vshll.u32 %v7448_v60, 16  ;;  %v9236_v25 = vrot.slane %v9235_v16, 4  ;;  %v12085_v60 = vld [vmem:[#allocation2 + $0xc0] sm:$0xff] }
 0x618   : >> { %8474 = vmatmul.bf16.gmra.mxu2 %v8330_v22  ;;  %v9238_v38 = vshll.u32 %v12183_v44, 16  ;;  %v9243_v22 = vshrl.u32 %v8879_v57, 16  ;;  %v9252_v42 = vshll.u32 %v15117_v5, 16  ;;  %v8263_v15 = vsel %vm12701_vm13, %v8261_v50, %v8262_v51 }
 0x619   : >> { %v8812_v52 = vadd.f32 %v8747_v36, %v8495_v34  ;;  %9471 = vmatmul.bf16.gmra.mxu0 %v9331_v40  ;;  %v7825_v34 = vshrl.u32 %v15102_v46, 16  ;;  %v9246_v40 = vshll.u32 %v8879_v57, 16  ;;  %v7814_v16 = vrot.slane %v7812_v63, 4 }
 0x61a   : >> { %v7817_v44 = vrot.slane %v7815_v27, 5  ;;  %v9231_v46 = vsel %vm12341_vm10, %v9226_v32, %v15104_v33  ;;  %v8260_v57 = vsel %vm12701_vm13, %v11581_v20, %v8259_v59  ;;  %v9245_v50 = vrot.slane %v9243_v22, 4 }
 0x61b   : >> { %v15110_v61 = vadd.f32 %v9432_v43, %v8812_v52  ;;  %v8435_v36 = vpop.f32.mrf.mxu2  ;;  %v7884_v43 = vunpack.c.l.b16 %v7810_v54  ;;  %v9240_v52 = vrot.slane %v9238_v38, 5  ;;  %v7823_v38 = vrot.slane %v7821_v2, 5 }
 0x61c   : >> { %v8003_v28 = vpop.f32.mrf.mxu1  ;;  %v9248_v63 = vrot.slane %v9246_v40, 5  ;;  %v9254_v27 = vrot.slane %v9252_v42, 5  ;;  %v8315_v33 = vunpack.c.l.b16 %v8263_v15  ;;  %v9314_v32 = vunpack.c.l.b16 %v9231_v46 }
 0x61d   : >> { %v8067_v31 = vadd.f32 %v8003_v28, %v14597_v6  ;;  %v7827_v28 = vrot.slane %v7825_v34, 4  ;;  %v7831_v20 = vshll.u32 %v15114_v53, 16 }
 0x61e   : >> { %v8749_v56 = vpop.f32.mrf.mxu3  ;;  %v9434_v6 = vpop.f32.mrf.mxu0  ;;  %v9249_v22 = vor.u32 %v9248_v63, %v9245_v50  ;;  %v12086_v63 = vld [vmem:[#allocation2 + $0xcc] sm:$0xff] }
 0x61f   : >> { %v8496_v37 = vadd.f32 %v8432_v26, %v8067_v31  ;;  %v9241_v26 = vsel %vm12341_vm10, %v9236_v25, %v9240_v52  ;;  %v7901_v31 = vpack.c.b16 %v7884_v43, %v7883_v41  ;;  %v15136_v25 = vld [vmem:[#allocation2 + $0xd4] sm:$0x1]  ;;  %v7818_v52 = vor.u32 %v7817_v44, %v7814_v16 }
 0x620   : >> { %v9315_v5 = vunpack.c.l.b16 %v9241_v26  ;;  %v8314_v43 = vunpack.c.l.b16 %v8260_v57  ;;  %v9262_v42 = vshll.u32 %v15136_v25, 16  ;;  %v9250_v44 = vrot.slane %v9249_v22, 4  ;;  %v12184_v22 = vld [vmem:[#allocation2 + $0x1c] sm:$0xf] }
 0x621   : >> { %v8813_v11 = vadd.f32 %v8749_v56, %v8496_v37  ;;  %v9258_v37 = vrot.slane %v9256_v62, 4 }
 0x622   : >> { %v8331_v62 = vpack.c.b16 %v8315_v33, %v8314_v43 }
 0x623   : >> { %v15131_v54 = vadd.f32 %v9434_v6, %v8813_v11  ;;  %8791 = vmatmul.bf16.gmra.mxu3 %v12085_v60  ;;  %v8437_v34 = vpop.f32.mrf.mxu2  ;;  %v7828_v6 = vor.u32 %v7827_v28, %v7823_v38  ;;  %v9259_v40 = vor.u32 %v9258_v37, %v9254_v27  ;;  %v9332_v11 = vpack.c.b16 %v9315_v5, %v9314_v32 }
 0x624   : >> { %v8006_v56 = vpop.f32.mrf.mxu1  ;;  %v7819_v60 = vrot.slane %v7818_v52, 4  ;;  %v9264_v28 = vrot.slane %v9262_v42, 5 }
 0x625   : >> { %v8068_v51 = vadd.f32 %v8006_v56, %v14605_v13  ;;  %v7829_v15 = vrot.slane %v7828_v6, 4  ;;  %v9260_v26 = vrot.slane %v9259_v40, 4  ;;  %v9585_v40 = vrot.slane %v12184_v22, 5 }
 0x626   : >> { %v8752_v2 = vpop.f32.mrf.mxu3  ;;  %v9437_v59 = vpop.f32.mrf.mxu0  ;;  %v7824_v56 = vsel %vm12341_vm10, %v7819_v60, %v7823_v38 }
 0x627   : >> { %v8497_v41 = vadd.f32 %v8435_v36, %v8068_v51  ;;  %8045 = vmatmul.bf16.gmra.mxu1 %v7901_v31  ;;  %v7833_v36 = vrot.slane %v7831_v20, 5  ;;  %v9255_v51 = vsel %vm12341_vm10, %v9250_v44, %v9254_v27  ;;  %v9265_v33 = vsel %vm12341_vm10, %v9260_v26, %v9264_v28 }
 0x628   : >> { %8479 = vmatmul.bf16.gmra.mxu2 %v8331_v62  ;;  %v9316_v6 = vunpack.c.l.b16 %v9255_v51  ;;  %v9317_v38 = vunpack.c.l.b16 %v9265_v33  ;;  %v9519_v62 = vld [vmem:[#allocation2 + $0x18] sm:$0xe] }
 0x629   : >> { %v8814_v13 = vadd.f32 %v8752_v2, %v8497_v41  ;;  %9476 = vmatmul.bf16.gmra.mxu0 %v9332_v11  ;;  %v7834_v5 = vsel %vm12341_vm10, %v7829_v15, %v7833_v36  ;;  %v7885_v2 = vunpack.c.l.b16 %v7824_v56  ;;  %v9587_v11 = vrot.slane %v9585_v40, 4  ;;  %v12185_v36 = vld [vmem:[#allocation2 + $0x20] sm:$0x1] }
 0x62a   : >> { %v9333_v35 = vpack.c.b16 %v9317_v38, %v9316_v6  ;;  %v9588_v44 = vrot.slane %v12185_v36, 5 }
 0x62b   : >> { %v15140_v46 = vadd.f32 %v9437_v59, %v8814_v13  ;;  %v8440_v57 = vpop.f32.mrf.mxu2 }
 0x62c   : >> { %v8008_v16 = vpop.f32.mrf.mxu1 }
 0x62d   : >> { %v8069_v53 = vadd.f32 %v8008_v16, %v14620_v29  ;;  %v7886_v29 = vunpack.c.l.b16 %v7834_v5  ;;  %v11799_v16 = vrot.slane %v9519_v62, 9 }
 0x62e   : >> { %v8754_v31 = vpop.f32.mrf.mxu3  ;;  %v9439_v37 = vpop.f32.mrf.mxu0 }
 0x62f   : >> { %v8498_v50 = vadd.f32 %v8437_v34, %v8069_v53  ;;  %v7902_v34 = vpack.c.b16 %v7886_v29, %v7885_v2  ;;  %v9589_v53 = vsel %vm12701_vm13, %v9587_v11, %v9588_v44  ;;  %v9586_v56 = vsel %vm12701_vm13, %v11799_v16, %v9585_v40  ;;  %v12186_v2 = vld [vmem:[#allocation2 + $0x28] sm:$0xf] }
 0x630   : >> { %v9592_v29 = vrot.slane %v12186_v2, 5 }
 0x631   : >> { %v8815_v32 = vadd.f32 %v8754_v31, %v8498_v50  ;;  %v9716_v50 = vunpack.c.l.b16 %v9589_v53 }
 0x633   : >> { %v15151_v52 = vadd.f32 %v9439_v37, %v8815_v32  ;;  %8796 = vmatmul.bf16.gmra.mxu3 %v12086_v63  ;;  %v8442_v20 = vpop.f32.mrf.mxu2  ;;  %v9715_v37 = vunpack.c.l.b16 %v9586_v56 }
 0x634   : >> { %v8011_v41 = vpop.f32.mrf.mxu1 }
 0x635   : >> { %v8070_v43 = vadd.f32 %v8011_v41, %v14632_v1  ;;  %v9747_v32 = vpack.c.b16 %v9716_v50, %v9715_v37 }
 0x636   : >> { %v8757_v59 = vpop.f32.mrf.mxu3  ;;  %v9442_v42 = vpop.f32.mrf.mxu0 }
 0x637   : >> { %v8499_v27 = vadd.f32 %v8440_v57, %v8070_v43  ;;  %8050 = vmatmul.bf16.gmra.mxu1 %v7902_v34  ;;  %v9520_v34 = vld [vmem:[#allocation2 + $0x24] sm:$0xe] }
 0x638   : >> { %v11800_v40 = vrot.slane %v9520_v34, 9 }
 0x639   : >> { %v8816_v13 = vadd.f32 %v8757_v59, %v8499_v27  ;;  %9481 = vmatmul.bf16.gmra.mxu0 %v9333_v35  ;;  %v9594_v59 = vrot.slane %v9592_v29, 4  ;;  %v12187_v27 = vld [vmem:[#allocation2 + $0x2c] sm:$0x1] }
 0x63a   : >> { %v9595_v35 = vrot.slane %v12187_v27, 5 }
 0x63b   : >> { %v15154_v60 = vadd.f32 %v9442_v42, %v8816_v13  ;;  %v8445_v28 = vpop.f32.mrf.mxu2 }
 0x63c   : >> { %v8013_v15 = vpop.f32.mrf.mxu1  ;;  %v9596_v13 = vsel %vm12701_vm13, %v9594_v59, %v9595_v35 }
 0x63d   : >> { %v8071_v1 = vadd.f32 %v8013_v15, %v14650_v19  ;;  %v9593_v15 = vsel %vm12701_vm13, %v11800_v40, %v9592_v29  ;;  %v9718_v36 = vunpack.c.l.b16 %v9596_v13 }
 0x63e   : >> { %v8759_v26 = vpop.f32.mrf.mxu3  ;;  %v9444_v57 = vpop.f32.mrf.mxu0 }
 0x63f   : >> { %v8500_v31 = vadd.f32 %v8442_v20, %v8071_v1 }
 0x641   : >> { %v8817_v5 = vadd.f32 %v8759_v26, %v8500_v31  ;;  %v9717_v26 = vunpack.c.l.b16 %v9593_v15 }
 0x643   : >> { %v15161_v63 = vadd.f32 %v9444_v57, %v8817_v5  ;;  %v8447_v38 = vpop.f32.mrf.mxu2  ;;  %v9748_v31 = vpack.c.b16 %v9718_v36, %v9717_v26  ;;  %v12188_v57 = vld [vmem:[#allocation2 + $0x34] sm:$0xf]  ;;  %v9522_v26 = vld [vmem:[#allocation2 + $0x3c] sm:$0xe] }
 0x644   : >> { %v8016_v51 = vpop.f32.mrf.mxu1  ;;  %v9599_v56 = vrot.slane %v12188_v57, 5  ;;  %v11802_v57 = vrot.slane %v9522_v26, 9 }
 0x645   : >> { %v8072_v33 = vadd.f32 %v8016_v51, %v14657_v12  ;;  %v9521_v51 = vld [vmem:[#allocation2 + $0x30] sm:$0xe] }
 0x646   : >> { %v8762_v19 = vpop.f32.mrf.mxu3  ;;  %v9447_v41 = vpop.f32.mrf.mxu0  ;;  %v11801_v29 = vrot.slane %v9521_v51, 9 }
 0x647   : >> { %v8501_v6 = vadd.f32 %v8445_v28, %v8072_v33  ;;  %9835 = vmatmul.bf16.vlgmr.msra.gmra.mxu1 %v9747_v32  ;;  %v9601_v33 = vrot.slane %v9599_v56, 4 }
 0x649   : >> { %v8818_v43 = vadd.f32 %v8762_v19, %v8501_v6  ;;  %v12189_v6 = vld [vmem:[#allocation2 + $0x38] sm:$0x1] }
 0x64b   : >> { %v15164_v20 = vadd.f32 %v9447_v41, %v8818_v43  ;;  %v8450_v44 = vpop.f32.mrf.mxu2 }
 0x64c   : >> { %v8018_v22 = vpop.f32.mrf.mxu1 }
 0x64d   : >> { %v8073_v42 = vadd.f32 %v8018_v22, %v14671_v8  ;;  %v9600_v22 = vsel %vm12701_vm13, %v11801_v29, %v9599_v56  ;;  %v12191_v56 = vld [vmem:[#allocation2 + $0x44] sm:$0x1] }
 0x64e   : >> { %v8764_v12 = vpop.f32.mrf.mxu3  ;;  %v9449_v11 = vpop.f32.mrf.mxu0 }
 0x64f   : >> { %v8502_v62 = vadd.f32 %v8447_v38, %v8073_v42  ;;  %v9602_v38 = vrot.slane %v12189_v6, 5  ;;  %v9719_v42 = vunpack.c.l.b16 %v9600_v22  ;;  %v12192_v6 = vld [vmem:[#allocation2 + $0x4c] sm:$0xf] }
 0x651   : >> { %v8819_v16 = vadd.f32 %v8764_v12, %v8502_v62  ;;  %v9603_v43 = vsel %vm12701_vm13, %v9601_v33, %v9602_v38  ;;  %v9613_v38 = vrot.slane %v12192_v6, 5  ;;  %v12197_v6 = vld [vmem:[#allocation2 + $0x68] sm:$0x1] }
 0x652   : >> { %v9720_v27 = vunpack.c.l.b16 %v9603_v43 }
 0x653   : >> { %v15171_v1 = vadd.f32 %v9449_v11, %v8819_v16  ;;  %v8452_v19 = vpop.f32.mrf.mxu2 }
 0x654   : >> { %v8021_v28 = vpop.f32.mrf.mxu1  ;;  %v9749_v62 = vpack.c.b16 %v9720_v27, %v9719_v42 }
 0x655   : >> { %v8074_v53 = vadd.f32 %v8021_v28, %v14691_v45 }
 0x656   : >> { %v8767_v8 = vpop.f32.mrf.mxu3  ;;  %v9452_v50 = vpop.f32.mrf.mxu0 }
 0x657   : >> { %v8503_v5 = vadd.f32 %v8450_v44, %v8074_v53  ;;  %9840 = vmatmul.bf16.gmra.mxu1 %v9748_v31 }
 0x659   : >> { %v8820_v37 = vadd.f32 %v8767_v8, %v8503_v5  ;;  %v9609_v5 = vrot.slane %v12191_v56, 5 }
 0x65b   : >> { %v15174_v32 = vadd.f32 %v9452_v50, %v8820_v37  ;;  %v8455_v11 = vpop.f32.mrf.mxu2 }
 0x65c   : >> { %v8023_v2 = vpop.f32.mrf.mxu1 }
 0x65d   : >> { %v8075_v41 = vadd.f32 %v8023_v2, %v14706_v10  ;;  %v12190_v10 = vld [vmem:[#allocation2 + $0x40] sm:$0xf] }
 0x65e   : >> { %v8769_v45 = vpop.f32.mrf.mxu3  ;;  %v9454_v59 = vpop.f32.mrf.mxu0  ;;  %v9606_v15 = vrot.slane %v12190_v10, 5 }
 0x65f   : >> { %v8504_v34 = vadd.f32 %v8452_v19, %v8075_v41  ;;  %v9523_v41 = vld [vmem:[#allocation2 + $0x48] sm:$0xe] }
 0x660   : >> { %v9608_v53 = vrot.slane %v9606_v15, 4  ;;  %v9607_v37 = vsel %vm12701_vm13, %v11802_v57, %v9606_v15  ;;  %v11803_v43 = vrot.slane %v9523_v41, 9  ;;  %v9524_v15 = vld [vmem:[#allocation2 + $0x54] sm:$0xe] }
 0x661   : >> { %v8821_v40 = vadd.f32 %v8769_v45, %v8504_v34  ;;  %v9721_v33 = vunpack.c.l.b16 %v9607_v37  ;;  %v9615_v45 = vrot.slane %v9613_v38, 4  ;;  %v12193_v34 = vld [vmem:[#allocation2 + $0x50] sm:$0x1]  ;;  %v12196_v37 = vld [vmem:[#allocation2 + $0x64] sm:$0xf] }
 0x663   : >> { %v15181_v35 = vadd.f32 %v9454_v59, %v8821_v40  ;;  %v9616_v59 = vrot.slane %v12193_v34, 5 }
 0x664   : >> { %v8026_v12 = vpop.f32.mrf.mxu1 }
 0x665   : >> { %v8076_v13 = vadd.f32 %v8026_v12, %v14728_v0  ;;  %v9610_v0 = vsel %vm12701_vm13, %v9608_v53, %v9609_v5  ;;  %v9617_v40 = vsel %vm12701_vm13, %v9615_v45, %v9616_v59  ;;  %v15835_v59 = vld [vmem:[#allocation8_spill] sm:$0xff] }
 0x666   : >> { %v8772_v36 = vpop.f32.mrf.mxu3  ;;  %v9457_v28 = vpop.f32.mrf.mxu0  ;;  %v9722_v51 = vunpack.c.l.b16 %v9610_v0  ;;  %v9724_v27 = vunpack.c.l.b16 %v9617_v40 }
 0x667   : >> { %v8505_v16 = vadd.f32 %v8455_v11, %v8076_v13  ;;  %9845 = vmatmul.bf16.gmra.mxu1 %v9749_v62  ;;  %v12194_v11 = vld [vmem:[#allocation2 + $0x58] sm:$0xf] }
 0x668   : >> { %v9750_v29 = vpack.c.b16 %v9722_v51, %v9721_v33  ;;  %v9620_v10 = vrot.slane %v12194_v11, 5  ;;  %v9627_v51 = vrot.slane %v12196_v37, 5  ;;  %v9525_v33 = vld [vmem:[#allocation2 + $0x60] sm:$0xe] }
 0x669   : >> { %v8822_v44 = vadd.f32 %v8772_v36, %v8505_v16  ;;  %v11804_v36 = vrot.slane %v9524_v15, 9 }
 0x66a   : >> { %v9622_v16 = vrot.slane %v9620_v10, 4 }
 0x66b   : >> { %v15184_v31 = vadd.f32 %v9457_v28, %v8822_v44  ;;  %v12195_v44 = vld [vmem:[#allocation2 + $0x5c] sm:$0x1] }
 0x66c   : >> { %v8028_v8 = vpop.f32.mrf.mxu1  ;;  %v9623_v26 = vrot.slane %v12195_v44, 5 }
 0x66d   : >> { %v15187_v50 = vadd.f32 %v8028_v8, %v14749_v39 }
 0x66e   : >> { %v9624_v53 = vsel %vm12701_vm13, %v9622_v16, %v9623_v26  ;;  %v15836_v16 = vld [vmem:[#allocation19_spill] sm:$0xff] }
 0x66f   : >> { %v9726_v8 = vunpack.c.l.b16 %v9624_v53 }
 0x674   : >> { %v8031_v19 = vpop.f32.mrf.mxu1 }
 0x675   : >> { %v15194_v2 = vadd.f32 %v8031_v19, %v14755_v24  ;;  %v9614_v24 = vsel %vm12701_vm13, %v11803_v43, %v9613_v38  ;;  %v9629_v19 = vrot.slane %v9627_v51, 4  ;;  %v9630_v38 = vrot.slane %v12197_v6, 5 }
 0x676   : >> { %v9723_v42 = vunpack.c.l.b16 %v9614_v24 }
 0x677   : >> { %9850 = vmatmul.bf16.gmra.mxu1 %v9750_v29  ;;  %v11805_v29 = vrot.slane %v9525_v33, 9  ;;  %v9631_v45 = vsel %vm12701_vm13, %v9629_v19, %v9630_v38 }
 0x678   : >> { %v9751_v62 = vpack.c.b16 %v9724_v27, %v9723_v42  ;;  %v12198_v27 = vld [vmem:[#allocation2 + $0x70] sm:$0xf] }
 0x679   : >> { %v9634_v42 = vrot.slane %v12198_v27, 5 }
 0x67c   : >> { %v8033_v39 = vpop.f32.mrf.mxu1 }
 0x67d   : >> { %v15197_v22 = vadd.f32 %v8033_v39, %v14773_v47  ;;  %v9728_v39 = vunpack.c.l.b16 %v9631_v45 }
 0x684   : >> { %v8036_v12 = vpop.f32.mrf.mxu1 }
 0x685   : >> { %v15204_v13 = vadd.f32 %v8036_v12, %v14800_v14  ;;  %v9621_v14 = vsel %vm12701_vm13, %v11804_v36, %v9620_v10  ;;  %v9526_v12 = vld [vmem:[#allocation2 + $0x6c] sm:$0xe]  ;;  %v12199_v10 = vld [vmem:[#allocation2 + $0x74] sm:$0x1] }
 0x686   : >> { %v9725_v57 = vunpack.c.l.b16 %v9621_v14  ;;  %v11806_v11 = vrot.slane %v9526_v12, 9  ;;  %v9637_v15 = vrot.slane %v12199_v10, 5  ;;  %v12203_v10 = vld [vmem:[#allocation2 + $0x8c] sm:$0x1] }
 0x687   : >> { %9855 = vmatmul.bf16.gmra.mxu1 %v9751_v62  ;;  %v9636_v62 = vrot.slane %v9634_v42, 4 }
 0x688   : >> { %v9752_v0 = vpack.c.b16 %v9726_v8, %v9725_v57  ;;  %v9635_v44 = vsel %vm12701_vm13, %v11806_v11, %v9634_v42  ;;  %v15837_v8 = vld [vmem:[#allocation5_spill] sm:$0xff]  ;;  %v12202_v42 = vld [vmem:[#allocation2 + $0x88] sm:$0xf] }
 0x689   : >> { %v9638_v36 = vsel %vm12701_vm13, %v9636_v62, %v9637_v15  ;;  %v9729_v53 = vunpack.c.l.b16 %v9635_v44  ;;  %v9648_v12 = vrot.slane %v12202_v42, 5  ;;  %v9528_v62 = vld [vmem:[#allocation2 + $0x84] sm:$0xe]  ;;  %v9651_v15 = vrot.slane %v12203_v10, 5 }
 0x68a   : >> { %v9730_v26 = vunpack.c.l.b16 %v9638_v36  ;;  %v11808_v11 = vrot.slane %v9528_v62, 9 }
 0x68c   : >> { %v8038_v47 = vpop.f32.mrf.mxu1  ;;  %v9649_v44 = vsel %vm12701_vm13, %v11808_v11, %v9648_v12 }
 0x68d   : >> { %v15207_v28 = vadd.f32 %v8038_v47, %v14822_v49 }
 0x694   : >> { %v8041_v56 = vpop.f32.mrf.mxu1 }
 0x695   : >> { %v15214_v5 = vadd.f32 %v8041_v56, %v14840_v3  ;;  %v9628_v3 = vsel %vm12701_vm13, %v11805_v29, %v9627_v51  ;;  %v9754_v56 = vpack.c.b16 %v9730_v26, %v9729_v53  ;;  %v9527_v51 = vld [vmem:[#allocation2 + $0x78] sm:$0xe]  ;;  %v12201_v29 = vld [vmem:[#allocation2 + $0x80] sm:$0x1]  ;;  %v9733_v53 = vunpack.c.l.b16 %v9649_v44 }
 0x696   : >> { %v9727_v43 = vunpack.c.l.b16 %v9628_v3  ;;  %v9644_v6 = vrot.slane %v12201_v29, 5 }
 0x697   : >> { %9860 = vmatmul.bf16.gmra.mxu1 %v9752_v0  ;;  %v12200_v0 = vld [vmem:[#allocation2 + $0x7c] sm:$0xf] }
 0x698   : >> { %v9753_v24 = vpack.c.b16 %v9728_v39, %v9727_v43  ;;  %v9641_v37 = vrot.slane %v12200_v0, 5  ;;  %v12204_v0 = vld [vmem:[#allocation2 + $0x94] sm:$0xf] }
 0x69a   : >> { %v9643_v33 = vrot.slane %v9641_v37, 4 }
 0x69c   : >> { %v8043_v49 = vpop.f32.mrf.mxu1  ;;  %v9645_v45 = vsel %vm12701_vm13, %v9643_v33, %v9644_v6  ;;  %v15839_v6 = vld [vmem:[#allocation20_spill] sm:$0xff] }
 0x69d   : >> { %v15217_v41 = vadd.f32 %v8043_v49, %v14854_v30  ;;  %v11807_v49 = vrot.slane %v9527_v51, 9  ;;  %v9732_v39 = vunpack.c.l.b16 %v9645_v45  ;;  %v9529_v51 = vld [vmem:[#allocation2 + $0x90] sm:$0xe] }
 0x69f   : >> { %v9642_v3 = vsel %vm12701_vm13, %v11807_v49, %v9641_v37  ;;  %v9655_v37 = vrot.slane %v12204_v0, 5  ;;  %v12205_v49 = vld [vmem:[#allocation2 + $0x98] sm:$0x1] }
 0x6a0   : >> { %v9731_v43 = vunpack.c.l.b16 %v9642_v3  ;;  %v9658_v29 = vrot.slane %v12205_v49, 5 }
 0x6a1   : >> { %v9657_v33 = vrot.slane %v9655_v37, 4 }
 0x6a2   : >> { %v9755_v27 = vpack.c.b16 %v9732_v39, %v9731_v43 }
 0x6a3   : >> { %v9659_v3 = vsel %vm12701_vm13, %v9657_v33, %v9658_v29  ;;  %v12208_v33 = vld [vmem:[#allocation2 + $0xac] sm:$0xf] }
 0x6a4   : >> { %v8046_v34 = vpop.f32.mrf.mxu1  ;;  %v9736_v39 = vunpack.c.l.b16 %v9659_v3 }
 0x6a5   : >> { %v15224_v40 = vadd.f32 %v8046_v34, %v15835_v59  ;;  %v15838_v59 = vld [vmem:[#allocation11_spill] sm:$0xff] }
 0x6a7   : >> { %9865 = vmatmul.bf16.gmra.mxu1 %v9753_v24 }
 0x6ac   : >> { %v8048_v30 = vpop.f32.mrf.mxu1 }
 0x6ad   : >> { %v15227_v47 = vadd.f32 %v8048_v30, %v15836_v16  ;;  %v9650_v30 = vrot.slane %v9648_v12, 4  ;;  %v12206_v12 = vld [vmem:[#allocation2 + $0xa0] sm:$0xf] }
 0x6ae   : >> { %v9662_v62 = vrot.slane %v12206_v12, 5 }
 0x6af   : >> { %v9652_v36 = vsel %vm12701_vm13, %v9650_v30, %v9651_v15  ;;  %v9530_v30 = vld [vmem:[#allocation2 + $0x9c] sm:$0xe]  ;;  %v12207_v15 = vld [vmem:[#allocation2 + $0xa4] sm:$0x1] }
 0x6b0   : >> { %v9734_v26 = vunpack.c.l.b16 %v9652_v36  ;;  %v11810_v10 = vrot.slane %v9530_v30, 9  ;;  %v9665_v36 = vrot.slane %v12207_v15, 5  ;;  %v15841_v30 = vld [vmem:[#allocation7_spill] sm:$0xff]  ;;  %v15843_v15 = vld [vmem:[#allocation13_spill] sm:$0xff] }
 0x6b4   : >> { %v8051_v14 = vpop.f32.mrf.mxu1 }
 0x6b5   : >> { %v15234_v57 = vadd.f32 %v8051_v14, %v15837_v8 }
 0x6b7   : >> { %9870 = vmatmul.bf16.gmra.mxu1 %v9754_v56  ;;  %v9756_v56 = vpack.c.b16 %v9734_v26, %v9733_v53  ;;  %v9663_v53 = vsel %vm12701_vm13, %v11810_v10, %v9662_v62 }
 0x6bc   : >> { %v8053_v19 = vpop.f32.mrf.mxu1 }
 0x6bd   : >> { %v15237_v38 = vadd.f32 %v8053_v19, %v14917_v48  ;;  %v11809_v19 = vrot.slane %v9529_v51, 9 }
 0x6c4   : >> { %v9836_v34 = vpop.f32.mrf.mxu1 }
 0x6c5   : >> { %v15244_v24 = vadd.f32 %v9836_v34, %v15838_v59  ;;  %v15840_v59 = vld [vmem:[#allocation12_spill] sm:$0xff] }
 0x6c7   : >> { %9875 = vmatmul.bf16.gmra.mxu1 %v9755_v27 }
 0x6cc   : >> { %v9838_v48 = vpop.f32.mrf.mxu1 }
 0x6cd   : >> { %v15247_v16 = vadd.f32 %v9838_v48, %v14957_v7  ;;  %v9664_v48 = vrot.slane %v9662_v62, 4 }
 0x6cf   : >> { %v9666_v26 = vsel %vm12701_vm13, %v9664_v48, %v9665_v36 }
 0x6d4   : >> { %v9841_v14 = vpop.f32.mrf.mxu1 }
 0x6d5   : >> { %v15254_v8 = vadd.f32 %v9841_v14, %v14972_v17  ;;  %v9656_v17 = vsel %vm12701_vm13, %v11809_v19, %v9655_v37  ;;  %v9738_v14 = vunpack.c.l.b16 %v9666_v26  ;;  %v9531_v19 = vld [vmem:[#allocation2 + $0xa8] sm:$0xe]  ;;  %v9534_v26 = vld [vmem:[#allocation2 + $0xcc] sm:$0xe] }
 0x6d6   : >> { %v9735_v43 = vunpack.c.l.b16 %v9656_v17  ;;  %v11811_v29 = vrot.slane %v9531_v19, 9 }
 0x6d7   : >> { %9880 = vmatmul.bf16.gmra.mxu1 %v9756_v56  ;;  %v9737_v56 = vunpack.c.l.b16 %v9663_v53  ;;  %v15845_v53 = vld [vmem:[#allocation9_spill] sm:$0xff] }
 0x6d8   : >> { %v9757_v42 = vpack.c.b16 %v9736_v39, %v9735_v43 }
 0x6d9   : >> { %v9758_v51 = vpack.c.b16 %v9738_v14, %v9737_v56 }
 0x6dc   : >> { %v9843_v7 = vpop.f32.mrf.mxu1 }
 0x6dd   : >> { %v15257_v45 = vadd.f32 %v9843_v7, %v15839_v6  ;;  %v9669_v7 = vrot.slane %v12208_v33, 5  ;;  %v9672_v6 = vrot.slane %v15036_v4, 5 }
 0x6df   : >> { %v9671_v49 = vrot.slane %v9669_v7, 4 }
 0x6e1   : >> { %v9673_v17 = vsel %vm12701_vm13, %v9671_v49, %v9672_v6 }
 0x6e2   : >> { %v9740_v39 = vunpack.c.l.b16 %v9673_v17  ;;  %v8457_v17 = vpop.f32.mrf.mxu2 }
 0x6e4   : >> { %v9846_v34 = vpop.f32.mrf.mxu1 }
 0x6e5   : >> { %v15264_v27 = vadd.f32 %v9846_v34, %v15840_v59 }
 0x6e7   : >> { %9885 = vmatmul.bf16.gmra.mxu1 %v9757_v42 }
 0x6ec   : >> { %v9848_v11 = vpop.f32.mrf.mxu1 }
 0x6ed   : >> { %v15267_v44 = vadd.f32 %v9848_v11, %v15025_v23 }
 0x6f4   : >> { %v9851_v0 = vpop.f32.mrf.mxu1 }
 0x6f5   : >> { %v15274_v37 = vadd.f32 %v9851_v0, %v15047_v55  ;;  %v9670_v55 = vsel %vm12701_vm13, %v11811_v29, %v9669_v7 }
 0x6f6   : >> { %v9739_v43 = vunpack.c.l.b16 %v9670_v55  ;;  %v8774_v55 = vpop.f32.mrf.mxu3 }
 0x6f7   : >> { %9890 = vmatmul.bf16.gmra.mxu1 %v9758_v51 }
 0x6f8   : >> { %v9759_v42 = vpack.c.b16 %v9740_v39, %v9739_v43 }
 0x6fc   : >> { %v9853_v23 = vpop.f32.mrf.mxu1 }
 0x6fd   : >> { %v15278_v3 = vadd.f32 %v9853_v23, %v15064_v18 }
 0x704   : >> { %v9856_v34 = vpop.f32.mrf.mxu1 }
 0x705   : >> { %v15285_v59 = vadd.f32 %v9856_v34, %v15076_v9  ;;  %v9690_v9 = vrot.slane %v15843_v15, 5  ;;  %v8460_v34 = vpop.f32.mrf.mxu2  ;;  %v9948_v15 = vadd.f32 %v15247_v16, %v15244_v24 }
 0x707   : >> { %9895 = vmatmul.bf16.gmra.mxu1 %v9759_v42  ;;  %v9692_v14 = vrot.slane %v9690_v9, 4  ;;  %v8777_v42 = vpop.f32.mrf.mxu3 }
 0x70c   : >> { %v9858_v12 = vpop.f32.mrf.mxu1 }
 0x70d   : >> { %v15288_v4 = vadd.f32 %v9858_v12, %v15096_v21  ;;  %v11814_v21 = vrot.slane %v9534_v26, 9  ;;  %v9949_v26 = vadd.f32 %v9948_v15, %v15254_v8 }
 0x70f   : >> { %v9691_v0 = vsel %vm12701_vm13, %v11814_v21, %v9690_v9 }
 0x710   : >> { %v9745_v33 = vunpack.c.l.b16 %v9691_v0 }
 0x714   : >> { %v9861_v18 = vpop.f32.mrf.mxu1 }
 0x715   : >> { %v15291_v62 = vadd.f32 %v9861_v18, %v15110_v61  ;;  %v9693_v61 = vrot.slane %v15136_v25, 5 }
 0x717   : >> { %9900 = vmatmul.bf16.gmra.mxu1 %v15841_v30 }
 0x71c   : >> { %v9863_v48 = vpop.f32.mrf.mxu1 }
 0x71d   : >> { %v15295_v11 = vadd.f32 %v9863_v48, %v15131_v54  ;;  %v9694_v54 = vsel %vm12701_vm13, %v9692_v14, %v9693_v61 }
 0x71f   : >> { %15842 = vst [vmem:[#allocation21_spill] sm:$0xff] %v15295_v11 }
 0x724   : >> { %v9866_v10 = vpop.f32.mrf.mxu1 }
 0x725   : >> { %v15299_v36 = vadd.f32 %v9866_v10, %v15140_v46  ;;  %v9746_v46 = vunpack.c.l.b16 %v9694_v54 }
 0x727   : >> { %15844 = vst [vmem:[#allocation10_spill] sm:$0xff] %v15299_v36  ;;  %9905 = vmatmul.bf16.gmra.mxu1 %v15845_v53  ;;  %v9762_v7 = vpack.c.b16 %v9746_v46, %v9745_v33  ;;  %v9950_v53 = vadd.f32 %v9949_v26, %v15257_v45 }
 0x72c   : >> { %v9868_v56 = vpop.f32.mrf.mxu1 }
 0x72d   : >> { %v15308_v51 = vadd.f32 %v9868_v56, %v15151_v52 }
 0x72f   : >> { %15846 = vst [vmem:[#allocation22_spill] sm:$0xff] %v15308_v51 }
 0x734   : >> { %v9871_v19 = vpop.f32.mrf.mxu1 }
 0x735   : >> { %v15311_v49 = vadd.f32 %v9871_v19, %v15154_v60  ;;  %v9459_v60 = vpop.f32.mrf.mxu0 }
 0x737   : >> { %9910 = vmatmul.bf16.gmra.mxu1 %v9762_v7 }
 0x73c   : >> { %v9873_v23 = vpop.f32.mrf.mxu1 }
 0x73d   : >> { %v15314_v25 = vadd.f32 %v9873_v23, %v15161_v63  ;;  %v9462_v18 = vpop.f32.mrf.mxu0 }
 0x744   : >> { %v9876_v29 = vpop.f32.mrf.mxu1 }
 0x745   : >> { %v15317_v6 = vadd.f32 %v9876_v29, %v15164_v20  ;;  %v8462_v20 = vpop.f32.mrf.mxu2  ;;  %v9464_v10 = vpop.f32.mrf.mxu0 }
 0x74c   : >> { %v9878_v58 = vpop.f32.mrf.mxu1 }
 0x74d   : >> { %v15320_v52 = vadd.f32 %v9878_v58, %v15171_v1  ;;  %v8779_v1 = vpop.f32.mrf.mxu3  ;;  %v9467_v61 = vpop.f32.mrf.mxu0 }
 0x754   : >> { %v9881_v39 = vpop.f32.mrf.mxu1 }
 0x755   : >> { %v15323_v43 = vadd.f32 %v9881_v39, %v15174_v32  ;;  %v8465_v32 = vpop.f32.mrf.mxu2  ;;  %v8782_v21 = vpop.f32.mrf.mxu3 }
 0x756   : >> { %v9469_v29 = vpop.f32.mrf.mxu0 }
 0x75c   : >> { %v9883_v12 = vpop.f32.mrf.mxu1 }
 0x75d   : >> { %v15326_v63 = vadd.f32 %v9883_v12, %v15181_v35  ;;  %v9951_v35 = vadd.f32 %v9950_v53, %v15264_v27  ;;  %v8467_v0 = vpop.f32.mrf.mxu2  ;;  %v8784_v46 = vpop.f32.mrf.mxu3  ;;  %v8506_v53 = vadd.f32 %v8457_v17, %v15187_v50 }
 0x75f   : >> { %v9952_v14 = vadd.f32 %v9951_v35, %v15267_v44 }
 0x764   : >> { %v9886_v30 = vpop.f32.mrf.mxu1 }
 0x765   : >> { %v15329_v48 = vadd.f32 %v9886_v30, %v15184_v31  ;;  %v9953_v31 = vadd.f32 %v9952_v14, %v15274_v37  ;;  %v8470_v39 = vpop.f32.mrf.mxu2  ;;  %v8787_v15 = vpop.f32.mrf.mxu3  ;;  %v8507_v14 = vadd.f32 %v8460_v34, %v15194_v2 }
 0x767   : >> { %v9954_v54 = vadd.f32 %v9953_v31, %v15278_v3 }
 0x769   : >> { %v9955_v33 = vadd.f32 %v9954_v54, %v15285_v59  ;;  %v9472_v54 = vpop.f32.mrf.mxu0 }
 0x76b   : >> { %v9956_v7 = vadd.f32 %v9955_v33, %v15288_v4  ;;  %v8823_v33 = vadd.f32 %v8774_v55, %v8506_v53 }
 0x76c   : >> { %v9888_v9 = vpop.f32.mrf.mxu1 }
 0x76d   : >> { %v9957_v23 = vadd.f32 %v9956_v7, %v15291_v62  ;;  %v8508_v7 = vadd.f32 %v8462_v20, %v15197_v22  ;;  %v9508_v50 = vadd.f32 %v9459_v60, %v8823_v33  ;;  %v8511_v22 = vadd.f32 %v8470_v39, %v15214_v5 }
 0x76f   : >> { %v9958_v58 = vadd.f32 %v9957_v23, %v15295_v11  ;;  %v8825_v17 = vadd.f32 %v8779_v1, %v8508_v7  ;;  %v15357_v53 = vadd.f32 %v9888_v9, %v9508_v50 }
 0x771   : >> { %v9959_v12 = vadd.f32 %v9958_v58, %v15299_v36  ;;  %v8509_v58 = vadd.f32 %v8465_v32, %v15204_v13  ;;  %v8472_v36 = vpop.f32.mrf.mxu2  ;;  %v9510_v13 = vadd.f32 %v9464_v10, %v8825_v17  ;;  %v9474_v1 = vpop.f32.mrf.mxu0 }
 0x773   : >> { %v9960_v30 = vadd.f32 %v9959_v12, %v15308_v51  ;;  %v8824_v12 = vadd.f32 %v8777_v42, %v8507_v14  ;;  %v8826_v34 = vadd.f32 %v8782_v21, %v8509_v58 }
 0x774   : >> { %v9891_v56 = vpop.f32.mrf.mxu1 }
 0x775   : >> { %v9961_v35 = vadd.f32 %v9960_v30, %v15311_v49  ;;  %v8510_v30 = vadd.f32 %v8467_v0, %v15207_v28  ;;  %v9509_v55 = vadd.f32 %v9462_v18, %v8824_v12  ;;  %v9511_v60 = vadd.f32 %v9467_v61, %v8826_v34 }
 0x776   : >> { %v8828_v28 = vadd.f32 %v8787_v15, %v8511_v22 }
 0x777   : >> { %v9962_v31 = vadd.f32 %v9961_v35, %v15314_v25  ;;  %v8789_v35 = vpop.f32.mrf.mxu3  ;;  %v8827_v42 = vadd.f32 %v8784_v46, %v8510_v30  ;;  %v15360_v14 = vadd.f32 %v9891_v56, %v9509_v55 }
 0x778   : >> { %v9513_v46 = vadd.f32 %v9472_v54, %v8828_v28 }
 0x779   : >> { %v9963_v23 = vadd.f32 %v9962_v31, %v15317_v6  ;;  %v8475_v5 = vpop.f32.mrf.mxu2  ;;  %v9512_v39 = vadd.f32 %v9469_v29, %v8827_v42  ;;  %v9477_v29 = vpop.f32.mrf.mxu0 }
 0x77b   : >> { %v9964_v51 = vadd.f32 %v9963_v23, %v15320_v52 }
 0x77c   : >> { %v9893_v19 = vpop.f32.mrf.mxu1 }
 0x77d   : >> { %v9965_v2 = vadd.f32 %v9964_v51, %v15323_v43  ;;  %v8512_v51 = vadd.f32 %v8472_v36, %v15217_v41  ;;  %v15364_v18 = vadd.f32 %v9893_v19, %v9510_v13  ;;  %v8513_v19 = vadd.f32 %v8475_v5, %v15224_v40 }
 0x77f   : >> { %v9966_v20 = vadd.f32 %v9965_v2, %v15326_v63  ;;  %v8829_v31 = vadd.f32 %v8789_v35, %v8512_v51  ;;  %v8792_v15 = vpop.f32.mrf.mxu3 }
 0x780   : >> { %v8830_v54 = vadd.f32 %v8792_v15, %v8513_v19 }
 0x781   : >> { %v9967_v32 = vadd.f32 %v9966_v20, %v15329_v48  ;;  %v9514_v33 = vadd.f32 %v9474_v1, %v8829_v31  ;;  %v8477_v12 = vpop.f32.mrf.mxu2  ;;  %v9479_v35 = vpop.f32.mrf.mxu0 }
 0x782   : >> { %v9515_v30 = vadd.f32 %v9477_v29, %v8830_v54  ;;  %v15847_v54 = vld [vmem:[#allocation16_spill] sm:$0xff] }
 0x783   : >> { %v9968_v21 = vadd.f32 %v9967_v32, %v15357_v53 }
 0x784   : >> { %v9896_v26 = vpop.f32.mrf.mxu1 }
 0x785   : >> { %v9969_v9 = vadd.f32 %v9968_v21, %v15360_v14  ;;  %v15367_v10 = vadd.f32 %v9896_v26, %v9511_v60 }
 0x787   : >> { %v9970_v56 = vadd.f32 %v9969_v9, %v15364_v18  ;;  %v8794_v17 = vpop.f32.mrf.mxu3 }
 0x789   : >> { %v9971_v41 = vadd.f32 %v9970_v56, %v15367_v10  ;;  %v8480_v20 = vpop.f32.mrf.mxu2  ;;  %v9482_v1 = vpop.f32.mrf.mxu0 }
 0x78a   : >> { %v8515_v42 = vadd.f32 %v8480_v20, %v15234_v57 }
 0x78c   : >> { %v9898_v11 = vpop.f32.mrf.mxu1 }
 0x78d   : >> { %v15370_v61 = vadd.f32 %v9898_v11, %v9512_v39  ;;  %v8514_v11 = vadd.f32 %v8477_v12, %v15227_v47 }
 0x78f   : >> { %v9972_v7 = vadd.f32 %v9971_v41, %v15370_v61  ;;  %v8831_v55 = vadd.f32 %v8794_v17, %v8514_v11  ;;  %v8797_v40 = vpop.f32.mrf.mxu3 }
 0x790   : >> { %v8832_v28 = vadd.f32 %v8797_v40, %v8515_v42 }
 0x791   : >> { %v9516_v13 = vadd.f32 %v9479_v35, %v8831_v55  ;;  %v8482_v21 = vpop.f32.mrf.mxu2  ;;  %v9484_v56 = vpop.f32.mrf.mxu0 }
 0x792   : >> { %v9517_v5 = vadd.f32 %v9482_v1, %v8832_v28 }
 0x794   : >> { %v9901_v0 = vpop.f32.mrf.mxu1 }
 0x795   : >> { %v9942_v36 = vadd.f32 %v9901_v0, %v9513_v46  ;;  %v8516_v0 = vadd.f32 %v8482_v21, %v15237_v38 }
 0x797   : >> { %v9973_v58 = vadd.f32 %v9972_v7, %v9942_v36  ;;  %v8799_v47 = vpop.f32.mrf.mxu3 }
 0x798   : >> { %v8833_v46 = vadd.f32 %v8799_v47, %v8516_v0 }
 0x79a   : >> { %v9518_v15 = vadd.f32 %v9484_v56, %v8833_v46 }
 0x79c   : >> { %v9903_v23 = vpop.f32.mrf.mxu1 }
 0x79d   : >> { %v9943_v26 = vadd.f32 %v9903_v23, %v9514_v33 }
 0x79f   : >> { %v9974_v50 = vadd.f32 %v9973_v58, %v9943_v26 }
 0x7a4   : >> { %v9906_v2 = vpop.f32.mrf.mxu1 }
 0x7a5   : >> { %v9944_v34 = vadd.f32 %v9906_v2, %v9515_v30 }
 0x7a7   : >> { %v9975_v22 = vadd.f32 %v9974_v50, %v9944_v34 }
 0x7ac   : >> { %v9908_v32 = vpop.f32.mrf.mxu1 }
 0x7ad   : >> { %v9945_v60 = vadd.f32 %v9908_v32, %v9516_v13 }
 0x7af   : >> { %v9976_v51 = vadd.f32 %v9975_v22, %v9945_v60 }
 0x7b4   : >> { %v9911_v39 = vpop.f32.mrf.mxu1 }
 0x7b5   : >> { %v9946_v9 = vadd.f32 %v9911_v39, %v9517_v5  ;;  %v15848_v39 = vld [vmem:[#allocation21_spill] sm:$0xff] }
 0x7b7   : >> { %v9977_v31 = vadd.f32 %v9976_v51, %v9946_v9 }
 0x7bc   : >> { %v9913_v41 = vpop.f32.mrf.mxu1 }
 0x7bd   : >> { %v9947_v33 = vadd.f32 %v9913_v41, %v9518_v15  ;;  %v15850_v41 = vld [vmem:[#allocation22_spill] sm:$0xff] }
 0x7bf   : >> { %v9978_v19 = vadd.f32 %v9977_v31, %v9947_v33  ;;  %v15849_v31 = vld [vmem:[#allocation10_spill] sm:$0xff] }
 0x7c1   : >> { %v9979_v57 = vrot.slane %v9978_v19, 4 }
 0x7c3   : >> { %v9980_v7 = vadd.f32 %v9979_v57, %v9978_v19 }
 0x7c5   : >> { %v9981_v29 = vrot.slane %v9980_v7, 2 }
 0x7c7   : >> { %v9982_v23 = vadd.f32 %v9981_v29, %v9980_v7 }
 0x7c9   : >> { %v9983_v58 = vrot.slane %v9982_v23, 1 }
 0x7cb   : >> { %v9984_v12 = vadd.f32 %v9983_v58, %v9982_v23 }
 0x7cd   : >> { %v15379_v50 = vmul.f32 %v9984_v12, %v15847_v54 }
 0x7cf   : >> { %v15382_v38 = vsub.f32 %v9942_v36, %v15379_v50  ;;  %v15385_v17 = vsub.f32 %v9943_v26, %v15379_v50  ;;  %v15388_v30 = vsub.f32 %v9944_v34, %v15379_v50  ;;  %v15391_v11 = vsub.f32 %v9945_v60, %v15379_v50 }
 0x7d0   : >> { %v15394_v2 = vsub.f32 %v9946_v9, %v15379_v50  ;;  %v15397_v35 = vsub.f32 %v9947_v33, %v15379_v50  ;;  %v15401_v55 = vsub.f32 %v15244_v24, %v15379_v50  ;;  %v15405_v36 = vsub.f32 %v15247_v16, %v15379_v50 }
 0x7d1   : >> { %v15409_v26 = vsub.f32 %v15254_v8, %v15379_v50  ;;  %v15417_v20 = vsub.f32 %v15257_v45, %v15379_v50  ;;  %v15421_v24 = vsub.f32 %v15264_v27, %v15379_v50  ;;  %v15427_v8 = vsub.f32 %v15267_v44, %v15379_v50 }
 0x7d2   : >> { %v10018_v34 = vmul.f32 %v15401_v55, %v15401_v55  ;;  %v10019_v22 = vmul.f32 %v15405_v36, %v15405_v36  ;;  %v15433_v45 = vsub.f32 %v15274_v37, %v15379_v50  ;;  %v15439_v60 = vsub.f32 %v15278_v3, %v15379_v50 }
 0x7d3   : >> { %v10020_v16 = vmul.f32 %v15409_v26, %v15409_v26  ;;  %v10021_v13 = vmul.f32 %v15417_v20, %v15417_v20  ;;  %v10022_v27 = vmul.f32 %v15421_v24, %v15421_v24  ;;  %v10023_v44 = vmul.f32 %v15427_v8, %v15427_v8 }
 0x7d4   : >> { %v10050_v40 = vadd.f32 %v10019_v22, %v10018_v34  ;;  %v15445_v28 = vsub.f32 %v15285_v59, %v15379_v50  ;;  %v10024_v37 = vmul.f32 %v15433_v45, %v15433_v45  ;;  %v15451_v21 = vsub.f32 %v15288_v4, %v15379_v50 }
 0x7d5   : >> { %v10025_v3 = vmul.f32 %v15439_v60, %v15439_v60  ;;  %v15457_v0 = vsub.f32 %v15291_v62, %v15379_v50  ;;  %v15463_v9 = vsub.f32 %v15848_v39, %v15379_v50  ;;  %v15469_v56 = vsub.f32 %v15849_v31, %v15379_v50 }
 0x7d6   : >> { %v10051_v42 = vadd.f32 %v10050_v40, %v10020_v16  ;;  %v10026_v59 = vmul.f32 %v15445_v28, %v15445_v28  ;;  %v10027_v4 = vmul.f32 %v15451_v21, %v15451_v21  ;;  %v15475_v33 = vsub.f32 %v15850_v41, %v15379_v50 }
 0x7d7   : >> { %v10028_v62 = vmul.f32 %v15457_v0, %v15457_v0  ;;  %v10029_v19 = vmul.f32 %v15463_v9, %v15463_v9  ;;  %v15481_v7 = vsub.f32 %v15311_v49, %v15379_v50  ;;  %v10030_v29 = vmul.f32 %v15469_v56, %v15469_v56 }
 0x7d8   : >> { %v10052_v32 = vadd.f32 %v10051_v42, %v10021_v13  ;;  %v15487_v58 = vsub.f32 %v15314_v25, %v15379_v50  ;;  %v10031_v12 = vmul.f32 %v15475_v33, %v15475_v33  ;;  %v15493_v22 = vsub.f32 %v15317_v6, %v15379_v50 }
 0x7d9   : >> { %v10032_v49 = vmul.f32 %v15481_v7, %v15481_v7  ;;  %v15499_v40 = vsub.f32 %v15320_v52, %v15379_v50  ;;  %v15505_v42 = vsub.f32 %v15323_v43, %v15379_v50  ;;  %v15547_v31 = vsub.f32 %v15370_v61, %v15379_v50 }
 0x7da   : >> { %v10053_v1 = vadd.f32 %v10052_v32, %v10022_v27  ;;  %v10033_v25 = vmul.f32 %v15487_v58, %v15487_v58  ;;  %v10034_v6 = vmul.f32 %v15493_v22, %v15493_v22  ;;  %v15511_v32 = vsub.f32 %v15326_v63, %v15379_v50 }
 0x7db   : >> { %v10035_v52 = vmul.f32 %v15499_v40, %v15499_v40  ;;  %v10036_v43 = vmul.f32 %v15505_v42, %v15505_v42  ;;  %v10045_v61 = vmul.f32 %v15385_v17, %v15385_v17 }
 0x7dc   : >> { %v10054_v51 = vadd.f32 %v10053_v1, %v10023_v44  ;;  %v15517_v1 = vsub.f32 %v15329_v48, %v15379_v50  ;;  %v10037_v63 = vmul.f32 %v15511_v32, %v15511_v32 }
 0x7de   : >> { %v10055_v5 = vadd.f32 %v10054_v51, %v10024_v37  ;;  %v15523_v51 = vsub.f32 %v15357_v53, %v15379_v50  ;;  %v10038_v48 = vmul.f32 %v15517_v1, %v15517_v1 }
 0x7e0   : >> { %v10056_v47 = vadd.f32 %v10055_v5, %v10025_v3  ;;  %v15529_v5 = vsub.f32 %v15360_v14, %v15379_v50  ;;  %v10039_v53 = vmul.f32 %v15523_v51, %v15523_v51 }
 0x7e2   : >> { %v10057_v46 = vadd.f32 %v10056_v47, %v10026_v59  ;;  %v15535_v47 = vsub.f32 %v15364_v18, %v15379_v50  ;;  %v10040_v14 = vmul.f32 %v15529_v5, %v15529_v5 }
 0x7e4   : >> { %v10058_v15 = vadd.f32 %v10057_v46, %v10027_v4  ;;  %v15541_v4 = vsub.f32 %v15367_v10, %v15379_v50  ;;  %v10041_v18 = vmul.f32 %v15535_v47, %v15535_v47  ;;  %v10043_v10 = vmul.f32 %v15547_v31, %v15547_v31 }
 0x7e6   : >> { %v10059_v57 = vadd.f32 %v10058_v15, %v10028_v62  ;;  %v10042_v15 = vmul.f32 %v15541_v4, %v15541_v4 }
 0x7e8   : >> { %v10060_v23 = vadd.f32 %v10059_v57, %v10029_v19  ;;  %v10044_v57 = vmul.f32 %v15382_v38, %v15382_v38 }
 0x7ea   : >> { %v10061_v34 = vadd.f32 %v10060_v23, %v10030_v29  ;;  %v10046_v23 = vmul.f32 %v15388_v30, %v15388_v30 }
 0x7ec   : >> { %v10062_v16 = vadd.f32 %v10061_v34, %v10031_v12  ;;  %v10047_v34 = vmul.f32 %v15391_v11, %v15391_v11 }
 0x7ee   : >> { %v10063_v13 = vadd.f32 %v10062_v16, %v10032_v49  ;;  %v10048_v16 = vmul.f32 %v15394_v2, %v15394_v2 }
 0x7f0   : >> { %v10064_v27 = vadd.f32 %v10063_v13, %v10033_v25  ;;  %v10049_v13 = vmul.f32 %v15397_v35, %v15397_v35 }
 0x7f2   : >> { %v10065_v44 = vadd.f32 %v10064_v27, %v10034_v6 }
 0x7f4   : >> { %v10066_v37 = vadd.f32 %v10065_v44, %v10035_v52 }
 0x7f6   : >> { %v10067_v3 = vadd.f32 %v10066_v37, %v10036_v43 }
 0x7f8   : >> { %v10068_v59 = vadd.f32 %v10067_v3, %v10037_v63 }
 0x7fa   : >> { %v10069_v39 = vadd.f32 %v10068_v59, %v10038_v48 }
 0x7fc   : >> { %v10070_v46 = vadd.f32 %v10069_v39, %v10039_v53 }
 0x7fe   : >> { %v10071_v62 = vadd.f32 %v10070_v46, %v10040_v14 }
 0x800   : >> { %v10072_v41 = vadd.f32 %v10071_v62, %v10041_v18 }
 0x802   : >> { %v10073_v19 = vadd.f32 %v10072_v41, %v10042_v15 }
 0x804   : >> { %v10074_v29 = vadd.f32 %v10073_v19, %v10043_v10  ;;  %v258_v19 = vld [vmem:[#allocation3 + $0xb0] sm:$0xff] }
 0x806   : >> { %v10075_v50 = vadd.f32 %v10074_v29, %v10044_v57  ;;  %v259_v57 = vld [vmem:[#allocation3] sm:$0xff]  ;;  %v260_v29 = vld [vmem:[#allocation3 + $0xd8] sm:$0xff] }
 0x808   : >> { %v10076_v12 = vadd.f32 %v10075_v50, %v10045_v61  ;;  %v261_v50 = vld [vmem:[#allocation3 + $0x18] sm:$0xff] }
 0x80a   : >> { %v10077_v49 = vadd.f32 %v10076_v12, %v10046_v23  ;;  %v262_v12 = vld [vmem:[#allocation3 + $0x50] sm:$0xff] }
 0x80c   : >> { %v10078_v25 = vadd.f32 %v10077_v49, %v10047_v34  ;;  %v263_v34 = vld [vmem:[#allocation3 + $0x68] sm:$0xff] }
 0x80e   : >> { %v10079_v6 = vadd.f32 %v10078_v25, %v10048_v16  ;;  %v264_v25 = vld [vmem:[#allocation3 + $0x30] sm:$0xff] }
 0x810   : >> { %v10080_v27 = vadd.f32 %v10079_v6, %v10049_v13  ;;  %v265_v6 = vld [vmem:[#allocation3 + $0x48] sm:$0xff] }
 0x812   : >> { %v10081_v52 = vrot.slane %v10080_v27, 4 }
 0x814   : >> { %v10082_v44 = vadd.f32 %v10081_v52, %v10080_v27  ;;  %v266_v52 = vld [vmem:[#allocation3 + $0x80] sm:$0xff] }
 0x816   : >> { %v10083_v43 = vrot.slane %v10082_v44, 2 }
 0x818   : >> { %v10084_v37 = vadd.f32 %v10083_v43, %v10082_v44 }
 0x81a   : >> { %v10085_v63 = vrot.slane %v10084_v37, 1 }
 0x81c   : >> { %v10086_v3 = vadd.f32 %v10085_v63, %v10084_v37 }
 0x81e   : >> { %v10087_v48 = vmul.f32 %v10086_v3, %v15847_v54 }
 0x820   : >> { %v10088_v59 = vadd.f32 1e-05, %v10087_v48 }
 0x822   : >> { %12149 = vrsqrt.f32 %v10088_v59  ;;  %vm10095_vm3 = vweird.f32 %v10088_v59 }
 0x828   : >> { %v12150_v53 = vpop.eup %12149 }
 0x829   : >> { %v10090_v39 = vmul.f32 %v12150_v53, %v10088_v59  ;;  %vm10096_vm2 = vweird.f32 %v12150_v53 }
 0x82a   : >> { %vm10097_vm4 = vmor %vm10095_vm3, %vm10096_vm2 }
 0x82b   : >> { %v10091_v14 = vmul.f32 %v12150_v53, %v10090_v39 }
 0x82d   : >> { %v10092_v46 = vmul.f32 0.5, %v10091_v14 }
 0x82f   : >> { %v10093_v18 = vsub.f32 1.5, %v10092_v46 }
 0x831   : >> { %v10094_v62 = vmul.f32 %v12150_v53, %v10093_v18 }
 0x833   : >> { %v15568_v15 = vsel %vm10097_vm4, %v12150_v53, %v10094_v62 }
 0x834   : >> { %v10099_v41 = vmul.f32 %v15568_v15, %v15401_v55  ;;  %v10100_v10 = vmul.f32 %v15568_v15, %v15405_v36  ;;  %v10101_v54 = vmul.f32 %v15568_v15, %v15409_v26  ;;  %v10102_v61 = vmul.f32 %v15568_v15, %v15417_v20 }
 0x835   : >> { %v10103_v23 = vmul.f32 %v15568_v15, %v15421_v24  ;;  %v10104_v55 = vmul.f32 %v15568_v15, %v15427_v8  ;;  %v10105_v36 = vmul.f32 %v15568_v15, %v15433_v45  ;;  %v10106_v13 = vmul.f32 %v15568_v15, %v15439_v60  ;;  %v267_v45 = vld [vmem:[#allocation3 + $0x88] sm:$0xff] }
 0x836   : >> { %v10227_v49 = vadd.f32 %v10099_v41, %v258_v19  ;;  %v10228_v26 = vadd.f32 %v10100_v10, %v259_v57  ;;  %v10229_v16 = vadd.f32 %v10101_v54, %v260_v29  ;;  %v10230_v20 = vadd.f32 %v10102_v61, %v261_v50  ;;  %v268_v60 = vld [vmem:[#allocation3 + $0xe8] sm:$0xff] }
 0x837   : >> { %v10107_v24 = vmul.f32 %v15568_v15, %v15445_v28  ;;  %v10231_v27 = vadd.f32 %v10103_v23, %v262_v12  ;;  %v10108_v8 = vmul.f32 %v15568_v15, %v15451_v21  ;;  %v10232_v44 = vadd.f32 %v10104_v55, %v263_v34  ;;  %v269_v28 = vld [vmem:[#allocation3 + $0xb8] sm:$0xff]  ;;  %v270_v21 = vld [vmem:[#allocation3 + $0x60] sm:$0xff] }
 0x838   : >> { %10259 = vst [vmem:[#allocation3 + $0xb0] sm:$0xff] %v10227_v49  ;;  %v10109_v43 = vmul.f32 %v15568_v15, %v15457_v0  ;;  %v10233_v37 = vadd.f32 %v10105_v36, %v264_v25  ;;  %v10110_v63 = vmul.f32 %v15568_v15, %v15463_v9  ;;  %v10234_v3 = vadd.f32 %v10106_v13, %v265_v6  ;;  %v271_v0 = vld [vmem:[#allocation3 + $0xf0] sm:$0xff]  ;;  %v272_v9 = vld [vmem:[#allocation3 + $0x8] sm:$0xff] }
 0x839   : >> { %10260 = vst [vmem:[#allocation3] sm:$0xff] %v10228_v26  ;;  %v10111_v48 = vmul.f32 %v15568_v15, %v15469_v56  ;;  %v10235_v59 = vadd.f32 %v10107_v24, %v266_v52  ;;  %v10112_v53 = vmul.f32 %v15568_v15, %v15475_v33  ;;  %v10236_v39 = vadd.f32 %v10108_v8, %v267_v45  ;;  %v273_v56 = vld [vmem:[#allocation3 + $0x78] sm:$0xff] }
 0x83a   : >> { %10261 = vst [vmem:[#allocation3 + $0xd8] sm:$0xff] %v10229_v16  ;;  %v10113_v14 = vmul.f32 %v15568_v15, %v15481_v7  ;;  %v10237_v46 = vadd.f32 %v10109_v43, %v268_v60  ;;  %v10114_v18 = vmul.f32 %v15568_v15, %v15487_v58  ;;  %v10238_v62 = vadd.f32 %v10110_v63, %v269_v28  ;;  %v274_v33 = vld [vmem:[#allocation3 + $0x38] sm:$0xff]  ;;  %v276_v58 = vld [vmem:[#allocation3 + $0x40] sm:$0xff] }
 0x83b   : >> { %10262 = vst [vmem:[#allocation3 + $0x18] sm:$0xff] %v10230_v20  ;;  %v10115_v41 = vmul.f32 %v15568_v15, %v15493_v22  ;;  %v10239_v10 = vadd.f32 %v10111_v48, %v270_v21  ;;  %v10116_v54 = vmul.f32 %v15568_v15, %v15499_v40  ;;  %v10240_v19 = vadd.f32 %v10112_v53, %v271_v0  ;;  %v275_v7 = vld [vmem:[#allocation3 + $0x58] sm:$0xff]  ;;  %v277_v22 = vld [vmem:[#allocation3 + $0xc8] sm:$0xff]  ;;  %v278_v40 = vld [vmem:[#allocation3 + $0xe0] sm:$0xff] }
 0x83c   : >> { %10263 = vst [vmem:[#allocation3 + $0x50] sm:$0xff] %v10231_v27  ;;  %v10117_v57 = vmul.f32 %v15568_v15, %v15505_v42  ;;  %v10241_v29 = vadd.f32 %v10113_v14, %v272_v9  ;;  %v10118_v61 = vmul.f32 %v15568_v15, %v15511_v32  ;;  %v10242_v50 = vadd.f32 %v10114_v18, %v273_v56  ;;  %v279_v42 = vld [vmem:[#allocation3 + $0x90] sm:$0xff] }
 0x83d   : >> { %10264 = vst [vmem:[#allocation3 + $0x68] sm:$0xff] %v10232_v44  ;;  %v10119_v23 = vmul.f32 %v15568_v15, %v15517_v1  ;;  %v10243_v12 = vadd.f32 %v10115_v41, %v274_v33  ;;  %v10120_v55 = vmul.f32 %v15568_v15, %v15523_v51  ;;  %v10244_v34 = vadd.f32 %v10116_v54, %v275_v7  ;;  %v280_v32 = vld [vmem:[#allocation3 + $0x70] sm:$0xff]  ;;  %v281_v1 = vld [vmem:[#allocation3 + $0xc0] sm:$0xff]  ;;  %v282_v51 = vld [vmem:[#allocation3 + $0xa8] sm:$0xff] }
 0x83e   : >> { %10265 = vst [vmem:[#allocation3 + $0x30] sm:$0xff] %v10233_v37  ;;  %v10121_v36 = vmul.f32 %v15568_v15, %v15529_v5  ;;  %v10245_v49 = vadd.f32 %v10117_v57, %v276_v58  ;;  %v10122_v26 = vmul.f32 %v15568_v15, %v15535_v47  ;;  %v10246_v16 = vadd.f32 %v10118_v61, %v277_v22  ;;  %v283_v5 = vld [vmem:[#allocation3 + $0xd0] sm:$0xff] }
 0x83f   : >> { %10266 = vst [vmem:[#allocation3 + $0x48] sm:$0xff] %v10234_v3  ;;  %v10123_v25 = vmul.f32 %v15568_v15, %v15541_v4  ;;  %v10247_v13 = vadd.f32 %v10119_v23, %v278_v40  ;;  %v10124_v20 = vmul.f32 %v15568_v15, %v15547_v31  ;;  %v10248_v6 = vadd.f32 %v10120_v55, %v279_v42  ;;  %v284_v47 = vld [vmem:[#allocation3 + $0x10] sm:$0xff]  ;;  %v285_v4 = vld [vmem:[#allocation3 + $0x28] sm:$0xff]  ;;  %v286_v31 = vld [vmem:[#allocation3 + $0xa0] sm:$0xff] }
 0x840   : >> { %10267 = vst [vmem:[#allocation3 + $0x80] sm:$0xff] %v10235_v59  ;;  %v10125_v24 = vmul.f32 %v15568_v15, %v15382_v38  ;;  %v10249_v27 = vadd.f32 %v10121_v36, %v280_v32  ;;  %v10126_v52 = vmul.f32 %v15568_v15, %v15385_v17  ;;  %v10250_v8 = vadd.f32 %v10122_v26, %v281_v1  ;;  %v287_v38 = vld [vmem:[#allocation3 + $0xf8] sm:$0xff]  ;;  %v288_v17 = vld [vmem:[#allocation3 + $0x20] sm:$0xff] }
 0x841   : >> { %10268 = vst [vmem:[#allocation3 + $0x88] sm:$0xff] %v10236_v39  ;;  %v10127_v44 = vmul.f32 %v15568_v15, %v15388_v30  ;;  %v10251_v45 = vadd.f32 %v10123_v25, %v282_v51  ;;  %v10128_v43 = vmul.f32 %v15568_v15, %v15391_v11  ;;  %v10252_v37 = vadd.f32 %v10124_v20, %v283_v5  ;;  %v289_v30 = vld [vmem:[#allocation3 + $0x98] sm:$0xff] }
 0x842   : >> { %10269 = vst [vmem:[#allocation3 + $0xe8] sm:$0xff] %v10237_v46  ;;  %v10129_v60 = vmul.f32 %v15568_v15, %v15394_v2  ;;  %v10253_v63 = vadd.f32 %v10125_v24, %v284_v47  ;;  %v10130_v3 = vmul.f32 %v15568_v15, %v15397_v35  ;;  %v10254_v28 = vadd.f32 %v10126_v52, %v285_v4  ;;  %v10291_v2 = vld [vmem:[#allocation3 + $0xb0] sm:$0xff] (%p254_p4)  ;;  %v10292_v35 = vld [vmem:[#allocation3] sm:$0xff] (%p254_p4)  ;;  %v10293_v15 = vld [vmem:[#allocation3 + $0xd8] sm:$0xff] (%p254_p4) }
 0x843   : >> { %10270 = vst [vmem:[#allocation3 + $0xb8] sm:$0xff] %v10238_v62  ;;  %v10255_v48 = vadd.f32 %v10127_v44, %v286_v31  ;;  %v10256_v59 = vadd.f32 %v10128_v43, %v287_v38  ;;  %v10294_v53 = vld [vmem:[#allocation3 + $0x18] sm:$0xff] (%p254_p4)  ;;  %v10295_v39 = vld [vmem:[#allocation3 + $0x50] sm:$0xff] (%p254_p4) }
 0x844   : >> { %10271 = vst [vmem:[#allocation3 + $0x60] sm:$0xff] %v10239_v10  ;;  %v10257_v11 = vadd.f32 %v10129_v60, %v288_v17  ;;  %v10258_v21 = vadd.f32 %v10130_v3, %v289_v30  ;;  %v10296_v0 = vld [vmem:[#allocation3 + $0x68] sm:$0xff] (%p254_p4) }
 0x845   : >> { %10272 = vst [vmem:[#allocation3 + $0xf0] sm:$0xff] %v10240_v19  ;;  %v10297_v14 = vld [vmem:[#allocation3 + $0x30] sm:$0xff] (%p254_p4) }
 0x846   : >> { %10273 = vst [vmem:[#allocation3 + $0x8] sm:$0xff] %v10241_v29  ;;  %v10298_v46 = vld [vmem:[#allocation3 + $0x48] sm:$0xff] (%p254_p4) }
 0x847   : >> { %10274 = vst [vmem:[#allocation3 + $0x78] sm:$0xff] %v10242_v50  ;;  %v10299_v9 = vld [vmem:[#allocation3 + $0x80] sm:$0xff] (%p254_p4) }
 0x848   : >> { %10275 = vst [vmem:[#allocation3 + $0x38] sm:$0xff] %v10243_v12  ;;  %v10300_v18 = vld [vmem:[#allocation3 + $0x88] sm:$0xff] (%p254_p4) }
 0x849   : >> { %10276 = vst [vmem:[#allocation3 + $0x58] sm:$0xff] %v10244_v34  ;;  %v10301_v62 = vld [vmem:[#allocation3 + $0xe8] sm:$0xff] (%p254_p4) }
 0x84a   : >> { %10277 = vst [vmem:[#allocation3 + $0x40] sm:$0xff] %v10245_v49  ;;  %v10302_v56 = vld [vmem:[#allocation3 + $0xb8] sm:$0xff] (%p254_p4) }
 0x84b   : >> { %10278 = vst [vmem:[#allocation3 + $0xc8] sm:$0xff] %v10246_v16  ;;  %v10303_v41 = vld [vmem:[#allocation3 + $0x60] sm:$0xff] (%p254_p4) }
 0x84c   : >> { %10279 = vst [vmem:[#allocation3 + $0xe0] sm:$0xff] %v10247_v13  ;;  %v10304_v10 = vld [vmem:[#allocation3 + $0xf0] sm:$0xff] (%p254_p4) }
 0x84d   : >> { %10280 = vst [vmem:[#allocation3 + $0x90] sm:$0xff] %v10248_v6  ;;  %v10305_v33 = vld [vmem:[#allocation3 + $0x8] sm:$0xff] (%p254_p4) }
 0x84e   : >> { %10281 = vst [vmem:[#allocation3 + $0x70] sm:$0xff] %v10249_v27  ;;  %v10306_v54 = vld [vmem:[#allocation3 + $0x78] sm:$0xff] (%p254_p4) }
 0x84f   : >> { %10282 = vst [vmem:[#allocation3 + $0xc0] sm:$0xff] %v10250_v8  ;;  %v10307_v19 = vld [vmem:[#allocation3 + $0x38] sm:$0xff] (%p254_p4) }
 0x850   : >> { %10283 = vst [vmem:[#allocation3 + $0xa8] sm:$0xff] %v10251_v45  ;;  %v10308_v7 = vld [vmem:[#allocation3 + $0x58] sm:$0xff] (%p254_p4) }
 0x851   : >> { %10284 = vst [vmem:[#allocation3 + $0xd0] sm:$0xff] %v10252_v37  ;;  %v10309_v57 = vld [vmem:[#allocation3 + $0x40] sm:$0xff] (%p254_p4) }
 0x852   : >> { %10285 = vst [vmem:[#allocation3 + $0x10] sm:$0xff] %v10253_v63  ;;  %v10310_v29 = vld [vmem:[#allocation3 + $0xc8] sm:$0xff] (%p254_p4) }
 0x853   : >> { %10286 = vst [vmem:[#allocation3 + $0x28] sm:$0xff] %v10254_v28  ;;  %256 = sbr.rel (!%p254_p4) target bundleno = 86 (0x56), region = 86  ;;  %v10311_v58 = vld [vmem:[#allocation3 + $0xe0] sm:$0xff] (%p254_p4) }
 0x854   : >> { %10287 = vst [vmem:[#allocation3 + $0xa0] sm:$0xff] %v10255_v48  ;;  %v10312_v61 = vld [vmem:[#allocation3 + $0x90] sm:$0xff] (%p254_p4) }
 0x855   : >> { %10288 = vst [vmem:[#allocation3 + $0xf8] sm:$0xff] %v10256_v59  ;;  %v10313_v50 = vld [vmem:[#allocation3 + $0x70] sm:$0xff] (%p254_p4) }
 0x856   : >> { %10289 = vst [vmem:[#allocation3 + $0x20] sm:$0xff] %v10257_v11  ;;  %v10314_v22 = vld [vmem:[#allocation3 + $0xc0] sm:$0xff] (%p254_p4) }
 0x857   : >> { %10290 = vst [vmem:[#allocation3 + $0x98] sm:$0xff] %v10258_v21  ;;  %v10315_v23 = vld [vmem:[#allocation3 + $0xa8] sm:$0xff] (%p254_p4) }
 0x858   : > { %10323 = vst [vmem:[%s12258_s14] sm:$0xff] %v10291_v2  ;;  %v10316_v12 = vld [vmem:[#allocation3 + $0xd0] sm:$0xff] }
 0x859   : > { %10324 = vst [vmem:[%s12258_s14 + $0x8] sm:$0xff] %v10292_v35  ;;  %v10317_v40 = vld [vmem:[#allocation3 + $0x10] sm:$0xff] }
 0x85a   : > { %10325 = vst [vmem:[%s12258_s14 + $0x10] sm:$0xff] %v10293_v15  ;;  %v10318_v55 = vld [vmem:[#allocation3 + $0x28] sm:$0xff] }
 0x85b   : > { %10326 = vst [vmem:[%s12258_s14 + $0x18] sm:$0xff] %v10294_v53  ;;  %v10319_v34 = vld [vmem:[#allocation3 + $0xa0] sm:$0xff] }
 0x85c   : > { %10327 = vst [vmem:[%s12258_s14 + $0x20] sm:$0xff] %v10295_v39  ;;  %v10320_v42 = vld [vmem:[#allocation3 + $0xf8] sm:$0xff] }
 0x85d   : > { %10328 = vst [vmem:[%s12258_s14 + $0x28] sm:$0xff] %v10296_v0  ;;  %v10321_v36 = vld [vmem:[#allocation3 + $0x20] sm:$0xff] }
 0x85e   : > { %10329 = vst [vmem:[%s12258_s14 + $0x30] sm:$0xff] %v10297_v14  ;;  %v10322_v49 = vld [vmem:[#allocation3 + $0x98] sm:$0xff] }
 0x85f   : > { %10330 = vst [vmem:[%s12258_s14 + $0x38] sm:$0xff] %v10298_v46 }
 0x860   : > { %10331 = vst [vmem:[%s12258_s14 + $0x40] sm:$0xff] %v10299_v9 }
 0x861   : > { %10332 = vst [vmem:[%s12258_s14 + $0x48] sm:$0xff] %v10300_v18 }
 0x862   : > { %10333 = vst [vmem:[%s12258_s14 + $0x50] sm:$0xff] %v10301_v62 }
 0x863   : > { %10334 = vst [vmem:[%s12258_s14 + $0x58] sm:$0xff] %v10302_v56 }
 0x864   : > { %10335 = vst [vmem:[%s12258_s14 + $0x60] sm:$0xff] %v10303_v41 }
 0x865   : > { %10336 = vst [vmem:[%s12258_s14 + $0x68] sm:$0xff] %v10304_v10 }
 0x866   : > { %10337 = vst [vmem:[%s12258_s14 + $0x70] sm:$0xff] %v10305_v33 }
 0x867   : > { %10338 = vst [vmem:[%s12258_s14 + $0x78] sm:$0xff] %v10306_v54 }
 0x868   : > { %10339 = vst [vmem:[%s12258_s14 + $0x80] sm:$0xff] %v10307_v19 }
 0x869   : > { %10340 = vst [vmem:[%s12258_s14 + $0x88] sm:$0xff] %v10308_v7 }
 0x86a   : > { %10341 = vst [vmem:[%s12258_s14 + $0x90] sm:$0xff] %v10309_v57 }
 0x86b   : > { %10342 = vst [vmem:[%s12258_s14 + $0x98] sm:$0xff] %v10310_v29 }
 0x86c   : > { %10343 = vst [vmem:[%s12258_s14 + $0xa0] sm:$0xff] %v10311_v58 }
 0x86d   : > { %10344 = vst [vmem:[%s12258_s14 + $0xa8] sm:$0xff] %v10312_v61 }
 0x86e   : > { %10345 = vst [vmem:[%s12258_s14 + $0xb0] sm:$0xff] %v10313_v50 }
 0x86f   : > { %10346 = vst [vmem:[%s12258_s14 + $0xb8] sm:$0xff] %v10314_v22 }
 0x870   : > { %10347 = vst [vmem:[%s12258_s14 + $0xc0] sm:$0xff] %v10315_v23 }
 0x871   : > { %10348 = vst [vmem:[%s12258_s14 + $0xc8] sm:$0xff] %v10316_v12 }
 0x872   : > { %10349 = vst [vmem:[%s12258_s14 + $0xd0] sm:$0xff] %v10317_v40 }
 0x873   : > { %10350 = vst [vmem:[%s12258_s14 + $0xd8] sm:$0xff] %v10318_v55 }
 0x874   : > { %10351 = vst [vmem:[%s12258_s14 + $0xe0] sm:$0xff] %v10319_v34 }
 0x875   : > { %10352 = vst [vmem:[%s12258_s14 + $0xe8] sm:$0xff] %v10320_v42 }
 0x876   : > { %10353 = vst [vmem:[%s12258_s14 + $0xf0] sm:$0xff] %v10321_v36 }
 0x877   : > { %10354 = vst [vmem:[%s12258_s14 + $0xf8] sm:$0xff] %v10322_v49 }
 0x878 PF: > { %s12_s9 = sadd.s32 1, %s12219_s9  }
 0x879   : > { %p9_p5 = scmp.ge.s32.totalorder %s12_s9, 4  }
 0x87b   :  { %11 = sbr.rel (!%p9_p5) target bundleno = 1 (0x1), region = 97 }

</bundles_post_ra>
